<compile_context>
chip_gen: v6e
topology: v6e:2x2x1
jax: 0.10.0
libtpu: 0.0.40
codegen_flags: <defaults>
</compile_context>

<pallas_src>
import functools

import numpy as np

import jax
import jax.numpy as jnp
from jax.experimental import pallas as pl
from jax.experimental.pallas import tpu as pltpu

ACT_DTYPE = jnp.bfloat16          # inter-kernel activation storage dtype
VMEM_LIMIT = 32 * 1024 * 1024     # conservative scoped-VMEM cap (v5e..v7x safe)


# --------------------------- in-kernel helpers -----------------------------

def _zero_pad_borders(pf_ref, H, W):
    """Zero the border region of the flat padded-image scratch.

    pf_ref: (C, (H+3)*(W+2)) bf16.  Only the borders are zeroed; the data
    region [Wp+1, Wp+1+H*Wp) is fully overwritten by _conv3x3_padflat, so the
    scratch is safely reused by several convs inside one kernel.  Do not write
    the border region anywhere else.
    """
    C = pf_ref.shape[0]
    Wp = W + 2
    n = H * Wp
    head = Wp + 1
    tail = pf_ref.shape[1] - (head + n)            # == 2*Wp - 1
    pf_ref[:, 0:head] = jnp.zeros((C, head), pf_ref.dtype)
    pf_ref[:, head + n:head + n + tail] = jnp.zeros((C, tail), pf_ref.dtype)


def _conv3x3_padflat(a, w_ref, b_ref, pf_ref, patch_ref, *, H, W, relu):
    """3x3 / stride-1 / pad-1 conv on one pad-ready image.

    a:       (Cin, H*Wp) value; the 2 junk (pad) columns of each row MUST be 0.
    w_ref:   (Cout, 9*Cin) bf16, column order (ky, kx, cin).
    b_ref:   (Cout, 1) f32.
    Returns (Cout, H*Wp) f32; junk columns hold garbage (caller masks them).
    """
    Cin = a.shape[0]
    Wp = W + 2
    n = H * Wp
    # One lane-offset copy builds the flattened zero-padded image: element
    # (y, x) lands at (y+1)*Wp + (x+1); the two zero junk columns of every row
    # land exactly on the right/left pad columns of the padded image.
    pf_ref[:, Wp + 1:Wp + 1 + n] = a.astype(pf_ref.dtype)
    # The 9 taps are contiguous lane slices of the flat padded image.
    for k in range(9):
        dy, dx = divmod(k, 3)
        off = dy * Wp + dx
        patch_ref[k * Cin:(k + 1) * Cin, :] = pf_ref[:, off:off + n]
    y = jnp.dot(w_ref[...], patch_ref[...], preferred_element_type=jnp.float32)
    y = y + b_ref[...]
    if relu:
        y = jnp.maximum(y, 0.0)
    return y


# ------------------------------ kernel bodies ------------------------------

def _conv3x3_kernel(x_ref, w_ref, b_ref, k_ref, o_ref, pf_ref, patch_ref, *,
                    H, W, relu):
    _zero_pad_borders(pf_ref, H, W)
    y = _conv3x3_padflat(x_ref[0], w_ref, b_ref, pf_ref, patch_ref,
                         H=H, W=W, relu=relu)
    keep = k_ref[...] != 0.0                     # (1, N) valid-column mask
    o_ref[0] = jnp.where(keep, y, 0.0).astype(o_ref.dtype)


def _conv_block_kernel(*refs, H, W, has_skip):
    """Fused ConvBlock: y = x (+ skip);  out = y + conv3x3(relu(conv3x3(y)))."""
    if has_skip:
        (x_ref, s_ref, w1_ref, b1_ref, w2_ref, b2_ref, k_ref,
         o_ref, pf_ref, patch_ref) = refs
    else:
        (x_ref, w1_ref, b1_ref, w2_ref, b2_ref, k_ref,
         o_ref, pf_ref, patch_ref) = refs
    keep = k_ref[...] != 0.0
    x0 = x_ref[0].astype(jnp.float32)
    if has_skip:
        x0 = x0 + s_ref[0].astype(jnp.float32)   # decoder skip-add fused here
    _zero_pad_borders(pf_ref, H, W)
    y1 = _conv3x3_padflat(x0, w1_ref, b1_ref, pf_ref, patch_ref,
                          H=H, W=W, relu=True)
    y1 = jnp.where(keep, y1, 0.0)                # junk cols must be 0 for refill
    y2 = _conv3x3_padflat(y1, w2_ref, b2_ref, pf_ref, patch_ref,
                          H=H, W=W, relu=False)
    out = x0 + jnp.where(keep, y2, 0.0)          # x0 junk cols are already 0
    o_ref[0] = out.astype(o_ref.dtype)


def _pointwise_mm_kernel(*refs, has_bias):
    """out = Wmat @ x (+ bias) over pixel columns (1x1 conv / 2x2-s2 matmul)."""
    if has_bias:
        x_ref, w_ref, b_ref, k_ref, o_ref = refs
    else:
        x_ref, w_ref, k_ref, o_ref = refs
    y = jnp.dot(w_ref[...], x_ref[0], preferred_element_type=jnp.float32)
    if has_bias:
        y = y + b_ref[...]
    keep = k_ref[...] != 0.0
    o_ref[0] = jnp.where(keep, y, 0.0).astype(o_ref.dtype)


def _ending_kernel(f_ref, b_ref, m_ref, wf_ref, bf_ref, wb_ref, bb_ref,
                   fo_ref, bo_ref, out_ref, pf_ref, patch_ref, *, H, W):
    """Fused ending: ending_fore conv3x3, ending_back conv3x3 and the blend."""
    _zero_pad_borders(pf_ref, H, W)
    f = _conv3x3_padflat(f_ref[0], wf_ref, bf_ref, pf_ref, patch_ref,
                         H=H, W=W, relu=False)
    b = _conv3x3_padflat(b_ref[0], wb_ref, bb_ref, pf_ref, patch_ref,
                         H=H, W=W, relu=False)
    m = m_ref[0].astype(jnp.float32)             # (1, N) broadcasts over (3, N)
    out = m * f + (1.0 - m) * b
    fo_ref[0] = f.astype(fo_ref.dtype)
    bo_ref[0] = b.astype(bo_ref.dtype)
    out_ref[0] = out.astype(out_ref.dtype)


# ------------------------------ wrapper utils -------------------------------

def _wmat(w):
    """(kh, kw, cin, cout) f32 -> (cout, kh*kw*cin) bf16, columns (ky, kx, cin)."""
    kh, kw, cin, cout = w.shape
    return w.transpose(3, 0, 1, 2).reshape(cout, kh * kw * cin).astype(jnp.bfloat16)


def _bcol(b):
    return b.reshape(-1, 1).astype(jnp.float32)


def _keep_arr(H, W):
    """(1, H*(W+2)) f32 {0,1}: 1 on the W valid columns of every row."""
    Wp = W + 2
    keep = (np.arange(H * Wp) % Wp) < W
    return jnp.asarray(keep.reshape(1, H * Wp), dtype=jnp.float32)


def _pad_ready(x):
    """(B, C, H, W) -> pad-ready (B, C, H*(W+2)) with zero junk columns."""
    B, C, H, W = x.shape
    xp = jnp.pad(x, ((0, 0), (0, 0), (0, 0), (0, 2)))
    return xp.reshape(B, C, H * (W + 2))


def _from_pad_ready(a, H, W):
    """pad-ready (B, C, H*(W+2)) -> (B, C, H, W)."""
    B, C, _ = a.shape
    return a.reshape(B, C, H, W + 2)[:, :, :, :W]


def _mosaic(sem):
    return pltpu.CompilerParams(dimension_semantics=sem,
                                vmem_limit_bytes=VMEM_LIMIT)


# ------------------------------ wrapper ops ---------------------------------

def conv3x3(a, H, W, p, relu=False):
    """a: pad-ready (B, Cin, H*(W+2)) -> pad-ready (B, Cout, H*(W+2)) bf16."""
    B, Cin, N = a.shape
    Wp = W + 2
    Cout = p["w"].shape[-1]
    kern = functools.partial(_conv3x3_kernel, H=H, W=W, relu=relu)
    return pl.pallas_call(
        kern,
        out_shape=jax.ShapeDtypeStruct((B, Cout, N), ACT_DTYPE),
        grid=(B,),
        in_specs=[
            pl.BlockSpec((1, Cin, N), lambda i: (i, 0, 0)),
            pl.BlockSpec((Cout, 9 * Cin), lambda i: (0, 0)),
            pl.BlockSpec((Cout, 1), lambda i: (0, 0)),
            pl.BlockSpec((1, N), lambda i: (0, 0)),
        ],
        out_specs=pl.BlockSpec((1, Cout, N), lambda i: (i, 0, 0)),
        scratch_shapes=[pltpu.VMEM((Cin, (H + 3) * Wp), jnp.bfloat16),
                        pltpu.VMEM((9 * Cin, N), jnp.bfloat16)],
        compiler_params=_mosaic(("parallel",)),
    )(a, _wmat(p["w"]), _bcol(p["b"]), _keep_arr(H, W))


def conv_block(a, H, W, p, skip=None):
    """Fused residual ConvBlock; optional decoder `skip` add fused in.

    TODO(synk): ConvBlock is not defined in the provided source; assuming the
    standard residual block  y + conv3x3(relu(conv3x3(y))), y = x (+ skip).
    """
    B, C, N = a.shape
    Wp = W + 2
    has_skip = skip is not None
    kern = functools.partial(_conv_block_kernel, H=H, W=W, has_skip=has_skip)
    img = pl.BlockSpec((1, C, N), lambda i: (i, 0, 0))
    wsp = pl.BlockSpec((C, 9 * C), lambda i: (0, 0))
    bsp = pl.BlockSpec((C, 1), lambda i: (0, 0))
    ksp = pl.BlockSpec((1, N), lambda i: (0, 0))
    in_specs = [img] + ([img] if has_skip else []) + [wsp, bsp, wsp, bsp, ksp]
    args = ((a,) + ((skip,) if has_skip else ())
            + (_wmat(p["w1"]), _bcol(p["b1"]), _wmat(p["w2"]), _bcol(p["b2"]),
               _keep_arr(H, W)))
    return pl.pallas_call(
        kern,
        out_shape=jax.ShapeDtypeStruct((B, C, N), ACT_DTYPE),
        grid=(B,),
        in_specs=in_specs,
        out_specs=img,
        scratch_shapes=[pltpu.VMEM((C, (H + 3) * Wp), jnp.bfloat16),
                        pltpu.VMEM((9 * C, N), jnp.bfloat16)],
        compiler_params=_mosaic(("parallel",)),
    )(*args)


def pointwise_conv(a, H, W, w_mat, bias=None):
    """(B, K, H*(W+2)) pad-ready @ (Cout, K) -> (B, Cout, H*(W+2)) pad-ready."""
    B, K, N = a.shape
    Cout = w_mat.shape[0]
    has_bias = bias is not None
    kern = functools.partial(_pointwise_mm_kernel, has_bias=has_bias)
    in_specs = [pl.BlockSpec((1, K, N), lambda i: (i, 0, 0)),
                pl.BlockSpec((Cout, K), lambda i: (0, 0))]
    args = [a, w_mat]
    if has_bias:
        in_specs.append(pl.BlockSpec((Cout, 1), lambda i: (0, 0)))
        args.append(_bcol(bias))
    in_specs.append(pl.BlockSpec((1, N), lambda i: (0, 0)))
    args.append(_keep_arr(H, W))
    return pl.pallas_call(
        kern,
        out_shape=jax.ShapeDtypeStruct((B, Cout, N), ACT_DTYPE),
        grid=(B,),
        in_specs=in_specs,
        out_specs=pl.BlockSpec((1, Cout, N), lambda i: (i, 0, 0)),
        compiler_params=_mosaic(("parallel",)),
    )(*args)


def conv2x2_stride2(a, H, W, p):
    """2x2 / stride-2 conv = space-to-depth + fused Pallas matmul."""
    # TODO(synk): fold the space-to-depth gather into the kernel via in-kernel
    # strided reads to drop this XLA relayout pass at production resolutions.
    B, C, _ = a.shape
    x = _from_pad_ready(a, H, W)
    sd = jnp.concatenate(
        [x[:, :, 0::2, 0::2], x[:, :, 0::2, 1::2],
         x[:, :, 1::2, 0::2], x[:, :, 1::2, 1::2]], axis=1)   # (B, 4C, H/2, W/2)
    sd = _pad_ready(sd)
    out = pointwise_conv(sd, H // 2, W // 2, _wmat(p["w"]), bias=p["b"])
    return out, H // 2, W // 2


def upconv_pixel_shuffle(z, h, w, p):
    """1x1 upconv (bias-free Pallas matmul) + PixelShuffle(2)."""
    # TODO(synk): fuse the pixel-shuffle interleave (and the following skip-add
    # + ConvBlock) into a single kernel via strided VMEM stores.
    B, C, _ = z.shape
    up = pointwise_conv(z, h, w, _wmat(p["w"]), bias=None)    # (B, 2C, h*(w+2))
    u = _from_pad_ready(up, h, w)                             # (B, 2C, h, w)
    Cf = u.shape[1] // 4
    u = u.reshape(B, Cf, 2, 2, h, w).transpose(0, 1, 4, 2, 5, 3)
    u = u.reshape(B, Cf, 2 * h, 2 * w)
    return _pad_ready(u), 2 * h, 2 * w


def ending_blend(f_feat, b_feat, mask_pr, H, W, pf, pb):
    """Fused: f = conv3x3(f_feat), b = conv3x3(b_feat), out = m*f + (1-m)*b."""
    B, C, N = f_feat.shape
    Wp = W + 2
    kern = functools.partial(_ending_kernel, H=H, W=W)
    feat = pl.BlockSpec((1, C, N), lambda i: (i, 0, 0))
    msk = pl.BlockSpec((1, 1, N), lambda i: (i, 0, 0))
    wsp = pl.BlockSpec((3, 9 * C), lambda i: (0, 0))
    bsp = pl.BlockSpec((3, 1), lambda i: (0, 0))
    osp = pl.BlockSpec((1, 3, N), lambda i: (i, 0, 0))
    sds = jax.ShapeDtypeStruct((B, 3, N), jnp.float32)
    return pl.pallas_call(
        kern,
        out_shape=(sds, sds, sds),
        grid=(B,),
        in_specs=[feat, feat, msk, wsp, bsp, wsp, bsp],
        out_specs=(osp, osp, osp),
        scratch_shapes=[pltpu.VMEM((C, (H + 3) * Wp), jnp.bfloat16),
                        pltpu.VMEM((9 * C, N), jnp.bfloat16)],
        compiler_params=_mosaic(("parallel",)),
    )(f_feat, b_feat, mask_pr, _wmat(pf["w"]), _bcol(pf["b"]),
      _wmat(pb["w"]), _bcol(pb["b"]))


# ----------------------------- parameters ---------------------------------

class _KeyGen:
    def __init__(self, seed):
        self.key = jax.random.PRNGKey(seed)

    def __call__(self):
        self.key, sub = jax.random.split(self.key)
        return sub


def _uniform(key, shape, scale):
    return jax.random.uniform(key, shape, jnp.float32, -scale, scale)


def _init_conv(kg, kh, kw, cin, cout, bias=True):
    scale = 1.0 / float(cin * kh * kw) ** 0.5
    p = {"w": _uniform(kg(), (kh, kw, cin, cout), scale)}
    if bias:
        p["b"] = _uniform(kg(), (cout,), scale)
    return p


def _init_conv_block(kg, c):
    a = _init_conv(kg, 3, 3, c, c)
    b = _init_conv(kg, 3, 3, c, c)
    return {"w1": a["w"], "b1": a["b"], "w2": b["w"], "b2": b["b"]}


def init_params(opt):
    kg = _KeyGen(0)
    params = {"intro": _init_conv(kg, 3, 3, opt["in_channels"], opt["width"])}
    chan = opt["width"]
    for i, num in enumerate(opt["enc_blk_nums"]):
        for j in range(num):
            params[f"enc_block_{i}_{j}"] = _init_conv_block(kg, chan)
        params[f"enc_down_{i}"] = _init_conv(kg, 2, 2, chan, 2 * chan)
        chan *= 2
    for i in range(opt["middle_blk_num"]):
        params[f"middle_block_{i}"] = _init_conv_block(kg, chan)
    for i, num in enumerate(opt["dec_blk_nums"]):
        params[f"dec_fore_upconv_{i}"] = _init_conv(kg, 1, 1, chan, 2 * chan,
                                                    bias=False)
        params[f"dec_back_upconv_{i}"] = _init_conv(kg, 1, 1, chan, 2 * chan,
                                                    bias=False)
        chan //= 2
        for j in range(num):
            params[f"dec_fore_block_{i}_{j}"] = _init_conv_block(kg, chan)
            params[f"dec_back_block_{i}_{j}"] = _init_conv_block(kg, chan)
    params["ending_fore"] = _init_conv(kg, 3, 3, opt["width"], 3)
    params["ending_back"] = _init_conv(kg, 3, 3, opt["width"], 3)
    # NOTE: ending_mask exists in the PyTorch __init__ but is unused in forward.
    return params


# ------------------------------- forward ----------------------------------

def generator_forward(params, x_nchw, mask_nchw, *, opt):
    B, _, H, W = x_nchw.shape
    x = x_nchw.astype(jnp.float32)
    m = mask_nchw.astype(jnp.float32)
    inp = jnp.concatenate([x, m], axis=1)               # torch.cat(dim=1)
    a = _pad_ready(inp).astype(ACT_DTYPE)                # (B, 4, H*(W+2))
    mask_pr = _pad_ready(m).astype(ACT_DTYPE)            # (B, 1, H*(W+2))

    h_act = conv3x3(a, H, W, params["intro"])
    ch, cw = H, W
    encs = []
    for i, num in enumerate(opt["enc_blk_nums"]):
        for j in range(num):
            h_act = conv_block(h_act, ch, cw, params[f"enc_block_{i}_{j}"])
        encs.append((h_act, ch, cw))
        h_act, ch, cw = conv2x2_stride2(h_act, ch, cw, params[f"enc_down_{i}"])
    for i in range(opt["middle_blk_num"]):
        h_act = conv_block(h_act, ch, cw, params[f"middle_block_{i}"])
    features, fh, fw = h_act, ch, cw

    def decode(prefix):
        z, zh, zw = features, fh, fw
        for i, (num, (enc, eh, ew)) in enumerate(
                zip(opt["dec_blk_nums"], encs[::-1])):
            z, zh, zw = upconv_pixel_shuffle(
                z, zh, zw, params[f"dec_{prefix}_upconv_{i}"])
            if num > 0:
                # the skip-add (z + enc) is fused into the first ConvBlock
                z = conv_block(z, zh, zw, params[f"dec_{prefix}_block_{i}_0"],
                               skip=enc)
                for j in range(1, num):
                    z = conv_block(z, zh, zw,
                                   params[f"dec_{prefix}_block_{i}_{j}"])
            else:
                z = (z.astype(jnp.float32)
                     + enc.astype(jnp.float32)).astype(ACT_DTYPE)
        return z

    f_feat = decode("fore")
    b_feat = decode("back")
    f_pr, b_pr, out_pr = ending_blend(f_feat, b_feat, mask_pr, H, W,
                                      params["ending_fore"],
                                      params["ending_back"])
    f = _from_pad_ready(f_pr, H, W)
    b = _from_pad_ready(b_pr, H, W)
    out = _from_pad_ready(out_pr, H, W)
    return f, b, out


# --------------------------------- main ------------------------------------

if __name__ == "__main__":
    opt = dict(in_channels=4, width=8, enc_blk_nums=[1, 1], middle_blk_num=1,
               dec_blk_nums=[1, 1])
    params = init_params(opt)

    key = jax.random.PRNGKey(0)
    kx, km = jax.random.split(key)
    x = jax.random.normal(kx, (2, 3, 16, 16), jnp.float32)             # NCHW
    mask = (jax.random.uniform(km, (2, 1, 16, 16)) > 0.5).astype(jnp.float32)

    fwd = jax.jit(lambda p, xx, mm: generator_forward(p, xx, mm, opt=opt))
    f, b, out = fwd(params, x, mask)
    jax.block_until_ready((f, b, out))
    assert f.shape == (2, 3, 16, 16)
    assert b.shape == (2, 3, 16, 16)
    assert out.shape == (2, 3, 16, 16)
    print("KERNEL_OK")
</pallas_src>

<mosaic_0001>
module attributes {stable_mosaic.version = 11 : i64} {
  func.func @_conv3x3_kernel(%arg0: i32, %arg1: memref<1x4x288xbf16, #tpu.memory_space<vmem>>, %arg2: memref<8x36xbf16, #tpu.memory_space<vmem>>, %arg3: memref<8x1xf32, #tpu.memory_space<vmem>>, %arg4: memref<1x288xf32, #tpu.memory_space<vmem>>, %arg5: memref<1x8x288xbf16, #tpu.memory_space<vmem>>, %arg6: memref<4x342xbf16, #tpu.memory_space<vmem>>, %arg7: memref<36x288xbf16, #tpu.memory_space<vmem>>) attributes {dimension_semantics = [#tpu.dimension_semantics<parallel>], iteration_bounds = array<i64: 2>, scalar_prefetch = 0 : i64, scratch_operands = 2 : i64, tpu.core_type = #tpu.core_type<tc>, window_params = [{transform_indices = @transform_0, window_bounds = array<i64: 1, 4, 288>}, {pipeline_mode = #tpu.pipeline_mode<synchronous>, transform_indices = @transform_1, window_bounds = array<i64: 8, 36>}, {pipeline_mode = #tpu.pipeline_mode<synchronous>, transform_indices = @transform_2, window_bounds = array<i64: 8, 1>}, {pipeline_mode = #tpu.pipeline_mode<synchronous>, transform_indices = @transform_3, window_bounds = array<i64: 1, 288>}, {transform_indices = @transform_4, window_bounds = array<i64: 1, 8, 288>}]} {
    %cst = arith.constant 0.000000e+00 : bf16
    %0 = vector.broadcast %cst : bf16 to vector<4x19xbf16>
    %c0 = arith.constant 0 : index
    %c0_0 = arith.constant 0 : index
    %1 = vector.load %arg6[%c0, %c0_0] : memref<4x342xbf16, #tpu.memory_space<vmem>>, vector<4x19xbf16>
    tpu.vector_store %arg6[%c0, %c0_0], %0 {strides = array<i32>} : memref<4x342xbf16, #tpu.memory_space<vmem>>, vector<4x19xbf16>,
    %cst_1 = arith.constant 0.000000e+00 : bf16
    %2 = vector.broadcast %cst_1 : bf16 to vector<4x35xbf16>
    %c0_2 = arith.constant 0 : index
    %c307 = arith.constant 307 : index
    %3 = vector.load %arg6[%c0_2, %c307] : memref<4x342xbf16, #tpu.memory_space<vmem>>, vector<4x35xbf16>
    tpu.vector_store %arg6[%c0_2, %c307], %2 {strides = array<i32>} : memref<4x342xbf16, #tpu.memory_space<vmem>>, vector<4x35xbf16>,
    %c0_3 = arith.constant 0 : index
    %c0_4 = arith.constant 0 : index
    %c0_5 = arith.constant 0 : index
    %4 = vector.load %arg1[%c0_3, %c0_4, %c0_5] : memref<1x4x288xbf16, #tpu.memory_space<vmem>>, vector<1x4x288xbf16>
    %5 = vector.shape_cast %4 : vector<1x4x288xbf16> to vector<4x288xbf16>
    %c0_6 = arith.constant 0 : index
    %c19 = arith.constant 19 : index
    %6 = vector.load %arg6[%c0_6, %c19] : memref<4x342xbf16, #tpu.memory_space<vmem>>, vector<4x288xbf16>
    tpu.vector_store %arg6[%c0_6, %c19], %5 {strides = array<i32>} : memref<4x342xbf16, #tpu.memory_space<vmem>>, vector<4x288xbf16>,
    %c0_7 = arith.constant 0 : index
    %c0_8 = arith.constant 0 : index
    %7 = vector.load %arg6[%c0_7, %c0_8] : memref<4x342xbf16, #tpu.memory_space<vmem>>, vector<4x288xbf16>
    %c0_9 = arith.constant 0 : index
    %c0_10 = arith.constant 0 : index
    %8 = vector.load %arg7[%c0_9, %c0_10] : memref<36x288xbf16, #tpu.memory_space<vmem>>, vector<4x288xbf16>
    tpu.vector_store %arg7[%c0_9, %c0_10], %7 {strides = array<i32>} : memref<36x288xbf16, #tpu.memory_space<vmem>>, vector<4x288xbf16>,
    %c0_11 = arith.constant 0 : index
    %c1 = arith.constant 1 : index
    %9 = vector.load %arg6[%c0_11, %c1] : memref<4x342xbf16, #tpu.memory_space<vmem>>, vector<4x288xbf16>
    %c4 = arith.constant 4 : index
    %c0_12 = arith.constant 0 : index
    %10 = vector.load %arg7[%c4, %c0_12] : memref<36x288xbf16, #tpu.memory_space<vmem>>, vector<4x288xbf16>
    tpu.vector_store %arg7[%c4, %c0_12], %9 {strides = array<i32>} : memref<36x288xbf16, #tpu.memory_space<vmem>>, vector<4x288xbf16>,
    %c0_13 = arith.constant 0 : index
    %c2 = arith.constant 2 : index
    %11 = vector.load %arg6[%c0_13, %c2] : memref<4x342xbf16, #tpu.memory_space<vmem>>, vector<4x288xbf16>
    %c8 = arith.constant 8 : index
    %c0_14 = arith.constant 0 : index
    %12 = vector.load %arg7[%c8, %c0_14] : memref<36x288xbf16, #tpu.memory_space<vmem>>, vector<4x288xbf16>
    tpu.vector_store %arg7[%c8, %c0_14], %11 {strides = array<i32>} : memref<36x288xbf16, #tpu.memory_space<vmem>>, vector<4x288xbf16>,
    %c0_15 = arith.constant 0 : index
    %c18 = arith.constant 18 : index
    %13 = vector.load %arg6[%c0_15, %c18] : memref<4x342xbf16, #tpu.memory_space<vmem>>, vector<4x288xbf16>
    %c12 = arith.constant 12 : index
    %c0_16 = arith.constant 0 : index
    %14 = vector.load %arg7[%c12, %c0_16] : memref<36x288xbf16, #tpu.memory_space<vmem>>, vector<4x288xbf16>
    tpu.vector_store %arg7[%c12, %c0_16], %13 {strides = array<i32>} : memref<36x288xbf16, #tpu.memory_space<vmem>>, vector<4x288xbf16>,
    %c0_17 = arith.constant 0 : index
    %c19_18 = arith.constant 19 : index
    %15 = vector.load %arg6[%c0_17, %c19_18] : memref<4x342xbf16, #tpu.memory_space<vmem>>, vector<4x288xbf16>
    %c16 = arith.constant 16 : index
    %c0_19 = arith.constant 0 : index
    %16 = vector.load %arg7[%c16, %c0_19] : memref<36x288xbf16, #tpu.memory_space<vmem>>, vector<4x288xbf16>
    tpu.vector_store %arg7[%c16, %c0_19], %15 {strides = array<i32>} : memref<36x288xbf16, #tpu.memory_space<vmem>>, vector<4x288xbf16>,
    %c0_20 = arith.constant 0 : index
    %c20 = arith.constant 20 : index
    %17 = vector.load %arg6[%c0_20, %c20] : memref<4x342xbf16, #tpu.memory_space<vmem>>, vector<4x288xbf16>
    %c20_21 = arith.constant 20 : index
    %c0_22 = arith.constant 0 : index
    %18 = vector.load %arg7[%c20_21, %c0_22] : memref<36x288xbf16, #tpu.memory_space<vmem>>, vector<4x288xbf16>
    tpu.vector_store %arg7[%c20_21, %c0_22], %17 {strides = array<i32>} : memref<36x288xbf16, #tpu.memory_space<vmem>>, vector<4x288xbf16>,
    %c0_23 = arith.constant 0 : index
    %c36 = arith.constant 36 : index
    %19 = vector.load %arg6[%c0_23, %c36] : memref<4x342xbf16, #tpu.memory_space<vmem>>, vector<4x288xbf16>
    %c24 = arith.constant 24 : index
    %c0_24 = arith.constant 0 : index
    %20 = vector.load %arg7[%c24, %c0_24] : memref<36x288xbf16, #tpu.memory_space<vmem>>, vector<4x288xbf16>
    tpu.vector_store %arg7[%c24, %c0_24], %19 {strides = array<i32>} : memref<36x288xbf16, #tpu.memory_space<vmem>>, vector<4x288xbf16>,
    %c0_25 = arith.constant 0 : index
    %c37 = arith.constant 37 : index
    %21 = vector.load %arg6[%c0_25, %c37] : memref<4x342xbf16, #tpu.memory_space<vmem>>, vector<4x288xbf16>
    %c28 = arith.constant 28 : index
    %c0_26 = arith.constant 0 : index
    %22 = vector.load %arg7[%c28, %c0_26] : memref<36x288xbf16, #tpu.memory_space<vmem>>, vector<4x288xbf16>
    tpu.vector_store %arg7[%c28, %c0_26], %21 {strides = array<i32>} : memref<36x288xbf16, #tpu.memory_space<vmem>>, vector<4x288xbf16>,
    %c0_27 = arith.constant 0 : index
    %c38 = arith.constant 38 : index
    %23 = vector.load %arg6[%c0_27, %c38] : memref<4x342xbf16, #tpu.memory_space<vmem>>, vector<4x288xbf16>
    %c32 = arith.constant 32 : index
    %c0_28 = arith.constant 0 : index
    %24 = vector.load %arg7[%c32, %c0_28] : memref<36x288xbf16, #tpu.memory_space<vmem>>, vector<4x288xbf16>
    tpu.vector_store %arg7[%c32, %c0_28], %23 {strides = array<i32>} : memref<36x288xbf16, #tpu.memory_space<vmem>>, vector<4x288xbf16>,
    %c0_29 = arith.constant 0 : index
    %c0_30 = arith.constant 0 : index
    %25 = vector.load %arg2[%c0_29, %c0_30] : memref<8x36xbf16, #tpu.memory_space<vmem>>, vector<8x36xbf16>
    %c0_31 = arith.constant 0 : index
    %c0_32 = arith.constant 0 : index
    %26 = vector.load %arg7[%c0_31, %c0_32] : memref<36x288xbf16, #tpu.memory_space<vmem>>, vector<36x288xbf16>
    %cst_33 = arith.constant dense<0.000000e+00> : vector<8x288xf32>
    %27 = tpu.matmul %25, %26, %cst_33 {dimension_numbers = #tpu.dot_dimension_numbers<[1], [0], [0], [1], [0, 0, 1, 1], [], []>} : vector<8x36xbf16>, vector<36x288xbf16>, vector<8x288xf32> -> vector<8x288xf32>
    %c0_34 = arith.constant 0 : index
    %c0_35 = arith.constant 0 : index
    %28 = vector.load %arg3[%c0_34, %c0_35] : memref<8x1xf32, #tpu.memory_space<vmem>>, vector<8x1xf32>
    %29 = vector.broadcast %28 : vector<8x1xf32> to vector<8x288xf32>
    %30 = arith.addf %27, %29 : vector<8x288xf32>
    %c0_36 = arith.constant 0 : index
    %c0_37 = arith.constant 0 : index
    %31 = vector.load %arg4[%c0_36, %c0_37] : memref<1x288xf32, #tpu.memory_space<vmem>>, vector<1x288xf32>
    %cst_38 = arith.constant 0.000000e+00 : f32
    %32 = vector.broadcast %cst_38 : f32 to vector<1x288xf32>
    %33 = arith.cmpf one, %31, %32 : vector<1x288xf32>
    %cst_39 = arith.constant 0.000000e+00 : f32
    %34 = vector.shape_cast %33 : vector<1x288xi1> to vector<1x288xi1>
    %35 = vector.broadcast %34 : vector<1x288xi1> to vector<8x288xi1>
    %36 = vector.broadcast %cst_39 : f32 to vector<8x288xf32>
    %37 = arith.select %35, %30, %36 : vector<8x288xi1>, vector<8x288xf32>
    %38 = arith.truncf %37 : vector<8x288xf32> to vector<8x288xbf16>
    %c0_40 = arith.constant 0 : index
    %c0_41 = arith.constant 0 : index
    %c0_42 = arith.constant 0 : index
    %39 = vector.load %arg5[%c0_40, %c0_41, %c0_42] : memref<1x8x288xbf16, #tpu.memory_space<vmem>>, vector<1x8x288xbf16>
    %40 = vector.shape_cast %39 : vector<1x8x288xbf16> to vector<8x288xbf16>
    %41 = vector.shape_cast %38 : vector<8x288xbf16> to vector<1x8x288xbf16>
    tpu.vector_store %arg5[%c0_40, %c0_41, %c0_42], %41 {strides = array<i32>} : memref<1x8x288xbf16, #tpu.memory_space<vmem>>, vector<1x8x288xbf16>,
    return
  }
  func.func @transform_0(%arg0: i32) -> (i32, i32, i32) {
    %c0_i32 = arith.constant 0 : i32
    %c0_i32_0 = arith.constant 0 : i32
    %c0_i32_1 = arith.constant 0 : i32
    return %arg0, %c0_i32, %c0_i32_0 : i32, i32, i32
  }
  func.func @transform_1(%arg0: i32) -> (i32, i32) {
    %c0_i32 = arith.constant 0 : i32
    %c0_i32_0 = arith.constant 0 : i32
    %c0_i32_1 = arith.constant 0 : i32
    return %c0_i32, %c0_i32_0 : i32, i32
  }
  func.func @transform_2(%arg0: i32) -> (i32, i32) {
    %c0_i32 = arith.constant 0 : i32
    %c0_i32_0 = arith.constant 0 : i32
    %c0_i32_1 = arith.constant 0 : i32
    return %c0_i32, %c0_i32_0 : i32, i32
  }
  func.func @transform_3(%arg0: i32) -> (i32, i32) {
    %c0_i32 = arith.constant 0 : i32
    %c0_i32_0 = arith.constant 0 : i32
    %c0_i32_1 = arith.constant 0 : i32
    return %c0_i32, %c0_i32_0 : i32, i32
  }
  func.func @transform_4(%arg0: i32) -> (i32, i32, i32) {
    %c0_i32 = arith.constant 0 : i32
    %c0_i32_0 = arith.constant 0 : i32
    %c0_i32_1 = arith.constant 0 : i32
    return %arg0, %c0_i32, %c0_i32_0 : i32, i32, i32
  }
}

module attributes {stable_mosaic.version = 11 : i64} {
  func.func @_conv_block_kernel(%arg0: i32, %arg1: memref<1x8x288xbf16, #tpu.memory_space<vmem>>, %arg2: memref<8x72xbf16, #tpu.memory_space<vmem>>, %arg3: memref<8x1xf32, #tpu.memory_space<vmem>>, %arg4: memref<8x72xbf16, #tpu.memory_space<vmem>>, %arg5: memref<8x1xf32, #tpu.memory_space<vmem>>, %arg6: memref<1x288xf32, #tpu.memory_space<vmem>>, %arg7: memref<1x8x288xbf16, #tpu.memory_space<vmem>>, %arg8: memref<8x342xbf16, #tpu.memory_space<vmem>>, %arg9: memref<72x288xbf16, #tpu.memory_space<vmem>>) attributes {dimension_semantics = [#tpu.dimension_semantics<parallel>], iteration_bounds = array<i64: 2>, scalar_prefetch = 0 : i64, scratch_operands = 2 : i64, tpu.core_type = #tpu.core_type<tc>, window_params = [{transform_indices = @transform_0, window_bounds = array<i64: 1, 8, 288>}, {pipeline_mode = #tpu.pipeline_mode<synchronous>, transform_indices = @transform_1, window_bounds = array<i64: 8, 72>}, {pipeline_mode = #tpu.pipeline_mode<synchronous>, transform_indices = @transform_2, window_bounds = array<i64: 8, 1>}, {pipeline_mode = #tpu.pipeline_mode<synchronous>, transform_indices = @transform_3, window_bounds = array<i64: 8, 72>}, {pipeline_mode = #tpu.pipeline_mode<synchronous>, transform_indices = @transform_4, window_bounds = array<i64: 8, 1>}, {pipeline_mode = #tpu.pipeline_mode<synchronous>, transform_indices = @transform_5, window_bounds = array<i64: 1, 288>}, {transform_indices = @transform_6, window_bounds = array<i64: 1, 8, 288>}]} {
    %c0 = arith.constant 0 : index
    %c0_0 = arith.constant 0 : index
    %0 = vector.load %arg6[%c0, %c0_0] : memref<1x288xf32, #tpu.memory_space<vmem>>, vector<1x288xf32>
    %cst = arith.constant 0.000000e+00 : f32
    %1 = vector.broadcast %cst : f32 to vector<1x288xf32>
    %2 = arith.cmpf one, %0, %1 : vector<1x288xf32>
    %c0_1 = arith.constant 0 : index
    %c0_2 = arith.constant 0 : index
    %c0_3 = arith.constant 0 : index
    %3 = vector.load %arg1[%c0_1, %c0_2, %c0_3] : memref<1x8x288xbf16, #tpu.memory_space<vmem>>, vector<1x8x288xbf16>
    %4 = vector.shape_cast %3 : vector<1x8x288xbf16> to vector<8x288xbf16>
    %5 = arith.extf %4 : vector<8x288xbf16> to vector<8x288xf32>
    %cst_4 = arith.constant 0.000000e+00 : bf16
    %6 = vector.broadcast %cst_4 : bf16 to vector<8x19xbf16>
    %c0_5 = arith.constant 0 : index
    %c0_6 = arith.constant 0 : index
    %7 = vector.load %arg8[%c0_5, %c0_6] : memref<8x342xbf16, #tpu.memory_space<vmem>>, vector<8x19xbf16>
    tpu.vector_store %arg8[%c0_5, %c0_6], %6 {strides = array<i32>} : memref<8x342xbf16, #tpu.memory_space<vmem>>, vector<8x19xbf16>,
    %cst_7 = arith.constant 0.000000e+00 : bf16
    %8 = vector.broadcast %cst_7 : bf16 to vector<8x35xbf16>
    %c0_8 = arith.constant 0 : index
    %c307 = arith.constant 307 : index
    %9 = vector.load %arg8[%c0_8, %c307] : memref<8x342xbf16, #tpu.memory_space<vmem>>, vector<8x35xbf16>
    tpu.vector_store %arg8[%c0_8, %c307], %8 {strides = array<i32>} : memref<8x342xbf16, #tpu.memory_space<vmem>>, vector<8x35xbf16>,
    %10 = arith.truncf %5 : vector<8x288xf32> to vector<8x288xbf16>
    %c0_9 = arith.constant 0 : index
    %c19 = arith.constant 19 : index
    %11 = vector.load %arg8[%c0_9, %c19] : memref<8x342xbf16, #tpu.memory_space<vmem>>, vector<8x288xbf16>
    tpu.vector_store %arg8[%c0_9, %c19], %10 {strides = array<i32>} : memref<8x342xbf16, #tpu.memory_space<vmem>>, vector<8x288xbf16>,
    %c0_10 = arith.constant 0 : index
    %c0_11 = arith.constant 0 : index
    %12 = vector.load %arg8[%c0_10, %c0_11] : memref<8x342xbf16, #tpu.memory_space<vmem>>, vector<8x288xbf16>
    %c0_12 = arith.constant 0 : index
    %c0_13 = arith.constant 0 : index
    %13 = vector.load %arg9[%c0_12, %c0_13] : memref<72x288xbf16, #tpu.memory_space<vmem>>, vector<8x288xbf16>
    tpu.vector_store %arg9[%c0_12, %c0_13], %12 {strides = array<i32>} : memref<72x288xbf16, #tpu.memory_space<vmem>>, vector<8x288xbf16>,
    %c0_14 = arith.constant 0 : index
    %c1 = arith.constant 1 : index
    %14 = vector.load %arg8[%c0_14, %c1] : memref<8x342xbf16, #tpu.memory_space<vmem>>, vector<8x288xbf16>
    %c8 = arith.constant 8 : index
    %c0_15 = arith.constant 0 : index
    %15 = vector.load %arg9[%c8, %c0_15] : memref<72x288xbf16, #tpu.memory_space<vmem>>, vector<8x288xbf16>
    tpu.vector_store %arg9[%c8, %c0_15], %14 {strides = array<i32>} : memref<72x288xbf16, #tpu.memory_space<vmem>>, vector<8x288xbf16>,
    %c0_16 = arith.constant 0 : index
    %c2 = arith.constant 2 : index
    %16 = vector.load %arg8[%c0_16, %c2] : memref<8x342xbf16, #tpu.memory_space<vmem>>, vector<8x288xbf16>
    %c16 = arith.constant 16 : index
    %c0_17 = arith.constant 0 : index
    %17 = vector.load %arg9[%c16, %c0_17] : memref<72x288xbf16, #tpu.memory_space<vmem>>, vector<8x288xbf16>
    tpu.vector_store %arg9[%c16, %c0_17], %16 {strides = array<i32>} : memref<72x288xbf16, #tpu.memory_space<vmem>>, vector<8x288xbf16>,
    %c0_18 = arith.constant 0 : index
    %c18 = arith.constant 18 : index
    %18 = vector.load %arg8[%c0_18, %c18] : memref<8x342xbf16, #tpu.memory_space<vmem>>, vector<8x288xbf16>
    %c24 = arith.constant 24 : index
    %c0_19 = arith.constant 0 : index
    %19 = vector.load %arg9[%c24, %c0_19] : memref<72x288xbf16, #tpu.memory_space<vmem>>, vector<8x288xbf16>
    tpu.vector_store %arg9[%c24, %c0_19], %18 {strides = array<i32>} : memref<72x288xbf16, #tpu.memory_space<vmem>>, vector<8x288xbf16>,
    %c0_20 = arith.constant 0 : index
    %c19_21 = arith.constant 19 : index
    %20 = vector.load %arg8[%c0_20, %c19_21] : memref<8x342xbf16, #tpu.memory_space<vmem>>, vector<8x288xbf16>
    %c32 = arith.constant 32 : index
    %c0_22 = arith.constant 0 : index
    %21 = vector.load %arg9[%c32, %c0_22] : memref<72x288xbf16, #tpu.memory_space<vmem>>, vector<8x288xbf16>
    tpu.vector_store %arg9[%c32, %c0_22], %20 {strides = array<i32>} : memref<72x288xbf16, #tpu.memory_space<vmem>>, vector<8x288xbf16>,
    %c0_23 = arith.constant 0 : index
    %c20 = arith.constant 20 : index
    %22 = vector.load %arg8[%c0_23, %c20] : memref<8x342xbf16, #tpu.memory_space<vmem>>, vector<8x288xbf16>
    %c40 = arith.constant 40 : index
    %c0_24 = arith.constant 0 : index
    %23 = vector.load %arg9[%c40, %c0_24] : memref<72x288xbf16, #tpu.memory_space<vmem>>, vector<8x288xbf16>
    tpu.vector_store %arg9[%c40, %c0_24], %22 {strides = array<i32>} : memref<72x288xbf16, #tpu.memory_space<vmem>>, vector<8x288xbf16>,
    %c0_25 = arith.constant 0 : index
    %c36 = arith.constant 36 : index
    %24 = vector.load %arg8[%c0_25, %c36] : memref<8x342xbf16, #tpu.memory_space<vmem>>, vector<8x288xbf16>
    %c48 = arith.constant 48 : index
    %c0_26 = arith.constant 0 : index
    %25 = vector.load %arg9[%c48, %c0_26] : memref<72x288xbf16, #tpu.memory_space<vmem>>, vector<8x288xbf16>
    tpu.vector_store %arg9[%c48, %c0_26], %24 {strides = array<i32>} : memref<72x288xbf16, #tpu.memory_space<vmem>>, vector<8x288xbf16>,
    %c0_27 = arith.constant 0 : index
    %c37 = arith.constant 37 : index
    %26 = vector.load %arg8[%c0_27, %c37] : memref<8x342xbf16, #tpu.memory_space<vmem>>, vector<8x288xbf16>
    %c56 = arith.constant 56 : index
    %c0_28 = arith.constant 0 : index
    %27 = vector.load %arg9[%c56, %c0_28] : memref<72x288xbf16, #tpu.memory_space<vmem>>, vector<8x288xbf16>
    tpu.vector_store %arg9[%c56, %c0_28], %26 {strides = array<i32>} : memref<72x288xbf16, #tpu.memory_space<vmem>>, vector<8x288xbf16>,
    %c0_29 = arith.constant 0 : index
    %c38 = arith.constant 38 : index
    %28 = vector.load %arg8[%c0_29, %c38] : memref<8x342xbf16, #tpu.memory_space<vmem>>, vector<8x288xbf16>
    %c64 = arith.constant 64 : index
    %c0_30 = arith.constant 0 : index
    %29 = vector.load %arg9[%c64, %c0_30] : memref<72x288xbf16, #tpu.memory_space<vmem>>, vector<8x288xbf16>
    tpu.vector_store %arg9[%c64, %c0_30], %28 {strides = array<i32>} : memref<72x288xbf16, #tpu.memory_space<vmem>>, vector<8x288xbf16>,
    %c0_31 = arith.constant 0 : index
    %c0_32 = arith.constant 0 : index
    %30 = vector.load %arg2[%c0_31, %c0_32] : memref<8x72xbf16, #tpu.memory_space<vmem>>, vector<8x72xbf16>
    %c0_33 = arith.constant 0 : index
    %c0_34 = arith.constant 0 : index
    %31 = vector.load %arg9[%c0_33, %c0_34] : memref<72x288xbf16, #tpu.memory_space<vmem>>, vector<72x288xbf16>
    %cst_35 = arith.constant dense<0.000000e+00> : vector<8x288xf32>
    %32 = tpu.matmul %30, %31, %cst_35 {dimension_numbers = #tpu.dot_dimension_numbers<[1], [0], [0], [1], [0, 0, 1, 1], [], []>} : vector<8x72xbf16>, vector<72x288xbf16>, vector<8x288xf32> -> vector<8x288xf32>
    %c0_36 = arith.constant 0 : index
    %c0_37 = arith.constant 0 : index
    %33 = vector.load %arg3[%c0_36, %c0_37] : memref<8x1xf32, #tpu.memory_space<vmem>>, vector<8x1xf32>
    %34 = vector.broadcast %33 : vector<8x1xf32> to vector<8x288xf32>
    %35 = arith.addf %32, %34 : vector<8x288xf32>
    %cst_38 = arith.constant 0.000000e+00 : f32
    %36 = vector.broadcast %cst_38 : f32 to vector<8x288xf32>
    %37 = arith.maximumf %35, %36 : vector<8x288xf32>
    %cst_39 = arith.constant 0.000000e+00 : f32
    %38 = vector.shape_cast %2 : vector<1x288xi1> to vector<1x288xi1>
    %39 = vector.broadcast %38 : vector<1x288xi1> to vector<8x288xi1>
    %40 = vector.broadcast %cst_39 : f32 to vector<8x288xf32>
    %41 = arith.select %39, %37, %40 : vector<8x288xi1>, vector<8x288xf32>
    %42 = arith.truncf %41 : vector<8x288xf32> to vector<8x288xbf16>
    %c0_40 = arith.constant 0 : index
    %c19_41 = arith.constant 19 : index
    %43 = vector.load %arg8[%c0_40, %c19_41] : memref<8x342xbf16, #tpu.memory_space<vmem>>, vector<8x288xbf16>
    tpu.vector_store %arg8[%c0_40, %c19_41], %42 {strides = array<i32>} : memref<8x342xbf16, #tpu.memory_space<vmem>>, vector<8x288xbf16>,
    %c0_42 = arith.constant 0 : index
    %c0_43 = arith.constant 0 : index
    %44 = vector.load %arg8[%c0_42, %c0_43] : memref<8x342xbf16, #tpu.memory_space<vmem>>, vector<8x288xbf16>
    %c0_44 = arith.constant 0 : index
    %c0_45 = arith.constant 0 : index
    %45 = vector.load %arg9[%c0_44, %c0_45] : memref<72x288xbf16, #tpu.memory_space<vmem>>, vector<8x288xbf16>
    tpu.vector_store %arg9[%c0_44, %c0_45], %44 {strides = array<i32>} : memref<72x288xbf16, #tpu.memory_space<vmem>>, vector<8x288xbf16>,
    %c0_46 = arith.constant 0 : index
    %c1_47 = arith.constant 1 : index
    %46 = vector.load %arg8[%c0_46, %c1_47] : memref<8x342xbf16, #tpu.memory_space<vmem>>, vector<8x288xbf16>
    %c8_48 = arith.constant 8 : index
    %c0_49 = arith.constant 0 : index
    %47 = vector.load %arg9[%c8_48, %c0_49] : memref<72x288xbf16, #tpu.memory_space<vmem>>, vector<8x288xbf16>
    tpu.vector_store %arg9[%c8_48, %c0_49], %46 {strides = array<i32>} : memref<72x288xbf16, #tpu.memory_space<vmem>>, vector<8x288xbf16>,
    %c0_50 = arith.constant 0 : index
    %c2_51 = arith.constant 2 : index
    %48 = vector.load %arg8[%c0_50, %c2_51] : memref<8x342xbf16, #tpu.memory_space<vmem>>, vector<8x288xbf16>
    %c16_52 = arith.constant 16 : index
    %c0_53 = arith.constant 0 : index
    %49 = vector.load %arg9[%c16_52, %c0_53] : memref<72x288xbf16, #tpu.memory_space<vmem>>, vector<8x288xbf16>
    tpu.vector_store %arg9[%c16_52, %c0_53], %48 {strides = array<i32>} : memref<72x288xbf16, #tpu.memory_space<vmem>>, vector<8x288xbf16>,
    %c0_54 = arith.constant 0 : index
    %c18_55 = arith.constant 18 : index
    %50 = vector.load %arg8[%c0_54, %c18_55] : memref<8x342xbf16, #tpu.memory_space<vmem>>, vector<8x288xbf16>
    %c24_56 = arith.constant 24 : index
    %c0_57 = arith.constant 0 : index
    %51 = vector.load %arg9[%c24_56, %c0_57] : memref<72x288xbf16, #tpu.memory_space<vmem>>, vector<8x288xbf16>
    tpu.vector_store %arg9[%c24_56, %c0_57], %50 {strides = array<i32>} : memref<72x288xbf16, #tpu.memory_space<vmem>>, vector<8x288xbf16>,
    %c0_58 = arith.constant 0 : index
    %c19_59 = arith.constant 19 : index
    %52 = vector.load %arg8[%c0_58, %c19_59] : memref<8x342xbf16, #tpu.memory_space<vmem>>, vector<8x288xbf16>
    %c32_60 = arith.constant 32 : index
    %c0_61 = arith.constant 0 : index
    %53 = vector.load %arg9[%c32_60, %c0_61] : memref<72x288xbf16, #tpu.memory_space<vmem>>, vector<8x288xbf16>
    tpu.vector_store %arg9[%c32_60, %c0_61], %52 {strides = array<i32>} : memref<72x288xbf16, #tpu.memory_space<vmem>>, vector<8x288xbf16>,
    %c0_62 = arith.constant 0 : index
    %c20_63 = arith.constant 20 : index
    %54 = vector.load %arg8[%c0_62, %c20_63] : memref<8x342xbf16, #tpu.memory_space<vmem>>, vector<8x288xbf16>
    %c40_64 = arith.constant 40 : index
    %c0_65 = arith.constant 0 : index
    %55 = vector.load %arg9[%c40_64, %c0_65] : memref<72x288xbf16, #tpu.memory_space<vmem>>, vector<8x288xbf16>
    tpu.vector_store %arg9[%c40_64, %c0_65], %54 {strides = array<i32>} : memref<72x288xbf16, #tpu.memory_space<vmem>>, vector<8x288xbf16>,
    %c0_66 = arith.constant 0 : index
    %c36_67 = arith.constant 36 : index
    %56 = vector.load %arg8[%c0_66, %c36_67] : memref<8x342xbf16, #tpu.memory_space<vmem>>, vector<8x288xbf16>
    %c48_68 = arith.constant 48 : index
    %c0_69 = arith.constant 0 : index
    %57 = vector.load %arg9[%c48_68, %c0_69] : memref<72x288xbf16, #tpu.memory_space<vmem>>, vector<8x288xbf16>
    tpu.vector_store %arg9[%c48_68, %c0_69], %56 {strides = array<i32>} : memref<72x288xbf16, #tpu.memory_space<vmem>>, vector<8x288xbf16>,
    %c0_70 = arith.constant 0 : index
    %c37_71 = arith.constant 37 : index
    %58 = vector.load %arg8[%c0_70, %c37_71] : memref<8x342xbf16, #tpu.memory_space<vmem>>, vector<8x288xbf16>
    %c56_72 = arith.constant 56 : index
    %c0_73 = arith.constant 0 : index
    %59 = vector.load %arg9[%c56_72, %c0_73] : memref<72x288xbf16, #tpu.memory_space<vmem>>, vector<8x288xbf16>
    tpu.vector_store %arg9[%c56_72, %c0_73], %58 {strides = array<i32>} : memref<72x288xbf16, #tpu.memory_space<vmem>>, vector<8x288xbf16>,
    %c0_74 = arith.constant 0 : index
    %c38_75 = arith.constant 38 : index
    %60 = vector.load %arg8[%c0_74, %c38_75] : memref<8x342xbf16, #tpu.memory_space<vmem>>, vector<8x288xbf16>
    %c64_76 = arith.constant 64 : index
    %c0_77 = arith.constant 0 : index
    %61 = vector.load %arg9[%c64_76, %c0_77] : memref<72x288xbf16, #tpu.memory_space<vmem>>, vector<8x288xbf16>
    tpu.vector_store %arg9[%c64_76, %c0_77], %60 {strides = array<i32>} : memref<72x288xbf16, #tpu.memory_space<vmem>>, vector<8x288xbf16>,
    %c0_78 = arith.constant 0 : index
    %c0_79 = arith.constant 0 : index
    %62 = vector.load %arg4[%c0_78, %c0_79] : memref<8x72xbf16, #tpu.memory_space<vmem>>, vector<8x72xbf16>
    %c0_80 = arith.constant 0 : index
    %c0_81 = arith.constant 0 : index
    %63 = vector.load %arg9[%c0_80, %c0_81] : memref<72x288xbf16, #tpu.memory_space<vmem>>, vector<72x288xbf16>
    %cst_82 = arith.constant dense<0.000000e+00> : vector<8x288xf32>
    %64 = tpu.matmul %62, %63, %cst_82 {dimension_numbers = #tpu.dot_dimension_numbers<[1], [0], [0], [1], [0, 0, 1, 1], [], []>} : vector<8x72xbf16>, vector<72x288xbf16>, vector<8x288xf32> -> vector<8x288xf32>
    %c0_83 = arith.constant 0 : index
    %c0_84 = arith.constant 0 : index
    %65 = vector.load %arg5[%c0_83, %c0_84] : memref<8x1xf32, #tpu.memory_space<vmem>>, vector<8x1xf32>
    %66 = vector.broadcast %65 : vector<8x1xf32> to vector<8x288xf32>
    %67 = arith.addf %64, %66 : vector<8x288xf32>
    %cst_85 = arith.constant 0.000000e+00 : f32
    %68 = vector.shape_cast %2 : vector<1x288xi1> to vector<1x288xi1>
    %69 = vector.broadcast %68 : vector<1x288xi1> to vector<8x288xi1>
    %70 = vector.broadcast %cst_85 : f32 to vector<8x288xf32>
    %71 = arith.select %69, %67, %70 : vector<8x288xi1>, vector<8x288xf32>
    %72 = arith.addf %5, %71 : vector<8x288xf32>
    %73 = arith.truncf %72 : vector<8x288xf32> to vector<8x288xbf16>
    %c0_86 = arith.constant 0 : index
    %c0_87 = arith.constant 0 : index
    %c0_88 = arith.constant 0 : index
    %74 = vector.load %arg7[%c0_86, %c0_87, %c0_88] : memref<1x8x288xbf16, #tpu.memory_space<vmem>>, vector<1x8x288xbf16>
    %75 = vector.shape_cast %74 : vector<1x8x288xbf16> to vector<8x288xbf16>
    %76 = vector.shape_cast %73 : vector<8x288xbf16> to vector<1x8x288xbf16>
    tpu.vector_store %arg7[%c0_86, %c0_87, %c0_88], %76 {strides = array<i32>} : memref<1x8x288xbf16, #tpu.memory_space<vmem>>, vector<1x8x288xbf16>,
    return
  }
  func.func @transform_0(%arg0: i32) -> (i32, i32, i32) {
    %c0_i32 = arith.constant 0 : i32
    %c0_i32_0 = arith.constant 0 : i32
    %c0_i32_1 = arith.constant 0 : i32
    return %arg0, %c0_i32, %c0_i32_0 : i32, i32, i32
  }
  func.func @transform_1(%arg0: i32) -> (i32, i32) {
    %c0_i32 = arith.constant 0 : i32
    %c0_i32_0 = arith.constant 0 : i32
    %c0_i32_1 = arith.constant 0 : i32
    return %c0_i32, %c0_i32_0 : i32, i32
  }
  func.func @transform_2(%arg0: i32) -> (i32, i32) {
    %c0_i32 = arith.constant 0 : i32
    %c0_i32_0 = arith.constant 0 : i32
    %c0_i32_1 = arith.constant 0 : i32
    return %c0_i32, %c0_i32_0 : i32, i32
  }
  func.func @transform_3(%arg0: i32) -> (i32, i32) {
    %c0_i32 = arith.constant 0 : i32
    %c0_i32_0 = arith.constant 0 : i32
    %c0_i32_1 = arith.constant 0 : i32
    return %c0_i32, %c0_i32_0 : i32, i32
  }
  func.func @transform_4(%arg0: i32) -> (i32, i32) {
    %c0_i32 = arith.constant 0 : i32
    %c0_i32_0 = arith.constant 0 : i32
    %c0_i32_1 = arith.constant 0 : i32
    return %c0_i32, %c0_i32_0 : i32, i32
  }
  func.func @transform_5(%arg0: i32) -> (i32, i32) {
    %c0_i32 = arith.constant 0 : i32
    %c0_i32_0 = arith.constant 0 : i32
    %c0_i32_1 = arith.constant 0 : i32
    return %c0_i32, %c0_i32_0 : i32, i32
  }
  func.func @transform_6(%arg0: i32) -> (i32, i32, i32) {
    %c0_i32 = arith.constant 0 : i32
    %c0_i32_0 = arith.constant 0 : i32
    %c0_i32_1 = arith.constant 0 : i32
    return %arg0, %c0_i32, %c0_i32_0 : i32, i32, i32
  }
}

module attributes {stable_mosaic.version = 11 : i64} {
  func.func @_pointwise_mm_kernel(%arg0: i32, %arg1: memref<1x32x80xbf16, #tpu.memory_space<vmem>>, %arg2: memref<16x32xbf16, #tpu.memory_space<vmem>>, %arg3: memref<16x1xf32, #tpu.memory_space<vmem>>, %arg4: memref<1x80xf32, #tpu.memory_space<vmem>>, %arg5: memref<1x16x80xbf16, #tpu.memory_space<vmem>>) attributes {dimension_semantics = [#tpu.dimension_semantics<parallel>], iteration_bounds = array<i64: 2>, scalar_prefetch = 0 : i64, scratch_operands = 0 : i64, tpu.core_type = #tpu.core_type<tc>, window_params = [{transform_indices = @transform_0, window_bounds = array<i64: 1, 32, 80>}, {pipeline_mode = #tpu.pipeline_mode<synchronous>, transform_indices = @transform_1, window_bounds = array<i64: 16, 32>}, {pipeline_mode = #tpu.pipeline_mode<synchronous>, transform_indices = @transform_2, window_bounds = array<i64: 16, 1>}, {pipeline_mode = #tpu.pipeline_mode<synchronous>, transform_indices = @transform_3, window_bounds = array<i64: 1, 80>}, {transform_indices = @transform_4, window_bounds = array<i64: 1, 16, 80>}]} {
    %c0 = arith.constant 0 : index
    %c0_0 = arith.constant 0 : index
    %0 = vector.load %arg2[%c0, %c0_0] : memref<16x32xbf16, #tpu.memory_space<vmem>>, vector<16x32xbf16>
    %c0_1 = arith.constant 0 : index
    %c0_2 = arith.constant 0 : index
    %c0_3 = arith.constant 0 : index
    %1 = vector.load %arg1[%c0_1, %c0_2, %c0_3] : memref<1x32x80xbf16, #tpu.memory_space<vmem>>, vector<1x32x80xbf16>
    %2 = vector.shape_cast %1 : vector<1x32x80xbf16> to vector<32x80xbf16>
    %cst = arith.constant dense<0.000000e+00> : vector<16x80xf32>
    %3 = tpu.matmul %0, %2, %cst {dimension_numbers = #tpu.dot_dimension_numbers<[1], [0], [0], [1], [0, 0, 1, 1], [], []>} : vector<16x32xbf16>, vector<32x80xbf16>, vector<16x80xf32> -> vector<16x80xf32>
    %c0_4 = arith.constant 0 : index
    %c0_5 = arith.constant 0 : index
    %4 = vector.load %arg3[%c0_4, %c0_5] : memref<16x1xf32, #tpu.memory_space<vmem>>, vector<16x1xf32>
    %5 = vector.broadcast %4 : vector<16x1xf32> to vector<16x80xf32>
    %6 = arith.addf %3, %5 : vector<16x80xf32>
    %c0_6 = arith.constant 0 : index
    %c0_7 = arith.constant 0 : index
    %7 = vector.load %arg4[%c0_6, %c0_7] : memref<1x80xf32, #tpu.memory_space<vmem>>, vector<1x80xf32>
    %cst_8 = arith.constant 0.000000e+00 : f32
    %8 = vector.broadcast %cst_8 : f32 to vector<1x80xf32>
    %9 = arith.cmpf one, %7, %8 : vector<1x80xf32>
    %cst_9 = arith.constant 0.000000e+00 : f32
    %10 = vector.shape_cast %9 : vector<1x80xi1> to vector<1x80xi1>
    %11 = vector.broadcast %10 : vector<1x80xi1> to vector<16x80xi1>
    %12 = vector.broadcast %cst_9 : f32 to vector<16x80xf32>
    %13 = arith.select %11, %6, %12 : vector<16x80xi1>, vector<16x80xf32>
    %14 = arith.truncf %13 : vector<16x80xf32> to vector<16x80xbf16>
    %c0_10 = arith.constant 0 : index
    %c0_11 = arith.constant 0 : index
    %c0_12 = arith.constant 0 : index
    %15 = vector.load %arg5[%c0_10, %c0_11, %c0_12] : memref<1x16x80xbf16, #tpu.memory_space<vmem>>, vector<1x16x80xbf16>
    %16 = vector.shape_cast %15 : vector<1x16x80xbf16> to vector<16x80xbf16>
    %17 = vector.shape_cast %14 : vector<16x80xbf16> to vector<1x16x80xbf16>
    tpu.vector_store %arg5[%c0_10, %c0_11, %c0_12], %17 {strides = array<i32>} : memref<1x16x80xbf16, #tpu.memory_space<vmem>>, vector<1x16x80xbf16>,
    return
  }
  func.func @transform_0(%arg0: i32) -> (i32, i32, i32) {
    %c0_i32 = arith.constant 0 : i32
    %c0_i32_0 = arith.constant 0 : i32
    %c0_i32_1 = arith.constant 0 : i32
    return %arg0, %c0_i32, %c0_i32_0 : i32, i32, i32
  }
  func.func @transform_1(%arg0: i32) -> (i32, i32) {
    %c0_i32 = arith.constant 0 : i32
    %c0_i32_0 = arith.constant 0 : i32
    %c0_i32_1 = arith.constant 0 : i32
    return %c0_i32, %c0_i32_0 : i32, i32
  }
  func.func @transform_2(%arg0: i32) -> (i32, i32) {
    %c0_i32 = arith.constant 0 : i32
    %c0_i32_0 = arith.constant 0 : i32
    %c0_i32_1 = arith.constant 0 : i32
    return %c0_i32, %c0_i32_0 : i32, i32
  }
  func.func @transform_3(%arg0: i32) -> (i32, i32) {
    %c0_i32 = arith.constant 0 : i32
    %c0_i32_0 = arith.constant 0 : i32
    %c0_i32_1 = arith.constant 0 : i32
    return %c0_i32, %c0_i32_0 : i32, i32
  }
  func.func @transform_4(%arg0: i32) -> (i32, i32, i32) {
    %c0_i32 = arith.constant 0 : i32
    %c0_i32_0 = arith.constant 0 : i32
    %c0_i32_1 = arith.constant 0 : i32
    return %arg0, %c0_i32, %c0_i32_0 : i32, i32, i32
  }
}

module attributes {stable_mosaic.version = 11 : i64} {
  func.func @_conv_block_kernel(%arg0: i32, %arg1: memref<1x16x80xbf16, #tpu.memory_space<vmem>>, %arg2: memref<16x144xbf16, #tpu.memory_space<vmem>>, %arg3: memref<16x1xf32, #tpu.memory_space<vmem>>, %arg4: memref<16x144xbf16, #tpu.memory_space<vmem>>, %arg5: memref<16x1xf32, #tpu.memory_space<vmem>>, %arg6: memref<1x80xf32, #tpu.memory_space<vmem>>, %arg7: memref<1x16x80xbf16, #tpu.memory_space<vmem>>, %arg8: memref<16x110xbf16, #tpu.memory_space<vmem>>, %arg9: memref<144x80xbf16, #tpu.memory_space<vmem>>) attributes {dimension_semantics = [#tpu.dimension_semantics<parallel>], iteration_bounds = array<i64: 2>, scalar_prefetch = 0 : i64, scratch_operands = 2 : i64, tpu.core_type = #tpu.core_type<tc>, window_params = [{transform_indices = @transform_0, window_bounds = array<i64: 1, 16, 80>}, {pipeline_mode = #tpu.pipeline_mode<synchronous>, transform_indices = @transform_1, window_bounds = array<i64: 16, 144>}, {pipeline_mode = #tpu.pipeline_mode<synchronous>, transform_indices = @transform_2, window_bounds = array<i64: 16, 1>}, {pipeline_mode = #tpu.pipeline_mode<synchronous>, transform_indices = @transform_3, window_bounds = array<i64: 16, 144>}, {pipeline_mode = #tpu.pipeline_mode<synchronous>, transform_indices = @transform_4, window_bounds = array<i64: 16, 1>}, {pipeline_mode = #tpu.pipeline_mode<synchronous>, transform_indices = @transform_5, window_bounds = array<i64: 1, 80>}, {transform_indices = @transform_6, window_bounds = array<i64: 1, 16, 80>}]} {
    %c0 = arith.constant 0 : index
    %c0_0 = arith.constant 0 : index
    %0 = vector.load %arg6[%c0, %c0_0] : memref<1x80xf32, #tpu.memory_space<vmem>>, vector<1x80xf32>
    %cst = arith.constant 0.000000e+00 : f32
    %1 = vector.broadcast %cst : f32 to vector<1x80xf32>
    %2 = arith.cmpf one, %0, %1 : vector<1x80xf32>
    %c0_1 = arith.constant 0 : index
    %c0_2 = arith.constant 0 : index
    %c0_3 = arith.constant 0 : index
    %3 = vector.load %arg1[%c0_1, %c0_2, %c0_3] : memref<1x16x80xbf16, #tpu.memory_space<vmem>>, vector<1x16x80xbf16>
    %4 = vector.shape_cast %3 : vector<1x16x80xbf16> to vector<16x80xbf16>
    %5 = arith.extf %4 : vector<16x80xbf16> to vector<16x80xf32>
    %cst_4 = arith.constant 0.000000e+00 : bf16
    %6 = vector.broadcast %cst_4 : bf16 to vector<16x11xbf16>
    %c0_5 = arith.constant 0 : index
    %c0_6 = arith.constant 0 : index
    %7 = vector.load %arg8[%c0_5, %c0_6] : memref<16x110xbf16, #tpu.memory_space<vmem>>, vector<16x11xbf16>
    tpu.vector_store %arg8[%c0_5, %c0_6], %6 {strides = array<i32>} : memref<16x110xbf16, #tpu.memory_space<vmem>>, vector<16x11xbf16>,
    %cst_7 = arith.constant 0.000000e+00 : bf16
    %8 = vector.broadcast %cst_7 : bf16 to vector<16x19xbf16>
    %c0_8 = arith.constant 0 : index
    %c91 = arith.constant 91 : index
    %9 = vector.load %arg8[%c0_8, %c91] : memref<16x110xbf16, #tpu.memory_space<vmem>>, vector<16x19xbf16>
    tpu.vector_store %arg8[%c0_8, %c91], %8 {strides = array<i32>} : memref<16x110xbf16, #tpu.memory_space<vmem>>, vector<16x19xbf16>,
    %10 = arith.truncf %5 : vector<16x80xf32> to vector<16x80xbf16>
    %c0_9 = arith.constant 0 : index
    %c11 = arith.constant 11 : index
    %11 = vector.load %arg8[%c0_9, %c11] : memref<16x110xbf16, #tpu.memory_space<vmem>>, vector<16x80xbf16>
    tpu.vector_store %arg8[%c0_9, %c11], %10 {strides = array<i32>} : memref<16x110xbf16, #tpu.memory_space<vmem>>, vector<16x80xbf16>,
    %c0_10 = arith.constant 0 : index
    %c0_11 = arith.constant 0 : index
    %12 = vector.load %arg8[%c0_10, %c0_11] : memref<16x110xbf16, #tpu.memory_space<vmem>>, vector<16x80xbf16>
    %c0_12 = arith.constant 0 : index
    %c0_13 = arith.constant 0 : index
    %13 = vector.load %arg9[%c0_12, %c0_13] : memref<144x80xbf16, #tpu.memory_space<vmem>>, vector<16x80xbf16>
    tpu.vector_store %arg9[%c0_12, %c0_13], %12 {strides = array<i32>} : memref<144x80xbf16, #tpu.memory_space<vmem>>, vector<16x80xbf16>,
    %c0_14 = arith.constant 0 : index
    %c1 = arith.constant 1 : index
    %14 = vector.load %arg8[%c0_14, %c1] : memref<16x110xbf16, #tpu.memory_space<vmem>>, vector<16x80xbf16>
    %c16 = arith.constant 16 : index
    %c0_15 = arith.constant 0 : index
    %15 = vector.load %arg9[%c16, %c0_15] : memref<144x80xbf16, #tpu.memory_space<vmem>>, vector<16x80xbf16>
    tpu.vector_store %arg9[%c16, %c0_15], %14 {strides = array<i32>} : memref<144x80xbf16, #tpu.memory_space<vmem>>, vector<16x80xbf16>,
    %c0_16 = arith.constant 0 : index
    %c2 = arith.constant 2 : index
    %16 = vector.load %arg8[%c0_16, %c2] : memref<16x110xbf16, #tpu.memory_space<vmem>>, vector<16x80xbf16>
    %c32 = arith.constant 32 : index
    %c0_17 = arith.constant 0 : index
    %17 = vector.load %arg9[%c32, %c0_17] : memref<144x80xbf16, #tpu.memory_space<vmem>>, vector<16x80xbf16>
    tpu.vector_store %arg9[%c32, %c0_17], %16 {strides = array<i32>} : memref<144x80xbf16, #tpu.memory_space<vmem>>, vector<16x80xbf16>,
    %c0_18 = arith.constant 0 : index
    %c10 = arith.constant 10 : index
    %18 = vector.load %arg8[%c0_18, %c10] : memref<16x110xbf16, #tpu.memory_space<vmem>>, vector<16x80xbf16>
    %c48 = arith.constant 48 : index
    %c0_19 = arith.constant 0 : index
    %19 = vector.load %arg9[%c48, %c0_19] : memref<144x80xbf16, #tpu.memory_space<vmem>>, vector<16x80xbf16>
    tpu.vector_store %arg9[%c48, %c0_19], %18 {strides = array<i32>} : memref<144x80xbf16, #tpu.memory_space<vmem>>, vector<16x80xbf16>,
    %c0_20 = arith.constant 0 : index
    %c11_21 = arith.constant 11 : index
    %20 = vector.load %arg8[%c0_20, %c11_21] : memref<16x110xbf16, #tpu.memory_space<vmem>>, vector<16x80xbf16>
    %c64 = arith.constant 64 : index
    %c0_22 = arith.constant 0 : index
    %21 = vector.load %arg9[%c64, %c0_22] : memref<144x80xbf16, #tpu.memory_space<vmem>>, vector<16x80xbf16>
    tpu.vector_store %arg9[%c64, %c0_22], %20 {strides = array<i32>} : memref<144x80xbf16, #tpu.memory_space<vmem>>, vector<16x80xbf16>,
    %c0_23 = arith.constant 0 : index
    %c12 = arith.constant 12 : index
    %22 = vector.load %arg8[%c0_23, %c12] : memref<16x110xbf16, #tpu.memory_space<vmem>>, vector<16x80xbf16>
    %c80 = arith.constant 80 : index
    %c0_24 = arith.constant 0 : index
    %23 = vector.load %arg9[%c80, %c0_24] : memref<144x80xbf16, #tpu.memory_space<vmem>>, vector<16x80xbf16>
    tpu.vector_store %arg9[%c80, %c0_24], %22 {strides = array<i32>} : memref<144x80xbf16, #tpu.memory_space<vmem>>, vector<16x80xbf16>,
    %c0_25 = arith.constant 0 : index
    %c20 = arith.constant 20 : index
    %24 = vector.load %arg8[%c0_25, %c20] : memref<16x110xbf16, #tpu.memory_space<vmem>>, vector<16x80xbf16>
    %c96 = arith.constant 96 : index
    %c0_26 = arith.constant 0 : index
    %25 = vector.load %arg9[%c96, %c0_26] : memref<144x80xbf16, #tpu.memory_space<vmem>>, vector<16x80xbf16>
    tpu.vector_store %arg9[%c96, %c0_26], %24 {strides = array<i32>} : memref<144x80xbf16, #tpu.memory_space<vmem>>, vector<16x80xbf16>,
    %c0_27 = arith.constant 0 : index
    %c21 = arith.constant 21 : index
    %26 = vector.load %arg8[%c0_27, %c21] : memref<16x110xbf16, #tpu.memory_space<vmem>>, vector<16x80xbf16>
    %c112 = arith.constant 112 : index
    %c0_28 = arith.constant 0 : index
    %27 = vector.load %arg9[%c112, %c0_28] : memref<144x80xbf16, #tpu.memory_space<vmem>>, vector<16x80xbf16>
    tpu.vector_store %arg9[%c112, %c0_28], %26 {strides = array<i32>} : memref<144x80xbf16, #tpu.memory_space<vmem>>, vector<16x80xbf16>,
    %c0_29 = arith.constant 0 : index
    %c22 = arith.constant 22 : index
    %28 = vector.load %arg8[%c0_29, %c22] : memref<16x110xbf16, #tpu.memory_space<vmem>>, vector<16x80xbf16>
    %c128 = arith.constant 128 : index
    %c0_30 = arith.constant 0 : index
    %29 = vector.load %arg9[%c128, %c0_30] : memref<144x80xbf16, #tpu.memory_space<vmem>>, vector<16x80xbf16>
    tpu.vector_store %arg9[%c128, %c0_30], %28 {strides = array<i32>} : memref<144x80xbf16, #tpu.memory_space<vmem>>, vector<16x80xbf16>,
    %c0_31 = arith.constant 0 : index
    %c0_32 = arith.constant 0 : index
    %30 = vector.load %arg2[%c0_31, %c0_32] : memref<16x144xbf16, #tpu.memory_space<vmem>>, vector<16x144xbf16>
    %c0_33 = arith.constant 0 : index
    %c0_34 = arith.constant 0 : index
    %31 = vector.load %arg9[%c0_33, %c0_34] : memref<144x80xbf16, #tpu.memory_space<vmem>>, vector<144x80xbf16>
    %cst_35 = arith.constant dense<0.000000e+00> : vector<16x80xf32>
    %32 = tpu.matmul %30, %31, %cst_35 {dimension_numbers = #tpu.dot_dimension_numbers<[1], [0], [0], [1], [0, 0, 1, 1], [], []>} : vector<16x144xbf16>, vector<144x80xbf16>, vector<16x80xf32> -> vector<16x80xf32>
    %c0_36 = arith.constant 0 : index
    %c0_37 = arith.constant 0 : index
    %33 = vector.load %arg3[%c0_36, %c0_37] : memref<16x1xf32, #tpu.memory_space<vmem>>, vector<16x1xf32>
    %34 = vector.broadcast %33 : vector<16x1xf32> to vector<16x80xf32>
    %35 = arith.addf %32, %34 : vector<16x80xf32>
    %cst_38 = arith.constant 0.000000e+00 : f32
    %36 = vector.broadcast %cst_38 : f32 to vector<16x80xf32>
    %37 = arith.maximumf %35, %36 : vector<16x80xf32>
    %cst_39 = arith.constant 0.000000e+00 : f32
    %38 = vector.shape_cast %2 : vector<1x80xi1> to vector<1x80xi1>
    %39 = vector.broadcast %38 : vector<1x80xi1> to vector<16x80xi1>
    %40 = vector.broadcast %cst_39 : f32 to vector<16x80xf32>
    %41 = arith.select %39, %37, %40 : vector<16x80xi1>, vector<16x80xf32>
    %42 = arith.truncf %41 : vector<16x80xf32> to vector<16x80xbf16>
    %c0_40 = arith.constant 0 : index
    %c11_41 = arith.constant 11 : index
    %43 = vector.load %arg8[%c0_40, %c11_41] : memref<16x110xbf16, #tpu.memory_space<vmem>>, vector<16x80xbf16>
    tpu.vector_store %arg8[%c0_40, %c11_41], %42 {strides = array<i32>} : memref<16x110xbf16, #tpu.memory_space<vmem>>, vector<16x80xbf16>,
    %c0_42 = arith.constant 0 : index
    %c0_43 = arith.constant 0 : index
    %44 = vector.load %arg8[%c0_42, %c0_43] : memref<16x110xbf16, #tpu.memory_space<vmem>>, vector<16x80xbf16>
    %c0_44 = arith.constant 0 : index
    %c0_45 = arith.constant 0 : index
    %45 = vector.load %arg9[%c0_44, %c0_45] : memref<144x80xbf16, #tpu.memory_space<vmem>>, vector<16x80xbf16>
    tpu.vector_store %arg9[%c0_44, %c0_45], %44 {strides = array<i32>} : memref<144x80xbf16, #tpu.memory_space<vmem>>, vector<16x80xbf16>,
    %c0_46 = arith.constant 0 : index
    %c1_47 = arith.constant 1 : index
    %46 = vector.load %arg8[%c0_46, %c1_47] : memref<16x110xbf16, #tpu.memory_space<vmem>>, vector<16x80xbf16>
    %c16_48 = arith.constant 16 : index
    %c0_49 = arith.constant 0 : index
    %47 = vector.load %arg9[%c16_48, %c0_49] : memref<144x80xbf16, #tpu.memory_space<vmem>>, vector<16x80xbf16>
    tpu.vector_store %arg9[%c16_48, %c0_49], %46 {strides = array<i32>} : memref<144x80xbf16, #tpu.memory_space<vmem>>, vector<16x80xbf16>,
    %c0_50 = arith.constant 0 : index
    %c2_51 = arith.constant 2 : index
    %48 = vector.load %arg8[%c0_50, %c2_51] : memref<16x110xbf16, #tpu.memory_space<vmem>>, vector<16x80xbf16>
    %c32_52 = arith.constant 32 : index
    %c0_53 = arith.constant 0 : index
    %49 = vector.load %arg9[%c32_52, %c0_53] : memref<144x80xbf16, #tpu.memory_space<vmem>>, vector<16x80xbf16>
    tpu.vector_store %arg9[%c32_52, %c0_53], %48 {strides = array<i32>} : memref<144x80xbf16, #tpu.memory_space<vmem>>, vector<16x80xbf16>,
    %c0_54 = arith.constant 0 : index
    %c10_55 = arith.constant 10 : index
    %50 = vector.load %arg8[%c0_54, %c10_55] : memref<16x110xbf16, #tpu.memory_space<vmem>>, vector<16x80xbf16>
    %c48_56 = arith.constant 48 : index
    %c0_57 = arith.constant 0 : index
    %51 = vector.load %arg9[%c48_56, %c0_57] : memref<144x80xbf16, #tpu.memory_space<vmem>>, vector<16x80xbf16>
    tpu.vector_store %arg9[%c48_56, %c0_57], %50 {strides = array<i32>} : memref<144x80xbf16, #tpu.memory_space<vmem>>, vector<16x80xbf16>,
    %c0_58 = arith.constant 0 : index
    %c11_59 = arith.constant 11 : index
    %52 = vector.load %arg8[%c0_58, %c11_59] : memref<16x110xbf16, #tpu.memory_space<vmem>>, vector<16x80xbf16>
    %c64_60 = arith.constant 64 : index
    %c0_61 = arith.constant 0 : index
    %53 = vector.load %arg9[%c64_60, %c0_61] : memref<144x80xbf16, #tpu.memory_space<vmem>>, vector<16x80xbf16>
    tpu.vector_store %arg9[%c64_60, %c0_61], %52 {strides = array<i32>} : memref<144x80xbf16, #tpu.memory_space<vmem>>, vector<16x80xbf16>,
    %c0_62 = arith.constant 0 : index
    %c12_63 = arith.constant 12 : index
    %54 = vector.load %arg8[%c0_62, %c12_63] : memref<16x110xbf16, #tpu.memory_space<vmem>>, vector<16x80xbf16>
    %c80_64 = arith.constant 80 : index
    %c0_65 = arith.constant 0 : index
    %55 = vector.load %arg9[%c80_64, %c0_65] : memref<144x80xbf16, #tpu.memory_space<vmem>>, vector<16x80xbf16>
    tpu.vector_store %arg9[%c80_64, %c0_65], %54 {strides = array<i32>} : memref<144x80xbf16, #tpu.memory_space<vmem>>, vector<16x80xbf16>,
    %c0_66 = arith.constant 0 : index
    %c20_67 = arith.constant 20 : index
    %56 = vector.load %arg8[%c0_66, %c20_67] : memref<16x110xbf16, #tpu.memory_space<vmem>>, vector<16x80xbf16>
    %c96_68 = arith.constant 96 : index
    %c0_69 = arith.constant 0 : index
    %57 = vector.load %arg9[%c96_68, %c0_69] : memref<144x80xbf16, #tpu.memory_space<vmem>>, vector<16x80xbf16>
    tpu.vector_store %arg9[%c96_68, %c0_69], %56 {strides = array<i32>} : memref<144x80xbf16, #tpu.memory_space<vmem>>, vector<16x80xbf16>,
    %c0_70 = arith.constant 0 : index
    %c21_71 = arith.constant 21 : index
    %58 = vector.load %arg8[%c0_70, %c21_71] : memref<16x110xbf16, #tpu.memory_space<vmem>>, vector<16x80xbf16>
    %c112_72 = arith.constant 112 : index
    %c0_73 = arith.constant 0 : index
    %59 = vector.load %arg9[%c112_72, %c0_73] : memref<144x80xbf16, #tpu.memory_space<vmem>>, vector<16x80xbf16>
    tpu.vector_store %arg9[%c112_72, %c0_73], %58 {strides = array<i32>} : memref<144x80xbf16, #tpu.memory_space<vmem>>, vector<16x80xbf16>,
    %c0_74 = arith.constant 0 : index
    %c22_75 = arith.constant 22 : index
    %60 = vector.load %arg8[%c0_74, %c22_75] : memref<16x110xbf16, #tpu.memory_space<vmem>>, vector<16x80xbf16>
    %c128_76 = arith.constant 128 : index
    %c0_77 = arith.constant 0 : index
    %61 = vector.load %arg9[%c128_76, %c0_77] : memref<144x80xbf16, #tpu.memory_space<vmem>>, vector<16x80xbf16>
    tpu.vector_store %arg9[%c128_76, %c0_77], %60 {strides = array<i32>} : memref<144x80xbf16, #tpu.memory_space<vmem>>, vector<16x80xbf16>,
    %c0_78 = arith.constant 0 : index
    %c0_79 = arith.constant 0 : index
    %62 = vector.load %arg4[%c0_78, %c0_79] : memref<16x144xbf16, #tpu.memory_space<vmem>>, vector<16x144xbf16>
    %c0_80 = arith.constant 0 : index
    %c0_81 = arith.constant 0 : index
    %63 = vector.load %arg9[%c0_80, %c0_81] : memref<144x80xbf16, #tpu.memory_space<vmem>>, vector<144x80xbf16>
    %cst_82 = arith.constant dense<0.000000e+00> : vector<16x80xf32>
    %64 = tpu.matmul %62, %63, %cst_82 {dimension_numbers = #tpu.dot_dimension_numbers<[1], [0], [0], [1], [0, 0, 1, 1], [], []>} : vector<16x144xbf16>, vector<144x80xbf16>, vector<16x80xf32> -> vector<16x80xf32>
    %c0_83 = arith.constant 0 : index
    %c0_84 = arith.constant 0 : index
    %65 = vector.load %arg5[%c0_83, %c0_84] : memref<16x1xf32, #tpu.memory_space<vmem>>, vector<16x1xf32>
    %66 = vector.broadcast %65 : vector<16x1xf32> to vector<16x80xf32>
    %67 = arith.addf %64, %66 : vector<16x80xf32>
    %cst_85 = arith.constant 0.000000e+00 : f32
    %68 = vector.shape_cast %2 : vector<1x80xi1> to vector<1x80xi1>
    %69 = vector.broadcast %68 : vector<1x80xi1> to vector<16x80xi1>
    %70 = vector.broadcast %cst_85 : f32 to vector<16x80xf32>
    %71 = arith.select %69, %67, %70 : vector<16x80xi1>, vector<16x80xf32>
    %72 = arith.addf %5, %71 : vector<16x80xf32>
    %73 = arith.truncf %72 : vector<16x80xf32> to vector<16x80xbf16>
    %c0_86 = arith.constant 0 : index
    %c0_87 = arith.constant 0 : index
    %c0_88 = arith.constant 0 : index
    %74 = vector.load %arg7[%c0_86, %c0_87, %c0_88] : memref<1x16x80xbf16, #tpu.memory_space<vmem>>, vector<1x16x80xbf16>
    %75 = vector.shape_cast %74 : vector<1x16x80xbf16> to vector<16x80xbf16>
    %76 = vector.shape_cast %73 : vector<16x80xbf16> to vector<1x16x80xbf16>
    tpu.vector_store %arg7[%c0_86, %c0_87, %c0_88], %76 {strides = array<i32>} : memref<1x16x80xbf16, #tpu.memory_space<vmem>>, vector<1x16x80xbf16>,
    return
  }
  func.func @transform_0(%arg0: i32) -> (i32, i32, i32) {
    %c0_i32 = arith.constant 0 : i32
    %c0_i32_0 = arith.constant 0 : i32
    %c0_i32_1 = arith.constant 0 : i32
    return %arg0, %c0_i32, %c0_i32_0 : i32, i32, i32
  }
  func.func @transform_1(%arg0: i32) -> (i32, i32) {
    %c0_i32 = arith.constant 0 : i32
    %c0_i32_0 = arith.constant 0 : i32
    %c0_i32_1 = arith.constant 0 : i32
    return %c0_i32, %c0_i32_0 : i32, i32
  }
  func.func @transform_2(%arg0: i32) -> (i32, i32) {
    %c0_i32 = arith.constant 0 : i32
    %c0_i32_0 = arith.constant 0 : i32
    %c0_i32_1 = arith.constant 0 : i32
    return %c0_i32, %c0_i32_0 : i32, i32
  }
  func.func @transform_3(%arg0: i32) -> (i32, i32) {
    %c0_i32 = arith.constant 0 : i32
    %c0_i32_0 = arith.constant 0 : i32
    %c0_i32_1 = arith.constant 0 : i32
    return %c0_i32, %c0_i32_0 : i32, i32
  }
  func.func @transform_4(%arg0: i32) -> (i32, i32) {
    %c0_i32 = arith.constant 0 : i32
    %c0_i32_0 = arith.constant 0 : i32
    %c0_i32_1 = arith.constant 0 : i32
    return %c0_i32, %c0_i32_0 : i32, i32
  }
  func.func @transform_5(%arg0: i32) -> (i32, i32) {
    %c0_i32 = arith.constant 0 : i32
    %c0_i32_0 = arith.constant 0 : i32
    %c0_i32_1 = arith.constant 0 : i32
    return %c0_i32, %c0_i32_0 : i32, i32
  }
  func.func @transform_6(%arg0: i32) -> (i32, i32, i32) {
    %c0_i32 = arith.constant 0 : i32
    %c0_i32_0 = arith.constant 0 : i32
    %c0_i32_1 = arith.constant 0 : i32
    return %arg0, %c0_i32, %c0_i32_0 : i32, i32, i32
  }
}

module attributes {stable_mosaic.version = 11 : i64} {
  func.func @_conv_block_kernel(%arg0: i32, %arg1: memref<1x32x24xbf16, #tpu.memory_space<vmem>>, %arg2: memref<32x288xbf16, #tpu.memory_space<vmem>>, %arg3: memref<32x1xf32, #tpu.memory_space<vmem>>, %arg4: memref<32x288xbf16, #tpu.memory_space<vmem>>, %arg5: memref<32x1xf32, #tpu.memory_space<vmem>>, %arg6: memref<1x24xf32, #tpu.memory_space<vmem>>, %arg7: memref<1x32x24xbf16, #tpu.memory_space<vmem>>, %arg8: memref<32x42xbf16, #tpu.memory_space<vmem>>, %arg9: memref<288x24xbf16, #tpu.memory_space<vmem>>) attributes {dimension_semantics = [#tpu.dimension_semantics<parallel>], iteration_bounds = array<i64: 2>, scalar_prefetch = 0 : i64, scratch_operands = 2 : i64, tpu.core_type = #tpu.core_type<tc>, window_params = [{transform_indices = @transform_0, window_bounds = array<i64: 1, 32, 24>}, {pipeline_mode = #tpu.pipeline_mode<synchronous>, transform_indices = @transform_1, window_bounds = array<i64: 32, 288>}, {pipeline_mode = #tpu.pipeline_mode<synchronous>, transform_indices = @transform_2, window_bounds = array<i64: 32, 1>}, {pipeline_mode = #tpu.pipeline_mode<synchronous>, transform_indices = @transform_3, window_bounds = array<i64: 32, 288>}, {pipeline_mode = #tpu.pipeline_mode<synchronous>, transform_indices = @transform_4, window_bounds = array<i64: 32, 1>}, {pipeline_mode = #tpu.pipeline_mode<synchronous>, transform_indices = @transform_5, window_bounds = array<i64: 1, 24>}, {transform_indices = @transform_6, window_bounds = array<i64: 1, 32, 24>}]} {
    %c0 = arith.constant 0 : index
    %c0_0 = arith.constant 0 : index
    %0 = vector.load %arg6[%c0, %c0_0] : memref<1x24xf32, #tpu.memory_space<vmem>>, vector<1x24xf32>
    %cst = arith.constant 0.000000e+00 : f32
    %1 = vector.broadcast %cst : f32 to vector<1x24xf32>
    %2 = arith.cmpf one, %0, %1 : vector<1x24xf32>
    %c0_1 = arith.constant 0 : index
    %c0_2 = arith.constant 0 : index
    %c0_3 = arith.constant 0 : index
    %3 = vector.load %arg1[%c0_1, %c0_2, %c0_3] : memref<1x32x24xbf16, #tpu.memory_space<vmem>>, vector<1x32x24xbf16>
    %4 = vector.shape_cast %3 : vector<1x32x24xbf16> to vector<32x24xbf16>
    %5 = arith.extf %4 : vector<32x24xbf16> to vector<32x24xf32>
    %cst_4 = arith.constant 0.000000e+00 : bf16
    %6 = vector.broadcast %cst_4 : bf16 to vector<32x7xbf16>
    %c0_5 = arith.constant 0 : index
    %c0_6 = arith.constant 0 : index
    %7 = vector.load %arg8[%c0_5, %c0_6] : memref<32x42xbf16, #tpu.memory_space<vmem>>, vector<32x7xbf16>
    tpu.vector_store %arg8[%c0_5, %c0_6], %6 {strides = array<i32>} : memref<32x42xbf16, #tpu.memory_space<vmem>>, vector<32x7xbf16>,
    %cst_7 = arith.constant 0.000000e+00 : bf16
    %8 = vector.broadcast %cst_7 : bf16 to vector<32x11xbf16>
    %c0_8 = arith.constant 0 : index
    %c31 = arith.constant 31 : index
    %9 = vector.load %arg8[%c0_8, %c31] : memref<32x42xbf16, #tpu.memory_space<vmem>>, vector<32x11xbf16>
    tpu.vector_store %arg8[%c0_8, %c31], %8 {strides = array<i32>} : memref<32x42xbf16, #tpu.memory_space<vmem>>, vector<32x11xbf16>,
    %10 = arith.truncf %5 : vector<32x24xf32> to vector<32x24xbf16>
    %c0_9 = arith.constant 0 : index
    %c7 = arith.constant 7 : index
    %11 = vector.load %arg8[%c0_9, %c7] : memref<32x42xbf16, #tpu.memory_space<vmem>>, vector<32x24xbf16>
    tpu.vector_store %arg8[%c0_9, %c7], %10 {strides = array<i32>} : memref<32x42xbf16, #tpu.memory_space<vmem>>, vector<32x24xbf16>,
    %c0_10 = arith.constant 0 : index
    %c0_11 = arith.constant 0 : index
    %12 = vector.load %arg8[%c0_10, %c0_11] : memref<32x42xbf16, #tpu.memory_space<vmem>>, vector<32x24xbf16>
    %c0_12 = arith.constant 0 : index
    %c0_13 = arith.constant 0 : index
    %13 = vector.load %arg9[%c0_12, %c0_13] : memref<288x24xbf16, #tpu.memory_space<vmem>>, vector<32x24xbf16>
    tpu.vector_store %arg9[%c0_12, %c0_13], %12 {strides = array<i32>} : memref<288x24xbf16, #tpu.memory_space<vmem>>, vector<32x24xbf16>,
    %c0_14 = arith.constant 0 : index
    %c1 = arith.constant 1 : index
    %14 = vector.load %arg8[%c0_14, %c1] : memref<32x42xbf16, #tpu.memory_space<vmem>>, vector<32x24xbf16>
    %c32 = arith.constant 32 : index
    %c0_15 = arith.constant 0 : index
    %15 = vector.load %arg9[%c32, %c0_15] : memref<288x24xbf16, #tpu.memory_space<vmem>>, vector<32x24xbf16>
    tpu.vector_store %arg9[%c32, %c0_15], %14 {strides = array<i32>} : memref<288x24xbf16, #tpu.memory_space<vmem>>, vector<32x24xbf16>,
    %c0_16 = arith.constant 0 : index
    %c2 = arith.constant 2 : index
    %16 = vector.load %arg8[%c0_16, %c2] : memref<32x42xbf16, #tpu.memory_space<vmem>>, vector<32x24xbf16>
    %c64 = arith.constant 64 : index
    %c0_17 = arith.constant 0 : index
    %17 = vector.load %arg9[%c64, %c0_17] : memref<288x24xbf16, #tpu.memory_space<vmem>>, vector<32x24xbf16>
    tpu.vector_store %arg9[%c64, %c0_17], %16 {strides = array<i32>} : memref<288x24xbf16, #tpu.memory_space<vmem>>, vector<32x24xbf16>,
    %c0_18 = arith.constant 0 : index
    %c6 = arith.constant 6 : index
    %18 = vector.load %arg8[%c0_18, %c6] : memref<32x42xbf16, #tpu.memory_space<vmem>>, vector<32x24xbf16>
    %c96 = arith.constant 96 : index
    %c0_19 = arith.constant 0 : index
    %19 = vector.load %arg9[%c96, %c0_19] : memref<288x24xbf16, #tpu.memory_space<vmem>>, vector<32x24xbf16>
    tpu.vector_store %arg9[%c96, %c0_19], %18 {strides = array<i32>} : memref<288x24xbf16, #tpu.memory_space<vmem>>, vector<32x24xbf16>,
    %c0_20 = arith.constant 0 : index
    %c7_21 = arith.constant 7 : index
    %20 = vector.load %arg8[%c0_20, %c7_21] : memref<32x42xbf16, #tpu.memory_space<vmem>>, vector<32x24xbf16>
    %c128 = arith.constant 128 : index
    %c0_22 = arith.constant 0 : index
    %21 = vector.load %arg9[%c128, %c0_22] : memref<288x24xbf16, #tpu.memory_space<vmem>>, vector<32x24xbf16>
    tpu.vector_store %arg9[%c128, %c0_22], %20 {strides = array<i32>} : memref<288x24xbf16, #tpu.memory_space<vmem>>, vector<32x24xbf16>,
    %c0_23 = arith.constant 0 : index
    %c8 = arith.constant 8 : index
    %22 = vector.load %arg8[%c0_23, %c8] : memref<32x42xbf16, #tpu.memory_space<vmem>>, vector<32x24xbf16>
    %c160 = arith.constant 160 : index
    %c0_24 = arith.constant 0 : index
    %23 = vector.load %arg9[%c160, %c0_24] : memref<288x24xbf16, #tpu.memory_space<vmem>>, vector<32x24xbf16>
    tpu.vector_store %arg9[%c160, %c0_24], %22 {strides = array<i32>} : memref<288x24xbf16, #tpu.memory_space<vmem>>, vector<32x24xbf16>,
    %c0_25 = arith.constant 0 : index
    %c12 = arith.constant 12 : index
    %24 = vector.load %arg8[%c0_25, %c12] : memref<32x42xbf16, #tpu.memory_space<vmem>>, vector<32x24xbf16>
    %c192 = arith.constant 192 : index
    %c0_26 = arith.constant 0 : index
    %25 = vector.load %arg9[%c192, %c0_26] : memref<288x24xbf16, #tpu.memory_space<vmem>>, vector<32x24xbf16>
    tpu.vector_store %arg9[%c192, %c0_26], %24 {strides = array<i32>} : memref<288x24xbf16, #tpu.memory_space<vmem>>, vector<32x24xbf16>,
    %c0_27 = arith.constant 0 : index
    %c13 = arith.constant 13 : index
    %26 = vector.load %arg8[%c0_27, %c13] : memref<32x42xbf16, #tpu.memory_space<vmem>>, vector<32x24xbf16>
    %c224 = arith.constant 224 : index
    %c0_28 = arith.constant 0 : index
    %27 = vector.load %arg9[%c224, %c0_28] : memref<288x24xbf16, #tpu.memory_space<vmem>>, vector<32x24xbf16>
    tpu.vector_store %arg9[%c224, %c0_28], %26 {strides = array<i32>} : memref<288x24xbf16, #tpu.memory_space<vmem>>, vector<32x24xbf16>,
    %c0_29 = arith.constant 0 : index
    %c14 = arith.constant 14 : index
    %28 = vector.load %arg8[%c0_29, %c14] : memref<32x42xbf16, #tpu.memory_space<vmem>>, vector<32x24xbf16>
    %c256 = arith.constant 256 : index
    %c0_30 = arith.constant 0 : index
    %29 = vector.load %arg9[%c256, %c0_30] : memref<288x24xbf16, #tpu.memory_space<vmem>>, vector<32x24xbf16>
    tpu.vector_store %arg9[%c256, %c0_30], %28 {strides = array<i32>} : memref<288x24xbf16, #tpu.memory_space<vmem>>, vector<32x24xbf16>,
    %c0_31 = arith.constant 0 : index
    %c0_32 = arith.constant 0 : index
    %30 = vector.load %arg2[%c0_31, %c0_32] : memref<32x288xbf16, #tpu.memory_space<vmem>>, vector<32x288xbf16>
    %c0_33 = arith.constant 0 : index
    %c0_34 = arith.constant 0 : index
    %31 = vector.load %arg9[%c0_33, %c0_34] : memref<288x24xbf16, #tpu.memory_space<vmem>>, vector<288x24xbf16>
    %cst_35 = arith.constant dense<0.000000e+00> : vector<32x24xf32>
    %32 = tpu.matmul %30, %31, %cst_35 {dimension_numbers = #tpu.dot_dimension_numbers<[1], [0], [0], [1], [0, 0, 1, 1], [], []>} : vector<32x288xbf16>, vector<288x24xbf16>, vector<32x24xf32> -> vector<32x24xf32>
    %c0_36 = arith.constant 0 : index
    %c0_37 = arith.constant 0 : index
    %33 = vector.load %arg3[%c0_36, %c0_37] : memref<32x1xf32, #tpu.memory_space<vmem>>, vector<32x1xf32>
    %34 = vector.broadcast %33 : vector<32x1xf32> to vector<32x24xf32>
    %35 = arith.addf %32, %34 : vector<32x24xf32>
    %cst_38 = arith.constant 0.000000e+00 : f32
    %36 = vector.broadcast %cst_38 : f32 to vector<32x24xf32>
    %37 = arith.maximumf %35, %36 : vector<32x24xf32>
    %cst_39 = arith.constant 0.000000e+00 : f32
    %38 = vector.shape_cast %2 : vector<1x24xi1> to vector<1x24xi1>
    %39 = vector.broadcast %38 : vector<1x24xi1> to vector<32x24xi1>
    %40 = vector.broadcast %cst_39 : f32 to vector<32x24xf32>
    %41 = arith.select %39, %37, %40 : vector<32x24xi1>, vector<32x24xf32>
    %42 = arith.truncf %41 : vector<32x24xf32> to vector<32x24xbf16>
    %c0_40 = arith.constant 0 : index
    %c7_41 = arith.constant 7 : index
    %43 = vector.load %arg8[%c0_40, %c7_41] : memref<32x42xbf16, #tpu.memory_space<vmem>>, vector<32x24xbf16>
    tpu.vector_store %arg8[%c0_40, %c7_41], %42 {strides = array<i32>} : memref<32x42xbf16, #tpu.memory_space<vmem>>, vector<32x24xbf16>,
    %c0_42 = arith.constant 0 : index
    %c0_43 = arith.constant 0 : index
    %44 = vector.load %arg8[%c0_42, %c0_43] : memref<32x42xbf16, #tpu.memory_space<vmem>>, vector<32x24xbf16>
    %c0_44 = arith.constant 0 : index
    %c0_45 = arith.constant 0 : index
    %45 = vector.load %arg9[%c0_44, %c0_45] : memref<288x24xbf16, #tpu.memory_space<vmem>>, vector<32x24xbf16>
    tpu.vector_store %arg9[%c0_44, %c0_45], %44 {strides = array<i32>} : memref<288x24xbf16, #tpu.memory_space<vmem>>, vector<32x24xbf16>,
    %c0_46 = arith.constant 0 : index
    %c1_47 = arith.constant 1 : index
    %46 = vector.load %arg8[%c0_46, %c1_47] : memref<32x42xbf16, #tpu.memory_space<vmem>>, vector<32x24xbf16>
    %c32_48 = arith.constant 32 : index
    %c0_49 = arith.constant 0 : index
    %47 = vector.load %arg9[%c32_48, %c0_49] : memref<288x24xbf16, #tpu.memory_space<vmem>>, vector<32x24xbf16>
    tpu.vector_store %arg9[%c32_48, %c0_49], %46 {strides = array<i32>} : memref<288x24xbf16, #tpu.memory_space<vmem>>, vector<32x24xbf16>,
    %c0_50 = arith.constant 0 : index
    %c2_51 = arith.constant 2 : index
    %48 = vector.load %arg8[%c0_50, %c2_51] : memref<32x42xbf16, #tpu.memory_space<vmem>>, vector<32x24xbf16>
    %c64_52 = arith.constant 64 : index
    %c0_53 = arith.constant 0 : index
    %49 = vector.load %arg9[%c64_52, %c0_53] : memref<288x24xbf16, #tpu.memory_space<vmem>>, vector<32x24xbf16>
    tpu.vector_store %arg9[%c64_52, %c0_53], %48 {strides = array<i32>} : memref<288x24xbf16, #tpu.memory_space<vmem>>, vector<32x24xbf16>,
    %c0_54 = arith.constant 0 : index
    %c6_55 = arith.constant 6 : index
    %50 = vector.load %arg8[%c0_54, %c6_55] : memref<32x42xbf16, #tpu.memory_space<vmem>>, vector<32x24xbf16>
    %c96_56 = arith.constant 96 : index
    %c0_57 = arith.constant 0 : index
    %51 = vector.load %arg9[%c96_56, %c0_57] : memref<288x24xbf16, #tpu.memory_space<vmem>>, vector<32x24xbf16>
    tpu.vector_store %arg9[%c96_56, %c0_57], %50 {strides = array<i32>} : memref<288x24xbf16, #tpu.memory_space<vmem>>, vector<32x24xbf16>,
    %c0_58 = arith.constant 0 : index
    %c7_59 = arith.constant 7 : index
    %52 = vector.load %arg8[%c0_58, %c7_59] : memref<32x42xbf16, #tpu.memory_space<vmem>>, vector<32x24xbf16>
    %c128_60 = arith.constant 128 : index
    %c0_61 = arith.constant 0 : index
    %53 = vector.load %arg9[%c128_60, %c0_61] : memref<288x24xbf16, #tpu.memory_space<vmem>>, vector<32x24xbf16>
    tpu.vector_store %arg9[%c128_60, %c0_61], %52 {strides = array<i32>} : memref<288x24xbf16, #tpu.memory_space<vmem>>, vector<32x24xbf16>,
    %c0_62 = arith.constant 0 : index
    %c8_63 = arith.constant 8 : index
    %54 = vector.load %arg8[%c0_62, %c8_63] : memref<32x42xbf16, #tpu.memory_space<vmem>>, vector<32x24xbf16>
    %c160_64 = arith.constant 160 : index
    %c0_65 = arith.constant 0 : index
    %55 = vector.load %arg9[%c160_64, %c0_65] : memref<288x24xbf16, #tpu.memory_space<vmem>>, vector<32x24xbf16>
    tpu.vector_store %arg9[%c160_64, %c0_65], %54 {strides = array<i32>} : memref<288x24xbf16, #tpu.memory_space<vmem>>, vector<32x24xbf16>,
    %c0_66 = arith.constant 0 : index
    %c12_67 = arith.constant 12 : index
    %56 = vector.load %arg8[%c0_66, %c12_67] : memref<32x42xbf16, #tpu.memory_space<vmem>>, vector<32x24xbf16>
    %c192_68 = arith.constant 192 : index
    %c0_69 = arith.constant 0 : index
    %57 = vector.load %arg9[%c192_68, %c0_69] : memref<288x24xbf16, #tpu.memory_space<vmem>>, vector<32x24xbf16>
    tpu.vector_store %arg9[%c192_68, %c0_69], %56 {strides = array<i32>} : memref<288x24xbf16, #tpu.memory_space<vmem>>, vector<32x24xbf16>,
    %c0_70 = arith.constant 0 : index
    %c13_71 = arith.constant 13 : index
    %58 = vector.load %arg8[%c0_70, %c13_71] : memref<32x42xbf16, #tpu.memory_space<vmem>>, vector<32x24xbf16>
    %c224_72 = arith.constant 224 : index
    %c0_73 = arith.constant 0 : index
    %59 = vector.load %arg9[%c224_72, %c0_73] : memref<288x24xbf16, #tpu.memory_space<vmem>>, vector<32x24xbf16>
    tpu.vector_store %arg9[%c224_72, %c0_73], %58 {strides = array<i32>} : memref<288x24xbf16, #tpu.memory_space<vmem>>, vector<32x24xbf16>,
    %c0_74 = arith.constant 0 : index
    %c14_75 = arith.constant 14 : index
    %60 = vector.load %arg8[%c0_74, %c14_75] : memref<32x42xbf16, #tpu.memory_space<vmem>>, vector<32x24xbf16>
    %c256_76 = arith.constant 256 : index
    %c0_77 = arith.constant 0 : index
    %61 = vector.load %arg9[%c256_76, %c0_77] : memref<288x24xbf16, #tpu.memory_space<vmem>>, vector<32x24xbf16>
    tpu.vector_store %arg9[%c256_76, %c0_77], %60 {strides = array<i32>} : memref<288x24xbf16, #tpu.memory_space<vmem>>, vector<32x24xbf16>,
    %c0_78 = arith.constant 0 : index
    %c0_79 = arith.constant 0 : index
    %62 = vector.load %arg4[%c0_78, %c0_79] : memref<32x288xbf16, #tpu.memory_space<vmem>>, vector<32x288xbf16>
    %c0_80 = arith.constant 0 : index
    %c0_81 = arith.constant 0 : index
    %63 = vector.load %arg9[%c0_80, %c0_81] : memref<288x24xbf16, #tpu.memory_space<vmem>>, vector<288x24xbf16>
    %cst_82 = arith.constant dense<0.000000e+00> : vector<32x24xf32>
    %64 = tpu.matmul %62, %63, %cst_82 {dimension_numbers = #tpu.dot_dimension_numbers<[1], [0], [0], [1], [0, 0, 1, 1], [], []>} : vector<32x288xbf16>, vector<288x24xbf16>, vector<32x24xf32> -> vector<32x24xf32>
    %c0_83 = arith.constant 0 : index
    %c0_84 = arith.constant 0 : index
    %65 = vector.load %arg5[%c0_83, %c0_84] : memref<32x1xf32, #tpu.memory_space<vmem>>, vector<32x1xf32>
    %66 = vector.broadcast %65 : vector<32x1xf32> to vector<32x24xf32>
    %67 = arith.addf %64, %66 : vector<32x24xf32>
    %cst_85 = arith.constant 0.000000e+00 : f32
    %68 = vector.shape_cast %2 : vector<1x24xi1> to vector<1x24xi1>
    %69 = vector.broadcast %68 : vector<1x24xi1> to vector<32x24xi1>
    %70 = vector.broadcast %cst_85 : f32 to vector<32x24xf32>
    %71 = arith.select %69, %67, %70 : vector<32x24xi1>, vector<32x24xf32>
    %72 = arith.addf %5, %71 : vector<32x24xf32>
    %73 = arith.truncf %72 : vector<32x24xf32> to vector<32x24xbf16>
    %c0_86 = arith.constant 0 : index
    %c0_87 = arith.constant 0 : index
    %c0_88 = arith.constant 0 : index
    %74 = vector.load %arg7[%c0_86, %c0_87, %c0_88] : memref<1x32x24xbf16, #tpu.memory_space<vmem>>, vector<1x32x24xbf16>
    %75 = vector.shape_cast %74 : vector<1x32x24xbf16> to vector<32x24xbf16>
    %76 = vector.shape_cast %73 : vector<32x24xbf16> to vector<1x32x24xbf16>
    tpu.vector_store %arg7[%c0_86, %c0_87, %c0_88], %76 {strides = array<i32>} : memref<1x32x24xbf16, #tpu.memory_space<vmem>>, vector<1x32x24xbf16>,
    return
  }
  func.func @transform_0(%arg0: i32) -> (i32, i32, i32) {
    %c0_i32 = arith.constant 0 : i32
    %c0_i32_0 = arith.constant 0 : i32
    %c0_i32_1 = arith.constant 0 : i32
    return %arg0, %c0_i32, %c0_i32_0 : i32, i32, i32
  }
  func.func @transform_1(%arg0: i32) -> (i32, i32) {
    %c0_i32 = arith.constant 0 : i32
    %c0_i32_0 = arith.constant 0 : i32
    %c0_i32_1 = arith.constant 0 : i32
    return %c0_i32, %c0_i32_0 : i32, i32
  }
  func.func @transform_2(%arg0: i32) -> (i32, i32) {
    %c0_i32 = arith.constant 0 : i32
    %c0_i32_0 = arith.constant 0 : i32
    %c0_i32_1 = arith.constant 0 : i32
    return %c0_i32, %c0_i32_0 : i32, i32
  }
  func.func @transform_3(%arg0: i32) -> (i32, i32) {
    %c0_i32 = arith.constant 0 : i32
    %c0_i32_0 = arith.constant 0 : i32
    %c0_i32_1 = arith.constant 0 : i32
    return %c0_i32, %c0_i32_0 : i32, i32
  }
  func.func @transform_4(%arg0: i32) -> (i32, i32) {
    %c0_i32 = arith.constant 0 : i32
    %c0_i32_0 = arith.constant 0 : i32
    %c0_i32_1 = arith.constant 0 : i32
    return %c0_i32, %c0_i32_0 : i32, i32
  }
  func.func @transform_5(%arg0: i32) -> (i32, i32) {
    %c0_i32 = arith.constant 0 : i32
    %c0_i32_0 = arith.constant 0 : i32
    %c0_i32_1 = arith.constant 0 : i32
    return %c0_i32, %c0_i32_0 : i32, i32
  }
  func.func @transform_6(%arg0: i32) -> (i32, i32, i32) {
    %c0_i32 = arith.constant 0 : i32
    %c0_i32_0 = arith.constant 0 : i32
    %c0_i32_1 = arith.constant 0 : i32
    return %arg0, %c0_i32, %c0_i32_0 : i32, i32, i32
  }
}

module attributes {stable_mosaic.version = 11 : i64} {
  func.func @_pointwise_mm_kernel(%arg0: i32, %arg1: memref<1x64x24xbf16, #tpu.memory_space<vmem>>, %arg2: memref<32x64xbf16, #tpu.memory_space<vmem>>, %arg3: memref<32x1xf32, #tpu.memory_space<vmem>>, %arg4: memref<1x24xf32, #tpu.memory_space<vmem>>, %arg5: memref<1x32x24xbf16, #tpu.memory_space<vmem>>) attributes {dimension_semantics = [#tpu.dimension_semantics<parallel>], iteration_bounds = array<i64: 2>, scalar_prefetch = 0 : i64, scratch_operands = 0 : i64, tpu.core_type = #tpu.core_type<tc>, window_params = [{transform_indices = @transform_0, window_bounds = array<i64: 1, 64, 24>}, {pipeline_mode = #tpu.pipeline_mode<synchronous>, transform_indices = @transform_1, window_bounds = array<i64: 32, 64>}, {pipeline_mode = #tpu.pipeline_mode<synchronous>, transform_indices = @transform_2, window_bounds = array<i64: 32, 1>}, {pipeline_mode = #tpu.pipeline_mode<synchronous>, transform_indices = @transform_3, window_bounds = array<i64: 1, 24>}, {transform_indices = @transform_4, window_bounds = array<i64: 1, 32, 24>}]} {
    %c0 = arith.constant 0 : index
    %c0_0 = arith.constant 0 : index
    %0 = vector.load %arg2[%c0, %c0_0] : memref<32x64xbf16, #tpu.memory_space<vmem>>, vector<32x64xbf16>
    %c0_1 = arith.constant 0 : index
    %c0_2 = arith.constant 0 : index
    %c0_3 = arith.constant 0 : index
    %1 = vector.load %arg1[%c0_1, %c0_2, %c0_3] : memref<1x64x24xbf16, #tpu.memory_space<vmem>>, vector<1x64x24xbf16>
    %2 = vector.shape_cast %1 : vector<1x64x24xbf16> to vector<64x24xbf16>
    %cst = arith.constant dense<0.000000e+00> : vector<32x24xf32>
    %3 = tpu.matmul %0, %2, %cst {dimension_numbers = #tpu.dot_dimension_numbers<[1], [0], [0], [1], [0, 0, 1, 1], [], []>} : vector<32x64xbf16>, vector<64x24xbf16>, vector<32x24xf32> -> vector<32x24xf32>
    %c0_4 = arith.constant 0 : index
    %c0_5 = arith.constant 0 : index
    %4 = vector.load %arg3[%c0_4, %c0_5] : memref<32x1xf32, #tpu.memory_space<vmem>>, vector<32x1xf32>
    %5 = vector.broadcast %4 : vector<32x1xf32> to vector<32x24xf32>
    %6 = arith.addf %3, %5 : vector<32x24xf32>
    %c0_6 = arith.constant 0 : index
    %c0_7 = arith.constant 0 : index
    %7 = vector.load %arg4[%c0_6, %c0_7] : memref<1x24xf32, #tpu.memory_space<vmem>>, vector<1x24xf32>
    %cst_8 = arith.constant 0.000000e+00 : f32
    %8 = vector.broadcast %cst_8 : f32 to vector<1x24xf32>
    %9 = arith.cmpf one, %7, %8 : vector<1x24xf32>
    %cst_9 = arith.constant 0.000000e+00 : f32
    %10 = vector.shape_cast %9 : vector<1x24xi1> to vector<1x24xi1>
    %11 = vector.broadcast %10 : vector<1x24xi1> to vector<32x24xi1>
    %12 = vector.broadcast %cst_9 : f32 to vector<32x24xf32>
    %13 = arith.select %11, %6, %12 : vector<32x24xi1>, vector<32x24xf32>
    %14 = arith.truncf %13 : vector<32x24xf32> to vector<32x24xbf16>
    %c0_10 = arith.constant 0 : index
    %c0_11 = arith.constant 0 : index
    %c0_12 = arith.constant 0 : index
    %15 = vector.load %arg5[%c0_10, %c0_11, %c0_12] : memref<1x32x24xbf16, #tpu.memory_space<vmem>>, vector<1x32x24xbf16>
    %16 = vector.shape_cast %15 : vector<1x32x24xbf16> to vector<32x24xbf16>
    %17 = vector.shape_cast %14 : vector<32x24xbf16> to vector<1x32x24xbf16>
    tpu.vector_store %arg5[%c0_10, %c0_11, %c0_12], %17 {strides = array<i32>} : memref<1x32x24xbf16, #tpu.memory_space<vmem>>, vector<1x32x24xbf16>,
    return
  }
  func.func @transform_0(%arg0: i32) -> (i32, i32, i32) {
    %c0_i32 = arith.constant 0 : i32
    %c0_i32_0 = arith.constant 0 : i32
    %c0_i32_1 = arith.constant 0 : i32
    return %arg0, %c0_i32, %c0_i32_0 : i32, i32, i32
  }
  func.func @transform_1(%arg0: i32) -> (i32, i32) {
    %c0_i32 = arith.constant 0 : i32
    %c0_i32_0 = arith.constant 0 : i32
    %c0_i32_1 = arith.constant 0 : i32
    return %c0_i32, %c0_i32_0 : i32, i32
  }
  func.func @transform_2(%arg0: i32) -> (i32, i32) {
    %c0_i32 = arith.constant 0 : i32
    %c0_i32_0 = arith.constant 0 : i32
    %c0_i32_1 = arith.constant 0 : i32
    return %c0_i32, %c0_i32_0 : i32, i32
  }
  func.func @transform_3(%arg0: i32) -> (i32, i32) {
    %c0_i32 = arith.constant 0 : i32
    %c0_i32_0 = arith.constant 0 : i32
    %c0_i32_1 = arith.constant 0 : i32
    return %c0_i32, %c0_i32_0 : i32, i32
  }
  func.func @transform_4(%arg0: i32) -> (i32, i32, i32) {
    %c0_i32 = arith.constant 0 : i32
    %c0_i32_0 = arith.constant 0 : i32
    %c0_i32_1 = arith.constant 0 : i32
    return %arg0, %c0_i32, %c0_i32_0 : i32, i32, i32
  }
}

module attributes {stable_mosaic.version = 11 : i64} {
  func.func @_pointwise_mm_kernel(%arg0: i32, %arg1: memref<1x32x24xbf16, #tpu.memory_space<vmem>>, %arg2: memref<64x32xbf16, #tpu.memory_space<vmem>>, %arg3: memref<1x24xf32, #tpu.memory_space<vmem>>, %arg4: memref<1x64x24xbf16, #tpu.memory_space<vmem>>) attributes {dimension_semantics = [#tpu.dimension_semantics<parallel>], iteration_bounds = array<i64: 2>, scalar_prefetch = 0 : i64, scratch_operands = 0 : i64, tpu.core_type = #tpu.core_type<tc>, window_params = [{transform_indices = @transform_0, window_bounds = array<i64: 1, 32, 24>}, {pipeline_mode = #tpu.pipeline_mode<synchronous>, transform_indices = @transform_1, window_bounds = array<i64: 64, 32>}, {pipeline_mode = #tpu.pipeline_mode<synchronous>, transform_indices = @transform_2, window_bounds = array<i64: 1, 24>}, {transform_indices = @transform_3, window_bounds = array<i64: 1, 64, 24>}]} {
    %c0 = arith.constant 0 : index
    %c0_0 = arith.constant 0 : index
    %0 = vector.load %arg2[%c0, %c0_0] : memref<64x32xbf16, #tpu.memory_space<vmem>>, vector<64x32xbf16>
    %c0_1 = arith.constant 0 : index
    %c0_2 = arith.constant 0 : index
    %c0_3 = arith.constant 0 : index
    %1 = vector.load %arg1[%c0_1, %c0_2, %c0_3] : memref<1x32x24xbf16, #tpu.memory_space<vmem>>, vector<1x32x24xbf16>
    %2 = vector.shape_cast %1 : vector<1x32x24xbf16> to vector<32x24xbf16>
    %cst = arith.constant dense<0.000000e+00> : vector<64x24xf32>
    %3 = tpu.matmul %0, %2, %cst {dimension_numbers = #tpu.dot_dimension_numbers<[1], [0], [0], [1], [0, 0, 1, 1], [], []>} : vector<64x32xbf16>, vector<32x24xbf16>, vector<64x24xf32> -> vector<64x24xf32>
    %c0_4 = arith.constant 0 : index
    %c0_5 = arith.constant 0 : index
    %4 = vector.load %arg3[%c0_4, %c0_5] : memref<1x24xf32, #tpu.memory_space<vmem>>, vector<1x24xf32>
    %cst_6 = arith.constant 0.000000e+00 : f32
    %5 = vector.broadcast %cst_6 : f32 to vector<1x24xf32>
    %6 = arith.cmpf one, %4, %5 : vector<1x24xf32>
    %cst_7 = arith.constant 0.000000e+00 : f32
    %7 = vector.shape_cast %6 : vector<1x24xi1> to vector<1x24xi1>
    %8 = vector.broadcast %7 : vector<1x24xi1> to vector<64x24xi1>
    %9 = vector.broadcast %cst_7 : f32 to vector<64x24xf32>
    %10 = arith.select %8, %3, %9 : vector<64x24xi1>, vector<64x24xf32>
    %11 = arith.truncf %10 : vector<64x24xf32> to vector<64x24xbf16>
    %c0_8 = arith.constant 0 : index
    %c0_9 = arith.constant 0 : index
    %c0_10 = arith.constant 0 : index
    %12 = vector.load %arg4[%c0_8, %c0_9, %c0_10] : memref<1x64x24xbf16, #tpu.memory_space<vmem>>, vector<1x64x24xbf16>
    %13 = vector.shape_cast %12 : vector<1x64x24xbf16> to vector<64x24xbf16>
    %14 = vector.shape_cast %11 : vector<64x24xbf16> to vector<1x64x24xbf16>
    tpu.vector_store %arg4[%c0_8, %c0_9, %c0_10], %14 {strides = array<i32>} : memref<1x64x24xbf16, #tpu.memory_space<vmem>>, vector<1x64x24xbf16>,
    return
  }
  func.func @transform_0(%arg0: i32) -> (i32, i32, i32) {
    %c0_i32 = arith.constant 0 : i32
    %c0_i32_0 = arith.constant 0 : i32
    %c0_i32_1 = arith.constant 0 : i32
    return %arg0, %c0_i32, %c0_i32_0 : i32, i32, i32
  }
  func.func @transform_1(%arg0: i32) -> (i32, i32) {
    %c0_i32 = arith.constant 0 : i32
    %c0_i32_0 = arith.constant 0 : i32
    %c0_i32_1 = arith.constant 0 : i32
    return %c0_i32, %c0_i32_0 : i32, i32
  }
  func.func @transform_2(%arg0: i32) -> (i32, i32) {
    %c0_i32 = arith.constant 0 : i32
    %c0_i32_0 = arith.constant 0 : i32
    %c0_i32_1 = arith.constant 0 : i32
    return %c0_i32, %c0_i32_0 : i32, i32
  }
  func.func @transform_3(%arg0: i32) -> (i32, i32, i32) {
    %c0_i32 = arith.constant 0 : i32
    %c0_i32_0 = arith.constant 0 : i32
    %c0_i32_1 = arith.constant 0 : i32
    return %arg0, %c0_i32, %c0_i32_0 : i32, i32, i32
  }
}

module attributes {stable_mosaic.version = 11 : i64} {
  func.func @_conv_block_kernel(%arg0: i32, %arg1: memref<1x16x80xbf16, #tpu.memory_space<vmem>>, %arg2: memref<1x16x80xbf16, #tpu.memory_space<vmem>>, %arg3: memref<16x144xbf16, #tpu.memory_space<vmem>>, %arg4: memref<16x1xf32, #tpu.memory_space<vmem>>, %arg5: memref<16x144xbf16, #tpu.memory_space<vmem>>, %arg6: memref<16x1xf32, #tpu.memory_space<vmem>>, %arg7: memref<1x80xf32, #tpu.memory_space<vmem>>, %arg8: memref<1x16x80xbf16, #tpu.memory_space<vmem>>, %arg9: memref<16x110xbf16, #tpu.memory_space<vmem>>, %arg10: memref<144x80xbf16, #tpu.memory_space<vmem>>) attributes {dimension_semantics = [#tpu.dimension_semantics<parallel>], iteration_bounds = array<i64: 2>, scalar_prefetch = 0 : i64, scratch_operands = 2 : i64, tpu.core_type = #tpu.core_type<tc>, window_params = [{transform_indices = @transform_0, window_bounds = array<i64: 1, 16, 80>}, {transform_indices = @transform_1, window_bounds = array<i64: 1, 16, 80>}, {pipeline_mode = #tpu.pipeline_mode<synchronous>, transform_indices = @transform_2, window_bounds = array<i64: 16, 144>}, {pipeline_mode = #tpu.pipeline_mode<synchronous>, transform_indices = @transform_3, window_bounds = array<i64: 16, 1>}, {pipeline_mode = #tpu.pipeline_mode<synchronous>, transform_indices = @transform_4, window_bounds = array<i64: 16, 144>}, {pipeline_mode = #tpu.pipeline_mode<synchronous>, transform_indices = @transform_5, window_bounds = array<i64: 16, 1>}, {pipeline_mode = #tpu.pipeline_mode<synchronous>, transform_indices = @transform_6, window_bounds = array<i64: 1, 80>}, {transform_indices = @transform_7, window_bounds = array<i64: 1, 16, 80>}]} {
    %c0 = arith.constant 0 : index
    %c0_0 = arith.constant 0 : index
    %0 = vector.load %arg7[%c0, %c0_0] : memref<1x80xf32, #tpu.memory_space<vmem>>, vector<1x80xf32>
    %cst = arith.constant 0.000000e+00 : f32
    %1 = vector.broadcast %cst : f32 to vector<1x80xf32>
    %2 = arith.cmpf one, %0, %1 : vector<1x80xf32>
    %c0_1 = arith.constant 0 : index
    %c0_2 = arith.constant 0 : index
    %c0_3 = arith.constant 0 : index
    %3 = vector.load %arg1[%c0_1, %c0_2, %c0_3] : memref<1x16x80xbf16, #tpu.memory_space<vmem>>, vector<1x16x80xbf16>
    %4 = vector.shape_cast %3 : vector<1x16x80xbf16> to vector<16x80xbf16>
    %5 = arith.extf %4 : vector<16x80xbf16> to vector<16x80xf32>
    %c0_4 = arith.constant 0 : index
    %c0_5 = arith.constant 0 : index
    %c0_6 = arith.constant 0 : index
    %6 = vector.load %arg2[%c0_4, %c0_5, %c0_6] : memref<1x16x80xbf16, #tpu.memory_space<vmem>>, vector<1x16x80xbf16>
    %7 = vector.shape_cast %6 : vector<1x16x80xbf16> to vector<16x80xbf16>
    %8 = arith.extf %7 : vector<16x80xbf16> to vector<16x80xf32>
    %9 = arith.addf %5, %8 : vector<16x80xf32>
    %cst_7 = arith.constant 0.000000e+00 : bf16
    %10 = vector.broadcast %cst_7 : bf16 to vector<16x11xbf16>
    %c0_8 = arith.constant 0 : index
    %c0_9 = arith.constant 0 : index
    %11 = vector.load %arg9[%c0_8, %c0_9] : memref<16x110xbf16, #tpu.memory_space<vmem>>, vector<16x11xbf16>
    tpu.vector_store %arg9[%c0_8, %c0_9], %10 {strides = array<i32>} : memref<16x110xbf16, #tpu.memory_space<vmem>>, vector<16x11xbf16>,
    %cst_10 = arith.constant 0.000000e+00 : bf16
    %12 = vector.broadcast %cst_10 : bf16 to vector<16x19xbf16>
    %c0_11 = arith.constant 0 : index
    %c91 = arith.constant 91 : index
    %13 = vector.load %arg9[%c0_11, %c91] : memref<16x110xbf16, #tpu.memory_space<vmem>>, vector<16x19xbf16>
    tpu.vector_store %arg9[%c0_11, %c91], %12 {strides = array<i32>} : memref<16x110xbf16, #tpu.memory_space<vmem>>, vector<16x19xbf16>,
    %14 = arith.truncf %9 : vector<16x80xf32> to vector<16x80xbf16>
    %c0_12 = arith.constant 0 : index
    %c11 = arith.constant 11 : index
    %15 = vector.load %arg9[%c0_12, %c11] : memref<16x110xbf16, #tpu.memory_space<vmem>>, vector<16x80xbf16>
    tpu.vector_store %arg9[%c0_12, %c11], %14 {strides = array<i32>} : memref<16x110xbf16, #tpu.memory_space<vmem>>, vector<16x80xbf16>,
    %c0_13 = arith.constant 0 : index
    %c0_14 = arith.constant 0 : index
    %16 = vector.load %arg9[%c0_13, %c0_14] : memref<16x110xbf16, #tpu.memory_space<vmem>>, vector<16x80xbf16>
    %c0_15 = arith.constant 0 : index
    %c0_16 = arith.constant 0 : index
    %17 = vector.load %arg10[%c0_15, %c0_16] : memref<144x80xbf16, #tpu.memory_space<vmem>>, vector<16x80xbf16>
    tpu.vector_store %arg10[%c0_15, %c0_16], %16 {strides = array<i32>} : memref<144x80xbf16, #tpu.memory_space<vmem>>, vector<16x80xbf16>,
    %c0_17 = arith.constant 0 : index
    %c1 = arith.constant 1 : index
    %18 = vector.load %arg9[%c0_17, %c1] : memref<16x110xbf16, #tpu.memory_space<vmem>>, vector<16x80xbf16>
    %c16 = arith.constant 16 : index
    %c0_18 = arith.constant 0 : index
    %19 = vector.load %arg10[%c16, %c0_18] : memref<144x80xbf16, #tpu.memory_space<vmem>>, vector<16x80xbf16>
    tpu.vector_store %arg10[%c16, %c0_18], %18 {strides = array<i32>} : memref<144x80xbf16, #tpu.memory_space<vmem>>, vector<16x80xbf16>,
    %c0_19 = arith.constant 0 : index
    %c2 = arith.constant 2 : index
    %20 = vector.load %arg9[%c0_19, %c2] : memref<16x110xbf16, #tpu.memory_space<vmem>>, vector<16x80xbf16>
    %c32 = arith.constant 32 : index
    %c0_20 = arith.constant 0 : index
    %21 = vector.load %arg10[%c32, %c0_20] : memref<144x80xbf16, #tpu.memory_space<vmem>>, vector<16x80xbf16>
    tpu.vector_store %arg10[%c32, %c0_20], %20 {strides = array<i32>} : memref<144x80xbf16, #tpu.memory_space<vmem>>, vector<16x80xbf16>,
    %c0_21 = arith.constant 0 : index
    %c10 = arith.constant 10 : index
    %22 = vector.load %arg9[%c0_21, %c10] : memref<16x110xbf16, #tpu.memory_space<vmem>>, vector<16x80xbf16>
    %c48 = arith.constant 48 : index
    %c0_22 = arith.constant 0 : index
    %23 = vector.load %arg10[%c48, %c0_22] : memref<144x80xbf16, #tpu.memory_space<vmem>>, vector<16x80xbf16>
    tpu.vector_store %arg10[%c48, %c0_22], %22 {strides = array<i32>} : memref<144x80xbf16, #tpu.memory_space<vmem>>, vector<16x80xbf16>,
    %c0_23 = arith.constant 0 : index
    %c11_24 = arith.constant 11 : index
    %24 = vector.load %arg9[%c0_23, %c11_24] : memref<16x110xbf16, #tpu.memory_space<vmem>>, vector<16x80xbf16>
    %c64 = arith.constant 64 : index
    %c0_25 = arith.constant 0 : index
    %25 = vector.load %arg10[%c64, %c0_25] : memref<144x80xbf16, #tpu.memory_space<vmem>>, vector<16x80xbf16>
    tpu.vector_store %arg10[%c64, %c0_25], %24 {strides = array<i32>} : memref<144x80xbf16, #tpu.memory_space<vmem>>, vector<16x80xbf16>,
    %c0_26 = arith.constant 0 : index
    %c12 = arith.constant 12 : index
    %26 = vector.load %arg9[%c0_26, %c12] : memref<16x110xbf16, #tpu.memory_space<vmem>>, vector<16x80xbf16>
    %c80 = arith.constant 80 : index
    %c0_27 = arith.constant 0 : index
    %27 = vector.load %arg10[%c80, %c0_27] : memref<144x80xbf16, #tpu.memory_space<vmem>>, vector<16x80xbf16>
    tpu.vector_store %arg10[%c80, %c0_27], %26 {strides = array<i32>} : memref<144x80xbf16, #tpu.memory_space<vmem>>, vector<16x80xbf16>,
    %c0_28 = arith.constant 0 : index
    %c20 = arith.constant 20 : index
    %28 = vector.load %arg9[%c0_28, %c20] : memref<16x110xbf16, #tpu.memory_space<vmem>>, vector<16x80xbf16>
    %c96 = arith.constant 96 : index
    %c0_29 = arith.constant 0 : index
    %29 = vector.load %arg10[%c96, %c0_29] : memref<144x80xbf16, #tpu.memory_space<vmem>>, vector<16x80xbf16>
    tpu.vector_store %arg10[%c96, %c0_29], %28 {strides = array<i32>} : memref<144x80xbf16, #tpu.memory_space<vmem>>, vector<16x80xbf16>,
    %c0_30 = arith.constant 0 : index
    %c21 = arith.constant 21 : index
    %30 = vector.load %arg9[%c0_30, %c21] : memref<16x110xbf16, #tpu.memory_space<vmem>>, vector<16x80xbf16>
    %c112 = arith.constant 112 : index
    %c0_31 = arith.constant 0 : index
    %31 = vector.load %arg10[%c112, %c0_31] : memref<144x80xbf16, #tpu.memory_space<vmem>>, vector<16x80xbf16>
    tpu.vector_store %arg10[%c112, %c0_31], %30 {strides = array<i32>} : memref<144x80xbf16, #tpu.memory_space<vmem>>, vector<16x80xbf16>,
    %c0_32 = arith.constant 0 : index
    %c22 = arith.constant 22 : index
    %32 = vector.load %arg9[%c0_32, %c22] : memref<16x110xbf16, #tpu.memory_space<vmem>>, vector<16x80xbf16>
    %c128 = arith.constant 128 : index
    %c0_33 = arith.constant 0 : index
    %33 = vector.load %arg10[%c128, %c0_33] : memref<144x80xbf16, #tpu.memory_space<vmem>>, vector<16x80xbf16>
    tpu.vector_store %arg10[%c128, %c0_33], %32 {strides = array<i32>} : memref<144x80xbf16, #tpu.memory_space<vmem>>, vector<16x80xbf16>,
    %c0_34 = arith.constant 0 : index
    %c0_35 = arith.constant 0 : index
    %34 = vector.load %arg3[%c0_34, %c0_35] : memref<16x144xbf16, #tpu.memory_space<vmem>>, vector<16x144xbf16>
    %c0_36 = arith.constant 0 : index
    %c0_37 = arith.constant 0 : index
    %35 = vector.load %arg10[%c0_36, %c0_37] : memref<144x80xbf16, #tpu.memory_space<vmem>>, vector<144x80xbf16>
    %cst_38 = arith.constant dense<0.000000e+00> : vector<16x80xf32>
    %36 = tpu.matmul %34, %35, %cst_38 {dimension_numbers = #tpu.dot_dimension_numbers<[1], [0], [0], [1], [0, 0, 1, 1], [], []>} : vector<16x144xbf16>, vector<144x80xbf16>, vector<16x80xf32> -> vector<16x80xf32>
    %c0_39 = arith.constant 0 : index
    %c0_40 = arith.constant 0 : index
    %37 = vector.load %arg4[%c0_39, %c0_40] : memref<16x1xf32, #tpu.memory_space<vmem>>, vector<16x1xf32>
    %38 = vector.broadcast %37 : vector<16x1xf32> to vector<16x80xf32>
    %39 = arith.addf %36, %38 : vector<16x80xf32>
    %cst_41 = arith.constant 0.000000e+00 : f32
    %40 = vector.broadcast %cst_41 : f32 to vector<16x80xf32>
    %41 = arith.maximumf %39, %40 : vector<16x80xf32>
    %cst_42 = arith.constant 0.000000e+00 : f32
    %42 = vector.shape_cast %2 : vector<1x80xi1> to vector<1x80xi1>
    %43 = vector.broadcast %42 : vector<1x80xi1> to vector<16x80xi1>
    %44 = vector.broadcast %cst_42 : f32 to vector<16x80xf32>
    %45 = arith.select %43, %41, %44 : vector<16x80xi1>, vector<16x80xf32>
    %46 = arith.truncf %45 : vector<16x80xf32> to vector<16x80xbf16>
    %c0_43 = arith.constant 0 : index
    %c11_44 = arith.constant 11 : index
    %47 = vector.load %arg9[%c0_43, %c11_44] : memref<16x110xbf16, #tpu.memory_space<vmem>>, vector<16x80xbf16>
    tpu.vector_store %arg9[%c0_43, %c11_44], %46 {strides = array<i32>} : memref<16x110xbf16, #tpu.memory_space<vmem>>, vector<16x80xbf16>,
    %c0_45 = arith.constant 0 : index
    %c0_46 = arith.constant 0 : index
    %48 = vector.load %arg9[%c0_45, %c0_46] : memref<16x110xbf16, #tpu.memory_space<vmem>>, vector<16x80xbf16>
    %c0_47 = arith.constant 0 : index
    %c0_48 = arith.constant 0 : index
    %49 = vector.load %arg10[%c0_47, %c0_48] : memref<144x80xbf16, #tpu.memory_space<vmem>>, vector<16x80xbf16>
    tpu.vector_store %arg10[%c0_47, %c0_48], %48 {strides = array<i32>} : memref<144x80xbf16, #tpu.memory_space<vmem>>, vector<16x80xbf16>,
    %c0_49 = arith.constant 0 : index
    %c1_50 = arith.constant 1 : index
    %50 = vector.load %arg9[%c0_49, %c1_50] : memref<16x110xbf16, #tpu.memory_space<vmem>>, vector<16x80xbf16>
    %c16_51 = arith.constant 16 : index
    %c0_52 = arith.constant 0 : index
    %51 = vector.load %arg10[%c16_51, %c0_52] : memref<144x80xbf16, #tpu.memory_space<vmem>>, vector<16x80xbf16>
    tpu.vector_store %arg10[%c16_51, %c0_52], %50 {strides = array<i32>} : memref<144x80xbf16, #tpu.memory_space<vmem>>, vector<16x80xbf16>,
    %c0_53 = arith.constant 0 : index
    %c2_54 = arith.constant 2 : index
    %52 = vector.load %arg9[%c0_53, %c2_54] : memref<16x110xbf16, #tpu.memory_space<vmem>>, vector<16x80xbf16>
    %c32_55 = arith.constant 32 : index
    %c0_56 = arith.constant 0 : index
    %53 = vector.load %arg10[%c32_55, %c0_56] : memref<144x80xbf16, #tpu.memory_space<vmem>>, vector<16x80xbf16>
    tpu.vector_store %arg10[%c32_55, %c0_56], %52 {strides = array<i32>} : memref<144x80xbf16, #tpu.memory_space<vmem>>, vector<16x80xbf16>,
    %c0_57 = arith.constant 0 : index
    %c10_58 = arith.constant 10 : index
    %54 = vector.load %arg9[%c0_57, %c10_58] : memref<16x110xbf16, #tpu.memory_space<vmem>>, vector<16x80xbf16>
    %c48_59 = arith.constant 48 : index
    %c0_60 = arith.constant 0 : index
    %55 = vector.load %arg10[%c48_59, %c0_60] : memref<144x80xbf16, #tpu.memory_space<vmem>>, vector<16x80xbf16>
    tpu.vector_store %arg10[%c48_59, %c0_60], %54 {strides = array<i32>} : memref<144x80xbf16, #tpu.memory_space<vmem>>, vector<16x80xbf16>,
    %c0_61 = arith.constant 0 : index
    %c11_62 = arith.constant 11 : index
    %56 = vector.load %arg9[%c0_61, %c11_62] : memref<16x110xbf16, #tpu.memory_space<vmem>>, vector<16x80xbf16>
    %c64_63 = arith.constant 64 : index
    %c0_64 = arith.constant 0 : index
    %57 = vector.load %arg10[%c64_63, %c0_64] : memref<144x80xbf16, #tpu.memory_space<vmem>>, vector<16x80xbf16>
    tpu.vector_store %arg10[%c64_63, %c0_64], %56 {strides = array<i32>} : memref<144x80xbf16, #tpu.memory_space<vmem>>, vector<16x80xbf16>,
    %c0_65 = arith.constant 0 : index
    %c12_66 = arith.constant 12 : index
    %58 = vector.load %arg9[%c0_65, %c12_66] : memref<16x110xbf16, #tpu.memory_space<vmem>>, vector<16x80xbf16>
    %c80_67 = arith.constant 80 : index
    %c0_68 = arith.constant 0 : index
    %59 = vector.load %arg10[%c80_67, %c0_68] : memref<144x80xbf16, #tpu.memory_space<vmem>>, vector<16x80xbf16>
    tpu.vector_store %arg10[%c80_67, %c0_68], %58 {strides = array<i32>} : memref<144x80xbf16, #tpu.memory_space<vmem>>, vector<16x80xbf16>,
    %c0_69 = arith.constant 0 : index
    %c20_70 = arith.constant 20 : index
    %60 = vector.load %arg9[%c0_69, %c20_70] : memref<16x110xbf16, #tpu.memory_space<vmem>>, vector<16x80xbf16>
    %c96_71 = arith.constant 96 : index
    %c0_72 = arith.constant 0 : index
    %61 = vector.load %arg10[%c96_71, %c0_72] : memref<144x80xbf16, #tpu.memory_space<vmem>>, vector<16x80xbf16>
    tpu.vector_store %arg10[%c96_71, %c0_72], %60 {strides = array<i32>} : memref<144x80xbf16, #tpu.memory_space<vmem>>, vector<16x80xbf16>,
    %c0_73 = arith.constant 0 : index
    %c21_74 = arith.constant 21 : index
    %62 = vector.load %arg9[%c0_73, %c21_74] : memref<16x110xbf16, #tpu.memory_space<vmem>>, vector<16x80xbf16>
    %c112_75 = arith.constant 112 : index
    %c0_76 = arith.constant 0 : index
    %63 = vector.load %arg10[%c112_75, %c0_76] : memref<144x80xbf16, #tpu.memory_space<vmem>>, vector<16x80xbf16>
    tpu.vector_store %arg10[%c112_75, %c0_76], %62 {strides = array<i32>} : memref<144x80xbf16, #tpu.memory_space<vmem>>, vector<16x80xbf16>,
    %c0_77 = arith.constant 0 : index
    %c22_78 = arith.constant 22 : index
    %64 = vector.load %arg9[%c0_77, %c22_78] : memref<16x110xbf16, #tpu.memory_space<vmem>>, vector<16x80xbf16>
    %c128_79 = arith.constant 128 : index
    %c0_80 = arith.constant 0 : index
    %65 = vector.load %arg10[%c128_79, %c0_80] : memref<144x80xbf16, #tpu.memory_space<vmem>>, vector<16x80xbf16>
    tpu.vector_store %arg10[%c128_79, %c0_80], %64 {strides = array<i32>} : memref<144x80xbf16, #tpu.memory_space<vmem>>, vector<16x80xbf16>,
    %c0_81 = arith.constant 0 : index
    %c0_82 = arith.constant 0 : index
    %66 = vector.load %arg5[%c0_81, %c0_82] : memref<16x144xbf16, #tpu.memory_space<vmem>>, vector<16x144xbf16>
    %c0_83 = arith.constant 0 : index
    %c0_84 = arith.constant 0 : index
    %67 = vector.load %arg10[%c0_83, %c0_84] : memref<144x80xbf16, #tpu.memory_space<vmem>>, vector<144x80xbf16>
    %cst_85 = arith.constant dense<0.000000e+00> : vector<16x80xf32>
    %68 = tpu.matmul %66, %67, %cst_85 {dimension_numbers = #tpu.dot_dimension_numbers<[1], [0], [0], [1], [0, 0, 1, 1], [], []>} : vector<16x144xbf16>, vector<144x80xbf16>, vector<16x80xf32> -> vector<16x80xf32>
    %c0_86 = arith.constant 0 : index
    %c0_87 = arith.constant 0 : index
    %69 = vector.load %arg6[%c0_86, %c0_87] : memref<16x1xf32, #tpu.memory_space<vmem>>, vector<16x1xf32>
    %70 = vector.broadcast %69 : vector<16x1xf32> to vector<16x80xf32>
    %71 = arith.addf %68, %70 : vector<16x80xf32>
    %cst_88 = arith.constant 0.000000e+00 : f32
    %72 = vector.shape_cast %2 : vector<1x80xi1> to vector<1x80xi1>
    %73 = vector.broadcast %72 : vector<1x80xi1> to vector<16x80xi1>
    %74 = vector.broadcast %cst_88 : f32 to vector<16x80xf32>
    %75 = arith.select %73, %71, %74 : vector<16x80xi1>, vector<16x80xf32>
    %76 = arith.addf %9, %75 : vector<16x80xf32>
    %77 = arith.truncf %76 : vector<16x80xf32> to vector<16x80xbf16>
    %c0_89 = arith.constant 0 : index
    %c0_90 = arith.constant 0 : index
    %c0_91 = arith.constant 0 : index
    %78 = vector.load %arg8[%c0_89, %c0_90, %c0_91] : memref<1x16x80xbf16, #tpu.memory_space<vmem>>, vector<1x16x80xbf16>
    %79 = vector.shape_cast %78 : vector<1x16x80xbf16> to vector<16x80xbf16>
    %80 = vector.shape_cast %77 : vector<16x80xbf16> to vector<1x16x80xbf16>
    tpu.vector_store %arg8[%c0_89, %c0_90, %c0_91], %80 {strides = array<i32>} : memref<1x16x80xbf16, #tpu.memory_space<vmem>>, vector<1x16x80xbf16>,
    return
  }
  func.func @transform_0(%arg0: i32) -> (i32, i32, i32) {
    %c0_i32 = arith.constant 0 : i32
    %c0_i32_0 = arith.constant 0 : i32
    %c0_i32_1 = arith.constant 0 : i32
    return %arg0, %c0_i32, %c0_i32_0 : i32, i32, i32
  }
  func.func @transform_1(%arg0: i32) -> (i32, i32, i32) {
    %c0_i32 = arith.constant 0 : i32
    %c0_i32_0 = arith.constant 0 : i32
    %c0_i32_1 = arith.constant 0 : i32
    return %arg0, %c0_i32, %c0_i32_0 : i32, i32, i32
  }
  func.func @transform_2(%arg0: i32) -> (i32, i32) {
    %c0_i32 = arith.constant 0 : i32
    %c0_i32_0 = arith.constant 0 : i32
    %c0_i32_1 = arith.constant 0 : i32
    return %c0_i32, %c0_i32_0 : i32, i32
  }
  func.func @transform_3(%arg0: i32) -> (i32, i32) {
    %c0_i32 = arith.constant 0 : i32
    %c0_i32_0 = arith.constant 0 : i32
    %c0_i32_1 = arith.constant 0 : i32
    return %c0_i32, %c0_i32_0 : i32, i32
  }
  func.func @transform_4(%arg0: i32) -> (i32, i32) {
    %c0_i32 = arith.constant 0 : i32
    %c0_i32_0 = arith.constant 0 : i32
    %c0_i32_1 = arith.constant 0 : i32
    return %c0_i32, %c0_i32_0 : i32, i32
  }
  func.func @transform_5(%arg0: i32) -> (i32, i32) {
    %c0_i32 = arith.constant 0 : i32
    %c0_i32_0 = arith.constant 0 : i32
    %c0_i32_1 = arith.constant 0 : i32
    return %c0_i32, %c0_i32_0 : i32, i32
  }
  func.func @transform_6(%arg0: i32) -> (i32, i32) {
    %c0_i32 = arith.constant 0 : i32
    %c0_i32_0 = arith.constant 0 : i32
    %c0_i32_1 = arith.constant 0 : i32
    return %c0_i32, %c0_i32_0 : i32, i32
  }
  func.func @transform_7(%arg0: i32) -> (i32, i32, i32) {
    %c0_i32 = arith.constant 0 : i32
    %c0_i32_0 = arith.constant 0 : i32
    %c0_i32_1 = arith.constant 0 : i32
    return %arg0, %c0_i32, %c0_i32_0 : i32, i32, i32
  }
}

module attributes {stable_mosaic.version = 11 : i64} {
  func.func @_pointwise_mm_kernel(%arg0: i32, %arg1: memref<1x16x80xbf16, #tpu.memory_space<vmem>>, %arg2: memref<32x16xbf16, #tpu.memory_space<vmem>>, %arg3: memref<1x80xf32, #tpu.memory_space<vmem>>, %arg4: memref<1x32x80xbf16, #tpu.memory_space<vmem>>) attributes {dimension_semantics = [#tpu.dimension_semantics<parallel>], iteration_bounds = array<i64: 2>, scalar_prefetch = 0 : i64, scratch_operands = 0 : i64, tpu.core_type = #tpu.core_type<tc>, window_params = [{transform_indices = @transform_0, window_bounds = array<i64: 1, 16, 80>}, {pipeline_mode = #tpu.pipeline_mode<synchronous>, transform_indices = @transform_1, window_bounds = array<i64: 32, 16>}, {pipeline_mode = #tpu.pipeline_mode<synchronous>, transform_indices = @transform_2, window_bounds = array<i64: 1, 80>}, {transform_indices = @transform_3, window_bounds = array<i64: 1, 32, 80>}]} {
    %c0 = arith.constant 0 : index
    %c0_0 = arith.constant 0 : index
    %0 = vector.load %arg2[%c0, %c0_0] : memref<32x16xbf16, #tpu.memory_space<vmem>>, vector<32x16xbf16>
    %c0_1 = arith.constant 0 : index
    %c0_2 = arith.constant 0 : index
    %c0_3 = arith.constant 0 : index
    %1 = vector.load %arg1[%c0_1, %c0_2, %c0_3] : memref<1x16x80xbf16, #tpu.memory_space<vmem>>, vector<1x16x80xbf16>
    %2 = vector.shape_cast %1 : vector<1x16x80xbf16> to vector<16x80xbf16>
    %cst = arith.constant dense<0.000000e+00> : vector<32x80xf32>
    %3 = tpu.matmul %0, %2, %cst {dimension_numbers = #tpu.dot_dimension_numbers<[1], [0], [0], [1], [0, 0, 1, 1], [], []>} : vector<32x16xbf16>, vector<16x80xbf16>, vector<32x80xf32> -> vector<32x80xf32>
    %c0_4 = arith.constant 0 : index
    %c0_5 = arith.constant 0 : index
    %4 = vector.load %arg3[%c0_4, %c0_5] : memref<1x80xf32, #tpu.memory_space<vmem>>, vector<1x80xf32>
    %cst_6 = arith.constant 0.000000e+00 : f32
    %5 = vector.broadcast %cst_6 : f32 to vector<1x80xf32>
    %6 = arith.cmpf one, %4, %5 : vector<1x80xf32>
    %cst_7 = arith.constant 0.000000e+00 : f32
    %7 = vector.shape_cast %6 : vector<1x80xi1> to vector<1x80xi1>
    %8 = vector.broadcast %7 : vector<1x80xi1> to vector<32x80xi1>
    %9 = vector.broadcast %cst_7 : f32 to vector<32x80xf32>
    %10 = arith.select %8, %3, %9 : vector<32x80xi1>, vector<32x80xf32>
    %11 = arith.truncf %10 : vector<32x80xf32> to vector<32x80xbf16>
    %c0_8 = arith.constant 0 : index
    %c0_9 = arith.constant 0 : index
    %c0_10 = arith.constant 0 : index
    %12 = vector.load %arg4[%c0_8, %c0_9, %c0_10] : memref<1x32x80xbf16, #tpu.memory_space<vmem>>, vector<1x32x80xbf16>
    %13 = vector.shape_cast %12 : vector<1x32x80xbf16> to vector<32x80xbf16>
    %14 = vector.shape_cast %11 : vector<32x80xbf16> to vector<1x32x80xbf16>
    tpu.vector_store %arg4[%c0_8, %c0_9, %c0_10], %14 {strides = array<i32>} : memref<1x32x80xbf16, #tpu.memory_space<vmem>>, vector<1x32x80xbf16>,
    return
  }
  func.func @transform_0(%arg0: i32) -> (i32, i32, i32) {
    %c0_i32 = arith.constant 0 : i32
    %c0_i32_0 = arith.constant 0 : i32
    %c0_i32_1 = arith.constant 0 : i32
    return %arg0, %c0_i32, %c0_i32_0 : i32, i32, i32
  }
  func.func @transform_1(%arg0: i32) -> (i32, i32) {
    %c0_i32 = arith.constant 0 : i32
    %c0_i32_0 = arith.constant 0 : i32
    %c0_i32_1 = arith.constant 0 : i32
    return %c0_i32, %c0_i32_0 : i32, i32
  }
  func.func @transform_2(%arg0: i32) -> (i32, i32) {
    %c0_i32 = arith.constant 0 : i32
    %c0_i32_0 = arith.constant 0 : i32
    %c0_i32_1 = arith.constant 0 : i32
    return %c0_i32, %c0_i32_0 : i32, i32
  }
  func.func @transform_3(%arg0: i32) -> (i32, i32, i32) {
    %c0_i32 = arith.constant 0 : i32
    %c0_i32_0 = arith.constant 0 : i32
    %c0_i32_1 = arith.constant 0 : i32
    return %arg0, %c0_i32, %c0_i32_0 : i32, i32, i32
  }
}

module attributes {stable_mosaic.version = 11 : i64} {
  func.func @_conv_block_kernel(%arg0: i32, %arg1: memref<1x8x288xbf16, #tpu.memory_space<vmem>>, %arg2: memref<1x8x288xbf16, #tpu.memory_space<vmem>>, %arg3: memref<8x72xbf16, #tpu.memory_space<vmem>>, %arg4: memref<8x1xf32, #tpu.memory_space<vmem>>, %arg5: memref<8x72xbf16, #tpu.memory_space<vmem>>, %arg6: memref<8x1xf32, #tpu.memory_space<vmem>>, %arg7: memref<1x288xf32, #tpu.memory_space<vmem>>, %arg8: memref<1x8x288xbf16, #tpu.memory_space<vmem>>, %arg9: memref<8x342xbf16, #tpu.memory_space<vmem>>, %arg10: memref<72x288xbf16, #tpu.memory_space<vmem>>) attributes {dimension_semantics = [#tpu.dimension_semantics<parallel>], iteration_bounds = array<i64: 2>, scalar_prefetch = 0 : i64, scratch_operands = 2 : i64, tpu.core_type = #tpu.core_type<tc>, window_params = [{transform_indices = @transform_0, window_bounds = array<i64: 1, 8, 288>}, {transform_indices = @transform_1, window_bounds = array<i64: 1, 8, 288>}, {pipeline_mode = #tpu.pipeline_mode<synchronous>, transform_indices = @transform_2, window_bounds = array<i64: 8, 72>}, {pipeline_mode = #tpu.pipeline_mode<synchronous>, transform_indices = @transform_3, window_bounds = array<i64: 8, 1>}, {pipeline_mode = #tpu.pipeline_mode<synchronous>, transform_indices = @transform_4, window_bounds = array<i64: 8, 72>}, {pipeline_mode = #tpu.pipeline_mode<synchronous>, transform_indices = @transform_5, window_bounds = array<i64: 8, 1>}, {pipeline_mode = #tpu.pipeline_mode<synchronous>, transform_indices = @transform_6, window_bounds = array<i64: 1, 288>}, {transform_indices = @transform_7, window_bounds = array<i64: 1, 8, 288>}]} {
    %c0 = arith.constant 0 : index
    %c0_0 = arith.constant 0 : index
    %0 = vector.load %arg7[%c0, %c0_0] : memref<1x288xf32, #tpu.memory_space<vmem>>, vector<1x288xf32>
    %cst = arith.constant 0.000000e+00 : f32
    %1 = vector.broadcast %cst : f32 to vector<1x288xf32>
    %2 = arith.cmpf one, %0, %1 : vector<1x288xf32>
    %c0_1 = arith.constant 0 : index
    %c0_2 = arith.constant 0 : index
    %c0_3 = arith.constant 0 : index
    %3 = vector.load %arg1[%c0_1, %c0_2, %c0_3] : memref<1x8x288xbf16, #tpu.memory_space<vmem>>, vector<1x8x288xbf16>
    %4 = vector.shape_cast %3 : vector<1x8x288xbf16> to vector<8x288xbf16>
    %5 = arith.extf %4 : vector<8x288xbf16> to vector<8x288xf32>
    %c0_4 = arith.constant 0 : index
    %c0_5 = arith.constant 0 : index
    %c0_6 = arith.constant 0 : index
    %6 = vector.load %arg2[%c0_4, %c0_5, %c0_6] : memref<1x8x288xbf16, #tpu.memory_space<vmem>>, vector<1x8x288xbf16>
    %7 = vector.shape_cast %6 : vector<1x8x288xbf16> to vector<8x288xbf16>
    %8 = arith.extf %7 : vector<8x288xbf16> to vector<8x288xf32>
    %9 = arith.addf %5, %8 : vector<8x288xf32>
    %cst_7 = arith.constant 0.000000e+00 : bf16
    %10 = vector.broadcast %cst_7 : bf16 to vector<8x19xbf16>
    %c0_8 = arith.constant 0 : index
    %c0_9 = arith.constant 0 : index
    %11 = vector.load %arg9[%c0_8, %c0_9] : memref<8x342xbf16, #tpu.memory_space<vmem>>, vector<8x19xbf16>
    tpu.vector_store %arg9[%c0_8, %c0_9], %10 {strides = array<i32>} : memref<8x342xbf16, #tpu.memory_space<vmem>>, vector<8x19xbf16>,
    %cst_10 = arith.constant 0.000000e+00 : bf16
    %12 = vector.broadcast %cst_10 : bf16 to vector<8x35xbf16>
    %c0_11 = arith.constant 0 : index
    %c307 = arith.constant 307 : index
    %13 = vector.load %arg9[%c0_11, %c307] : memref<8x342xbf16, #tpu.memory_space<vmem>>, vector<8x35xbf16>
    tpu.vector_store %arg9[%c0_11, %c307], %12 {strides = array<i32>} : memref<8x342xbf16, #tpu.memory_space<vmem>>, vector<8x35xbf16>,
    %14 = arith.truncf %9 : vector<8x288xf32> to vector<8x288xbf16>
    %c0_12 = arith.constant 0 : index
    %c19 = arith.constant 19 : index
    %15 = vector.load %arg9[%c0_12, %c19] : memref<8x342xbf16, #tpu.memory_space<vmem>>, vector<8x288xbf16>
    tpu.vector_store %arg9[%c0_12, %c19], %14 {strides = array<i32>} : memref<8x342xbf16, #tpu.memory_space<vmem>>, vector<8x288xbf16>,
    %c0_13 = arith.constant 0 : index
    %c0_14 = arith.constant 0 : index
    %16 = vector.load %arg9[%c0_13, %c0_14] : memref<8x342xbf16, #tpu.memory_space<vmem>>, vector<8x288xbf16>
    %c0_15 = arith.constant 0 : index
    %c0_16 = arith.constant 0 : index
    %17 = vector.load %arg10[%c0_15, %c0_16] : memref<72x288xbf16, #tpu.memory_space<vmem>>, vector<8x288xbf16>
    tpu.vector_store %arg10[%c0_15, %c0_16], %16 {strides = array<i32>} : memref<72x288xbf16, #tpu.memory_space<vmem>>, vector<8x288xbf16>,
    %c0_17 = arith.constant 0 : index
    %c1 = arith.constant 1 : index
    %18 = vector.load %arg9[%c0_17, %c1] : memref<8x342xbf16, #tpu.memory_space<vmem>>, vector<8x288xbf16>
    %c8 = arith.constant 8 : index
    %c0_18 = arith.constant 0 : index
    %19 = vector.load %arg10[%c8, %c0_18] : memref<72x288xbf16, #tpu.memory_space<vmem>>, vector<8x288xbf16>
    tpu.vector_store %arg10[%c8, %c0_18], %18 {strides = array<i32>} : memref<72x288xbf16, #tpu.memory_space<vmem>>, vector<8x288xbf16>,
    %c0_19 = arith.constant 0 : index
    %c2 = arith.constant 2 : index
    %20 = vector.load %arg9[%c0_19, %c2] : memref<8x342xbf16, #tpu.memory_space<vmem>>, vector<8x288xbf16>
    %c16 = arith.constant 16 : index
    %c0_20 = arith.constant 0 : index
    %21 = vector.load %arg10[%c16, %c0_20] : memref<72x288xbf16, #tpu.memory_space<vmem>>, vector<8x288xbf16>
    tpu.vector_store %arg10[%c16, %c0_20], %20 {strides = array<i32>} : memref<72x288xbf16, #tpu.memory_space<vmem>>, vector<8x288xbf16>,
    %c0_21 = arith.constant 0 : index
    %c18 = arith.constant 18 : index
    %22 = vector.load %arg9[%c0_21, %c18] : memref<8x342xbf16, #tpu.memory_space<vmem>>, vector<8x288xbf16>
    %c24 = arith.constant 24 : index
    %c0_22 = arith.constant 0 : index
    %23 = vector.load %arg10[%c24, %c0_22] : memref<72x288xbf16, #tpu.memory_space<vmem>>, vector<8x288xbf16>
    tpu.vector_store %arg10[%c24, %c0_22], %22 {strides = array<i32>} : memref<72x288xbf16, #tpu.memory_space<vmem>>, vector<8x288xbf16>,
    %c0_23 = arith.constant 0 : index
    %c19_24 = arith.constant 19 : index
    %24 = vector.load %arg9[%c0_23, %c19_24] : memref<8x342xbf16, #tpu.memory_space<vmem>>, vector<8x288xbf16>
    %c32 = arith.constant 32 : index
    %c0_25 = arith.constant 0 : index
    %25 = vector.load %arg10[%c32, %c0_25] : memref<72x288xbf16, #tpu.memory_space<vmem>>, vector<8x288xbf16>
    tpu.vector_store %arg10[%c32, %c0_25], %24 {strides = array<i32>} : memref<72x288xbf16, #tpu.memory_space<vmem>>, vector<8x288xbf16>,
    %c0_26 = arith.constant 0 : index
    %c20 = arith.constant 20 : index
    %26 = vector.load %arg9[%c0_26, %c20] : memref<8x342xbf16, #tpu.memory_space<vmem>>, vector<8x288xbf16>
    %c40 = arith.constant 40 : index
    %c0_27 = arith.constant 0 : index
    %27 = vector.load %arg10[%c40, %c0_27] : memref<72x288xbf16, #tpu.memory_space<vmem>>, vector<8x288xbf16>
    tpu.vector_store %arg10[%c40, %c0_27], %26 {strides = array<i32>} : memref<72x288xbf16, #tpu.memory_space<vmem>>, vector<8x288xbf16>,
    %c0_28 = arith.constant 0 : index
    %c36 = arith.constant 36 : index
    %28 = vector.load %arg9[%c0_28, %c36] : memref<8x342xbf16, #tpu.memory_space<vmem>>, vector<8x288xbf16>
    %c48 = arith.constant 48 : index
    %c0_29 = arith.constant 0 : index
    %29 = vector.load %arg10[%c48, %c0_29] : memref<72x288xbf16, #tpu.memory_space<vmem>>, vector<8x288xbf16>
    tpu.vector_store %arg10[%c48, %c0_29], %28 {strides = array<i32>} : memref<72x288xbf16, #tpu.memory_space<vmem>>, vector<8x288xbf16>,
    %c0_30 = arith.constant 0 : index
    %c37 = arith.constant 37 : index
    %30 = vector.load %arg9[%c0_30, %c37] : memref<8x342xbf16, #tpu.memory_space<vmem>>, vector<8x288xbf16>
    %c56 = arith.constant 56 : index
    %c0_31 = arith.constant 0 : index
    %31 = vector.load %arg10[%c56, %c0_31] : memref<72x288xbf16, #tpu.memory_space<vmem>>, vector<8x288xbf16>
    tpu.vector_store %arg10[%c56, %c0_31], %30 {strides = array<i32>} : memref<72x288xbf16, #tpu.memory_space<vmem>>, vector<8x288xbf16>,
    %c0_32 = arith.constant 0 : index
    %c38 = arith.constant 38 : index
    %32 = vector.load %arg9[%c0_32, %c38] : memref<8x342xbf16, #tpu.memory_space<vmem>>, vector<8x288xbf16>
    %c64 = arith.constant 64 : index
    %c0_33 = arith.constant 0 : index
    %33 = vector.load %arg10[%c64, %c0_33] : memref<72x288xbf16, #tpu.memory_space<vmem>>, vector<8x288xbf16>
    tpu.vector_store %arg10[%c64, %c0_33], %32 {strides = array<i32>} : memref<72x288xbf16, #tpu.memory_space<vmem>>, vector<8x288xbf16>,
    %c0_34 = arith.constant 0 : index
    %c0_35 = arith.constant 0 : index
    %34 = vector.load %arg3[%c0_34, %c0_35] : memref<8x72xbf16, #tpu.memory_space<vmem>>, vector<8x72xbf16>
    %c0_36 = arith.constant 0 : index
    %c0_37 = arith.constant 0 : index
    %35 = vector.load %arg10[%c0_36, %c0_37] : memref<72x288xbf16, #tpu.memory_space<vmem>>, vector<72x288xbf16>
    %cst_38 = arith.constant dense<0.000000e+00> : vector<8x288xf32>
    %36 = tpu.matmul %34, %35, %cst_38 {dimension_numbers = #tpu.dot_dimension_numbers<[1], [0], [0], [1], [0, 0, 1, 1], [], []>} : vector<8x72xbf16>, vector<72x288xbf16>, vector<8x288xf32> -> vector<8x288xf32>
    %c0_39 = arith.constant 0 : index
    %c0_40 = arith.constant 0 : index
    %37 = vector.load %arg4[%c0_39, %c0_40] : memref<8x1xf32, #tpu.memory_space<vmem>>, vector<8x1xf32>
    %38 = vector.broadcast %37 : vector<8x1xf32> to vector<8x288xf32>
    %39 = arith.addf %36, %38 : vector<8x288xf32>
    %cst_41 = arith.constant 0.000000e+00 : f32
    %40 = vector.broadcast %cst_41 : f32 to vector<8x288xf32>
    %41 = arith.maximumf %39, %40 : vector<8x288xf32>
    %cst_42 = arith.constant 0.000000e+00 : f32
    %42 = vector.shape_cast %2 : vector<1x288xi1> to vector<1x288xi1>
    %43 = vector.broadcast %42 : vector<1x288xi1> to vector<8x288xi1>
    %44 = vector.broadcast %cst_42 : f32 to vector<8x288xf32>
    %45 = arith.select %43, %41, %44 : vector<8x288xi1>, vector<8x288xf32>
    %46 = arith.truncf %45 : vector<8x288xf32> to vector<8x288xbf16>
    %c0_43 = arith.constant 0 : index
    %c19_44 = arith.constant 19 : index
    %47 = vector.load %arg9[%c0_43, %c19_44] : memref<8x342xbf16, #tpu.memory_space<vmem>>, vector<8x288xbf16>
    tpu.vector_store %arg9[%c0_43, %c19_44], %46 {strides = array<i32>} : memref<8x342xbf16, #tpu.memory_space<vmem>>, vector<8x288xbf16>,
    %c0_45 = arith.constant 0 : index
    %c0_46 = arith.constant 0 : index
    %48 = vector.load %arg9[%c0_45, %c0_46] : memref<8x342xbf16, #tpu.memory_space<vmem>>, vector<8x288xbf16>
    %c0_47 = arith.constant 0 : index
    %c0_48 = arith.constant 0 : index
    %49 = vector.load %arg10[%c0_47, %c0_48] : memref<72x288xbf16, #tpu.memory_space<vmem>>, vector<8x288xbf16>
    tpu.vector_store %arg10[%c0_47, %c0_48], %48 {strides = array<i32>} : memref<72x288xbf16, #tpu.memory_space<vmem>>, vector<8x288xbf16>,
    %c0_49 = arith.constant 0 : index
    %c1_50 = arith.constant 1 : index
    %50 = vector.load %arg9[%c0_49, %c1_50] : memref<8x342xbf16, #tpu.memory_space<vmem>>, vector<8x288xbf16>
    %c8_51 = arith.constant 8 : index
    %c0_52 = arith.constant 0 : index
    %51 = vector.load %arg10[%c8_51, %c0_52] : memref<72x288xbf16, #tpu.memory_space<vmem>>, vector<8x288xbf16>
    tpu.vector_store %arg10[%c8_51, %c0_52], %50 {strides = array<i32>} : memref<72x288xbf16, #tpu.memory_space<vmem>>, vector<8x288xbf16>,
    %c0_53 = arith.constant 0 : index
    %c2_54 = arith.constant 2 : index
    %52 = vector.load %arg9[%c0_53, %c2_54] : memref<8x342xbf16, #tpu.memory_space<vmem>>, vector<8x288xbf16>
    %c16_55 = arith.constant 16 : index
    %c0_56 = arith.constant 0 : index
    %53 = vector.load %arg10[%c16_55, %c0_56] : memref<72x288xbf16, #tpu.memory_space<vmem>>, vector<8x288xbf16>
    tpu.vector_store %arg10[%c16_55, %c0_56], %52 {strides = array<i32>} : memref<72x288xbf16, #tpu.memory_space<vmem>>, vector<8x288xbf16>,
    %c0_57 = arith.constant 0 : index
    %c18_58 = arith.constant 18 : index
    %54 = vector.load %arg9[%c0_57, %c18_58] : memref<8x342xbf16, #tpu.memory_space<vmem>>, vector<8x288xbf16>
    %c24_59 = arith.constant 24 : index
    %c0_60 = arith.constant 0 : index
    %55 = vector.load %arg10[%c24_59, %c0_60] : memref<72x288xbf16, #tpu.memory_space<vmem>>, vector<8x288xbf16>
    tpu.vector_store %arg10[%c24_59, %c0_60], %54 {strides = array<i32>} : memref<72x288xbf16, #tpu.memory_space<vmem>>, vector<8x288xbf16>,
    %c0_61 = arith.constant 0 : index
    %c19_62 = arith.constant 19 : index
    %56 = vector.load %arg9[%c0_61, %c19_62] : memref<8x342xbf16, #tpu.memory_space<vmem>>, vector<8x288xbf16>
    %c32_63 = arith.constant 32 : index
    %c0_64 = arith.constant 0 : index
    %57 = vector.load %arg10[%c32_63, %c0_64] : memref<72x288xbf16, #tpu.memory_space<vmem>>, vector<8x288xbf16>
    tpu.vector_store %arg10[%c32_63, %c0_64], %56 {strides = array<i32>} : memref<72x288xbf16, #tpu.memory_space<vmem>>, vector<8x288xbf16>,
    %c0_65 = arith.constant 0 : index
    %c20_66 = arith.constant 20 : index
    %58 = vector.load %arg9[%c0_65, %c20_66] : memref<8x342xbf16, #tpu.memory_space<vmem>>, vector<8x288xbf16>
    %c40_67 = arith.constant 40 : index
    %c0_68 = arith.constant 0 : index
    %59 = vector.load %arg10[%c40_67, %c0_68] : memref<72x288xbf16, #tpu.memory_space<vmem>>, vector<8x288xbf16>
    tpu.vector_store %arg10[%c40_67, %c0_68], %58 {strides = array<i32>} : memref<72x288xbf16, #tpu.memory_space<vmem>>, vector<8x288xbf16>,
    %c0_69 = arith.constant 0 : index
    %c36_70 = arith.constant 36 : index
    %60 = vector.load %arg9[%c0_69, %c36_70] : memref<8x342xbf16, #tpu.memory_space<vmem>>, vector<8x288xbf16>
    %c48_71 = arith.constant 48 : index
    %c0_72 = arith.constant 0 : index
    %61 = vector.load %arg10[%c48_71, %c0_72] : memref<72x288xbf16, #tpu.memory_space<vmem>>, vector<8x288xbf16>
    tpu.vector_store %arg10[%c48_71, %c0_72], %60 {strides = array<i32>} : memref<72x288xbf16, #tpu.memory_space<vmem>>, vector<8x288xbf16>,
    %c0_73 = arith.constant 0 : index
    %c37_74 = arith.constant 37 : index
    %62 = vector.load %arg9[%c0_73, %c37_74] : memref<8x342xbf16, #tpu.memory_space<vmem>>, vector<8x288xbf16>
    %c56_75 = arith.constant 56 : index
    %c0_76 = arith.constant 0 : index
    %63 = vector.load %arg10[%c56_75, %c0_76] : memref<72x288xbf16, #tpu.memory_space<vmem>>, vector<8x288xbf16>
    tpu.vector_store %arg10[%c56_75, %c0_76], %62 {strides = array<i32>} : memref<72x288xbf16, #tpu.memory_space<vmem>>, vector<8x288xbf16>,
    %c0_77 = arith.constant 0 : index
    %c38_78 = arith.constant 38 : index
    %64 = vector.load %arg9[%c0_77, %c38_78] : memref<8x342xbf16, #tpu.memory_space<vmem>>, vector<8x288xbf16>
    %c64_79 = arith.constant 64 : index
    %c0_80 = arith.constant 0 : index
    %65 = vector.load %arg10[%c64_79, %c0_80] : memref<72x288xbf16, #tpu.memory_space<vmem>>, vector<8x288xbf16>
    tpu.vector_store %arg10[%c64_79, %c0_80], %64 {strides = array<i32>} : memref<72x288xbf16, #tpu.memory_space<vmem>>, vector<8x288xbf16>,
    %c0_81 = arith.constant 0 : index
    %c0_82 = arith.constant 0 : index
    %66 = vector.load %arg5[%c0_81, %c0_82] : memref<8x72xbf16, #tpu.memory_space<vmem>>, vector<8x72xbf16>
    %c0_83 = arith.constant 0 : index
    %c0_84 = arith.constant 0 : index
    %67 = vector.load %arg10[%c0_83, %c0_84] : memref<72x288xbf16, #tpu.memory_space<vmem>>, vector<72x288xbf16>
    %cst_85 = arith.constant dense<0.000000e+00> : vector<8x288xf32>
    %68 = tpu.matmul %66, %67, %cst_85 {dimension_numbers = #tpu.dot_dimension_numbers<[1], [0], [0], [1], [0, 0, 1, 1], [], []>} : vector<8x72xbf16>, vector<72x288xbf16>, vector<8x288xf32> -> vector<8x288xf32>
    %c0_86 = arith.constant 0 : index
    %c0_87 = arith.constant 0 : index
    %69 = vector.load %arg6[%c0_86, %c0_87] : memref<8x1xf32, #tpu.memory_space<vmem>>, vector<8x1xf32>
    %70 = vector.broadcast %69 : vector<8x1xf32> to vector<8x288xf32>
    %71 = arith.addf %68, %70 : vector<8x288xf32>
    %cst_88 = arith.constant 0.000000e+00 : f32
    %72 = vector.shape_cast %2 : vector<1x288xi1> to vector<1x288xi1>
    %73 = vector.broadcast %72 : vector<1x288xi1> to vector<8x288xi1>
    %74 = vector.broadcast %cst_88 : f32 to vector<8x288xf32>
    %75 = arith.select %73, %71, %74 : vector<8x288xi1>, vector<8x288xf32>
    %76 = arith.addf %9, %75 : vector<8x288xf32>
    %77 = arith.truncf %76 : vector<8x288xf32> to vector<8x288xbf16>
    %c0_89 = arith.constant 0 : index
    %c0_90 = arith.constant 0 : index
    %c0_91 = arith.constant 0 : index
    %78 = vector.load %arg8[%c0_89, %c0_90, %c0_91] : memref<1x8x288xbf16, #tpu.memory_space<vmem>>, vector<1x8x288xbf16>
    %79 = vector.shape_cast %78 : vector<1x8x288xbf16> to vector<8x288xbf16>
    %80 = vector.shape_cast %77 : vector<8x288xbf16> to vector<1x8x288xbf16>
    tpu.vector_store %arg8[%c0_89, %c0_90, %c0_91], %80 {strides = array<i32>} : memref<1x8x288xbf16, #tpu.memory_space<vmem>>, vector<1x8x288xbf16>,
    return
  }
  func.func @transform_0(%arg0: i32) -> (i32, i32, i32) {
    %c0_i32 = arith.constant 0 : i32
    %c0_i32_0 = arith.constant 0 : i32
    %c0_i32_1 = arith.constant 0 : i32
    return %arg0, %c0_i32, %c0_i32_0 : i32, i32, i32
  }
  func.func @transform_1(%arg0: i32) -> (i32, i32, i32) {
    %c0_i32 = arith.constant 0 : i32
    %c0_i32_0 = arith.constant 0 : i32
    %c0_i32_1 = arith.constant 0 : i32
    return %arg0, %c0_i32, %c0_i32_0 : i32, i32, i32
  }
  func.func @transform_2(%arg0: i32) -> (i32, i32) {
    %c0_i32 = arith.constant 0 : i32
    %c0_i32_0 = arith.constant 0 : i32
    %c0_i32_1 = arith.constant 0 : i32
    return %c0_i32, %c0_i32_0 : i32, i32
  }
  func.func @transform_3(%arg0: i32) -> (i32, i32) {
    %c0_i32 = arith.constant 0 : i32
    %c0_i32_0 = arith.constant 0 : i32
    %c0_i32_1 = arith.constant 0 : i32
    return %c0_i32, %c0_i32_0 : i32, i32
  }
  func.func @transform_4(%arg0: i32) -> (i32, i32) {
    %c0_i32 = arith.constant 0 : i32
    %c0_i32_0 = arith.constant 0 : i32
    %c0_i32_1 = arith.constant 0 : i32
    return %c0_i32, %c0_i32_0 : i32, i32
  }
  func.func @transform_5(%arg0: i32) -> (i32, i32) {
    %c0_i32 = arith.constant 0 : i32
    %c0_i32_0 = arith.constant 0 : i32
    %c0_i32_1 = arith.constant 0 : i32
    return %c0_i32, %c0_i32_0 : i32, i32
  }
  func.func @transform_6(%arg0: i32) -> (i32, i32) {
    %c0_i32 = arith.constant 0 : i32
    %c0_i32_0 = arith.constant 0 : i32
    %c0_i32_1 = arith.constant 0 : i32
    return %c0_i32, %c0_i32_0 : i32, i32
  }
  func.func @transform_7(%arg0: i32) -> (i32, i32, i32) {
    %c0_i32 = arith.constant 0 : i32
    %c0_i32_0 = arith.constant 0 : i32
    %c0_i32_1 = arith.constant 0 : i32
    return %arg0, %c0_i32, %c0_i32_0 : i32, i32, i32
  }
}

module attributes {stable_mosaic.version = 11 : i64} {
  func.func @_ending_kernel(%arg0: i32, %arg1: memref<1x8x288xbf16, #tpu.memory_space<vmem>>, %arg2: memref<1x8x288xbf16, #tpu.memory_space<vmem>>, %arg3: memref<1x1x288xbf16, #tpu.memory_space<vmem>>, %arg4: memref<3x72xbf16, #tpu.memory_space<vmem>>, %arg5: memref<3x1xf32, #tpu.memory_space<vmem>>, %arg6: memref<3x72xbf16, #tpu.memory_space<vmem>>, %arg7: memref<3x1xf32, #tpu.memory_space<vmem>>, %arg8: memref<1x3x288xf32, #tpu.memory_space<vmem>>, %arg9: memref<1x3x288xf32, #tpu.memory_space<vmem>>, %arg10: memref<1x3x288xf32, #tpu.memory_space<vmem>>, %arg11: memref<8x342xbf16, #tpu.memory_space<vmem>>, %arg12: memref<72x288xbf16, #tpu.memory_space<vmem>>) attributes {dimension_semantics = [#tpu.dimension_semantics<parallel>], iteration_bounds = array<i64: 2>, scalar_prefetch = 0 : i64, scratch_operands = 2 : i64, tpu.core_type = #tpu.core_type<tc>, window_params = [{transform_indices = @transform_0, window_bounds = array<i64: 1, 8, 288>}, {transform_indices = @transform_1, window_bounds = array<i64: 1, 8, 288>}, {transform_indices = @transform_2, window_bounds = array<i64: 1, 1, 288>}, {pipeline_mode = #tpu.pipeline_mode<synchronous>, transform_indices = @transform_3, window_bounds = array<i64: 3, 72>}, {pipeline_mode = #tpu.pipeline_mode<synchronous>, transform_indices = @transform_4, window_bounds = array<i64: 3, 1>}, {pipeline_mode = #tpu.pipeline_mode<synchronous>, transform_indices = @transform_5, window_bounds = array<i64: 3, 72>}, {pipeline_mode = #tpu.pipeline_mode<synchronous>, transform_indices = @transform_6, window_bounds = array<i64: 3, 1>}, {transform_indices = @transform_7, window_bounds = array<i64: 1, 3, 288>}, {transform_indices = @transform_8, window_bounds = array<i64: 1, 3, 288>}, {transform_indices = @transform_9, window_bounds = array<i64: 1, 3, 288>}]} {
    %cst = arith.constant 0.000000e+00 : bf16
    %0 = vector.broadcast %cst : bf16 to vector<8x19xbf16>
    %c0 = arith.constant 0 : index
    %c0_0 = arith.constant 0 : index
    %1 = vector.load %arg11[%c0, %c0_0] : memref<8x342xbf16, #tpu.memory_space<vmem>>, vector<8x19xbf16>
    tpu.vector_store %arg11[%c0, %c0_0], %0 {strides = array<i32>} : memref<8x342xbf16, #tpu.memory_space<vmem>>, vector<8x19xbf16>,
    %cst_1 = arith.constant 0.000000e+00 : bf16
    %2 = vector.broadcast %cst_1 : bf16 to vector<8x35xbf16>
    %c0_2 = arith.constant 0 : index
    %c307 = arith.constant 307 : index
    %3 = vector.load %arg11[%c0_2, %c307] : memref<8x342xbf16, #tpu.memory_space<vmem>>, vector<8x35xbf16>
    tpu.vector_store %arg11[%c0_2, %c307], %2 {strides = array<i32>} : memref<8x342xbf16, #tpu.memory_space<vmem>>, vector<8x35xbf16>,
    %c0_3 = arith.constant 0 : index
    %c0_4 = arith.constant 0 : index
    %c0_5 = arith.constant 0 : index
    %4 = vector.load %arg1[%c0_3, %c0_4, %c0_5] : memref<1x8x288xbf16, #tpu.memory_space<vmem>>, vector<1x8x288xbf16>
    %5 = vector.shape_cast %4 : vector<1x8x288xbf16> to vector<8x288xbf16>
    %c0_6 = arith.constant 0 : index
    %c19 = arith.constant 19 : index
    %6 = vector.load %arg11[%c0_6, %c19] : memref<8x342xbf16, #tpu.memory_space<vmem>>, vector<8x288xbf16>
    tpu.vector_store %arg11[%c0_6, %c19], %5 {strides = array<i32>} : memref<8x342xbf16, #tpu.memory_space<vmem>>, vector<8x288xbf16>,
    %c0_7 = arith.constant 0 : index
    %c0_8 = arith.constant 0 : index
    %7 = vector.load %arg11[%c0_7, %c0_8] : memref<8x342xbf16, #tpu.memory_space<vmem>>, vector<8x288xbf16>
    %c0_9 = arith.constant 0 : index
    %c0_10 = arith.constant 0 : index
    %8 = vector.load %arg12[%c0_9, %c0_10] : memref<72x288xbf16, #tpu.memory_space<vmem>>, vector<8x288xbf16>
    tpu.vector_store %arg12[%c0_9, %c0_10], %7 {strides = array<i32>} : memref<72x288xbf16, #tpu.memory_space<vmem>>, vector<8x288xbf16>,
    %c0_11 = arith.constant 0 : index
    %c1 = arith.constant 1 : index
    %9 = vector.load %arg11[%c0_11, %c1] : memref<8x342xbf16, #tpu.memory_space<vmem>>, vector<8x288xbf16>
    %c8 = arith.constant 8 : index
    %c0_12 = arith.constant 0 : index
    %10 = vector.load %arg12[%c8, %c0_12] : memref<72x288xbf16, #tpu.memory_space<vmem>>, vector<8x288xbf16>
    tpu.vector_store %arg12[%c8, %c0_12], %9 {strides = array<i32>} : memref<72x288xbf16, #tpu.memory_space<vmem>>, vector<8x288xbf16>,
    %c0_13 = arith.constant 0 : index
    %c2 = arith.constant 2 : index
    %11 = vector.load %arg11[%c0_13, %c2] : memref<8x342xbf16, #tpu.memory_space<vmem>>, vector<8x288xbf16>
    %c16 = arith.constant 16 : index
    %c0_14 = arith.constant 0 : index
    %12 = vector.load %arg12[%c16, %c0_14] : memref<72x288xbf16, #tpu.memory_space<vmem>>, vector<8x288xbf16>
    tpu.vector_store %arg12[%c16, %c0_14], %11 {strides = array<i32>} : memref<72x288xbf16, #tpu.memory_space<vmem>>, vector<8x288xbf16>,
    %c0_15 = arith.constant 0 : index
    %c18 = arith.constant 18 : index
    %13 = vector.load %arg11[%c0_15, %c18] : memref<8x342xbf16, #tpu.memory_space<vmem>>, vector<8x288xbf16>
    %c24 = arith.constant 24 : index
    %c0_16 = arith.constant 0 : index
    %14 = vector.load %arg12[%c24, %c0_16] : memref<72x288xbf16, #tpu.memory_space<vmem>>, vector<8x288xbf16>
    tpu.vector_store %arg12[%c24, %c0_16], %13 {strides = array<i32>} : memref<72x288xbf16, #tpu.memory_space<vmem>>, vector<8x288xbf16>,
    %c0_17 = arith.constant 0 : index
    %c19_18 = arith.constant 19 : index
    %15 = vector.load %arg11[%c0_17, %c19_18] : memref<8x342xbf16, #tpu.memory_space<vmem>>, vector<8x288xbf16>
    %c32 = arith.constant 32 : index
    %c0_19 = arith.constant 0 : index
    %16 = vector.load %arg12[%c32, %c0_19] : memref<72x288xbf16, #tpu.memory_space<vmem>>, vector<8x288xbf16>
    tpu.vector_store %arg12[%c32, %c0_19], %15 {strides = array<i32>} : memref<72x288xbf16, #tpu.memory_space<vmem>>, vector<8x288xbf16>,
    %c0_20 = arith.constant 0 : index
    %c20 = arith.constant 20 : index
    %17 = vector.load %arg11[%c0_20, %c20] : memref<8x342xbf16, #tpu.memory_space<vmem>>, vector<8x288xbf16>
    %c40 = arith.constant 40 : index
    %c0_21 = arith.constant 0 : index
    %18 = vector.load %arg12[%c40, %c0_21] : memref<72x288xbf16, #tpu.memory_space<vmem>>, vector<8x288xbf16>
    tpu.vector_store %arg12[%c40, %c0_21], %17 {strides = array<i32>} : memref<72x288xbf16, #tpu.memory_space<vmem>>, vector<8x288xbf16>,
    %c0_22 = arith.constant 0 : index
    %c36 = arith.constant 36 : index
    %19 = vector.load %arg11[%c0_22, %c36] : memref<8x342xbf16, #tpu.memory_space<vmem>>, vector<8x288xbf16>
    %c48 = arith.constant 48 : index
    %c0_23 = arith.constant 0 : index
    %20 = vector.load %arg12[%c48, %c0_23] : memref<72x288xbf16, #tpu.memory_space<vmem>>, vector<8x288xbf16>
    tpu.vector_store %arg12[%c48, %c0_23], %19 {strides = array<i32>} : memref<72x288xbf16, #tpu.memory_space<vmem>>, vector<8x288xbf16>,
    %c0_24 = arith.constant 0 : index
    %c37 = arith.constant 37 : index
    %21 = vector.load %arg11[%c0_24, %c37] : memref<8x342xbf16, #tpu.memory_space<vmem>>, vector<8x288xbf16>
    %c56 = arith.constant 56 : index
    %c0_25 = arith.constant 0 : index
    %22 = vector.load %arg12[%c56, %c0_25] : memref<72x288xbf16, #tpu.memory_space<vmem>>, vector<8x288xbf16>
    tpu.vector_store %arg12[%c56, %c0_25], %21 {strides = array<i32>} : memref<72x288xbf16, #tpu.memory_space<vmem>>, vector<8x288xbf16>,
    %c0_26 = arith.constant 0 : index
    %c38 = arith.constant 38 : index
    %23 = vector.load %arg11[%c0_26, %c38] : memref<8x342xbf16, #tpu.memory_space<vmem>>, vector<8x288xbf16>
    %c64 = arith.constant 64 : index
    %c0_27 = arith.constant 0 : index
    %24 = vector.load %arg12[%c64, %c0_27] : memref<72x288xbf16, #tpu.memory_space<vmem>>, vector<8x288xbf16>
    tpu.vector_store %arg12[%c64, %c0_27], %23 {strides = array<i32>} : memref<72x288xbf16, #tpu.memory_space<vmem>>, vector<8x288xbf16>,
    %c0_28 = arith.constant 0 : index
    %c0_29 = arith.constant 0 : index
    %25 = vector.load %arg4[%c0_28, %c0_29] : memref<3x72xbf16, #tpu.memory_space<vmem>>, vector<3x72xbf16>
    %c0_30 = arith.constant 0 : index
    %c0_31 = arith.constant 0 : index
    %26 = vector.load %arg12[%c0_30, %c0_31] : memref<72x288xbf16, #tpu.memory_space<vmem>>, vector<72x288xbf16>
    %cst_32 = arith.constant dense<0.000000e+00> : vector<3x288xf32>
    %27 = tpu.matmul %25, %26, %cst_32 {dimension_numbers = #tpu.dot_dimension_numbers<[1], [0], [0], [1], [0, 0, 1, 1], [], []>} : vector<3x72xbf16>, vector<72x288xbf16>, vector<3x288xf32> -> vector<3x288xf32>
    %c0_33 = arith.constant 0 : index
    %c0_34 = arith.constant 0 : index
    %28 = vector.load %arg5[%c0_33, %c0_34] : memref<3x1xf32, #tpu.memory_space<vmem>>, vector<3x1xf32>
    %29 = vector.broadcast %28 : vector<3x1xf32> to vector<3x288xf32>
    %30 = arith.addf %27, %29 : vector<3x288xf32>
    %c0_35 = arith.constant 0 : index
    %c0_36 = arith.constant 0 : index
    %c0_37 = arith.constant 0 : index
    %31 = vector.load %arg2[%c0_35, %c0_36, %c0_37] : memref<1x8x288xbf16, #tpu.memory_space<vmem>>, vector<1x8x288xbf16>
    %32 = vector.shape_cast %31 : vector<1x8x288xbf16> to vector<8x288xbf16>
    %c0_38 = arith.constant 0 : index
    %c19_39 = arith.constant 19 : index
    %33 = vector.load %arg11[%c0_38, %c19_39] : memref<8x342xbf16, #tpu.memory_space<vmem>>, vector<8x288xbf16>
    tpu.vector_store %arg11[%c0_38, %c19_39], %32 {strides = array<i32>} : memref<8x342xbf16, #tpu.memory_space<vmem>>, vector<8x288xbf16>,
    %c0_40 = arith.constant 0 : index
    %c0_41 = arith.constant 0 : index
    %34 = vector.load %arg11[%c0_40, %c0_41] : memref<8x342xbf16, #tpu.memory_space<vmem>>, vector<8x288xbf16>
    %c0_42 = arith.constant 0 : index
    %c0_43 = arith.constant 0 : index
    %35 = vector.load %arg12[%c0_42, %c0_43] : memref<72x288xbf16, #tpu.memory_space<vmem>>, vector<8x288xbf16>
    tpu.vector_store %arg12[%c0_42, %c0_43], %34 {strides = array<i32>} : memref<72x288xbf16, #tpu.memory_space<vmem>>, vector<8x288xbf16>,
    %c0_44 = arith.constant 0 : index
    %c1_45 = arith.constant 1 : index
    %36 = vector.load %arg11[%c0_44, %c1_45] : memref<8x342xbf16, #tpu.memory_space<vmem>>, vector<8x288xbf16>
    %c8_46 = arith.constant 8 : index
    %c0_47 = arith.constant 0 : index
    %37 = vector.load %arg12[%c8_46, %c0_47] : memref<72x288xbf16, #tpu.memory_space<vmem>>, vector<8x288xbf16>
    tpu.vector_store %arg12[%c8_46, %c0_47], %36 {strides = array<i32>} : memref<72x288xbf16, #tpu.memory_space<vmem>>, vector<8x288xbf16>,
    %c0_48 = arith.constant 0 : index
    %c2_49 = arith.constant 2 : index
    %38 = vector.load %arg11[%c0_48, %c2_49] : memref<8x342xbf16, #tpu.memory_space<vmem>>, vector<8x288xbf16>
    %c16_50 = arith.constant 16 : index
    %c0_51 = arith.constant 0 : index
    %39 = vector.load %arg12[%c16_50, %c0_51] : memref<72x288xbf16, #tpu.memory_space<vmem>>, vector<8x288xbf16>
    tpu.vector_store %arg12[%c16_50, %c0_51], %38 {strides = array<i32>} : memref<72x288xbf16, #tpu.memory_space<vmem>>, vector<8x288xbf16>,
    %c0_52 = arith.constant 0 : index
    %c18_53 = arith.constant 18 : index
    %40 = vector.load %arg11[%c0_52, %c18_53] : memref<8x342xbf16, #tpu.memory_space<vmem>>, vector<8x288xbf16>
    %c24_54 = arith.constant 24 : index
    %c0_55 = arith.constant 0 : index
    %41 = vector.load %arg12[%c24_54, %c0_55] : memref<72x288xbf16, #tpu.memory_space<vmem>>, vector<8x288xbf16>
    tpu.vector_store %arg12[%c24_54, %c0_55], %40 {strides = array<i32>} : memref<72x288xbf16, #tpu.memory_space<vmem>>, vector<8x288xbf16>,
    %c0_56 = arith.constant 0 : index
    %c19_57 = arith.constant 19 : index
    %42 = vector.load %arg11[%c0_56, %c19_57] : memref<8x342xbf16, #tpu.memory_space<vmem>>, vector<8x288xbf16>
    %c32_58 = arith.constant 32 : index
    %c0_59 = arith.constant 0 : index
    %43 = vector.load %arg12[%c32_58, %c0_59] : memref<72x288xbf16, #tpu.memory_space<vmem>>, vector<8x288xbf16>
    tpu.vector_store %arg12[%c32_58, %c0_59], %42 {strides = array<i32>} : memref<72x288xbf16, #tpu.memory_space<vmem>>, vector<8x288xbf16>,
    %c0_60 = arith.constant 0 : index
    %c20_61 = arith.constant 20 : index
    %44 = vector.load %arg11[%c0_60, %c20_61] : memref<8x342xbf16, #tpu.memory_space<vmem>>, vector<8x288xbf16>
    %c40_62 = arith.constant 40 : index
    %c0_63 = arith.constant 0 : index
    %45 = vector.load %arg12[%c40_62, %c0_63] : memref<72x288xbf16, #tpu.memory_space<vmem>>, vector<8x288xbf16>
    tpu.vector_store %arg12[%c40_62, %c0_63], %44 {strides = array<i32>} : memref<72x288xbf16, #tpu.memory_space<vmem>>, vector<8x288xbf16>,
    %c0_64 = arith.constant 0 : index
    %c36_65 = arith.constant 36 : index
    %46 = vector.load %arg11[%c0_64, %c36_65] : memref<8x342xbf16, #tpu.memory_space<vmem>>, vector<8x288xbf16>
    %c48_66 = arith.constant 48 : index
    %c0_67 = arith.constant 0 : index
    %47 = vector.load %arg12[%c48_66, %c0_67] : memref<72x288xbf16, #tpu.memory_space<vmem>>, vector<8x288xbf16>
    tpu.vector_store %arg12[%c48_66, %c0_67], %46 {strides = array<i32>} : memref<72x288xbf16, #tpu.memory_space<vmem>>, vector<8x288xbf16>,
    %c0_68 = arith.constant 0 : index
    %c37_69 = arith.constant 37 : index
    %48 = vector.load %arg11[%c0_68, %c37_69] : memref<8x342xbf16, #tpu.memory_space<vmem>>, vector<8x288xbf16>
    %c56_70 = arith.constant 56 : index
    %c0_71 = arith.constant 0 : index
    %49 = vector.load %arg12[%c56_70, %c0_71] : memref<72x288xbf16, #tpu.memory_space<vmem>>, vector<8x288xbf16>
    tpu.vector_store %arg12[%c56_70, %c0_71], %48 {strides = array<i32>} : memref<72x288xbf16, #tpu.memory_space<vmem>>, vector<8x288xbf16>,
    %c0_72 = arith.constant 0 : index
    %c38_73 = arith.constant 38 : index
    %50 = vector.load %arg11[%c0_72, %c38_73] : memref<8x342xbf16, #tpu.memory_space<vmem>>, vector<8x288xbf16>
    %c64_74 = arith.constant 64 : index
    %c0_75 = arith.constant 0 : index
    %51 = vector.load %arg12[%c64_74, %c0_75] : memref<72x288xbf16, #tpu.memory_space<vmem>>, vector<8x288xbf16>
    tpu.vector_store %arg12[%c64_74, %c0_75], %50 {strides = array<i32>} : memref<72x288xbf16, #tpu.memory_space<vmem>>, vector<8x288xbf16>,
    %c0_76 = arith.constant 0 : index
    %c0_77 = arith.constant 0 : index
    %52 = vector.load %arg6[%c0_76, %c0_77] : memref<3x72xbf16, #tpu.memory_space<vmem>>, vector<3x72xbf16>
    %c0_78 = arith.constant 0 : index
    %c0_79 = arith.constant 0 : index
    %53 = vector.load %arg12[%c0_78, %c0_79] : memref<72x288xbf16, #tpu.memory_space<vmem>>, vector<72x288xbf16>
    %cst_80 = arith.constant dense<0.000000e+00> : vector<3x288xf32>
    %54 = tpu.matmul %52, %53, %cst_80 {dimension_numbers = #tpu.dot_dimension_numbers<[1], [0], [0], [1], [0, 0, 1, 1], [], []>} : vector<3x72xbf16>, vector<72x288xbf16>, vector<3x288xf32> -> vector<3x288xf32>
    %c0_81 = arith.constant 0 : index
    %c0_82 = arith.constant 0 : index
    %55 = vector.load %arg7[%c0_81, %c0_82] : memref<3x1xf32, #tpu.memory_space<vmem>>, vector<3x1xf32>
    %56 = vector.broadcast %55 : vector<3x1xf32> to vector<3x288xf32>
    %57 = arith.addf %54, %56 : vector<3x288xf32>
    %c0_83 = arith.constant 0 : index
    %c0_84 = arith.constant 0 : index
    %c0_85 = arith.constant 0 : index
    %58 = vector.load %arg3[%c0_83, %c0_84, %c0_85] : memref<1x1x288xbf16, #tpu.memory_space<vmem>>, vector<1x1x288xbf16>
    %59 = vector.shape_cast %58 : vector<1x1x288xbf16> to vector<1x288xbf16>
    %60 = arith.extf %59 : vector<1x288xbf16> to vector<1x288xf32>
    %61 = vector.broadcast %60 : vector<1x288xf32> to vector<3x288xf32>
    %62 = arith.mulf %61, %30 : vector<3x288xf32>
    %cst_86 = arith.constant 1.000000e+00 : f32
    %63 = vector.broadcast %cst_86 : f32 to vector<1x288xf32>
    %64 = arith.subf %63, %60 : vector<1x288xf32>
    %65 = vector.broadcast %64 : vector<1x288xf32> to vector<3x288xf32>
    %66 = arith.mulf %65, %57 : vector<3x288xf32>
    %67 = arith.addf %62, %66 : vector<3x288xf32>
    %c0_87 = arith.constant 0 : index
    %c0_88 = arith.constant 0 : index
    %c0_89 = arith.constant 0 : index
    %68 = vector.load %arg8[%c0_87, %c0_88, %c0_89] : memref<1x3x288xf32, #tpu.memory_space<vmem>>, vector<1x3x288xf32>
    %69 = vector.shape_cast %68 : vector<1x3x288xf32> to vector<3x288xf32>
    %70 = vector.shape_cast %30 : vector<3x288xf32> to vector<1x3x288xf32>
    tpu.vector_store %arg8[%c0_87, %c0_88, %c0_89], %70 {strides = array<i32>} : memref<1x3x288xf32, #tpu.memory_space<vmem>>, vector<1x3x288xf32>,
    %c0_90 = arith.constant 0 : index
    %c0_91 = arith.constant 0 : index
    %c0_92 = arith.constant 0 : index
    %71 = vector.load %arg9[%c0_90, %c0_91, %c0_92] : memref<1x3x288xf32, #tpu.memory_space<vmem>>, vector<1x3x288xf32>
    %72 = vector.shape_cast %71 : vector<1x3x288xf32> to vector<3x288xf32>
    %73 = vector.shape_cast %57 : vector<3x288xf32> to vector<1x3x288xf32>
    tpu.vector_store %arg9[%c0_90, %c0_91, %c0_92], %73 {strides = array<i32>} : memref<1x3x288xf32, #tpu.memory_space<vmem>>, vector<1x3x288xf32>,
    %c0_93 = arith.constant 0 : index
    %c0_94 = arith.constant 0 : index
    %c0_95 = arith.constant 0 : index
    %74 = vector.load %arg10[%c0_93, %c0_94, %c0_95] : memref<1x3x288xf32, #tpu.memory_space<vmem>>, vector<1x3x288xf32>
    %75 = vector.shape_cast %74 : vector<1x3x288xf32> to vector<3x288xf32>
    %76 = vector.shape_cast %67 : vector<3x288xf32> to vector<1x3x288xf32>
    tpu.vector_store %arg10[%c0_93, %c0_94, %c0_95], %76 {strides = array<i32>} : memref<1x3x288xf32, #tpu.memory_space<vmem>>, vector<1x3x288xf32>,
    return
  }
  func.func @transform_0(%arg0: i32) -> (i32, i32, i32) {
    %c0_i32 = arith.constant 0 : i32
    %c0_i32_0 = arith.constant 0 : i32
    %c0_i32_1 = arith.constant 0 : i32
    return %arg0, %c0_i32, %c0_i32_0 : i32, i32, i32
  }
  func.func @transform_1(%arg0: i32) -> (i32, i32, i32) {
    %c0_i32 = arith.constant 0 : i32
    %c0_i32_0 = arith.constant 0 : i32
    %c0_i32_1 = arith.constant 0 : i32
    return %arg0, %c0_i32, %c0_i32_0 : i32, i32, i32
  }
  func.func @transform_2(%arg0: i32) -> (i32, i32, i32) {
    %c0_i32 = arith.constant 0 : i32
    %c0_i32_0 = arith.constant 0 : i32
    %c0_i32_1 = arith.constant 0 : i32
    return %arg0, %c0_i32, %c0_i32_0 : i32, i32, i32
  }
  func.func @transform_3(%arg0: i32) -> (i32, i32) {
    %c0_i32 = arith.constant 0 : i32
    %c0_i32_0 = arith.constant 0 : i32
    %c0_i32_1 = arith.constant 0 : i32
    return %c0_i32, %c0_i32_0 : i32, i32
  }
  func.func @transform_4(%arg0: i32) -> (i32, i32) {
    %c0_i32 = arith.constant 0 : i32
    %c0_i32_0 = arith.constant 0 : i32
    %c0_i32_1 = arith.constant 0 : i32
    return %c0_i32, %c0_i32_0 : i32, i32
  }
  func.func @transform_5(%arg0: i32) -> (i32, i32) {
    %c0_i32 = arith.constant 0 : i32
    %c0_i32_0 = arith.constant 0 : i32
    %c0_i32_1 = arith.constant 0 : i32
    return %c0_i32, %c0_i32_0 : i32, i32
  }
  func.func @transform_6(%arg0: i32) -> (i32, i32) {
    %c0_i32 = arith.constant 0 : i32
    %c0_i32_0 = arith.constant 0 : i32
    %c0_i32_1 = arith.constant 0 : i32
    return %c0_i32, %c0_i32_0 : i32, i32
  }
  func.func @transform_7(%arg0: i32) -> (i32, i32, i32) {
    %c0_i32 = arith.constant 0 : i32
    %c0_i32_0 = arith.constant 0 : i32
    %c0_i32_1 = arith.constant 0 : i32
    return %arg0, %c0_i32, %c0_i32_0 : i32, i32, i32
  }
  func.func @transform_8(%arg0: i32) -> (i32, i32, i32) {
    %c0_i32 = arith.constant 0 : i32
    %c0_i32_0 = arith.constant 0 : i32
    %c0_i32_1 = arith.constant 0 : i32
    return %arg0, %c0_i32, %c0_i32_0 : i32, i32, i32
  }
  func.func @transform_9(%arg0: i32) -> (i32, i32, i32) {
    %c0_i32 = arith.constant 0 : i32
    %c0_i32_0 = arith.constant 0 : i32
    %c0_i32_1 = arith.constant 0 : i32
    return %arg0, %c0_i32, %c0_i32_0 : i32, i32, i32
  }
}

</mosaic_0001>

<bundles_post_ra>
// kernel: _lambda_.15
= control target key start
LH: loop header
LB: loop body
LE: loop exit
PB: predicated region body
PF: predicated region fallthrough
CT: control target
= control target key end

     0   :  { %s856_s15 = smov 0   ;;  %s953_s0 = inlined_call_operand.vmem [shape: bf16[2,4,288], index: 0, kind: input, shape index: {}]   ;;  %s954_s1 = inlined_call_operand.vmem [shape: bf16[8,36], index: 1, kind: input, shape index: {}]   ;;  %s955_s2 = inlined_call_operand.vmem [shape: f32[8,1], index: 2, kind: input, shape index: {}]   ;;  %s956_s3 = inlined_call_operand.vmem [shape: f32[1,288], index: 3, kind: input, shape index: {}]   ;;  %s957_s4 = inlined_call_operand.vmem [shape: bf16[2,8,288], index: 4, kind: output, shape index: {}]  }
   0x1 LB: > { %s725_s16 = sadd.s32 4294967295, %s816_s15   ;;  %p729_p0 = scmp.ge.s32.totalorder %s816_s15, 1  ;;  %s816_s15 = sphi %s856_s15, %s14_s15  }
   0x2   : > { %p162_p1 = scmp.lt.s32.totalorder %s816_s15, 3 }
   0x4   : > { %p163_p2 = pnand %p729_p0, %p162_p1 }
   0x5   : > { %p188_p3 = scmp.lt.s32.totalorder (!%p163_p2), %s725_s16, 1  ;;  %s819_s21 = smov (!%p163_p2), 19  }
   0x6   : > { %166 = sbr.rel (%p163_p2) target bundleno = 505 (0x1f9), region = 36  ;;  %s821_s22 = smov (!%p163_p2), 90  }
   0x7   : > { %s822_s23 = smov (!%p163_p2), 109   ;;  %s823_s24 = smov (!%p163_p2), 108  }
   0x8   : > { %s824_s25 = smov (!%p163_p2), 92   ;;  %s825_s26 = smov (!%p163_p2), 91  }
   0x9   : > { %s826_s27 = smov (!%p163_p2), 126   ;;  %s827_s28 = smov (!%p163_p2), 127  }
   0xa   : > { %s830_s29 = smov (!%p163_p2), 110  }
   0xb   : > { %vm199_vm0 = vcmask 148480   ;;  %vm201_vm1 = vcmask 697752   ;;  %v818_v0 = vmov 0   ;;  %s959_s16 = smov (!%p188_p3, %s725_s16), 1  ;;  %vm211_vm2 = vcmask 1041560   ;;  %v492_v47 = vld [vmem:[%s955_s2] sm:$0xff] }
   0xc   : > { %200 = vst.msk [vmem:[#allocation2] sm:$0x3] %vm199_vm0, %v818_v0  ;;  %584 = vmatprep.mubr.bf16.mxu0 %v818_v0  ;;  %788 = vset.pattern.permute.xlu1 %v818_v0  ;;  %s765_s17 = smul.u32 6, %s959_s16  ;;  %vm212_vm3 = vcmask 1043458   ;;  %vm214_vm5 = vcmask 414724   ;;  %vm208_vm6 = vcmask 154624   ;;  %v230_v5 = vlaneseq }
   0xd   : > { %202 = vst.msk [vmem:[#allocation2 + $0x4] sm:$0x3] %vm201_vm1, %v818_v0  ;;  %789 = vset.pattern.permute.xlu0 %v818_v0  ;;  %vm213_vm4 = vmor %vm212_vm3, %vm211_vm2  ;;  %v820_v3 = vmov 1983009808   ;;  %vm237_vm8 = vcmask 254976   ;;  %v828_v32 = vmov 0.0  }
   0xe   : > { %s192_s20 = scalar_lea.vmem %s953_s0, %s765_s17  ;;  %v228_v4 = vunpack.c.l.s4 %v820_v3  ;;  %vm215_vm7 = vmor %vm214_vm5, %vm213_vm4  ;;  %v875_v9 = vshrl.u32 %v230_v5, 7  ;;  %755 = vmatprep.subr.bf16.mxu1 %v828_v32  ;;  %vm829_vm9 = vmmov 0   ;;  %vm269_vm10 = vcmask 257026   ;;  %s766_s10 = smul.u32 12, %s959_s16 }
   0xf   : > { %v203_v1 = vld [vmem:[%s192_s20] sm:$0x3f]  ;;  %761 = vmatprep.mubr.msk.bf16.mxu1 %vm829_vm9, %v828_v32  ;;  %vm262_vm11 = vcmask 1043456   ;;  %vm475_vm12 = vcmask 736256   ;;  %vm385_vm13 = vcmask 883712   ;;  %vm355_vm14 = vcmask 891904  }
  0x10   : > { %205 = vrot.lane.b32.xlu0 %v203_v1, %s819_s21  ;;  %v229_v8 = vunpack.c.0.s8 %v228_v4  ;;  %vm445_vm15 = vcmask 744448   ;;  %vm542_vm0 = vcmask 1041408   ;;  %vm415_vm1 = vcmask 752640   ;;  %s197_s13 = scalar_lea.vmem %s957_s4, %s766_s10 }
  0x11   : > { %vm295_vm2 = vcmask 1031168   ;;  %vm264_vm3 = vcmask 1039360   ;;  %vm325_vm4 = vcmask 900096   ;;  %vm538_vm5 = vcmask 293888  }
  0x12   : > { %v878_v10 = vsub.s32 %v229_v8, %v875_v9 }
  0x82   : > { %v206_v2 = vpop.permute.xlu0 %205 }
  0x83   : > { %v207_v6 = vrot.slane %v206_v2, 6 }
  0x85   : > { %v209_v7 = vsel %vm208_vm6, %v207_v6, %v206_v2 }
  0x86   : > { %216 = vst.msk [vmem:[#allocation2] sm:$0x3f] %vm215_vm7, %v209_v7 }
  0x8d   : > { %v451_v11 = vld [vmem:[#allocation2] sm:$0x3f] }
  0x8e   : > { %v331_v12 = vld [vmem:[#allocation2] sm:$0x3f]  ;;  %v460_v13 = vrot.slane %v451_v11, %v878_v10  ;;  %v453_v26 = vcombine.high %v451_v11, %v451_v11 }
  0x8f   : > { %v340_v14 = vrot.slane %v331_v12, %v878_v10  ;;  %v361_v15 = vld [vmem:[#allocation2] sm:$0x3f]  ;;  %v333_v28 = vcombine.high %v331_v12, %v331_v12 }
  0x90   : > { %v391_v16 = vld [vmem:[#allocation2] sm:$0x3f]  ;;  %468 = vrot.lane.b32.xlu0 %v460_v13, %s821_s22  ;;  %v377_v18 = vrot.slane %v361_v15, %v878_v10  ;;  %v467_v29 = vrot.slane %v453_v26, %v878_v10  ;;  %v363_v31 = vcombine.low %v361_v15, %v361_v15 }
  0x91   : > { %v217_v17 = vld [vmem:[#allocation2] sm:$0x3f]  ;;  %348 = vrot.lane.b32.xlu1 %v340_v14, %s822_s23  ;;  %v400_v19 = vrot.slane %v391_v16, %v878_v10  ;;  %v347_v34 = vrot.slane %v333_v28, %v878_v10  ;;  %v393_v36 = vcombine.high %v391_v16, %v391_v16 }
  0x92   : > { %732 = vst.sshfl [vmem:[#allocation3] sm:$0xf pattern:$0x76325410] %v217_v17  ;;  %v421_v20 = vld [vmem:[#allocation2] sm:$0x3f]  ;;  %v219_v22 = vcombine.high %v217_v17, %v217_v17  ;;  %v370_v33 = vrot.slane %v363_v31, %v878_v10 }
  0x93   : > { %v271_v21 = vld [vmem:[#allocation2] sm:$0x3f]  ;;  %v437_v24 = vrot.slane %v421_v20, %v878_v10  ;;  %v423_v35 = vcombine.low %v421_v20, %v421_v20  ;;  %v407_v38 = vrot.slane %v393_v36, %v878_v10 }
  0x94   : > { %380 = vrot.lane.b32.xlu0 %v377_v18, %s823_s24  ;;  %v233_v23 = vrot.slane %v219_v22, %v878_v10  ;;  %v280_v25 = vrot.slane %v271_v21, %v878_v10  ;;  %v239_v27 = vld [vmem:[#allocation2] sm:$0x3f]  ;;  %v273_v39 = vcombine.high %v271_v21, %v271_v21 }
  0x95   : > { %408 = vrot.lane.b32.xlu1 %v400_v19, %s824_s25  ;;  %v255_v30 = vrot.slane %v239_v27, %v878_v10  ;;  %v430_v37 = vrot.slane %v423_v35, %v878_v10  ;;  %v241_v40 = vcombine.low %v239_v27, %v239_v27  ;;  %v301_v41 = vld [vmem:[#allocation2] sm:$0x3f] }
  0x96   : > { %238 = vst.msk [vmem:[#allocation3 + $0x8] sm:$0x3] %vm237_vm8, %v233_v23  ;;  %v287_v42 = vrot.slane %v273_v39, %v878_v10  ;;  %v303_v44 = vcombine.low %v301_v41, %v301_v41  ;;  %v317_v45 = vrot.slane %v301_v41, %v878_v10 }
  0x97   : > { %v248_v43 = vrot.slane %v241_v40, %v878_v10 }
  0x98   : > { %440 = vrot.lane.b32.xlu0 %v437_v24, %s825_s26  ;;  %v310_v46 = vrot.slane %v303_v44, %v878_v10 }
  0x99   : > { %288 = vrot.lane.b32.xlu1 %v280_v25, %s826_s27 }
  0x9c   : > { %258 = vrot.lane.b32.xlu0 %v255_v30, %s827_s28 }
  0x9d   : > { %470 = vrot.lane.b32.xlu1 %v467_v29, %s821_s22 }
  0xa0   : > { %350 = vrot.lane.b32.xlu0 %v347_v34, %s822_s23 }
  0xa1   : > { %378 = vrot.lane.b32.xlu1 %v370_v33, %s823_s24 }
  0xa4   : > { %410 = vrot.lane.b32.xlu0 %v407_v38, %s824_s25 }
  0xa5   : > { %438 = vrot.lane.b32.xlu1 %v430_v37, %s825_s26 }
  0xa8   : > { %290 = vrot.lane.b32.xlu0 %v287_v42, %s826_s27 }
  0xa9   : > { %256 = vrot.lane.b32.xlu1 %v248_v43, %s827_s28 }
  0xac   : > { %320 = vrot.lane.b32.xlu0 %v317_v45, %s830_s29  ;;  %v481_v45 = vld [vmem:[%s954_s1] sm:$0xf] }
  0xad   : > { %318 = vrot.lane.b32.xlu1 %v310_v46, %s830_s29 }
  0xb1   : > { %495 = vperm.xlu1 %788, %v492_v47  }
 0x102   : > { %v469_v48 = vpop.permute.xlu0 %468 }
 0x103   : > { %v349_v49 = vpop.permute.xlu1 %348  ;;  %v472_v56 = vrot.slane %v469_v48, 4 }
 0x104   : > { %v352_v62 = vrot.slane %v349_v49, 4 }
 0x106   : > { %v381_v50 = vpop.permute.xlu0 %380 }
 0x107   : > { %v409_v51 = vpop.permute.xlu1 %408  ;;  %390 = vst.msk [vmem:[#allocation3 + $0x20] sm:$0xc] %vm269_vm10, %v381_v50  ;;  %v383_v63 = vrot.slane %v381_v50, 4 }
 0x108   : > { %v412_v11 = vrot.slane %v409_v51, 4 }
 0x10a   : > { %v441_v52 = vpop.permute.xlu0 %440 }
 0x10b   : > { %v908_v53 = vpop.permute.xlu1 %288  ;;  %450 = vst.msk [vmem:[#allocation3 + $0x2c] sm:$0xc] %vm269_vm10, %v441_v52  ;;  %v443_v12 = vrot.slane %v441_v52, 4  ;;  %v642_v52 = vsub.s32 1, %v875_v9 }
 0x10c   : > { %v292_v18 = vrot.slane %v908_v53, 4 }
 0x10e   : > { %v259_v55 = vpop.permute.xlu0 %258 }
 0x10f   : > { %v471_v54 = vpop.permute.xlu1 %470  ;;  %270 = vst.msk [vmem:[#allocation3 + $0x8] sm:$0xc] %vm269_vm10, %v259_v55  ;;  %v261_v19 = vrot.slane %v259_v55, 4 }
 0x110   : > { %v473_v57 = vrot.slane %v471_v54, 4  ;;  %480 = vst.msk [vmem:[#allocation3 + $0x38] sm:$0x3] %vm237_vm8, %v471_v54 }
 0x112   : > { %v474_v58 = vsel %vm262_vm11, %v472_v56, %v473_v57  ;;  %v351_v61 = vpop.permute.xlu0 %350 }
 0x113   : > { %v476_v59 = vsel %vm475_vm12, %v469_v48, %v474_v58  ;;  %v379_v60 = vpop.permute.xlu1 %378  ;;  %v353_v2 = vrot.slane %v351_v61, 4  ;;  %360 = vst.msk [vmem:[#allocation3 + $0x20] sm:$0x3] %vm237_vm8, %v351_v61  ;;  %v646_v48 = vsub.s32 2, %v875_v9 }
 0x114   : > { %479 = vst [vmem:[#allocation3 + $0x30] sm:$0x33] %v476_v59  ;;  %v382_v1 = vrot.slane %v379_v60, 4 }
 0x115   : > { %v354_v4 = vsel %vm262_vm11, %v352_v62, %v353_v2 }
 0x116   : > { %v384_v3 = vsel %vm262_vm11, %v382_v1, %v383_v63  ;;  %v356_v6 = vsel %vm355_vm14, %v349_v49, %v354_v4  ;;  %v411_v8 = vpop.permute.xlu0 %410 }
 0x117   : > { %v386_v5 = vsel %vm385_vm13, %v379_v60, %v384_v3  ;;  %v439_v7 = vpop.permute.xlu1 %438  ;;  %v799_v10 = vld [vmem:[#allocation3 + $0x38] ss:$0 sps:$4 sm:$0x33]   ;;  %359 = vst [vmem:[#allocation3 + $0x18] sm:$0x33] %v356_v6  ;;  %v413_v14 = vrot.slane %v411_v8, 4 }
 0x118   : > { %389 = vst [vmem:[#allocation3 + $0x18] sm:$0xcc] %v386_v5  ;;  %v442_v13 = vrot.slane %v439_v7, 4  ;;  %420 = vst.msk [vmem:[#allocation3 + $0x2c] sm:$0x3] %vm237_vm8, %v411_v8  ;;  %v550_v15 = vsel %vm542_vm0, %v799_v10, 0 }
 0x119   : > { %v414_v17 = vsel %vm262_vm11, %v412_v11, %v413_v14  ;;  %756 = vmatpush3.bf16.msra.mxu1 %v550_v15 }
 0x11a   : > { %v444_v16 = vsel %vm262_vm11, %v442_v13, %v443_v12  ;;  %v416_v21 = vsel %vm415_vm1, %v409_v51, %v414_v17  ;;  %v291_v22 = vpop.permute.xlu0 %290  ;;  %757 = vmatprep.subr.bf16.mxu1 %v828_v32  ;;  %v638_v51 = vsub.s32 0, %v875_v9 }
 0x11b   : > { %v446_v20 = vsel %vm445_vm15, %v439_v7, %v444_v16  ;;  %v257_v23 = vpop.permute.xlu1 %256  ;;  %v490_v24 = vld [vmem:[#allocation3 + $0x30] sm:$0x33]  ;;  %419 = vst [vmem:[#allocation3 + $0x24] sm:$0x33] %v416_v21  ;;  %v293_v25 = vrot.slane %v291_v22, 4 }
 0x11c   : > { %449 = vst [vmem:[#allocation3 + $0x24] sm:$0xcc] %v446_v20  ;;  %300 = vst.msk [vmem:[#allocation3 + $0x14] sm:$0x3] %vm237_vm8, %v291_v22  ;;  %v260_v26 = vrot.slane %v257_v23, 4  ;;  %v740_v27 = vcombine.high %v490_v24, %v490_v24  ;;  %v739_v28 = vcombine.low %v490_v24, %v490_v24  ;;  %vm668_vm8 = vcmask 257024  }
 0x11d   : > { %v294_v29 = vsel %vm262_vm11, %v292_v18, %v293_v25 }
 0x11e   : > { %v263_v30 = vsel %vm262_vm11, %v260_v26, %v261_v19  ;;  %742 = vmatprep.subr.msk.bf16.mxu0 %vm542_vm0, %v740_v27  ;;  %v544_v31 = vsel %vm542_vm0, %v739_v28, 0  ;;  %v296_v33 = vsel %vm295_vm2, %v908_v53, %v294_v29  ;;  %v321_v35 = vpop.permute.xlu0 %320 }
 0x11f   : > { %v265_v34 = vsel %vm264_vm3, %v257_v23, %v263_v30  ;;  %563 = vmatpush1.bf16.msra.mxu0 %v544_v31  ;;  %v319_v36 = vpop.permute.xlu1 %318  ;;  %v802_v37 = vld [vmem:[#allocation3 + $0x20] ss:$12 sps:$4 sm:$0xff]   ;;  %299 = vst [vmem:[#allocation3 + $0xc] sm:$0x33] %v296_v33  ;;  %v323_v38 = vrot.slane %v321_v35, 4 }
 0x120   : > { %268 = vst [vmem:[#allocation3] sm:$0xcc] %v265_v34  ;;  %330 = vst.msk [vmem:[#allocation3 + $0x14] sm:$0xc] %vm269_vm10, %v321_v35  ;;  %v322_v39 = vrot.slane %v319_v36, 4  ;;  %758 = vmatpush3.bf16.msra.mxu1 %v802_v37 }
 0x121   : > { %759 = vmatprep.subr.bf16.mxu1 %v828_v32  ;;  %v633_v32 = vld [vmem:[%s956_s3] sm:$0x7] }
 0x122   : > { %v324_v40 = vsel %vm262_vm11, %v322_v39, %v323_v38  ;;  %vm634_vm6 = vcmp.ne.f32.partialorder %v633_v32, 0.0 }
 0x123   : > { %v326_v41 = vsel %vm325_vm4, %v319_v36, %v324_v40  ;;  %v803_v42 = vld [vmem:[#allocation3 + $0x1c] ss:$12 sps:$4 sm:$0xff]   ;;  %v805_v43 = vld [vmem:[#allocation3 + $0x18] ss:$12 sps:$4 sm:$0xff]   ;;  %v635_v49 = vsel %vm634_vm6, 1, %v818_v0 }
 0x124   : > { %329 = vst [vmem:[#allocation3 + $0xc] sm:$0xcc] %v326_v41  ;;  %564 = vmatprep.subr.bf16.mxu0 %v803_v42  ;;  %v647_v50 = vrot.slane %v635_v49, %v646_v48  ;;  %v639_v58 = vrot.slane %v635_v49, %v638_v51  ;;  %v643_v59 = vrot.slane %v635_v49, %v642_v52 }
 0x125   : > { %565 = vmatpush1.bf16.msra.mxu0 %v805_v43 }
 0x126   : > { %vm650_vm7 = vcmp.eq.s32.totalorder %v647_v50, 1  ;;  %vm648_vm9 = vcmp.eq.s32.totalorder %v639_v58, 1  ;;  %vm649_vm10 = vcmp.eq.s32.totalorder %v643_v59, 1 }
 0x127   : > { %v806_v44 = vld [vmem:[#allocation3 + $0x8] ss:$12 sps:$4 sm:$0xff]  }
 0x128   : > { %760 = vmatpush3.bf16.msra.mxu1 %v806_v44 }
 0x12b   : > { %v807_v46 = vld [vmem:[#allocation3 + $0x4] ss:$12 sps:$4 sm:$0xff]   ;;  %v809_v47 = vld [vmem:[#allocation3] ss:$12 sps:$4 sm:$0xff]   ;;  %762 = vmatmul.mubr.msk.bf16.vlgmr.msra.gmra.mxu1 %vm538_vm5, %v481_v45 }
 0x12c   : > { %566 = vmatprep.subr.bf16.mxu0 %v807_v46  ;;  %v496_v54 = vpop.permute.xlu1 %495 }
 0x12d   : > { %567 = vmatpush1.bf16.msra.mxu0 %v809_v47 }
 0x130   : > { %743 = vmatmul.mubr.msk.bf16.vlgmr.msra.gmra.mxu0 %vm538_vm5, %v481_v45 }
 0x1eb   : > { %v627_v53 = vpop.f32.mrf.mxu1 }
 0x1ec   : > { %v628_v55 = vadd.f32 %v627_v53, %v496_v54 }
 0x1ed   : > { %v763_v56 = vpop.f32.mrf.mxu1 }
 0x1ee   : > { %v653_v57 = vsel %vm650_vm7, %v628_v55, 0.0 }
 0x1ef   : > { %v750_v0 = vpack.c.bf16 %v653_v57, %v653_v57  ;;  %v630_v60 = vpop.f32.mrf.mxu1 }
 0x1f0   : > { %v586_v61 = vpop.f32.mrf.mxu0 }
 0x1f1   : > { %669 = vst.msk [vmem:[%s197_s13 + $0x8] sm:$0xf] %vm668_vm8, %v750_v0  ;;  %v587_v62 = vadd.f32 %v586_v61, %v496_v54  ;;  %v764_v63 = vpop.f32.mrf.mxu1 }
 0x1f2   : > { %v588_v9 = vpop.f32.mrf.mxu0 }
 0x1f3   : > { %v589_v1 = vadd.f32 %v588_v9, %v496_v54  ;;  %v651_v3 = vsel %vm648_vm9, %v587_v62, 0.0 }
 0x1f4   : > { %v590_v2 = vpop.f32.mrf.mxu0 }
 0x1f5   : > { %v652_v4 = vsel %vm649_vm10, %v589_v1, 0.0 }
 0x1f6   : > { %v749_v5 = vpack.c.bf16 %v652_v4, %v651_v3  ;;  %v591_v6 = vpop.f32.mrf.mxu0 }
 0x1f8   : > { %667 = vst [vmem:[%s197_s13] sm:$0xff] %v749_v5 }
 0x1f9 PF: > { %s14_s15 = sadd.s32 1, %s816_s15  }
 0x1fa   : > { %p11_p4 = scmp.ge.s32.totalorder %s14_s15, 4  }
 0x1fc   :  { %13 = sbr.rel (!%p11_p4) target bundleno = 1 (0x1), region = 66 }

// kernel: _lambda_.16
= control target key start
LH: loop header
LB: loop body
LE: loop exit
PB: predicated region body
PF: predicated region fallthrough
CT: control target
= control target key end

     0   :  { %s1238_s21 = smov 0   ;;  %s1462_s0 = inlined_call_operand.vmem [shape: bf16[2,8,288], index: 0, kind: input, shape index: {}]   ;;  %s1463_s1 = inlined_call_operand.vmem [shape: bf16[8,72], index: 1, kind: input, shape index: {}]   ;;  %s1464_s2 = inlined_call_operand.vmem [shape: f32[8,1], index: 2, kind: input, shape index: {}]   ;;  %s1465_s3 = inlined_call_operand.vmem [shape: bf16[8,72], index: 3, kind: input, shape index: {}]   ;;  %s1466_s4 = inlined_call_operand.vmem [shape: f32[8,1], index: 4, kind: input, shape index: {}]   ;;  %s1467_s5 = inlined_call_operand.vmem [shape: f32[1,288], index: 5, kind: input, shape index: {}]   ;;  %s1468_s6 = inlined_call_operand.vmem [shape: bf16[2,8,288], index: 6, kind: output, shape index: {}]  }
   0x1 LB: > { %s1058_s22 = sadd.s32 4294967295, %s1189_s21   ;;  %p1062_p0 = scmp.ge.s32.totalorder %s1189_s21, 1  ;;  %s1189_s21 = sphi %s1238_s21, %s16_s21  }
   0x2   : > { %p212_p1 = scmp.lt.s32.totalorder %s1189_s21, 3 }
   0x4   : > { %p213_p2 = pnand %p1062_p0, %p212_p1 }
   0x5   : > { %p242_p3 = scmp.lt.s32.totalorder (!%p213_p2), %s1058_s22, 1  ;;  %s1192_s27 = smov (!%p213_p2), 19  }
   0x6   : > { %216 = sbr.rel (%p213_p2) target bundleno = 985 (0x3d9), region = 44  ;;  %s1193_s28 = smov (!%p213_p2), 90  }
   0x7   : > { %s1194_s29 = smov (!%p213_p2), 92   ;;  %s1195_s30 = smov (!%p213_p2), 91  }
   0x8   : > { %s1197_s7 = smov (!%p213_p2), 109   ;;  %s1198_s8 = smov (!%p213_p2), 108  }
   0x9   : > { %s1199_s9 = smov (!%p213_p2), 126   ;;  %s1200_s10 = smov (!%p213_p2), 110  }
   0xa   : > { %s1201_s11 = smov (!%p213_p2), 127  }
   0xb   : > { %vm260_vm0 = vcmask 150528   ;;  %v1191_v0 = vmov 0   ;;  %vm262_vm1 = vcmask 699800   ;;  %s1475_s22 = smov (!%p242_p3, %s1058_s22), 1  ;;  %vm276_vm2 = vcmask 1043608   ;;  %v443_v20 = vld [vmem:[%s1464_s2] sm:$0xff] }
   0xc   : > { %261 = vst.msk [vmem:[#allocation2] sm:$0xf] %vm260_vm0, %v1191_v0  ;;  %567 = vmatprep.mubr.bf16.mxu0 %v1191_v0  ;;  %1172 = vset.pattern.permute.xlu0 %v1191_v0  ;;  %s1151_s23 = smul.u32 12, %s1475_s22  ;;  %vm277_vm3 = vcmask 1047556   ;;  %vm271_vm4 = vcmask 154624   ;;  %vm280_vm6 = vcmask 412672  }
   0xd   : > { %263 = vst.msk [vmem:[#allocation2 + $0x8] sm:$0xf] %vm262_vm1, %v1191_v0  ;;  %vm1266_vm5 = vmor %vm277_vm3, %vm276_vm2  ;;  %vm285_vm7 = vcmask 257024   ;;  %v1196_v12 = vmov 0.0   ;;  %vm1202_vm8 = vmmov 0   ;;  %vm297_vm9 = vcmask 1043456  }
   0xe   : > { %s246_s26 = scalar_lea.vmem %s1462_s0, %s1151_s23  ;;  %1123 = vmatprep.subr.bf16.mxu1 %v1196_v12  ;;  %1133 = vmatprep.mubr.msk.bf16.mxu1 %vm1202_vm8, %v1196_v12  ;;  %vm418_vm10 = vcmask 736256   ;;  %vm384_vm11 = vcmask 752640   ;;  %vm401_vm12 = vcmask 744448   ;;  %vm350_vm13 = vcmask 891904  }
   0xf   : > { %v1258_v1 = vld [vmem:[%s246_s26] sm:$0xff]  ;;  %v1262_v2 = vld [vmem:[%s246_s26 + $0x8] sm:$0xf]  ;;  %vm367_vm14 = vcmask 883712   ;;  %vm316_vm15 = vcmask 1031168   ;;  %vm333_vm0 = vcmask 900096  }
  0x10   : > { %266 = vrot.lane.b32.xlu0 %v1258_v1, %s1192_s27  ;;  %vm299_vm1 = vcmask 1039360   ;;  %vm1469_vm2 = vcmask 588800  }
  0x14   : > { %268 = vrot.lane.b32.xlu0 %v1262_v2, %s1192_s27 }
  0x82   : > { %v267_v3 = vpop.permute.xlu0 %266 }
  0x83   : > { %v270_v5 = vrot.slane %v267_v3, 4 }
  0x85   : > { %v272_v6 = vsel %vm271_vm4, %v270_v5, %v267_v3 }
  0x86   : > { %279 = vst.msk [vmem:[#allocation2] sm:$0xff] %vm1266_vm5, %v272_v6  ;;  %v269_v7 = vpop.permute.xlu0 %268 }
  0x87   : > { %v273_v8 = vsel %vm271_vm4, %v270_v5, %v269_v7 }
  0x88   : > { %281 = vst.msk [vmem:[#allocation2 + $0x8] sm:$0xf] %vm280_vm6, %v273_v8 }
  0x8d   : > { %v1275_v9 = vld [vmem:[#allocation2] sm:$0xff] }
  0x8e   : > { %411 = vrot.lane.b32.xlu1 %v1275_v9, %s1193_s28  ;;  %377 = vrot.lane.b32.xlu0 %v1275_v9, %s1194_s29 }
  0x8f   : > { %v283_v10 = vld [vmem:[#allocation2 + $0x8] sm:$0xf] }
  0x90   : > { %286 = vst.msk [vmem:[#allocation3 + $0x8] sm:$0xf] %vm285_vm7, %v283_v10  ;;  %v408_v11 = vld [vmem:[#allocation2 + $0x8] sm:$0xf] }
  0x91   : > { %v374_v13 = vld [vmem:[#allocation2 + $0x8] sm:$0xf] }
  0x92   : > { %394 = vrot.lane.b32.xlu0 %v1275_v9, %s1195_s30  ;;  %413 = vrot.lane.b32.xlu1 %v408_v11, %s1193_s28  ;;  %v391_v14 = vld [vmem:[#allocation2 + $0x8] sm:$0xf] }
  0x93   : > { %v340_v15 = vld [vmem:[#allocation2 + $0x8] sm:$0xf] }
  0x94   : > { %v357_v16 = vld [vmem:[#allocation2 + $0x8] sm:$0xf] }
  0x95   : > { %v306_v17 = vld [vmem:[#allocation2 + $0x8] sm:$0xf] }
  0x96   : > { %343 = vrot.lane.b32.xlu0 %v1275_v9, %s1197_s7  ;;  %379 = vrot.lane.b32.xlu1 %v374_v13, %s1194_s29  ;;  %v323_v18 = vld [vmem:[#allocation2 + $0x8] sm:$0xf] }
  0x97   : > { %v288_v19 = vld [vmem:[#allocation2 + $0x8] sm:$0xf] }
  0x9a   : > { %360 = vrot.lane.b32.xlu0 %v1275_v9, %s1198_s8  ;;  %396 = vrot.lane.b32.xlu1 %v391_v14, %s1195_s30 }
  0x9e   : > { %309 = vrot.lane.b32.xlu0 %v1275_v9, %s1199_s9  ;;  %345 = vrot.lane.b32.xlu1 %v340_v15, %s1197_s7 }
  0xa2   : > { %326 = vrot.lane.b32.xlu0 %v1275_v9, %s1200_s10  ;;  %362 = vrot.lane.b32.xlu1 %v357_v16, %s1198_s8 }
  0xa6   : > { %291 = vrot.lane.b32.xlu0 %v1275_v9, %s1201_s11  ;;  %311 = vrot.lane.b32.xlu1 %v306_v17, %s1199_s9 }
  0xaa   : > { %328 = vrot.lane.b32.xlu1 %v323_v18, %s1200_s10  ;;  %446 = vperm.xlu0 %1172, %v443_v20  }
  0xae   : > { %293 = vrot.lane.b32.xlu1 %v288_v19, %s1201_s11 }
 0x100   : > { %v412_v21 = vpop.permute.xlu1 %411  ;;  %v378_v22 = vpop.permute.xlu0 %377 }
 0x101   : > { %v415_v25 = vrot.slane %v412_v21, 4  ;;  %v381_v34 = vrot.slane %v378_v22, 4 }
 0x104   : > { %v414_v23 = vpop.permute.xlu1 %413  ;;  %v395_v24 = vpop.permute.xlu0 %394 }
 0x105   : > { %v416_v26 = vrot.slane %v414_v23, 4  ;;  %423 = vst.msk [vmem:[#allocation3 + $0x68] sm:$0xf] %vm285_vm7, %v414_v23  ;;  %v398_v39 = vrot.slane %v395_v24, 4 }
 0x107   : > { %v417_v27 = vsel %vm297_vm9, %v415_v25, %v416_v26 }
 0x108   : > { %v419_v28 = vsel %vm418_vm10, %v412_v21, %v417_v27  ;;  %v380_v29 = vpop.permute.xlu1 %379  ;;  %v344_v30 = vpop.permute.xlu0 %343  ;;  %v424_v27 = vld [vmem:[%s1463_s1] sm:$0xf] }
 0x109   : > { %v382_v31 = vrot.slane %v380_v29, 4  ;;  %389 = vst.msk [vmem:[#allocation3 + $0x50] sm:$0xf] %vm285_vm7, %v380_v29  ;;  %v1078_v32 = vcombine.high %v419_v28, %v419_v28  ;;  %v1077_v33 = vcombine.low %v419_v28, %v419_v28  ;;  %v347_v51 = vrot.slane %v344_v30, 4  ;;  %v253_v29 = vld [vmem:[%s1467_s5] sm:$0x7] }
 0x10a   : > { %vm254_vm3 = vcmp.ne.f32.partialorder %v253_v29, 0.0 }
 0x10b   : > { %1080 = vmatprep.subr.msk.bf16.mxu0 %vm297_vm9, %v1078_v32  ;;  %v527_v35 = vsel %vm297_vm9, %v1077_v33, 0  ;;  %v383_v40 = vsel %vm297_vm9, %v381_v34, %v382_v31  ;;  %v619_v33 = vsel %vm254_vm3, 1, %v1191_v0 }
 0x10c   : > { %v397_v36 = vpop.permute.xlu1 %396  ;;  %v361_v37 = vpop.permute.xlu0 %360  ;;  %v1173_v38 = vld [vmem:[#allocation3 + $0x68] ss:$0 sps:$4 sm:$0xff]   ;;  %542 = vmatpush1.bf16.msra.mxu0 %v527_v35  ;;  %v385_v44 = vsel %vm384_vm11, %v378_v22, %v383_v40 }
 0x10d   : > { %v399_v41 = vrot.slane %v397_v36, 4  ;;  %406 = vst.msk [vmem:[#allocation3 + $0x5c] sm:$0xf] %vm285_vm7, %v397_v36  ;;  %v533_v42 = vsel %vm297_vm9, %v1173_v38, 0  ;;  %v364_v54 = vrot.slane %v361_v37, 4 }
 0x10e   : > { %1124 = vmatpush3.bf16.msra.mxu1 %v533_v42 }
 0x10f   : > { %v400_v43 = vsel %vm297_vm9, %v398_v39, %v399_v41  ;;  %1125 = vmatprep.subr.bf16.mxu1 %v1196_v12 }
 0x110   : > { %v402_v45 = vsel %vm401_vm12, %v395_v24, %v400_v43  ;;  %v346_v46 = vpop.permute.xlu1 %345  ;;  %v310_v50 = vpop.permute.xlu0 %309 }
 0x111   : > { %v348_v47 = vrot.slane %v346_v46, 4  ;;  %355 = vst.msk [vmem:[#allocation3 + $0x38] sm:$0xf] %vm285_vm7, %v346_v46  ;;  %v1075_v48 = vcombine.high %v385_v44, %v402_v45  ;;  %v1074_v49 = vcombine.low %v385_v44, %v402_v45  ;;  %v313_v5 = vrot.slane %v310_v50, 4 }
 0x113   : > { %543 = vmatprep.subr.bf16.mxu0 %v1075_v48  ;;  %v349_v55 = vsel %vm297_vm9, %v347_v51, %v348_v47 }
 0x114   : > { %v363_v52 = vpop.permute.xlu1 %362  ;;  %v1174_v53 = vld [vmem:[#allocation3 + $0x50] ss:$12 sps:$4 sm:$0xff]   ;;  %544 = vmatpush1.bf16.msra.mxu0 %v1074_v49  ;;  %v351_v58 = vsel %vm350_vm13, %v344_v30, %v349_v55  ;;  %v327_v60 = vpop.permute.xlu0 %326 }
 0x115   : > { %v365_v56 = vrot.slane %v363_v52, 4  ;;  %372 = vst.msk [vmem:[#allocation3 + $0x44] sm:$0xf] %vm285_vm7, %v363_v52  ;;  %1126 = vmatpush3.bf16.msra.mxu1 %v1174_v53  ;;  %v330_v8 = vrot.slane %v327_v60, 4 }
 0x116   : > { %1127 = vmatprep.subr.bf16.mxu1 %v1196_v12 }
 0x117   : > { %v366_v57 = vsel %vm297_vm9, %v364_v54, %v365_v56 }
 0x118   : > { %v368_v59 = vsel %vm367_vm14, %v361_v37, %v366_v57  ;;  %v312_v61 = vpop.permute.xlu1 %311  ;;  %v292_v13 = vpop.permute.xlu0 %291 }
 0x119   : > { %v314_v62 = vrot.slane %v312_v61, 4  ;;  %321 = vst.msk [vmem:[#allocation3 + $0x20] sm:$0xf] %vm285_vm7, %v312_v61  ;;  %v1072_v63 = vcombine.high %v351_v58, %v368_v59  ;;  %v1071_v3 = vcombine.low %v351_v58, %v368_v59  ;;  %v295_v18 = vrot.slane %v292_v13, 4 }
 0x11b   : > { %545 = vmatprep.subr.bf16.mxu0 %v1072_v63  ;;  %v315_v10 = vsel %vm297_vm9, %v313_v5, %v314_v62 }
 0x11c   : > { %v329_v6 = vpop.permute.xlu1 %328  ;;  %v1175_v7 = vld [vmem:[#allocation3 + $0x38] ss:$12 sps:$4 sm:$0xff]   ;;  %546 = vmatpush1.bf16.msra.mxu0 %v1071_v3  ;;  %v317_v15 = vsel %vm316_vm15, %v310_v50, %v315_v10 }
 0x11d   : > { %v331_v11 = vrot.slane %v329_v6, 4  ;;  %338 = vst.msk [vmem:[#allocation3 + $0x2c] sm:$0xf] %vm285_vm7, %v329_v6  ;;  %1128 = vmatpush3.bf16.msra.mxu1 %v1175_v7 }
 0x11e   : > { %1129 = vmatprep.subr.bf16.mxu1 %v1196_v12 }
 0x11f   : > { %v332_v14 = vsel %vm297_vm9, %v330_v8, %v331_v11 }
 0x120   : > { %v334_v16 = vsel %vm333_vm0, %v327_v60, %v332_v14  ;;  %v294_v17 = vpop.permute.xlu1 %293 }
 0x121   : > { %v296_v19 = vrot.slane %v294_v17, 4  ;;  %304 = vst.msk [vmem:[#allocation3 + $0x14] sm:$0xf] %vm285_vm7, %v294_v17  ;;  %v1069_v20 = vcombine.high %v317_v15, %v334_v16  ;;  %v1068_v21 = vcombine.low %v317_v15, %v334_v16 }
 0x123   : > { %v298_v22 = vsel %vm297_vm9, %v295_v18, %v296_v19  ;;  %547 = vmatprep.subr.bf16.mxu0 %v1069_v20 }
 0x124   : > { %v300_v23 = vsel %vm299_vm1, %v292_v13, %v298_v22  ;;  %v1176_v24 = vld [vmem:[#allocation3 + $0x20] ss:$12 sps:$4 sm:$0xff]   ;;  %548 = vmatpush1.bf16.msra.mxu0 %v1068_v21  ;;  %v811_v13 = vld [vmem:[%s1466_s4] sm:$0xff] }
 0x125   : > { %v1066_v25 = vcombine.high %v1275_v9, %v300_v23  ;;  %v1065_v26 = vcombine.low %v1275_v9, %v300_v23  ;;  %1130 = vmatpush3.bf16.msra.mxu1 %v1176_v24  ;;  %v620_v9 = vlaneseq  ;;  %v447_v34 = vpop.permute.xlu0 %446 }
 0x126   : > { %1131 = vmatprep.subr.bf16.mxu1 %v1196_v12 }
 0x127   : > { %549 = vmatprep.subr.bf16.mxu0 %v1066_v25  ;;  %v621_v30 = vshrl.u32 %v620_v9, 7 }
 0x128   : > { %v1177_v28 = vld [vmem:[#allocation3 + $0x8] ss:$12 sps:$4 sm:$0xff]   ;;  %550 = vmatpush1.bf16.msra.mxu0 %v1065_v26 }
 0x129   : > { %1132 = vmatpush3.bf16.msra.mxu1 %v1177_v28  ;;  %v626_v31 = vsub.s32 1, %v621_v30  ;;  %v622_v32 = vsub.s32 0, %v621_v30  ;;  %v630_v35 = vsub.s32 2, %v621_v30 }
 0x12a   : > { %1137 = vmatprep.subr.bf16.mxu1 %v1196_v12 }
 0x12b   : > { %1081 = vmatmul.mubr.msk.bf16.vlgmr.msra.gmra.mxu0 %vm1469_vm2, %v424_v27  ;;  %v1354_v37 = vrot.slane %v619_v33, %v626_v31  ;;  %v1356_v38 = vrot.slane %v619_v33, %v622_v32  ;;  %v1358_v42 = vrot.slane %v619_v33, %v630_v35 }
 0x12c   : > { %933 = vmatprep.mubr.bf16.mxu0 %v1191_v0  ;;  %1134 = vmatmul.mubr.msk.bf16.vlgmr.msra.gmra.mxu1 %vm1469_vm2, %v424_v27 }
 0x12d   : > { %1147 = vmatprep.mubr.msk.bf16.mxu1 %vm1202_vm8, %v1196_v12  ;;  %vm633_vm8 = vcmp.eq.s32.totalorder %v1354_v37, 1  ;;  %vm632_vm3 = vcmp.eq.s32.totalorder %v1356_v38, 1  ;;  %vm634_vm2 = vcmp.eq.s32.totalorder %v1358_v42, 1 }
 0x1eb   : > { %v569_v36 = vpop.f32.mrf.mxu0 }
 0x1ec   : > { %v570_v39 = vadd.f32 %v569_v36, %v447_v34  ;;  %v610_v40 = vpop.f32.mrf.mxu1 }
 0x1ed   : > { %v571_v41 = vpop.f32.mrf.mxu0  ;;  %v611_v43 = vadd.f32 %v610_v40, %v447_v34 }
 0x1ee   : > { %v616_v44 = vmax.f32 %v570_v39, 0.0  ;;  %v572_v45 = vadd.f32 %v571_v41, %v447_v34  ;;  %v1135_v46 = vpop.f32.mrf.mxu1 }
 0x1ef   : > { %v573_v47 = vpop.f32.mrf.mxu0  ;;  %v618_v0 = vmax.f32 %v611_v43, 0.0 }
 0x1f0   : > { %v617_v48 = vmax.f32 %v572_v45, 0.0  ;;  %v613_v49 = vpop.f32.mrf.mxu1  ;;  %v635_v52 = vsel %vm632_vm3, %v616_v44, 0.0 }
 0x1f1   : > { %v574_v50 = vpop.f32.mrf.mxu0  ;;  %v637_v55 = vsel %vm634_vm2, %v618_v0, 0.0 }
 0x1f2   : > { %v636_v51 = vsel %vm633_vm8, %v617_v48, 0.0  ;;  %v1136_v53 = vpop.f32.mrf.mxu1  ;;  %v1108_v56 = vpack.c.bf16 %v637_v55, %v637_v55 }
 0x1f3   : > { %v1107_v54 = vpack.c.bf16 %v636_v51, %v635_v52 }
 0x1f5   : > { %649 = vrot.lane.b32.xlu1 %v1107_v54, %s1192_s27 }
 0x1f9   : > { %651 = vrot.lane.b32.xlu1 %v1108_v56, %s1192_s27  ;;  %s251_s27 = scalar_lea.vmem %s1468_s6, %s1151_s23 }
 0x267   : > { %v650_v57 = vpop.permute.xlu1 %649 }
 0x268   : > { %v653_v58 = vrot.slane %v650_v57, 4 }
 0x26a   : > { %v654_v59 = vsel %vm271_vm4, %v653_v58, %v650_v57 }
 0x26b   : > { %658 = vst.msk [vmem:[#allocation2] sm:$0xff] %vm1266_vm5, %v654_v59  ;;  %v652_v60 = vpop.permute.xlu1 %651 }
 0x26c   : > { %v655_v61 = vsel %vm271_vm4, %v653_v58, %v652_v60  ;;  %vm1472_vm4 = vcmask 588800  }
 0x26d   : > { %659 = vst.msk [vmem:[#allocation2 + $0x8] sm:$0xf] %vm280_vm6, %v655_v61  ;;  %vm1473_vm5 = vmmov %vm1472_vm4 }
 0x272   : > { %v1376_v62 = vld [vmem:[#allocation2] sm:$0xff] }
 0x273   : > { %780 = vrot.lane.b32.xlu0 %v1376_v62, %s1193_s28 }
 0x274   : > { %v777_v63 = vld [vmem:[#allocation2 + $0x8] sm:$0xf] }
 0x275   : > { %782 = vrot.lane.b32.xlu1 %v777_v63, %s1193_s28  ;;  %v661_v3 = vld [vmem:[#allocation2 + $0x8] sm:$0xf] }
 0x276   : > { %663 = vst.msk [vmem:[#allocation3 + $0x8] sm:$0xf] %vm285_vm7, %v661_v3  ;;  %v745_v4 = vld [vmem:[#allocation2 + $0x8] sm:$0xf] }
 0x277   : > { %748 = vrot.lane.b32.xlu0 %v1376_v62, %s1194_s29  ;;  %v761_v5 = vld [vmem:[#allocation2 + $0x8] sm:$0xf] }
 0x278   : > { %v713_v6 = vld [vmem:[#allocation2 + $0x8] sm:$0xf] }
 0x279   : > { %750 = vrot.lane.b32.xlu1 %v745_v4, %s1194_s29  ;;  %v729_v7 = vld [vmem:[#allocation2 + $0x8] sm:$0xf] }
 0x27a   : > { %v681_v8 = vld [vmem:[#allocation2 + $0x8] sm:$0xf] }
 0x27b   : > { %764 = vrot.lane.b32.xlu0 %v1376_v62, %s1195_s30  ;;  %v697_v10 = vld [vmem:[#allocation2 + $0x8] sm:$0xf] }
 0x27c   : > { %v665_v11 = vld [vmem:[#allocation2 + $0x8] sm:$0xf] }
 0x27d   : > { %766 = vrot.lane.b32.xlu1 %v761_v5, %s1195_s30 }
 0x27f   : > { %716 = vrot.lane.b32.xlu0 %v1376_v62, %s1197_s7 }
 0x281   : > { %718 = vrot.lane.b32.xlu1 %v713_v6, %s1197_s7 }
 0x283   : > { %732 = vrot.lane.b32.xlu0 %v1376_v62, %s1198_s8 }
 0x285   : > { %734 = vrot.lane.b32.xlu1 %v729_v7, %s1198_s8 }
 0x287   : > { %684 = vrot.lane.b32.xlu0 %v1376_v62, %s1199_s9 }
 0x289   : > { %686 = vrot.lane.b32.xlu1 %v681_v8, %s1199_s9 }
 0x28b   : > { %700 = vrot.lane.b32.xlu0 %v1376_v62, %s1200_s10 }
 0x28d   : > { %702 = vrot.lane.b32.xlu1 %v697_v10, %s1200_s10 }
 0x28f   : > { %668 = vrot.lane.b32.xlu0 %v1376_v62, %s1201_s11 }
 0x291   : > { %670 = vrot.lane.b32.xlu1 %v665_v11, %s1201_s11 }
 0x293   : > { %814 = vperm.xlu0 %1172, %v811_v13  }
 0x2e5   : > { %v781_v14 = vpop.permute.xlu0 %780 }
 0x2e6   : > { %v784_v16 = vrot.slane %v781_v14, 4 }
 0x2e7   : > { %v783_v15 = vpop.permute.xlu1 %782 }
 0x2e8   : > { %v785_v17 = vrot.slane %v783_v15, 4  ;;  %791 = vst.msk [vmem:[#allocation3 + $0x68] sm:$0xf] %vm285_vm7, %v783_v15 }
 0x2e9   : > { %v749_v18 = vpop.permute.xlu0 %748 }
 0x2ea   : > { %v786_v19 = vsel %vm297_vm9, %v784_v16, %v785_v17  ;;  %v752_v22 = vrot.slane %v749_v18, 4 }
 0x2eb   : > { %v787_v20 = vsel %vm418_vm10, %v781_v14, %v786_v19  ;;  %v751_v21 = vpop.permute.xlu1 %750 }
 0x2ec   : > { %v753_v23 = vrot.slane %v751_v21, 4  ;;  %759 = vst.msk [vmem:[#allocation3 + $0x50] sm:$0xf] %vm285_vm7, %v751_v21  ;;  %v1098_v24 = vcombine.high %v787_v20, %v787_v20  ;;  %v1097_v25 = vcombine.low %v787_v20, %v787_v20 }
 0x2ed   : > { %v765_v26 = vpop.permute.xlu0 %764 }
 0x2ee   : > { %v754_v27 = vsel %vm297_vm9, %v752_v22, %v753_v23  ;;  %1100 = vmatprep.subr.msk.bf16.mxu0 %vm297_vm9, %v1098_v24  ;;  %v893_v28 = vsel %vm297_vm9, %v1097_v25, 0  ;;  %v768_v31 = vrot.slane %v765_v26, 4  ;;  %v792_v22 = vld [vmem:[%s1465_s3] sm:$0xf] }
 0x2ef   : > { %v755_v9 = vsel %vm384_vm11, %v749_v18, %v754_v27  ;;  %v767_v29 = vpop.permute.xlu1 %766  ;;  %v1178_v30 = vld [vmem:[#allocation3 + $0x68] ss:$0 sps:$4 sm:$0xff]   ;;  %908 = vmatpush1.bf16.msra.mxu0 %v893_v28 }
 0x2f0   : > { %v769_v32 = vrot.slane %v767_v29, 4  ;;  %775 = vst.msk [vmem:[#allocation3 + $0x5c] sm:$0xf] %vm285_vm7, %v767_v29  ;;  %v899_v34 = vsel %vm297_vm9, %v1178_v30, 0 }
 0x2f1   : > { %v717_v33 = vpop.permute.xlu0 %716  ;;  %1138 = vmatpush3.bf16.msra.mxu1 %v899_v34 }
 0x2f2   : > { %v770_v35 = vsel %vm297_vm9, %v768_v31, %v769_v32  ;;  %1139 = vmatprep.subr.bf16.mxu1 %v1196_v12  ;;  %v720_v40 = vrot.slane %v717_v33, 4 }
 0x2f3   : > { %v771_v36 = vsel %vm401_vm12, %v765_v26, %v770_v35  ;;  %v719_v39 = vpop.permute.xlu1 %718  ;;  %v258_v26 = vunpack.c.h.bf16 %v1258_v1 }
 0x2f4   : > { %v721_v41 = vrot.slane %v719_v39, 4  ;;  %727 = vst.msk [vmem:[#allocation3 + $0x38] sm:$0xf] %vm285_vm7, %v719_v39  ;;  %v1094_v43 = vcombine.low %v755_v9, %v771_v36  ;;  %v1095_v44 = vcombine.high %v755_v9, %v771_v36 }
 0x2f5   : > { %v733_v45 = vpop.permute.xlu0 %732 }
 0x2f6   : > { %v722_v46 = vsel %vm297_vm9, %v720_v40, %v721_v41  ;;  %909 = vmatprep.subr.bf16.mxu0 %v1095_v44  ;;  %v736_v49 = vrot.slane %v733_v45, 4 }
 0x2f7   : > { %v723_v47 = vsel %vm350_vm13, %v717_v33, %v722_v46  ;;  %v735_v0 = vpop.permute.xlu1 %734  ;;  %v1179_v48 = vld [vmem:[#allocation3 + $0x50] ss:$12 sps:$4 sm:$0xff]   ;;  %910 = vmatpush1.bf16.msra.mxu0 %v1094_v43 }
 0x2f8   : > { %v737_v50 = vrot.slane %v735_v0, 4  ;;  %743 = vst.msk [vmem:[#allocation3 + $0x44] sm:$0xf] %vm285_vm7, %v735_v0  ;;  %1140 = vmatpush3.bf16.msra.mxu1 %v1179_v48 }
 0x2f9   : > { %v685_v51 = vpop.permute.xlu0 %684  ;;  %1141 = vmatprep.subr.bf16.mxu1 %v1196_v12 }
 0x2fa   : > { %v738_v52 = vsel %vm297_vm9, %v736_v49, %v737_v50  ;;  %v688_v55 = vrot.slane %v685_v51, 4 }
 0x2fb   : > { %v739_v53 = vsel %vm367_vm14, %v733_v45, %v738_v52  ;;  %v687_v54 = vpop.permute.xlu1 %686 }
 0x2fc   : > { %v689_v56 = vrot.slane %v687_v54, 4  ;;  %695 = vst.msk [vmem:[#allocation3 + $0x20] sm:$0xf] %vm285_vm7, %v687_v54  ;;  %v1091_v57 = vcombine.low %v723_v47, %v739_v53  ;;  %v1092_v58 = vcombine.high %v723_v47, %v739_v53 }
 0x2fd   : > { %v701_v59 = vpop.permute.xlu0 %700 }
 0x2fe   : > { %v690_v60 = vsel %vm297_vm9, %v688_v55, %v689_v56  ;;  %911 = vmatprep.subr.bf16.mxu0 %v1092_v58  ;;  %v704_v4 = vrot.slane %v701_v59, 4 }
 0x2ff   : > { %v691_v61 = vsel %vm316_vm15, %v685_v51, %v690_v60  ;;  %v703_v63 = vpop.permute.xlu1 %702  ;;  %v1180_v3 = vld [vmem:[#allocation3 + $0x38] ss:$12 sps:$4 sm:$0xff]   ;;  %912 = vmatpush1.bf16.msra.mxu0 %v1091_v57 }
 0x300   : > { %v705_v5 = vrot.slane %v703_v63, 4  ;;  %711 = vst.msk [vmem:[#allocation3 + $0x2c] sm:$0xf] %vm285_vm7, %v703_v63  ;;  %1142 = vmatpush3.bf16.msra.mxu1 %v1180_v3 }
 0x301   : > { %v669_v6 = vpop.permute.xlu0 %668  ;;  %1143 = vmatprep.subr.bf16.mxu1 %v1196_v12 }
 0x302   : > { %v706_v7 = vsel %vm297_vm9, %v704_v4, %v705_v5  ;;  %v672_v11 = vrot.slane %v669_v6, 4 }
 0x303   : > { %v707_v8 = vsel %vm333_vm0, %v701_v59, %v706_v7  ;;  %v671_v10 = vpop.permute.xlu1 %670 }
 0x304   : > { %v673_v13 = vrot.slane %v671_v10, 4  ;;  %679 = vst.msk [vmem:[#allocation3 + $0x14] sm:$0xf] %vm285_vm7, %v671_v10  ;;  %v1088_v14 = vcombine.low %v691_v61, %v707_v8  ;;  %v1089_v15 = vcombine.high %v691_v61, %v707_v8 }
 0x306   : > { %v674_v16 = vsel %vm297_vm9, %v672_v11, %v673_v13  ;;  %913 = vmatprep.subr.bf16.mxu0 %v1089_v15 }
 0x307   : > { %v675_v17 = vsel %vm299_vm1, %v669_v6, %v674_v16  ;;  %v1181_v18 = vld [vmem:[#allocation3 + $0x20] ss:$12 sps:$4 sm:$0xff]   ;;  %914 = vmatpush1.bf16.msra.mxu0 %v1088_v14 }
 0x308   : > { %v1085_v19 = vcombine.low %v1376_v62, %v675_v17  ;;  %v1086_v20 = vcombine.high %v1376_v62, %v675_v17  ;;  %1144 = vmatpush3.bf16.msra.mxu1 %v1181_v18  ;;  %v257_v62 = vunpack.c.l.bf16 %v1258_v1 }
 0x309   : > { %1145 = vmatprep.subr.bf16.mxu1 %v1196_v12  ;;  %v259_v12 = vunpack.c.l.bf16 %v1262_v2 }
 0x30a   : > { %915 = vmatprep.subr.bf16.mxu0 %v1086_v20 }
 0x30b   : > { %v1182_v21 = vld [vmem:[#allocation3 + $0x8] ss:$12 sps:$4 sm:$0xff]   ;;  %916 = vmatpush1.bf16.msra.mxu0 %v1085_v19 }
 0x30c   : > { %1146 = vmatpush3.bf16.msra.mxu1 %v1182_v21 }
 0x30e   : > { %1101 = vmatmul.mubr.msk.bf16.vlgmr.msra.gmra.mxu0 %vm1472_vm4, %v792_v22  ;;  %v815_v23 = vpop.permute.xlu0 %814 }
 0x30f   : > { %1148 = vmatmul.mubr.msk.bf16.vlgmr.msra.gmra.mxu1 %vm1473_vm5, %v792_v22 }
 0x3ce   : > { %v935_v24 = vpop.f32.mrf.mxu0 }
 0x3cf   : > { %v936_v25 = vadd.f32 %v935_v24, %v815_v23  ;;  %v976_v27 = vpop.f32.mrf.mxu1 }
 0x3d0   : > { %v937_v28 = vpop.f32.mrf.mxu0  ;;  %v977_v9 = vadd.f32 %v976_v27, %v815_v23 }
 0x3d1   : > { %v982_v29 = vsel %vm632_vm3, %v936_v25, 0.0  ;;  %v938_v30 = vadd.f32 %v937_v28, %v815_v23  ;;  %v1149_v31 = vpop.f32.mrf.mxu1 }
 0x3d2   : > { %v939_v32 = vpop.f32.mrf.mxu0  ;;  %v984_v33 = vsel %vm634_vm2, %v977_v9, 0.0  ;;  %v985_v1 = vadd.f32 %v982_v29, %v257_v62 }
 0x3d3   : > { %v983_v34 = vsel %vm633_vm8, %v938_v30, 0.0  ;;  %v987_v35 = vadd.f32 %v984_v33, %v259_v12  ;;  %v979_v36 = vpop.f32.mrf.mxu1 }
 0x3d4   : > { %v986_v39 = vadd.f32 %v983_v34, %v258_v26  ;;  %v940_v2 = vpop.f32.mrf.mxu0 }
 0x3d5   : > { %v1110_v38 = vpack.c.bf16 %v987_v35, %v987_v35  ;;  %v1150_v41 = vpop.f32.mrf.mxu1 }
 0x3d6   : > { %v1109_v40 = vpack.c.bf16 %v986_v39, %v985_v1 }
 0x3d7   : > { %1002 = vst.msk [vmem:[%s251_s27 + $0x8] sm:$0xf] %vm285_vm7, %v1110_v38 }
 0x3d8   : > { %1001 = vst [vmem:[%s251_s27] sm:$0xff] %v1109_v40 }
 0x3d9 PF: > { %s16_s21 = sadd.s32 1, %s1189_s21  }
 0x3da   : > { %p13_p4 = scmp.ge.s32.totalorder %s16_s21, 4  }
 0x3dc   :  { %15 = sbr.rel (!%p13_p4) target bundleno = 1 (0x1), region = 74 }

// kernel: _lambda_.17
= control target key start
LH: loop header
LB: loop body
LE: loop exit
PB: predicated region body
PF: predicated region fallthrough
CT: control target
= control target key end

     0   :  { %s438_s15 = smov 0   ;;  %s471_s0 = inlined_call_operand.vmem [shape: bf16[2,32,80], index: 0, kind: input, shape index: {}]   ;;  %s472_s1 = inlined_call_operand.vmem [shape: bf16[16,32], index: 1, kind: input, shape index: {}]   ;;  %s473_s2 = inlined_call_operand.vmem [shape: f32[16,1], index: 2, kind: input, shape index: {}]   ;;  %s474_s3 = inlined_call_operand.vmem [shape: f32[1,80], index: 3, kind: input, shape index: {}]   ;;  %s475_s4 = inlined_call_operand.vmem [shape: bf16[2,16,80], index: 4, kind: output, shape index: {}]  }
   0x1 LB: > { %s355_s16 = sadd.s32 4294967295, %s408_s15   ;;  %p359_p0 = scmp.ge.s32.totalorder %s408_s15, 1  ;;  %s408_s15 = sphi %s438_s15, %s14_s15  }
   0x2   : > { %p162_p1 = scmp.lt.s32.totalorder %s408_s15, 3 }
   0x4   : > { %p163_p2 = pnand %p359_p0, %p162_p1 }
   0x5   : > { %p188_p3 = scmp.lt.s32.totalorder (!%p163_p2), %s355_s16, 1 }
   0x6   : > { %166 = sbr.rel (%p163_p2) target bundleno = 225 (0xe1), region = 36 }
   0xb   : > { %v410_v0 = vmov 0.0   ;;  %vm411_vm0 = vmmov 0   ;;  %s477_s16 = smov (!%p188_p3, %s355_s16), 1  ;;  %v412_v1 = vmov 0   ;;  %v205_v2 = vld [vmem:[%s473_s2] sm:$0xff]  ;;  %v206_v3 = vld [vmem:[%s473_s2 + $0x8] sm:$0xff]  ;;  %v282_v7 = vlaneseq }
   0xc   : > { %379 = vmatprep.subr.bf16.mxu0 %v410_v0  ;;  %383 = vmatprep.mubr.msk.bf16.mxu0 %vm411_vm0, %v410_v0  ;;  %s372_s19 = sshll.u32 %s477_s16, 4  ;;  %v401_v6 = vld [vmem:[%s472_s1] sm:$0xff]   ;;  %vm234_vm1 = vcmask 261120   ;;  %s373_s29 = sshll.u32 %s477_s16, 3  ;;  %vm297_vm4 = vcmask 650240  }
   0xd   : > { %398 = vset.pattern.permute.xlu0 %v412_v1  ;;  %s192_s24 = scalar_lea.vmem %s471_s0, %s372_s19  ;;  %v279_v8 = vld [vmem:[%s474_s3] sm:$0x1]  ;;  %v283_v9 = vshrl.u32 %v282_v7, 7  ;;  %s197_s6 = scalar_lea.vmem %s475_s4, %s373_s29 }
   0xe   : > { %209 = vperm.xlu0 %398, %v205_v2   ;;  %v399_v4 = vld [vmem:[%s192_s24 + $0x8] sm:$0xff]   ;;  %v400_v5 = vld [vmem:[%s192_s24] sm:$0xff]   ;;  %vm280_vm2 = vcmp.ne.f32.partialorder %v279_v8, 0.0 }
   0xf   : > { %380 = vmatpush3.bf16.msra.mxu0 %v399_v4  ;;  %v284_v10 = vsub.s32 0, %v283_v9  ;;  %v281_v11 = vsel %vm280_vm2, 1, %v412_v1 }
  0x10   : > { %381 = vmatprep.subr.bf16.mxu0 %v410_v0 }
  0x11   : > { %v285_v12 = vrot.slane %v281_v11, %v284_v10 }
  0x12   : > { %214 = vperm.xlu0 %398, %v206_v3  }
  0x13   : > { %382 = vmatpush3.bf16.msra.mxu0 %v400_v5  ;;  %vm286_vm3 = vcmp.eq.s32.totalorder %v285_v12, 1 }
  0x16   : > { %384 = vmatmul.mubr.msk.bf16.vlgmr.msra.gmra.mxu0 %vm234_vm1, %v401_v6 }
  0x89   : > { %v210_v13 = vpop.permute.xlu0 %209 }
  0x8d   : > { %v215_v18 = vpop.permute.xlu0 %214 }
  0xd6   : > { %v272_v14 = vpop.f32.mrf.mxu0 }
  0xd7   : > { %v273_v15 = vadd.f32 %v272_v14, %v210_v13 }
  0xd8   : > { %v385_v16 = vpop.f32.mrf.mxu0 }
  0xd9   : > { %v287_v17 = vsel %vm286_vm3, %v273_v15, 0.0 }
  0xda   : > { %v374_v19 = vpack.c.bf16 %v287_v17, %v287_v17  ;;  %v275_v20 = vpop.f32.mrf.mxu0 }
  0xdb   : > { %v276_v21 = vadd.f32 %v275_v20, %v215_v18 }
  0xdc   : > { %298 = vst.msk [vmem:[%s197_s6] sm:$0xf] %vm297_vm4, %v374_v19  ;;  %v386_v22 = vpop.f32.mrf.mxu0 }
  0xdd   : > { %v288_v23 = vsel %vm286_vm3, %v276_v21, 0.0 }
  0xde   : > { %v375_v24 = vpack.c.bf16 %v288_v23, %v288_v23 }
  0xe0   : > { %299 = vst.msk [vmem:[%s197_s6 + $0x4] sm:$0xf] %vm297_vm4, %v375_v24 }
  0xe1 PF: > { %s14_s15 = sadd.s32 1, %s408_s15  }
  0xe2   : > { %p11_p4 = scmp.ge.s32.totalorder %s14_s15, 4  }
  0xe4   :  { %13 = sbr.rel (!%p11_p4) target bundleno = 1 (0x1), region = 66 }

// kernel: _lambda_.18
= control target key start
LH: loop header
LB: loop body
LE: loop exit
PB: predicated region body
PF: predicated region fallthrough
CT: control target
= control target key end

     0   :  { %s991_s21 = smov 0   ;;  %s1166_s0 = inlined_call_operand.vmem [shape: bf16[2,16,80], index: 0, kind: input, shape index: {}]   ;;  %s1167_s1 = inlined_call_operand.vmem [shape: bf16[16,144], index: 1, kind: input, shape index: {}]   ;;  %s1168_s2 = inlined_call_operand.vmem [shape: f32[16,1], index: 2, kind: input, shape index: {}]   ;;  %s1169_s3 = inlined_call_operand.vmem [shape: bf16[16,144], index: 3, kind: input, shape index: {}]   ;;  %s1170_s4 = inlined_call_operand.vmem [shape: f32[16,1], index: 4, kind: input, shape index: {}]   ;;  %s1171_s5 = inlined_call_operand.vmem [shape: f32[1,80], index: 5, kind: input, shape index: {}]   ;;  %s1172_s6 = inlined_call_operand.vmem [shape: bf16[2,16,80], index: 6, kind: output, shape index: {}]  }
   0x1 LB: > { %s849_s22 = sadd.s32 4294967295, %s944_s21   ;;  %p853_p0 = scmp.ge.s32.totalorder %s944_s21, 1  ;;  %s944_s21 = sphi %s991_s21, %s16_s21  }
   0x2   : > { %p212_p1 = scmp.lt.s32.totalorder %s944_s21, 3 }
   0x4   : > { %p213_p2 = pnand %p853_p0, %p212_p1 }
   0x5   : > { %p242_p3 = scmp.lt.s32.totalorder (!%p213_p2), %s849_s22, 1  ;;  %s947_s27 = smov (!%p213_p2), 11  }
   0x6   : > { %216 = sbr.rel (%p213_p2) target bundleno = 991 (0x3df), region = 44  ;;  %s948_s28 = smov (!%p213_p2), 107  }
   0x7   : > { %s949_s29 = smov (!%p213_p2), 108   ;;  %s950_s30 = smov (!%p213_p2), 116  }
   0x8   : > { %s951_s7 = smov (!%p213_p2), 117   ;;  %s952_s8 = smov (!%p213_p2), 118  }
   0x9   : > { %s953_s9 = smov (!%p213_p2), 126   ;;  %s954_s10 = smov (!%p213_p2), 127  }
   0xa   : > { %s955_s11 = smov (!%p213_p2), 106  }
   0xb   : > { %vm259_vm0 = vcmask 84992   ;;  %vm262_vm1 = vcmask 896728   ;;  %v946_v0 = vmov 0   ;;  %s1174_s22 = smov (!%p242_p3, %s849_s22), 1  ;;  %vm273_vm2 = vcmask 740440   ;;  %v397_v24 = vld [vmem:[%s1168_s2] sm:$0xff] }
   0xc   : > { %260 = vst.msk [vmem:[#allocation2] sm:$0xf] %vm259_vm0, %v946_v0  ;;  %261 = vst.msk [vmem:[#allocation2 + $0x4] sm:$0xf] %vm259_vm0, %v946_v0  ;;  %476 = vmatprep.subr.bf16.mxu0 %v946_v0  ;;  %912 = vset.pattern.permute.xlu0 %v946_v0  ;;  %s888_s23 = sshll.u32 %s1174_s22, 3  ;;  %vm278_vm3 = vcmask 650240   ;;  %v520_v52 = vlaneseq }
   0xd   : > { %263 = vst.msk [vmem:[#allocation2] sm:$0xf] %vm262_vm1, %v946_v0  ;;  %264 = vst.msk [vmem:[#allocation2 + $0x4] sm:$0xf] %vm262_vm1, %v946_v0  ;;  %913 = vset.pattern.permute.xlu1 %v946_v0  ;;  %739 = vmatprep.subr.bf16.mxu1 %v946_v0  ;;  %s246_s26 = scalar_lea.vmem %s1166_s0, %s888_s23  ;;  %v925_v23 = vld [vmem:[%s1167_s1 + $0x4] ss:$8 sps:$4 sm:$0xff]  }
   0xe   : > { %v1015_v1 = vld [vmem:[%s246_s26] sm:$0xf]  ;;  %v1019_v2 = vld [vmem:[%s246_s26 + $0x4] sm:$0xf]  ;;  %vm472_vm4 = vcmask 130048   ;;  %v398_v25 = vld [vmem:[%s1168_s2 + $0x8] sm:$0xff] }
   0xf   : > { %267 = vrot.lane.b32.xlu0 %v1015_v1, %s947_s27  ;;  %869 = vmatprep.mubr.msk.bf16.mxu0 %vm472_vm4, %v925_v23  ;;  %v923_v51 = vld [vmem:[%s1167_s1] ss:$8 sps:$4 sm:$0xff]   ;;  %v521_v54 = vshrl.u32 %v520_v52, 7 }
  0x10   : > { %v253_v53 = vld [vmem:[%s1171_s5] sm:$0x1] }
  0x11   : > { %vm254_vm5 = vcmp.ne.f32.partialorder %v253_v53, 0.0  ;;  %v522_v55 = vsub.s32 0, %v521_v54 }
  0x12   : > { %v519_v56 = vsel %vm254_vm5, 1, %v946_v0 }
  0x13   : > { %269 = vrot.lane.b32.xlu0 %v1019_v2, %s947_s27  ;;  %v1084_v57 = vrot.slane %v519_v56, %v522_v55 }
  0x15   : > { %vm524_vm6 = vcmp.eq.s32.totalorder %v1084_v57, 1 }
  0x81   : > { %v268_v3 = vpop.permute.xlu0 %267 }
  0x82   : > { %274 = vst.msk [vmem:[#allocation2] sm:$0xf] %vm273_vm2, %v268_v3 }
  0x85   : > { %v270_v4 = vpop.permute.xlu0 %269 }
  0x86   : > { %275 = vst.msk [vmem:[#allocation2 + $0x4] sm:$0xf] %vm273_vm2, %v270_v4 }
  0x89   : > { %v276_v5 = vld [vmem:[#allocation2] sm:$0xf] }
  0x8a   : > { %v353_v6 = vld [vmem:[#allocation2] sm:$0xf]  ;;  %279 = vst.msk [vmem:[#allocation3] sm:$0xf] %vm278_vm3, %v276_v5 }
  0x8b   : > { %v341_v7 = vld [vmem:[#allocation2] sm:$0xf]  ;;  %357 = vrot.lane.b32.xlu1 %v353_v6, %s948_s28 }
  0x8c   : > { %345 = vrot.lane.b32.xlu0 %v341_v7, %s949_s29  ;;  %v329_v9 = vld [vmem:[#allocation2] sm:$0xf] }
  0x8d   : > { %v277_v8 = vld [vmem:[#allocation2 + $0x4] sm:$0xf]  ;;  %v317_v11 = vld [vmem:[#allocation2] sm:$0xf] }
  0x8e   : > { %v354_v10 = vld [vmem:[#allocation2 + $0x4] sm:$0xf]  ;;  %280 = vst.msk [vmem:[#allocation3 + $0x4] sm:$0xf] %vm278_vm3, %v277_v8  ;;  %v305_v13 = vld [vmem:[#allocation2] sm:$0xf] }
  0x8f   : > { %359 = vrot.lane.b32.xlu1 %v354_v10, %s948_s28  ;;  %v342_v12 = vld [vmem:[#allocation2 + $0x4] sm:$0xf]  ;;  %v293_v15 = vld [vmem:[#allocation2] sm:$0xf] }
  0x90   : > { %333 = vrot.lane.b32.xlu0 %v329_v9, %s950_s30  ;;  %v330_v14 = vld [vmem:[#allocation2 + $0x4] sm:$0xf]  ;;  %v281_v17 = vld [vmem:[#allocation2] sm:$0xf] }
  0x91   : > { %v318_v16 = vld [vmem:[#allocation2 + $0x4] sm:$0xf]  ;;  %v365_v19 = vld [vmem:[#allocation2] sm:$0xf] }
  0x92   : > { %v306_v18 = vld [vmem:[#allocation2 + $0x4] sm:$0xf] }
  0x93   : > { %347 = vrot.lane.b32.xlu1 %v342_v12, %s949_s29  ;;  %v294_v20 = vld [vmem:[#allocation2 + $0x4] sm:$0xf] }
  0x94   : > { %321 = vrot.lane.b32.xlu0 %v317_v11, %s951_s7  ;;  %v282_v21 = vld [vmem:[#allocation2 + $0x4] sm:$0xf] }
  0x95   : > { %v366_v22 = vld [vmem:[#allocation2 + $0x4] sm:$0xf]  ;;  %v921_v49 = vld [vmem:[#allocation3] sm:$0xff]  }
  0x97   : > { %335 = vrot.lane.b32.xlu1 %v330_v14, %s950_s30 }
  0x98   : > { %309 = vrot.lane.b32.xlu0 %v305_v13, %s952_s8 }
  0x9b   : > { %323 = vrot.lane.b32.xlu1 %v318_v16, %s951_s7 }
  0x9c   : > { %297 = vrot.lane.b32.xlu0 %v293_v15, %s953_s9 }
  0x9f   : > { %311 = vrot.lane.b32.xlu1 %v306_v18, %s952_s8 }
  0xa0   : > { %285 = vrot.lane.b32.xlu0 %v281_v17, %s954_s10 }
  0xa3   : > { %299 = vrot.lane.b32.xlu1 %v294_v20, %s953_s9 }
  0xa4   : > { %369 = vrot.lane.b32.xlu0 %v365_v19, %s955_s11 }
  0xa7   : > { %287 = vrot.lane.b32.xlu1 %v282_v21, %s954_s10 }
  0xa8   : > { %401 = vperm.xlu0 %912, %v397_v24  }
  0xab   : > { %371 = vrot.lane.b32.xlu1 %v366_v22, %s955_s11 }
  0xaf   : > { %406 = vperm.xlu1 %913, %v398_v25  }
  0xfd   : > { %v358_v26 = vpop.permute.xlu1 %357 }
  0xfe   : > { %v346_v27 = vpop.permute.xlu0 %345  ;;  %363 = vst.msk [vmem:[#allocation3 + $0x38] sm:$0xf] %vm278_vm3, %v358_v26 }
  0xff   : > { %351 = vst.msk [vmem:[#allocation3 + $0x30] sm:$0xf] %vm278_vm3, %v346_v27 }
 0x101   : > { %v360_v28 = vpop.permute.xlu1 %359 }
 0x102   : > { %v334_v29 = vpop.permute.xlu0 %333  ;;  %364 = vst.msk [vmem:[#allocation3 + $0x3c] sm:$0xf] %vm278_vm3, %v360_v28 }
 0x103   : > { %339 = vst.msk [vmem:[#allocation3 + $0x28] sm:$0xf] %vm278_vm3, %v334_v29 }
 0x105   : > { %v348_v30 = vpop.permute.xlu1 %347 }
 0x106   : > { %v322_v31 = vpop.permute.xlu0 %321  ;;  %352 = vst.msk [vmem:[#allocation3 + $0x34] sm:$0xf] %vm278_vm3, %v348_v30  ;;  %v661_v30 = vld [vmem:[%s1170_s4] sm:$0xff] }
 0x107   : > { %327 = vst.msk [vmem:[#allocation3 + $0x20] sm:$0xf] %vm278_vm3, %v322_v31 }
 0x109   : > { %v336_v32 = vpop.permute.xlu1 %335  ;;  %v914_v34 = vld [vmem:[#allocation3 + $0x38] sm:$0xff]  }
 0x10a   : > { %v310_v33 = vpop.permute.xlu0 %309  ;;  %340 = vst.msk [vmem:[#allocation3 + $0x2c] sm:$0xf] %vm278_vm3, %v336_v32  ;;  %477 = vmatpush1.bf16.msra.mxu0 %v914_v34  ;;  %v937_v32 = vld [vmem:[%s1169_s3 + $0x4] ss:$8 sps:$4 sm:$0xff]  }
 0x10b   : > { %315 = vst.msk [vmem:[#allocation3 + $0x18] sm:$0xf] %vm278_vm3, %v310_v33  ;;  %478 = vmatprep.subr.bf16.mxu0 %v946_v0  ;;  %v662_v33 = vld [vmem:[%s1170_s4 + $0x8] sm:$0xff]  ;;  %883 = vmatprep.mubr.msk.bf16.mxu1 %vm472_vm4, %v937_v32 }
 0x10d   : > { %v324_v35 = vpop.permute.xlu1 %323  ;;  %v915_v37 = vld [vmem:[#allocation3 + $0x30] sm:$0xff]  }
 0x10e   : > { %v298_v36 = vpop.permute.xlu0 %297  ;;  %328 = vst.msk [vmem:[#allocation3 + $0x24] sm:$0xf] %vm278_vm3, %v324_v35  ;;  %479 = vmatpush1.bf16.msra.mxu0 %v915_v37 }
 0x10f   : > { %303 = vst.msk [vmem:[#allocation3 + $0x10] sm:$0xf] %vm278_vm3, %v298_v36  ;;  %480 = vmatprep.subr.bf16.mxu0 %v946_v0 }
 0x111   : > { %v312_v38 = vpop.permute.xlu1 %311  ;;  %v916_v40 = vld [vmem:[#allocation3 + $0x28] sm:$0xff]  }
 0x112   : > { %v286_v39 = vpop.permute.xlu0 %285  ;;  %316 = vst.msk [vmem:[#allocation3 + $0x1c] sm:$0xf] %vm278_vm3, %v312_v38  ;;  %481 = vmatpush1.bf16.msra.mxu0 %v916_v40 }
 0x113   : > { %291 = vst.msk [vmem:[#allocation3 + $0x8] sm:$0xf] %vm278_vm3, %v286_v39  ;;  %482 = vmatprep.subr.bf16.mxu0 %v946_v0 }
 0x115   : > { %v300_v41 = vpop.permute.xlu1 %299  ;;  %v917_v43 = vld [vmem:[#allocation3 + $0x20] sm:$0xff]  }
 0x116   : > { %v370_v42 = vpop.permute.xlu0 %369  ;;  %304 = vst.msk [vmem:[#allocation3 + $0x14] sm:$0xf] %vm278_vm3, %v300_v41  ;;  %483 = vmatpush1.bf16.msra.mxu0 %v917_v43 }
 0x117   : > { %375 = vst.msk [vmem:[#allocation3 + $0x40] sm:$0xf] %vm278_vm3, %v370_v42  ;;  %484 = vmatprep.subr.bf16.mxu0 %v946_v0 }
 0x119   : > { %v288_v44 = vpop.permute.xlu1 %287  ;;  %v918_v45 = vld [vmem:[#allocation3 + $0x18] sm:$0xff]  }
 0x11a   : > { %292 = vst.msk [vmem:[#allocation3 + $0xc] sm:$0xf] %vm278_vm3, %v288_v44  ;;  %485 = vmatpush1.bf16.msra.mxu0 %v918_v45 }
 0x11b   : > { %486 = vmatprep.subr.bf16.mxu0 %v946_v0 }
 0x11d   : > { %v372_v46 = vpop.permute.xlu1 %371  ;;  %v919_v47 = vld [vmem:[#allocation3 + $0x10] sm:$0xff]  }
 0x11e   : > { %376 = vst.msk [vmem:[#allocation3 + $0x44] sm:$0xf] %vm278_vm3, %v372_v46  ;;  %487 = vmatpush1.bf16.msra.mxu0 %v919_v47 }
 0x11f   : > { %488 = vmatprep.subr.bf16.mxu0 %v946_v0 }
 0x121   : > { %v920_v48 = vld [vmem:[#allocation3 + $0x8] sm:$0xff]  }
 0x122   : > { %489 = vmatpush1.bf16.msra.mxu0 %v920_v48 }
 0x123   : > { %490 = vmatprep.subr.bf16.mxu0 %v946_v0  ;;  %v402_v58 = vpop.permute.xlu0 %401 }
 0x125   : > { %v922_v50 = vld [vmem:[#allocation3 + $0x40] sm:$0xff]  }
 0x126   : > { %491 = vmatpush1.bf16.msra.mxu0 %v921_v49 }
 0x127   : > { %506 = vmatprep.subr.bf16.mxu0 %v946_v0 }
 0x12a   : > { %507 = vmatpush2.bf16.msra.mxu0 %v922_v50  ;;  %v407_v62 = vpop.permute.xlu1 %406 }
 0x12d   : > { %509 = vmatmul.mubr.bf16.vlgmr.msra.gmra.mxu0 %v923_v51 }
 0x1ed   : > { %v510_v59 = vpop.f32.mrf.mxu0 }
 0x1ee   : > { %v511_v60 = vadd.f32 %v510_v59, %v402_v58 }
 0x1ef   : > { %v512_v61 = vpop.f32.mrf.mxu0 }
 0x1f0   : > { %v517_v63 = vmax.f32 %v511_v60, 0.0  ;;  %v935_v60 = vld [vmem:[%s1169_s3] ss:$8 sps:$4 sm:$0xff]   ;;  %v257_v61 = vunpack.c.l.bf16 %v1015_v1 }
 0x1f1   : > { %v513_v3 = vpop.f32.mrf.mxu0 }
 0x1f2   : > { %v525_v4 = vsel %vm524_vm6, %v517_v63, 0.0  ;;  %v514_v5 = vadd.f32 %v513_v3, %v407_v62 }
 0x1f3   : > { %v890_v6 = vpack.c.bf16 %v525_v4, %v525_v4  ;;  %v515_v7 = vpop.f32.mrf.mxu0 }
 0x1f4   : > { %v518_v8 = vmax.f32 %v514_v5, 0.0 }
 0x1f5   : > { %533 = vrot.lane.b32.xlu1 %v890_v6, %s947_s27  ;;  %v258_v6 = vunpack.c.l.bf16 %v1019_v2 }
 0x1f6   : > { %v526_v9 = vsel %vm524_vm6, %v518_v8, 0.0 }
 0x1f7   : > { %v891_v10 = vpack.c.bf16 %v526_v9, %v526_v9 }
 0x1f9   : > { %535 = vrot.lane.b32.xlu0 %v891_v10, %s947_s27 }
 0x267   : > { %v534_v11 = vpop.permute.xlu1 %533 }
 0x268   : > { %539 = vst.msk [vmem:[#allocation2] sm:$0xf] %vm273_vm2, %v534_v11 }
 0x26b   : > { %v536_v12 = vpop.permute.xlu0 %535 }
 0x26c   : > { %540 = vst.msk [vmem:[#allocation2 + $0x4] sm:$0xf] %vm273_vm2, %v536_v12 }
 0x26f   : > { %v617_v13 = vld [vmem:[#allocation2] sm:$0xf] }
 0x270   : > { %621 = vrot.lane.b32.xlu1 %v617_v13, %s948_s28  ;;  %v541_v14 = vld [vmem:[#allocation2] sm:$0xf] }
 0x271   : > { %543 = vst.msk [vmem:[#allocation3] sm:$0xf] %vm278_vm3, %v541_v14  ;;  %v605_v15 = vld [vmem:[#allocation2] sm:$0xf] }
 0x272   : > { %v593_v18 = vld [vmem:[#allocation2] sm:$0xf] }
 0x273   : > { %v618_v16 = vld [vmem:[#allocation2 + $0x4] sm:$0xf]  ;;  %v581_v20 = vld [vmem:[#allocation2] sm:$0xf] }
 0x274   : > { %609 = vrot.lane.b32.xlu1 %v605_v15, %s949_s29  ;;  %623 = vrot.lane.b32.xlu0 %v618_v16, %s948_s28  ;;  %v542_v17 = vld [vmem:[#allocation2 + $0x4] sm:$0xf]  ;;  %v569_v22 = vld [vmem:[#allocation2] sm:$0xf] }
 0x275   : > { %544 = vst.msk [vmem:[#allocation3 + $0x4] sm:$0xf] %vm278_vm3, %v542_v17  ;;  %v606_v19 = vld [vmem:[#allocation2 + $0x4] sm:$0xf]  ;;  %v557_v24 = vld [vmem:[#allocation2] sm:$0xf] }
 0x276   : > { %v594_v21 = vld [vmem:[#allocation2 + $0x4] sm:$0xf]  ;;  %v545_v26 = vld [vmem:[#allocation2] sm:$0xf] }
 0x277   : > { %v582_v23 = vld [vmem:[#allocation2 + $0x4] sm:$0xf]  ;;  %v629_v28 = vld [vmem:[#allocation2] sm:$0xf] }
 0x278   : > { %597 = vrot.lane.b32.xlu1 %v593_v18, %s950_s30  ;;  %611 = vrot.lane.b32.xlu0 %v606_v19, %s949_s29  ;;  %v570_v25 = vld [vmem:[#allocation2 + $0x4] sm:$0xf] }
 0x279   : > { %v558_v27 = vld [vmem:[#allocation2 + $0x4] sm:$0xf] }
 0x27a   : > { %v546_v29 = vld [vmem:[#allocation2 + $0x4] sm:$0xf] }
 0x27b   : > { %v630_v31 = vld [vmem:[#allocation2 + $0x4] sm:$0xf] }
 0x27c   : > { %585 = vrot.lane.b32.xlu1 %v581_v20, %s951_s7  ;;  %599 = vrot.lane.b32.xlu0 %v594_v21, %s950_s30  ;;  %v933_v58 = vld [vmem:[#allocation3] sm:$0xff]  }
 0x280   : > { %573 = vrot.lane.b32.xlu1 %v569_v22, %s952_s8  ;;  %587 = vrot.lane.b32.xlu0 %v582_v23, %s951_s7 }
 0x284   : > { %561 = vrot.lane.b32.xlu1 %v557_v24, %s953_s9  ;;  %575 = vrot.lane.b32.xlu0 %v570_v25, %s952_s8 }
 0x288   : > { %549 = vrot.lane.b32.xlu1 %v545_v26, %s954_s10  ;;  %563 = vrot.lane.b32.xlu0 %v558_v27, %s953_s9 }
 0x28c   : > { %633 = vrot.lane.b32.xlu1 %v629_v28, %s955_s11  ;;  %551 = vrot.lane.b32.xlu0 %v546_v29, %s954_s10 }
 0x290   : > { %665 = vperm.xlu1 %913, %v661_v30   ;;  %635 = vrot.lane.b32.xlu0 %v630_v31, %s955_s11  ;;  %s251_s11 = scalar_lea.vmem %s1172_s6, %s888_s23 }
 0x294   : > { %670 = vperm.xlu0 %912, %v662_v33  }
 0x2e2   : > { %v622_v34 = vpop.permute.xlu1 %621 }
 0x2e3   : > { %627 = vst.msk [vmem:[#allocation3 + $0x38] sm:$0xf] %vm278_vm3, %v622_v34 }
 0x2e6   : > { %v610_v35 = vpop.permute.xlu1 %609  ;;  %v624_v36 = vpop.permute.xlu0 %623 }
 0x2e7   : > { %615 = vst.msk [vmem:[#allocation3 + $0x30] sm:$0xf] %vm278_vm3, %v610_v35  ;;  %628 = vst.msk [vmem:[#allocation3 + $0x3c] sm:$0xf] %vm278_vm3, %v624_v36 }
 0x2ea   : > { %v598_v37 = vpop.permute.xlu1 %597  ;;  %v612_v38 = vpop.permute.xlu0 %611 }
 0x2eb   : > { %603 = vst.msk [vmem:[#allocation3 + $0x28] sm:$0xf] %vm278_vm3, %v598_v37  ;;  %616 = vst.msk [vmem:[#allocation3 + $0x34] sm:$0xf] %vm278_vm3, %v612_v38 }
 0x2ee   : > { %v586_v39 = vpop.permute.xlu1 %585  ;;  %v600_v40 = vpop.permute.xlu0 %599  ;;  %v926_v41 = vld [vmem:[#allocation3 + $0x38] sm:$0xff]  }
 0x2ef   : > { %591 = vst.msk [vmem:[#allocation3 + $0x20] sm:$0xf] %vm278_vm3, %v586_v39  ;;  %604 = vst.msk [vmem:[#allocation3 + $0x2c] sm:$0xf] %vm278_vm3, %v600_v40  ;;  %740 = vmatpush1.bf16.msra.mxu1 %v926_v41 }
 0x2f0   : > { %741 = vmatprep.subr.bf16.mxu1 %v946_v0 }
 0x2f2   : > { %v574_v42 = vpop.permute.xlu1 %573  ;;  %v588_v43 = vpop.permute.xlu0 %587  ;;  %v927_v44 = vld [vmem:[#allocation3 + $0x30] sm:$0xff]  }
 0x2f3   : > { %579 = vst.msk [vmem:[#allocation3 + $0x18] sm:$0xf] %vm278_vm3, %v574_v42  ;;  %592 = vst.msk [vmem:[#allocation3 + $0x24] sm:$0xf] %vm278_vm3, %v588_v43  ;;  %742 = vmatpush1.bf16.msra.mxu1 %v927_v44 }
 0x2f4   : > { %743 = vmatprep.subr.bf16.mxu1 %v946_v0 }
 0x2f6   : > { %v562_v45 = vpop.permute.xlu1 %561  ;;  %v576_v46 = vpop.permute.xlu0 %575  ;;  %v928_v47 = vld [vmem:[#allocation3 + $0x28] sm:$0xff]  }
 0x2f7   : > { %567 = vst.msk [vmem:[#allocation3 + $0x10] sm:$0xf] %vm278_vm3, %v562_v45  ;;  %580 = vst.msk [vmem:[#allocation3 + $0x1c] sm:$0xf] %vm278_vm3, %v576_v46  ;;  %744 = vmatpush1.bf16.msra.mxu1 %v928_v47 }
 0x2f8   : > { %745 = vmatprep.subr.bf16.mxu1 %v946_v0 }
 0x2fa   : > { %v550_v48 = vpop.permute.xlu1 %549  ;;  %v564_v49 = vpop.permute.xlu0 %563  ;;  %v929_v50 = vld [vmem:[#allocation3 + $0x20] sm:$0xff]  }
 0x2fb   : > { %555 = vst.msk [vmem:[#allocation3 + $0x8] sm:$0xf] %vm278_vm3, %v550_v48  ;;  %568 = vst.msk [vmem:[#allocation3 + $0x14] sm:$0xf] %vm278_vm3, %v564_v49  ;;  %746 = vmatpush1.bf16.msra.mxu1 %v929_v50 }
 0x2fc   : > { %747 = vmatprep.subr.bf16.mxu1 %v946_v0 }
 0x2fe   : > { %v634_v51 = vpop.permute.xlu1 %633  ;;  %v552_v52 = vpop.permute.xlu0 %551  ;;  %v930_v53 = vld [vmem:[#allocation3 + $0x18] sm:$0xff]  }
 0x2ff   : > { %639 = vst.msk [vmem:[#allocation3 + $0x40] sm:$0xf] %vm278_vm3, %v634_v51  ;;  %556 = vst.msk [vmem:[#allocation3 + $0xc] sm:$0xf] %vm278_vm3, %v552_v52  ;;  %748 = vmatpush1.bf16.msra.mxu1 %v930_v53 }
 0x300   : > { %749 = vmatprep.subr.bf16.mxu1 %v946_v0 }
 0x302   : > { %v636_v54 = vpop.permute.xlu0 %635  ;;  %v931_v55 = vld [vmem:[#allocation3 + $0x10] sm:$0xff]  }
 0x303   : > { %640 = vst.msk [vmem:[#allocation3 + $0x44] sm:$0xf] %vm278_vm3, %v636_v54  ;;  %750 = vmatpush1.bf16.msra.mxu1 %v931_v55 }
 0x304   : > { %751 = vmatprep.subr.bf16.mxu1 %v946_v0 }
 0x306   : > { %v932_v56 = vld [vmem:[#allocation3 + $0x8] sm:$0xff]  }
 0x307   : > { %752 = vmatpush1.bf16.msra.mxu1 %v932_v56 }
 0x308   : > { %753 = vmatprep.subr.bf16.mxu1 %v946_v0 }
 0x30a   : > { %v934_v59 = vld [vmem:[#allocation3 + $0x40] sm:$0xff]  }
 0x30b   : > { %754 = vmatpush1.bf16.msra.mxu1 %v933_v58  ;;  %v666_v62 = vpop.permute.xlu1 %665 }
 0x30c   : > { %769 = vmatprep.subr.bf16.mxu1 %v946_v0 }
 0x30f   : > { %770 = vmatpush2.bf16.msra.mxu1 %v934_v59  ;;  %v671_v7 = vpop.permute.xlu0 %670 }
 0x312   : > { %772 = vmatmul.mubr.bf16.vlgmr.msra.gmra.mxu1 %v935_v60 }
 0x3d2   : > { %v773_v63 = vpop.f32.mrf.mxu1 }
 0x3d3   : > { %v774_v3 = vadd.f32 %v773_v63, %v666_v62 }
 0x3d4   : > { %v775_v4 = vpop.f32.mrf.mxu1 }
 0x3d5   : > { %v780_v5 = vsel %vm524_vm6, %v774_v3, 0.0 }
 0x3d6   : > { %v782_v0 = vadd.f32 %v780_v5, %v257_v61  ;;  %v776_v8 = vpop.f32.mrf.mxu1 }
 0x3d7   : > { %v777_v9 = vadd.f32 %v776_v8, %v671_v7 }
 0x3d8   : > { %v892_v10 = vpack.c.bf16 %v782_v0, %v782_v0  ;;  %v778_v1 = vpop.f32.mrf.mxu1 }
 0x3d9   : > { %v781_v11 = vsel %vm524_vm6, %v777_v9, 0.0 }
 0x3da   : > { %792 = vst.msk [vmem:[%s251_s11] sm:$0xf] %vm278_vm3, %v892_v10  ;;  %v783_v12 = vadd.f32 %v781_v11, %v258_v6 }
 0x3dc   : > { %v893_v13 = vpack.c.bf16 %v783_v12, %v783_v12 }
 0x3de   : > { %793 = vst.msk [vmem:[%s251_s11 + $0x4] sm:$0xf] %vm278_vm3, %v893_v13 }
 0x3df PF: > { %s16_s21 = sadd.s32 1, %s944_s21  }
 0x3e0   : > { %p13_p4 = scmp.ge.s32.totalorder %s16_s21, 4  }
 0x3e2   :  { %15 = sbr.rel (!%p13_p4) target bundleno = 1 (0x1), region = 74 }

// kernel: _lambda_.19
= control target key start
LH: loop header
LB: loop body
LE: loop exit
PB: predicated region body
PF: predicated region fallthrough
CT: control target
= control target key end

     0   :  { %s511_s15 = smov 0   ;;  %s563_s0 = inlined_call_operand.vmem [shape: bf16[2,64,24], index: 0, kind: input, shape index: {}]   ;;  %s564_s1 = inlined_call_operand.vmem [shape: bf16[32,64], index: 1, kind: input, shape index: {}]   ;;  %s565_s2 = inlined_call_operand.vmem [shape: f32[32,1], index: 2, kind: input, shape index: {}]   ;;  %s566_s3 = inlined_call_operand.vmem [shape: f32[1,24], index: 3, kind: input, shape index: {}]   ;;  %s567_s4 = inlined_call_operand.vmem [shape: bf16[2,32,24], index: 4, kind: output, shape index: {}]  }
   0x1 LB: > { %s413_s16 = sadd.s32 4294967295, %s483_s15   ;;  %p417_p0 = scmp.ge.s32.totalorder %s483_s15, 1  ;;  %s483_s15 = sphi %s511_s15, %s14_s15  }
   0x2   : > { %p162_p1 = scmp.lt.s32.totalorder %s483_s15, 3 }
   0x4   : > { %p163_p2 = pnand %p417_p0, %p162_p1 }
   0x5   : > { %p188_p3 = scmp.lt.s32.totalorder (!%p163_p2), %s413_s16, 1 }
   0x6   : > { %166 = sbr.rel (%p163_p2) target bundleno = 236 (0xec), region = 36 }
   0xb   : > { %v475_v0 = vld [vmem:[%s564_s1] sm:$0xff]   ;;  %vm269_vm0 = vcmask 523264   ;;  %s569_s16 = smov (!%p188_p3, %s413_s16), 1  ;;  %v213_v1 = vld [vmem:[%s565_s2 + $0x10] sm:$0xff]  ;;  %v485_v2 = vmov 0   ;;  %v214_v4 = vld [vmem:[%s565_s2 + $0x18] sm:$0xff]  ;;  %v328_v11 = vlaneseq }
   0xc   : > { %456 = vmatprep.mubr.msk.bf16.mxu0 %vm269_vm0, %v475_v0  ;;  %470 = vset.pattern.permute.xlu1 %v485_v2  ;;  %v211_v3 = vld [vmem:[%s565_s2] sm:$0xff]  ;;  %s436_s23 = sshll.u32 %s569_s16, 5  ;;  %v212_v5 = vld [vmem:[%s565_s2 + $0x8] sm:$0xff]  ;;  %s437_s9 = sshll.u32 %s569_s16, 4  ;;  %vm353_vm3 = vcmask 191488  }
   0xd   : > { %469 = vset.pattern.permute.xlu0 %v485_v2  ;;  %227 = vperm.xlu1 %470, %v213_v1   ;;  %s192_s26 = scalar_lea.vmem %s563_s0, %s436_s23  ;;  %v476_v10 = vld [vmem:[%s564_s1 + $0x8] sm:$0xff]   ;;  %v325_v12 = vld [vmem:[%s566_s3] sm:$0x1]  ;;  %v329_v13 = vshrl.u32 %v328_v11, 7  ;;  %s197_s12 = scalar_lea.vmem %s567_s4, %s437_s9 }
   0xe   : > { %217 = vperm.xlu0 %469, %v211_v3   ;;  %v471_v6 = vld [vmem:[%s192_s26 + $0x18] sm:$0xff]   ;;  %v472_v7 = vld [vmem:[%s192_s26 + $0x10] sm:$0xff]   ;;  %v473_v8 = vld [vmem:[%s192_s26 + $0x8] sm:$0xff]   ;;  %vm326_vm1 = vcmp.ne.f32.partialorder %v325_v12, 0.0 }
   0xf   : > { %448 = vmatprep.subr.bf16.mxu0 %v471_v6  ;;  %v474_v9 = vld [vmem:[%s192_s26] sm:$0xff]   ;;  %v330_v14 = vsub.s32 0, %v329_v13  ;;  %v327_v15 = vsel %vm326_vm1, 1, %v485_v2 }
  0x10   : > { %449 = vmatpush3.bf16.msra.mxu0 %v471_v6 }
  0x11   : > { %232 = vperm.xlu1 %470, %v214_v4   ;;  %450 = vmatprep.subr.bf16.mxu0 %v472_v7  ;;  %v331_v16 = vrot.slane %v327_v15, %v330_v14 }
  0x12   : > { %222 = vperm.xlu0 %469, %v212_v5  }
  0x13   : > { %vm332_vm2 = vcmp.eq.s32.totalorder %v331_v16, 1 }
  0x14   : > { %451 = vmatpush3.bf16.msra.mxu0 %v472_v7 }
  0x15   : > { %452 = vmatprep.subr.bf16.mxu0 %v473_v8 }
  0x18   : > { %453 = vmatpush3.bf16.msra.mxu0 %v473_v8 }
  0x19   : > { %454 = vmatprep.subr.bf16.mxu0 %v474_v9 }
  0x1c   : > { %455 = vmatpush3.bf16.msra.mxu0 %v474_v9 }
  0x1f   : > { %457 = vmatmul.mubr.msk.bf16.vlgmr.msra.gmra.mxu0 %vm269_vm0, %v476_v10 }
  0x88   : > { %v228_v17 = vpop.permute.xlu1 %227 }
  0x89   : > { %v218_v18 = vpop.permute.xlu0 %217 }
  0x8c   : > { %v233_v25 = vpop.permute.xlu1 %232 }
  0x8d   : > { %v223_v29 = vpop.permute.xlu0 %222 }
  0xdf   : > { %v458_v19 = vpop.f32.mrf.mxu0 }
  0xe0   : > { %v319_v20 = vadd.f32 %v458_v19, %v228_v17 }
  0xe1   : > { %v310_v21 = vpop.f32.mrf.mxu0 }
  0xe2   : > { %v335_v22 = vsel %vm332_vm2, %v319_v20, 0.0  ;;  %v311_v23 = vadd.f32 %v310_v21, %v218_v18 }
  0xe3   : > { %v440_v24 = vpack.c.bf16 %v335_v22, %v335_v22  ;;  %v459_v26 = vpop.f32.mrf.mxu0 }
  0xe4   : > { %v333_v27 = vsel %vm332_vm2, %v311_v23, 0.0  ;;  %v322_v28 = vadd.f32 %v459_v26, %v233_v25 }
  0xe5   : > { %356 = vst.msk [vmem:[%s197_s12 + $0x8] sm:$0xf] %vm353_vm3, %v440_v24  ;;  %v438_v30 = vpack.c.bf16 %v333_v27, %v333_v27  ;;  %v313_v31 = vpop.f32.mrf.mxu0 }
  0xe6   : > { %v336_v32 = vsel %vm332_vm2, %v322_v28, 0.0  ;;  %v314_v33 = vadd.f32 %v313_v31, %v223_v29 }
  0xe7   : > { %354 = vst.msk [vmem:[%s197_s12] sm:$0xf] %vm353_vm3, %v438_v30  ;;  %v441_v34 = vpack.c.bf16 %v336_v32, %v336_v32 }
  0xe8   : > { %v334_v35 = vsel %vm332_vm2, %v314_v33, 0.0 }
  0xe9   : > { %357 = vst.msk [vmem:[%s197_s12 + $0xc] sm:$0xf] %vm353_vm3, %v441_v34  ;;  %v439_v36 = vpack.c.bf16 %v334_v35, %v334_v35 }
  0xeb   : > { %355 = vst.msk [vmem:[%s197_s12 + $0x4] sm:$0xf] %vm353_vm3, %v439_v36 }
  0xec PF: > { %s14_s15 = sadd.s32 1, %s483_s15  }
  0xed   : > { %p11_p4 = scmp.ge.s32.totalorder %s14_s15, 4  }
  0xef   :  { %13 = sbr.rel (!%p11_p4) target bundleno = 1 (0x1), region = 66 }

// kernel: _lambda_.25
= control target key start
LH: loop header
LB: loop body
LE: loop exit
PB: predicated region body
PF: predicated region fallthrough
CT: control target
= control target key end

     0   :  { %s511_s12 = smov 0   ;;  %s577_s0 = inlined_call_operand.vmem [shape: bf16[2,32,24], index: 0, kind: input, shape index: {}]   ;;  %s578_s1 = inlined_call_operand.vmem [shape: bf16[64,32], index: 1, kind: input, shape index: {}]   ;;  %s579_s2 = inlined_call_operand.vmem [shape: f32[1,24], index: 2, kind: input, shape index: {}]   ;;  %s580_s3 = inlined_call_operand.vmem [shape: bf16[2,64,24], index: 3, kind: output, shape index: {}]  }
   0x1 LB: > { %s406_s13 = sadd.s32 4294967295, %s488_s12   ;;  %p410_p0 = scmp.ge.s32.totalorder %s488_s12, 1  ;;  %s488_s12 = sphi %s511_s12, %s13_s12  }
   0x2   : > { %p137_p1 = scmp.lt.s32.totalorder %s488_s12, 3 }
   0x4   : > { %p138_p2 = pnand %p410_p0, %p137_p1 }
   0x5   : > { %p161_p3 = scmp.lt.s32.totalorder (!%p138_p2), %s406_s13, 1 }
   0x6   : > { %141 = sbr.rel (%p138_p2) target bundleno = 226 (0xe2), region = 32 }
   0xb   : > { %v478_v0 = vld [vmem:[%s578_s1] sm:$0xff]   ;;  %vm216_vm0 = vcmask 261120   ;;  %v479_v1 = vld [vmem:[%s578_s1 + $0x10] sm:$0xff]   ;;  %s582_s13 = smov (!%p161_p3, %s406_s13), 1  ;;  %v480_v4 = vld [vmem:[%s578_s1 + $0x8] sm:$0xff]   ;;  %v297_v6 = vlaneseq  ;;  %v490_v10 = vmov 0  }
   0xc   : > { %455 = vmatprep.mubr.msk.bf16.mxu0 %vm216_vm0, %v478_v0  ;;  %459 = vmatprep.mubr.msk.bf16.mxu1 %vm216_vm0, %v479_v1  ;;  %s435_s18 = sshll.u32 %s582_s13, 4  ;;  %v481_v5 = vld [vmem:[%s578_s1 + $0x18] sm:$0xff]   ;;  %v294_v7 = vld [vmem:[%s579_s2] sm:$0x1]  ;;  %s436_s28 = sshll.u32 %s582_s13, 5  ;;  %vm342_vm3 = vcmask 191488  }
   0xd   : > { %s165_s21 = scalar_lea.vmem %s577_s0, %s435_s18  ;;  %v298_v8 = vshrl.u32 %v297_v6, 7  ;;  %vm295_vm1 = vcmp.ne.f32.partialorder %v294_v7, 0.0  ;;  %s548_s4 = scalar_lea.vmem %s580_s3, %s436_s28 }
   0xe   : > { %v476_v2 = vld [vmem:[%s165_s21 + $0x8] sm:$0xff]   ;;  %v477_v3 = vld [vmem:[%s165_s21] sm:$0xff]   ;;  %v296_v11 = vsel %vm295_vm1, 1, %v490_v10 }
   0xf   : > { %451 = vmatprep.subr.bf16.mxu0 %v476_v2  ;;  %463 = vmatprep.subr.bf16.mxu1 %v476_v2  ;;  %v299_v9 = vsub.s32 0, %v298_v8 }
  0x10   : > { %452 = vmatpush3.bf16.msra.mxu0 %v476_v2  ;;  %465 = vmatpush3.bf16.msra.mxu1 %v476_v2 }
  0x11   : > { %453 = vmatprep.subr.bf16.mxu0 %v477_v3  ;;  %464 = vmatprep.subr.bf16.mxu1 %v477_v3  ;;  %v300_v12 = vrot.slane %v296_v11, %v299_v9 }
  0x13   : > { %vm301_vm2 = vcmp.eq.s32.totalorder %v300_v12, 1 }
  0x14   : > { %454 = vmatpush3.bf16.msra.mxu0 %v477_v3  ;;  %466 = vmatpush3.bf16.msra.mxu1 %v477_v3 }
  0x17   : > { %456 = vmatmul.mubr.msk.bf16.vlgmr.msra.gmra.mxu0 %vm216_vm0, %v480_v4  ;;  %460 = vmatmul.mubr.msk.bf16.vlgmr.msra.gmra.mxu1 %vm216_vm0, %v481_v5 }
  0xd7   : > { %v457_v13 = vpop.f32.mrf.mxu0  ;;  %v461_v14 = vpop.f32.mrf.mxu1 }
  0xd8   : > { %v304_v15 = vsel %vm301_vm2, %v457_v13, 0.0  ;;  %v308_v16 = vsel %vm301_vm2, %v461_v14, 0.0 }
  0xd9   : > { %v439_v17 = vpack.c.bf16 %v304_v15, %v304_v15  ;;  %v443_v18 = vpack.c.bf16 %v308_v16, %v308_v16  ;;  %v263_v19 = vpop.f32.mrf.mxu0  ;;  %v279_v20 = vpop.f32.mrf.mxu1 }
  0xda   : > { %v302_v21 = vsel %vm301_vm2, %v263_v19, 0.0  ;;  %v306_v22 = vsel %vm301_vm2, %v279_v20, 0.0 }
  0xdb   : > { %345 = vst.msk [vmem:[%s548_s4 + $0x8] sm:$0xf] %vm342_vm3, %v439_v17  ;;  %349 = vst.msk [vmem:[%s548_s4 + $0x18] sm:$0xf] %vm342_vm3, %v443_v18  ;;  %v437_v23 = vpack.c.bf16 %v302_v21, %v302_v21  ;;  %v441_v24 = vpack.c.bf16 %v306_v22, %v306_v22  ;;  %v458_v25 = vpop.f32.mrf.mxu0  ;;  %v462_v26 = vpop.f32.mrf.mxu1 }
  0xdc   : > { %v305_v27 = vsel %vm301_vm2, %v458_v25, 0.0  ;;  %v309_v28 = vsel %vm301_vm2, %v462_v26, 0.0 }
  0xdd   : > { %343 = vst.msk [vmem:[%s548_s4] sm:$0xf] %vm342_vm3, %v437_v23  ;;  %347 = vst.msk [vmem:[%s548_s4 + $0x10] sm:$0xf] %vm342_vm3, %v441_v24  ;;  %v440_v29 = vpack.c.bf16 %v305_v27, %v305_v27  ;;  %v444_v30 = vpack.c.bf16 %v309_v28, %v309_v28  ;;  %v266_v31 = vpop.f32.mrf.mxu0  ;;  %v282_v32 = vpop.f32.mrf.mxu1 }
  0xde   : > { %v303_v33 = vsel %vm301_vm2, %v266_v31, 0.0  ;;  %v307_v34 = vsel %vm301_vm2, %v282_v32, 0.0 }
  0xdf   : > { %346 = vst.msk [vmem:[%s548_s4 + $0xc] sm:$0xf] %vm342_vm3, %v440_v29  ;;  %350 = vst.msk [vmem:[%s548_s4 + $0x1c] sm:$0xf] %vm342_vm3, %v444_v30  ;;  %v438_v35 = vpack.c.bf16 %v303_v33, %v303_v33  ;;  %v442_v36 = vpack.c.bf16 %v307_v34, %v307_v34 }
  0xe1   : > { %344 = vst.msk [vmem:[%s548_s4 + $0x4] sm:$0xf] %vm342_vm3, %v438_v35  ;;  %348 = vst.msk [vmem:[%s548_s4 + $0x14] sm:$0xf] %vm342_vm3, %v442_v36 }
  0xe2 PF: > { %s13_s12 = sadd.s32 1, %s488_s12  }
  0xe3   : > { %p10_p4 = scmp.ge.s32.totalorder %s13_s12, 4  }
  0xe5   :  { %12 = sbr.rel (!%p10_p4) target bundleno = 1 (0x1), region = 62 }

// kernel: _lambda_.20
= control target key start
LH: loop header
LB: loop body
LE: loop exit
PB: predicated region body
PF: predicated region fallthrough
CT: control target
= control target key end

     0   :  { %s1731_s21 = smov 0   ;;  %s2018_s0 = inlined_call_operand.vmem [shape: bf16[2,32,24], index: 0, kind: input, shape index: {}]   ;;  %s2019_s1 = inlined_call_operand.vmem [shape: bf16[32,288], index: 1, kind: input, shape index: {}]   ;;  %s2020_s2 = inlined_call_operand.vmem [shape: f32[32,1], index: 2, kind: input, shape index: {}]   ;;  %s2021_s3 = inlined_call_operand.vmem [shape: bf16[32,288], index: 3, kind: input, shape index: {}]   ;;  %s2022_s4 = inlined_call_operand.vmem [shape: f32[32,1], index: 4, kind: input, shape index: {}]   ;;  %s2023_s5 = inlined_call_operand.vmem [shape: f32[1,24], index: 5, kind: input, shape index: {}]   ;;  %s2024_s6 = inlined_call_operand.vmem [shape: bf16[2,32,24], index: 6, kind: output, shape index: {}]  }
   0x1 LB: > { %s1441_s22 = sadd.s32 4294967295, %s1684_s21   ;;  %p1445_p0 = scmp.ge.s32.totalorder %s1684_s21, 1  ;;  %s1684_s21 = sphi %s1731_s21, %s16_s21  }
   0x2   : > { %p212_p1 = scmp.lt.s32.totalorder %s1684_s21, 3 }
   0x4   : > { %p213_p2 = pnand %p1445_p0, %p212_p1 }
   0x5   : > { %p242_p3 = scmp.lt.s32.totalorder (!%p213_p2), %s1441_s22, 1  ;;  %s1687_s27 = smov (!%p213_p2), 7  }
   0x6   : > { %216 = sbr.rel (%p213_p2) target bundleno = 1065 (0x429), region = 44  ;;  %s1688_s28 = smov (!%p213_p2), 115  }
   0x7   : > { %s1689_s29 = smov (!%p213_p2), 122   ;;  %s1690_s30 = smov (!%p213_p2), 116  }
   0x8   : > { %s1691_s7 = smov (!%p213_p2), 126   ;;  %s1692_s8 = smov (!%p213_p2), 120  }
   0x9   : > { %s1693_s9 = smov (!%p213_p2), 127   ;;  %s1694_s10 = smov (!%p213_p2), 121  }
   0xa   : > { %s1695_s13 = smov (!%p213_p2), 114  }
   0xb   : > { %vm263_vm0 = vcmask 52224   ;;  %vm268_vm1 = vcmask 339192   ;;  %v1686_v0 = vmov 0   ;;  %s2026_s22 = smov (!%p242_p3, %s1441_s22), 1  ;;  %vm289_vm2 = vcmask 248888   ;;  %v541_v47 = vld [vmem:[%s2020_s2 + $0x10] sm:$0xff] }
   0xc   : > { %266 = vst.msk [vmem:[#allocation2 + $0x8] sm:$0xf] %vm263_vm0, %v1686_v0  ;;  %264 = vst.msk [vmem:[#allocation2] sm:$0xf] %vm263_vm0, %v1686_v0  ;;  %1621 = vset.pattern.permute.xlu1 %v1686_v0  ;;  %1620 = vset.pattern.permute.xlu0 %v1686_v0  ;;  %s1512_s23 = sshll.u32 %s2026_s22, 4  ;;  %vm298_vm3 = vcmask 191488  }
   0xd   : > { %265 = vst.msk [vmem:[#allocation2 + $0x4] sm:$0xf] %vm263_vm0, %v1686_v0  ;;  %267 = vst.msk [vmem:[#allocation2 + $0xc] sm:$0xf] %vm263_vm0, %v1686_v0  ;;  %s1757_s26 = scalar_lea.vmem %s2018_s0, %s1512_s23  ;;  %v1640_v40 = vld [vmem:[%s2019_s1 + $0x4] ss:$12 sps:$4 sm:$0xff]  }
   0xe   : > { %271 = vst.msk [vmem:[#allocation2 + $0x8] sm:$0xf] %vm268_vm1, %v1686_v0  ;;  %272 = vst.msk [vmem:[#allocation2 + $0xc] sm:$0xf] %vm268_vm1, %v1686_v0  ;;  %v257_v1 = vld [vmem:[%s1757_s26 + $0x8] sm:$0xf]  ;;  %740 = vmatprep.mubr.bf16.mxu0 %v1640_v40 }
   0xf   : > { %269 = vst.msk [vmem:[#allocation2] sm:$0xf] %vm268_vm1, %v1686_v0  ;;  %270 = vst.msk [vmem:[#allocation2 + $0x4] sm:$0xf] %vm268_vm1, %v1686_v0  ;;  %v255_v2 = vld [vmem:[%s1757_s26] sm:$0xf]  ;;  %281 = vrot.lane.b32.xlu0 %v257_v1, %s1687_s27 }
  0x10   : > { %277 = vrot.lane.b32.xlu1 %v255_v2, %s1687_s27  ;;  %v258_v3 = vld [vmem:[%s1757_s26 + $0xc] sm:$0xf]  ;;  %v256_v4 = vld [vmem:[%s1757_s26 + $0x4] sm:$0xf]  ;;  %v1645_v45 = vld [vmem:[%s2019_s1 + $0x8] ss:$12 sps:$4 sm:$0xff]  }
  0x11   : > { %vm701_vm4 = vcmask 261120   ;;  %v542_v48 = vld [vmem:[%s2020_s2 + $0x18] sm:$0xff]  ;;  %v540_v49 = vld [vmem:[%s2020_s2 + $0x8] sm:$0xff]  ;;  %v539_v50 = vld [vmem:[%s2020_s2] sm:$0xff] }
  0x12   : > { %1590 = vmatprep.mubr.msk.bf16.mxu1 %vm701_vm4, %v1645_v45  ;;  %v1646_v40 = vld [vmem:[%s2019_s1 + $0x18] ss:$12 sps:$4 sm:$0xff]   ;;  %v811_v45 = vlaneseq }
  0x13   : > { %283 = vrot.lane.b32.xlu0 %v258_v3, %s1687_s27 }
  0x14   : > { %279 = vrot.lane.b32.xlu1 %v256_v4, %s1687_s27 }
  0x81   : > { %v282_v5 = vpop.permute.xlu0 %281 }
  0x82   : > { %v278_v6 = vpop.permute.xlu1 %277  ;;  %292 = vst.msk [vmem:[#allocation2 + $0x8] sm:$0xf] %vm289_vm2, %v282_v5 }
  0x83   : > { %290 = vst.msk [vmem:[#allocation2] sm:$0xf] %vm289_vm2, %v278_v6 }
  0x85   : > { %v284_v7 = vpop.permute.xlu0 %283 }
  0x86   : > { %v280_v8 = vpop.permute.xlu1 %279  ;;  %293 = vst.msk [vmem:[#allocation2 + $0xc] sm:$0xf] %vm289_vm2, %v284_v7 }
  0x87   : > { %291 = vst.msk [vmem:[#allocation2 + $0x4] sm:$0xf] %vm289_vm2, %v280_v8 }
  0x89   : > { %v296_v9 = vld [vmem:[#allocation2 + $0x8] sm:$0xf] }
  0x8a   : > { %v294_v10 = vld [vmem:[#allocation2] sm:$0xf]  ;;  %v449_v11 = vld [vmem:[#allocation2 + $0x8] sm:$0xf]  ;;  %301 = vst.msk [vmem:[#allocation3 + $0x8] sm:$0xf] %vm298_vm3, %v296_v9 }
  0x8b   : > { %299 = vst.msk [vmem:[#allocation3] sm:$0xf] %vm298_vm3, %v294_v10  ;;  %459 = vrot.lane.b32.xlu0 %v449_v11, %s1688_s28  ;;  %v353_v12 = vld [vmem:[#allocation2 + $0x8] sm:$0xf]  ;;  %v447_v16 = vld [vmem:[#allocation2] sm:$0xf] }
  0x8c   : > { %v351_v19 = vld [vmem:[#allocation2] sm:$0xf]  ;;  %v425_v20 = vld [vmem:[#allocation2 + $0x8] sm:$0xf] }
  0x8d   : > { %v297_v13 = vld [vmem:[#allocation2 + $0xc] sm:$0xf]  ;;  %v329_v22 = vld [vmem:[#allocation2 + $0x8] sm:$0xf]  ;;  %v423_v24 = vld [vmem:[#allocation2] sm:$0xf] }
  0x8e   : > { %v295_v14 = vld [vmem:[#allocation2 + $0x4] sm:$0xf]  ;;  %v450_v15 = vld [vmem:[#allocation2 + $0xc] sm:$0xf]  ;;  %302 = vst.msk [vmem:[#allocation3 + $0xc] sm:$0xf] %vm298_vm3, %v297_v13 }
  0x8f   : > { %300 = vst.msk [vmem:[#allocation3 + $0x4] sm:$0xf] %vm298_vm3, %v295_v14  ;;  %363 = vrot.lane.b32.xlu0 %v353_v12, %s1689_s29  ;;  %461 = vrot.lane.b32.xlu1 %v450_v15, %s1688_s28  ;;  %v354_v17 = vld [vmem:[#allocation2 + $0xc] sm:$0xf]  ;;  %v448_v18 = vld [vmem:[#allocation2 + $0x4] sm:$0xf] }
  0x90   : > { %v352_v21 = vld [vmem:[#allocation2 + $0x4] sm:$0xf]  ;;  %v426_v23 = vld [vmem:[#allocation2 + $0xc] sm:$0xf]  ;;  %v327_v26 = vld [vmem:[#allocation2] sm:$0xf] }
  0x91   : > { %v330_v25 = vld [vmem:[#allocation2 + $0xc] sm:$0xf]  ;;  %v424_v27 = vld [vmem:[#allocation2 + $0x4] sm:$0xf]  ;;  %v401_v28 = vld [vmem:[#allocation2 + $0x8] sm:$0xf] }
  0x92   : > { %v328_v29 = vld [vmem:[#allocation2 + $0x4] sm:$0xf]  ;;  %v305_v30 = vld [vmem:[#allocation2 + $0x8] sm:$0xf]  ;;  %v402_v31 = vld [vmem:[#allocation2 + $0xc] sm:$0xf] }
  0x93   : > { %365 = vrot.lane.b32.xlu1 %v354_v17, %s1689_s29  ;;  %455 = vrot.lane.b32.xlu0 %v447_v16, %s1688_s28  ;;  %v399_v32 = vld [vmem:[#allocation2] sm:$0xf]  ;;  %v306_v33 = vld [vmem:[#allocation2 + $0xc] sm:$0xf]  ;;  %v400_v35 = vld [vmem:[#allocation2 + $0x4] sm:$0xf] }
  0x94   : > { %v303_v34 = vld [vmem:[#allocation2] sm:$0xf]  ;;  %v377_v36 = vld [vmem:[#allocation2 + $0x8] sm:$0xf]  ;;  %v304_v37 = vld [vmem:[#allocation2 + $0x4] sm:$0xf] }
  0x95   : > { %v375_v38 = vld [vmem:[#allocation2] sm:$0xf]  ;;  %v378_v39 = vld [vmem:[#allocation2 + $0xc] sm:$0xf]  ;;  %v473_v41 = vld [vmem:[#allocation2 + $0x8] sm:$0xf] }
  0x96   : > { %v376_v42 = vld [vmem:[#allocation2 + $0x4] sm:$0xf]  ;;  %v471_v43 = vld [vmem:[#allocation2] sm:$0xf]  ;;  %v474_v44 = vld [vmem:[#allocation2 + $0xc] sm:$0xf] }
  0x97   : > { %359 = vrot.lane.b32.xlu0 %v351_v19, %s1689_s29  ;;  %457 = vrot.lane.b32.xlu1 %v448_v18, %s1688_s28  ;;  %v472_v46 = vld [vmem:[#allocation2 + $0x4] sm:$0xf] }
  0x9b   : > { %435 = vrot.lane.b32.xlu0 %v425_v20, %s1690_s30  ;;  %361 = vrot.lane.b32.xlu1 %v352_v21, %s1689_s29 }
  0x9f   : > { %339 = vrot.lane.b32.xlu0 %v329_v22, %s1691_s7  ;;  %437 = vrot.lane.b32.xlu1 %v426_v23, %s1690_s30 }
  0xa3   : > { %431 = vrot.lane.b32.xlu0 %v423_v24, %s1690_s30  ;;  %341 = vrot.lane.b32.xlu1 %v330_v25, %s1691_s7 }
  0xa7   : > { %335 = vrot.lane.b32.xlu0 %v327_v26, %s1691_s7  ;;  %433 = vrot.lane.b32.xlu1 %v424_v27, %s1690_s30 }
  0xab   : > { %411 = vrot.lane.b32.xlu0 %v401_v28, %s1692_s8  ;;  %337 = vrot.lane.b32.xlu1 %v328_v29, %s1691_s7 }
  0xaf   : > { %315 = vrot.lane.b32.xlu0 %v305_v30, %s1693_s9  ;;  %413 = vrot.lane.b32.xlu1 %v402_v31, %s1692_s8 }
  0xb3   : > { %407 = vrot.lane.b32.xlu0 %v399_v32, %s1692_s8  ;;  %317 = vrot.lane.b32.xlu1 %v306_v33, %s1693_s9  ;;  %v1635_v32 = vld [vmem:[#allocation3 + $0x8] sm:$0xff]  }
  0xb7   : > { %311 = vrot.lane.b32.xlu0 %v303_v34, %s1693_s9  ;;  %409 = vrot.lane.b32.xlu1 %v400_v35, %s1692_s8  ;;  %v1637_v35 = vld [vmem:[#allocation3] sm:$0xff]  }
  0xbb   : > { %387 = vrot.lane.b32.xlu0 %v377_v36, %s1694_s10  ;;  %313 = vrot.lane.b32.xlu1 %v304_v37, %s1693_s9  ;;  %v1638_v36 = vld [vmem:[%s2019_s1] ss:$12 sps:$4 sm:$0xff]   ;;  %v1643_v37 = vld [vmem:[%s2019_s1 + $0x1c] ss:$12 sps:$4 sm:$0xff]  }
  0xbf   : > { %383 = vrot.lane.b32.xlu0 %v375_v38, %s1694_s10  ;;  %389 = vrot.lane.b32.xlu1 %v378_v39, %s1694_s10 }
  0xc3   : > { %483 = vrot.lane.b32.xlu0 %v473_v41, %s1695_s13  ;;  %385 = vrot.lane.b32.xlu1 %v376_v42, %s1694_s10  ;;  %v1647_v41 = vld [vmem:[%s2019_s1 + $0x20] ss:$12 sps:$4 sm:$0xff]  }
  0xc7   : > { %479 = vrot.lane.b32.xlu0 %v471_v43, %s1695_s13  ;;  %485 = vrot.lane.b32.xlu1 %v474_v44, %s1695_s13 }
  0xcb   : > { %481 = vrot.lane.b32.xlu1 %v472_v46, %s1695_s13  ;;  %555 = vperm.xlu0 %1620, %v541_v47  }
  0xcf   : > { %560 = vperm.xlu1 %1621, %v542_v48   ;;  %550 = vperm.xlu0 %1620, %v540_v49   ;;  %v253_v48 = vld [vmem:[%s2023_s5] sm:$0x1] }
  0xd0   : > { %vm254_vm5 = vcmp.ne.f32.partialorder %v253_v48, 0.0 }
  0xd3   : > { %545 = vperm.xlu1 %1621, %v539_v50   ;;  %v812_v50 = vshrl.u32 %v811_v45, 7 }
  0xfd   : > { %v460_v51 = vpop.permute.xlu0 %459 }
  0xfe   : > { %469 = vst.msk [vmem:[#allocation3 + $0x78] sm:$0xf] %vm298_vm3, %v460_v51 }
 0x101   : > { %v364_v52 = vpop.permute.xlu0 %363  ;;  %v462_v53 = vpop.permute.xlu1 %461 }
 0x102   : > { %373 = vst.msk [vmem:[#allocation3 + $0x38] sm:$0xf] %vm298_vm3, %v364_v52  ;;  %470 = vst.msk [vmem:[#allocation3 + $0x7c] sm:$0xf] %vm298_vm3, %v462_v53 }
 0x105   : > { %v456_v54 = vpop.permute.xlu0 %455  ;;  %v366_v55 = vpop.permute.xlu1 %365 }
 0x106   : > { %467 = vst.msk [vmem:[#allocation3 + $0x70] sm:$0xf] %vm298_vm3, %v456_v54  ;;  %374 = vst.msk [vmem:[#allocation3 + $0x3c] sm:$0xf] %vm298_vm3, %v366_v55 }
 0x109   : > { %v360_v56 = vpop.permute.xlu0 %359  ;;  %v458_v57 = vpop.permute.xlu1 %457  ;;  %v1622_v58 = vld [vmem:[#allocation3 + $0x78] sm:$0xff]  }
 0x10a   : > { %371 = vst.msk [vmem:[#allocation3 + $0x30] sm:$0xf] %vm298_vm3, %v360_v56  ;;  %468 = vst.msk [vmem:[#allocation3 + $0x74] sm:$0xf] %vm298_vm3, %v458_v57  ;;  %1522 = vmatprep.subr.bf16.mxu0 %v1622_v58  ;;  %v813_v57 = vsub.s32 0, %v812_v50 }
 0x10d   : > { %v436_v59 = vpop.permute.xlu0 %435  ;;  %v362_v60 = vpop.permute.xlu1 %361  ;;  %v1623_v61 = vld [vmem:[#allocation3 + $0x38] sm:$0xff]  }
 0x10e   : > { %445 = vst.msk [vmem:[#allocation3 + $0x68] sm:$0xf] %vm298_vm3, %v436_v59  ;;  %372 = vst.msk [vmem:[#allocation3 + $0x34] sm:$0xf] %vm298_vm3, %v362_v60  ;;  %1523 = vmatpush3.bf16.msra.mxu0 %v1623_v61 }
 0x111   : > { %v340_v62 = vpop.permute.xlu0 %339  ;;  %v438_v63 = vpop.permute.xlu1 %437  ;;  %v1624_v1 = vld [vmem:[#allocation3 + $0x70] sm:$0xff]  }
 0x112   : > { %349 = vst.msk [vmem:[#allocation3 + $0x28] sm:$0xf] %vm298_vm3, %v340_v62  ;;  %446 = vst.msk [vmem:[#allocation3 + $0x6c] sm:$0xf] %vm298_vm3, %v438_v63  ;;  %1524 = vmatprep.subr.bf16.mxu0 %v1624_v1  ;;  %v810_v62 = vsel %vm254_vm5, 1, %v1686_v0 }
 0x115   : > { %v432_v2 = vpop.permute.xlu0 %431  ;;  %v342_v3 = vpop.permute.xlu1 %341  ;;  %v1625_v4 = vld [vmem:[#allocation3 + $0x30] sm:$0xff]  }
 0x116   : > { %443 = vst.msk [vmem:[#allocation3 + $0x60] sm:$0xf] %vm298_vm3, %v432_v2  ;;  %350 = vst.msk [vmem:[#allocation3 + $0x2c] sm:$0xf] %vm298_vm3, %v342_v3  ;;  %1525 = vmatpush3.bf16.msra.mxu0 %v1625_v4  ;;  %v1875_v4 = vrot.slane %v810_v62, %v813_v57 }
 0x118   : > { %vm815_vm6 = vcmp.eq.s32.totalorder %v1875_v4, 1 }
 0x119   : > { %v336_v5 = vpop.permute.xlu0 %335  ;;  %v434_v6 = vpop.permute.xlu1 %433  ;;  %v1626_v7 = vld [vmem:[#allocation3 + $0x68] sm:$0xff]  }
 0x11a   : > { %347 = vst.msk [vmem:[#allocation3 + $0x20] sm:$0xf] %vm298_vm3, %v336_v5  ;;  %444 = vst.msk [vmem:[#allocation3 + $0x64] sm:$0xf] %vm298_vm3, %v434_v6  ;;  %1526 = vmatprep.subr.bf16.mxu0 %v1626_v7 }
 0x11d   : > { %v412_v8 = vpop.permute.xlu0 %411  ;;  %v338_v9 = vpop.permute.xlu1 %337  ;;  %v1627_v10 = vld [vmem:[#allocation3 + $0x28] sm:$0xff]  }
 0x11e   : > { %421 = vst.msk [vmem:[#allocation3 + $0x58] sm:$0xf] %vm298_vm3, %v412_v8  ;;  %348 = vst.msk [vmem:[#allocation3 + $0x24] sm:$0xf] %vm298_vm3, %v338_v9  ;;  %1527 = vmatpush3.bf16.msra.mxu0 %v1627_v10 }
 0x121   : > { %v316_v11 = vpop.permute.xlu0 %315  ;;  %v414_v12 = vpop.permute.xlu1 %413  ;;  %v1628_v13 = vld [vmem:[#allocation3 + $0x60] sm:$0xff]  }
 0x122   : > { %325 = vst.msk [vmem:[#allocation3 + $0x18] sm:$0xf] %vm298_vm3, %v316_v11  ;;  %422 = vst.msk [vmem:[#allocation3 + $0x5c] sm:$0xf] %vm298_vm3, %v414_v12  ;;  %1528 = vmatprep.subr.bf16.mxu0 %v1628_v13 }
 0x125   : > { %v408_v14 = vpop.permute.xlu0 %407  ;;  %v318_v15 = vpop.permute.xlu1 %317  ;;  %v1629_v16 = vld [vmem:[#allocation3 + $0x20] sm:$0xff]  }
 0x126   : > { %419 = vst.msk [vmem:[#allocation3 + $0x50] sm:$0xf] %vm298_vm3, %v408_v14  ;;  %326 = vst.msk [vmem:[#allocation3 + $0x1c] sm:$0xf] %vm298_vm3, %v318_v15  ;;  %1529 = vmatpush3.bf16.msra.mxu0 %v1629_v16 }
 0x129   : > { %v312_v17 = vpop.permute.xlu0 %311  ;;  %v410_v18 = vpop.permute.xlu1 %409  ;;  %v1630_v19 = vld [vmem:[#allocation3 + $0x58] sm:$0xff]  }
 0x12a   : > { %323 = vst.msk [vmem:[#allocation3 + $0x10] sm:$0xf] %vm298_vm3, %v312_v17  ;;  %420 = vst.msk [vmem:[#allocation3 + $0x54] sm:$0xf] %vm298_vm3, %v410_v18  ;;  %1530 = vmatprep.subr.bf16.mxu0 %v1630_v19 }
 0x12d   : > { %v388_v20 = vpop.permute.xlu0 %387  ;;  %v314_v21 = vpop.permute.xlu1 %313  ;;  %v1631_v22 = vld [vmem:[#allocation3 + $0x18] sm:$0xff]  }
 0x12e   : > { %397 = vst.msk [vmem:[#allocation3 + $0x48] sm:$0xf] %vm298_vm3, %v388_v20  ;;  %324 = vst.msk [vmem:[#allocation3 + $0x14] sm:$0xf] %vm298_vm3, %v314_v21  ;;  %1531 = vmatpush3.bf16.msra.mxu0 %v1631_v22 }
 0x131   : > { %v384_v23 = vpop.permute.xlu0 %383  ;;  %v390_v24 = vpop.permute.xlu1 %389  ;;  %v1632_v25 = vld [vmem:[#allocation3 + $0x50] sm:$0xff]  }
 0x132   : > { %395 = vst.msk [vmem:[#allocation3 + $0x40] sm:$0xf] %vm298_vm3, %v384_v23  ;;  %398 = vst.msk [vmem:[#allocation3 + $0x4c] sm:$0xf] %vm298_vm3, %v390_v24  ;;  %1532 = vmatprep.subr.bf16.mxu0 %v1632_v25 }
 0x135   : > { %v484_v26 = vpop.permute.xlu0 %483  ;;  %v386_v27 = vpop.permute.xlu1 %385  ;;  %v1633_v28 = vld [vmem:[#allocation3 + $0x10] sm:$0xff]  }
 0x136   : > { %493 = vst.msk [vmem:[#allocation3 + $0x88] sm:$0xf] %vm298_vm3, %v484_v26  ;;  %396 = vst.msk [vmem:[#allocation3 + $0x44] sm:$0xf] %vm298_vm3, %v386_v27  ;;  %1533 = vmatpush3.bf16.msra.mxu0 %v1633_v28 }
 0x139   : > { %v480_v29 = vpop.permute.xlu0 %479  ;;  %v486_v30 = vpop.permute.xlu1 %485  ;;  %v1634_v31 = vld [vmem:[#allocation3 + $0x48] sm:$0xff]  }
 0x13a   : > { %491 = vst.msk [vmem:[#allocation3 + $0x80] sm:$0xf] %vm298_vm3, %v480_v29  ;;  %494 = vst.msk [vmem:[#allocation3 + $0x8c] sm:$0xf] %vm298_vm3, %v486_v30  ;;  %1534 = vmatprep.subr.bf16.mxu0 %v1634_v31 }
 0x13b   : > { %1535 = vmatpush3.bf16.msra.mxu0 %v1635_v32 }
 0x13d   : > { %v482_v33 = vpop.permute.xlu1 %481  ;;  %v1636_v34 = vld [vmem:[#allocation3 + $0x40] sm:$0xff]  }
 0x13e   : > { %492 = vst.msk [vmem:[#allocation3 + $0x84] sm:$0xf] %vm298_vm3, %v482_v33  ;;  %1536 = vmatprep.subr.bf16.mxu0 %v1636_v34 }
 0x13f   : > { %1537 = vmatpush3.bf16.msra.mxu0 %v1637_v35 }
 0x141   : > { %v1641_v38 = vld [vmem:[#allocation3 + $0x88] sm:$0xff]  }
 0x142   : > { %741 = vmatmul.mubr.bf16.vlgmr.msra.gmra.mxu0 %v1638_v36  ;;  %1586 = vmatprep.subr.bf16.mxu1 %v1641_v38 }
 0x143   : > { %1587 = vmatpush3.bf16.msra.mxu1 %v1641_v38  ;;  %748 = vmatprep.mubr.bf16.mxu0 %v1643_v37 }
 0x145   : > { %v1642_v39 = vld [vmem:[#allocation3 + $0x80] sm:$0xff]  }
 0x146   : > { %1588 = vmatprep.subr.bf16.mxu1 %v1642_v39  ;;  %v556_v47 = vpop.permute.xlu0 %555 }
 0x147   : > { %1589 = vmatpush3.bf16.msra.mxu1 %v1642_v39 }
 0x14a   : > { %749 = vmatmul.mubr.bf16.gmra.mxu0 %v1646_v40  ;;  %1591 = vmatmul.mubr.msk.bf16.vlgmr.msra.gmra.mxu1 %vm701_vm4, %v1647_v41  ;;  %v561_v43 = vpop.permute.xlu1 %560  ;;  %v551_v60 = vpop.permute.xlu0 %550 }
 0x14e   : > { %v546_v52 = vpop.permute.xlu1 %545 }
 0x202   : > { %v1538_v42 = vpop.f32.mrf.mxu0 }
 0x204   : > { %v1539_v44 = vpop.f32.mrf.mxu0 }
 0x205   : > { %v1540_v51 = vadd.f32 %v1539_v44, %v1538_v42 }
 0x206   : > { %v1541_v46 = vpop.f32.mrf.mxu0 }
 0x207   : > { %v743_v58 = vadd.f32 %v1540_v51, %v546_v52 }
 0x208   : > { %v1542_v49 = vpop.f32.mrf.mxu0 }
 0x209   : > { %v1543_v59 = vadd.f32 %v1542_v49, %v1541_v46 }
 0x20a   : > { %v1544_v53 = vpop.f32.mrf.mxu0  ;;  %v1592_v54 = vpop.f32.mrf.mxu1 }
 0x20b   : > { %v746_v7 = vadd.f32 %v1543_v59, %v551_v60  ;;  %v1666_v59 = vld [vmem:[%s2021_s3 + $0x4] ss:$12 sps:$4 sm:$0xff]  }
 0x20c   : > { %v1545_v55 = vpop.f32.mrf.mxu0  ;;  %v791_v56 = vpop.f32.mrf.mxu1  ;;  %1292 = vmatprep.mubr.bf16.mxu1 %v1666_v59  ;;  %v1672_v59 = vld [vmem:[%s2021_s3 + $0x18] ss:$12 sps:$4 sm:$0xff]  }
 0x20d   : > { %v1546_v61 = vadd.f32 %v1545_v55, %v1544_v53  ;;  %v792_v3 = vadd.f32 %v791_v56, %v743_v58 }
 0x20e   : > { %v1547_v63 = vpop.f32.mrf.mxu0  ;;  %v1593_v1 = vpop.f32.mrf.mxu1 }
 0x20f   : > { %v751_v2 = vadd.f32 %v1546_v61, %v556_v47  ;;  %v806_v11 = vmax.f32 %v792_v3, 0.0  ;;  %v1671_v3 = vld [vmem:[%s2021_s3 + $0x8] ss:$12 sps:$4 sm:$0xff]  }
 0x210   : > { %v1548_v5 = vpop.f32.mrf.mxu0  ;;  %v794_v6 = vpop.f32.mrf.mxu1  ;;  %1598 = vmatprep.mubr.msk.bf16.mxu0 %vm701_vm4, %v1671_v3 }
 0x211   : > { %v800_v8 = vadd.f32 %v1592_v54, %v751_v2  ;;  %v1549_v9 = vadd.f32 %v1548_v5, %v1547_v63  ;;  %v795_v13 = vadd.f32 %v794_v6, %v746_v7  ;;  %v816_v16 = vsel %vm815_vm6, %v806_v11, 0.0  ;;  %v1093_v5 = vld [vmem:[%s2022_s4 + $0x8] sm:$0xff]  ;;  %v1094_v6 = vld [vmem:[%s2022_s4 + $0x10] sm:$0xff]  ;;  %v1095_v7 = vld [vmem:[%s2022_s4 + $0x18] sm:$0xff] }
 0x212   : > { %v1514_v20 = vpack.c.bf16 %v816_v16, %v816_v16 }
 0x213   : > { %v808_v10 = vmax.f32 %v800_v8, 0.0  ;;  %v754_v12 = vadd.f32 %v1549_v9, %v561_v43  ;;  %v807_v18 = vmax.f32 %v795_v13, 0.0 }
 0x215   : > { %v803_v14 = vadd.f32 %v1593_v1, %v754_v12  ;;  %v818_v0 = vsel %vm815_vm6, %v808_v10, 0.0  ;;  %v817_v22 = vsel %vm815_vm6, %v807_v18, 0.0  ;;  %v1092_v1 = vld [vmem:[%s2022_s4] sm:$0xff] }
 0x216   : > { %v1516_v15 = vpack.c.bf16 %v818_v0, %v818_v0  ;;  %v1515_v23 = vpack.c.bf16 %v817_v22, %v817_v22 }
 0x217   : > { %v809_v17 = vmax.f32 %v803_v14, 0.0 }
 0x218   : > { %836 = vrot.lane.b32.xlu1 %v1516_v15, %s1687_s27 }
 0x219   : > { %v819_v19 = vsel %vm815_vm6, %v809_v17, 0.0 }
 0x21a   : > { %v1517_v21 = vpack.c.bf16 %v819_v19, %v819_v19 }
 0x21c   : > { %838 = vrot.lane.b32.xlu0 %v1517_v21, %s1687_s27  ;;  %832 = vrot.lane.b32.xlu1 %v1514_v20, %s1687_s27 }
 0x220   : > { %834 = vrot.lane.b32.xlu0 %v1515_v23, %s1687_s27 }
 0x28a   : > { %v837_v24 = vpop.permute.xlu1 %836 }
 0x28b   : > { %846 = vst.msk [vmem:[#allocation2 + $0x8] sm:$0xf] %vm289_vm2, %v837_v24 }
 0x28e   : > { %v839_v25 = vpop.permute.xlu0 %838  ;;  %v833_v26 = vpop.permute.xlu1 %832 }
 0x28f   : > { %847 = vst.msk [vmem:[#allocation2 + $0xc] sm:$0xf] %vm289_vm2, %v839_v25  ;;  %844 = vst.msk [vmem:[#allocation2] sm:$0xf] %vm289_vm2, %v833_v26 }
 0x292   : > { %v835_v27 = vpop.permute.xlu0 %834  ;;  %v850_v28 = vld [vmem:[#allocation2 + $0x8] sm:$0xf] }
 0x293   : > { %845 = vst.msk [vmem:[#allocation2 + $0x4] sm:$0xf] %vm289_vm2, %v835_v27  ;;  %v1002_v42 = vld [vmem:[#allocation2 + $0x8] sm:$0xf] }
 0x294   : > { %854 = vst.msk [vmem:[#allocation3 + $0x8] sm:$0xf] %vm298_vm3, %v850_v28  ;;  %v906_v44 = vld [vmem:[#allocation2 + $0x8] sm:$0xf] }
 0x295   : > { %v978_v46 = vld [vmem:[#allocation2 + $0x8] sm:$0xf] }
 0x296   : > { %v1000_v29 = vld [vmem:[#allocation2] sm:$0xf]  ;;  %v851_v34 = vld [vmem:[#allocation2 + $0xc] sm:$0xf]  ;;  %v882_v48 = vld [vmem:[#allocation2 + $0x8] sm:$0xf] }
 0x297   : > { %1008 = vrot.lane.b32.xlu1 %v1000_v29, %s1688_s28  ;;  %v904_v31 = vld [vmem:[#allocation2] sm:$0xf]  ;;  %855 = vst.msk [vmem:[#allocation3 + $0xc] sm:$0xf] %vm298_vm3, %v851_v34  ;;  %v1003_v43 = vld [vmem:[#allocation2 + $0xc] sm:$0xf] }
 0x298   : > { %v976_v33 = vld [vmem:[#allocation2] sm:$0xf]  ;;  %v907_v45 = vld [vmem:[#allocation2 + $0xc] sm:$0xf]  ;;  %v954_v50 = vld [vmem:[#allocation2 + $0x8] sm:$0xf] }
 0x299   : > { %v848_v35 = vld [vmem:[#allocation2] sm:$0xf]  ;;  %v979_v47 = vld [vmem:[#allocation2 + $0xc] sm:$0xf]  ;;  %v858_v52 = vld [vmem:[#allocation2 + $0x8] sm:$0xf] }
 0x29a   : > { %v1001_v30 = vld [vmem:[#allocation2 + $0x4] sm:$0xf]  ;;  %852 = vst.msk [vmem:[#allocation3] sm:$0xf] %vm298_vm3, %v848_v35  ;;  %v880_v38 = vld [vmem:[#allocation2] sm:$0xf] }
 0x29b   : > { %1010 = vrot.lane.b32.xlu0 %v1001_v30, %s1688_s28  ;;  %912 = vrot.lane.b32.xlu1 %v904_v31, %s1689_s29  ;;  %v905_v32 = vld [vmem:[#allocation2 + $0x4] sm:$0xf]  ;;  %v952_v39 = vld [vmem:[#allocation2] sm:$0xf]  ;;  %v883_v49 = vld [vmem:[#allocation2 + $0xc] sm:$0xf] }
 0x29c   : > { %v849_v36 = vld [vmem:[#allocation2 + $0x4] sm:$0xf]  ;;  %v955_v51 = vld [vmem:[#allocation2 + $0xc] sm:$0xf]  ;;  %v856_v54 = vld [vmem:[#allocation2] sm:$0xf] }
 0x29d   : > { %853 = vst.msk [vmem:[#allocation3 + $0x4] sm:$0xf] %vm298_vm3, %v849_v36  ;;  %v977_v37 = vld [vmem:[#allocation2 + $0x4] sm:$0xf]  ;;  %v859_v53 = vld [vmem:[#allocation2 + $0xc] sm:$0xf] }
 0x29e   : > { %v881_v40 = vld [vmem:[#allocation2 + $0x4] sm:$0xf]  ;;  %v930_v56 = vld [vmem:[#allocation2 + $0x8] sm:$0xf]  ;;  %v931_v57 = vld [vmem:[#allocation2 + $0xc] sm:$0xf] }
 0x29f   : > { %914 = vrot.lane.b32.xlu0 %v905_v32, %s1689_s29  ;;  %984 = vrot.lane.b32.xlu1 %v976_v33, %s1690_s30  ;;  %v953_v41 = vld [vmem:[#allocation2 + $0x4] sm:$0xf]  ;;  %v928_v58 = vld [vmem:[#allocation2] sm:$0xf]  ;;  %v1026_v61 = vld [vmem:[#allocation2 + $0x8] sm:$0xf] }
 0x2a0   : > { %v857_v55 = vld [vmem:[#allocation2 + $0x4] sm:$0xf]  ;;  %v1027_v62 = vld [vmem:[#allocation2 + $0xc] sm:$0xf]  ;;  %v1024_v63 = vld [vmem:[#allocation2] sm:$0xf] }
 0x2a1   : > { %v929_v60 = vld [vmem:[#allocation2 + $0x4] sm:$0xf] }
 0x2a2   : > { %v1025_v2 = vld [vmem:[#allocation2 + $0x4] sm:$0xf] }
 0x2a3   : > { %986 = vrot.lane.b32.xlu0 %v977_v37, %s1690_s30  ;;  %888 = vrot.lane.b32.xlu1 %v880_v38, %s1691_s7 }
 0x2a7   : > { %890 = vrot.lane.b32.xlu0 %v881_v40, %s1691_s7  ;;  %960 = vrot.lane.b32.xlu1 %v952_v39, %s1692_s8 }
 0x2ab   : > { %962 = vrot.lane.b32.xlu0 %v953_v41, %s1692_s8  ;;  %1012 = vrot.lane.b32.xlu1 %v1002_v42, %s1688_s28 }
 0x2af   : > { %1014 = vrot.lane.b32.xlu0 %v1003_v43, %s1688_s28  ;;  %916 = vrot.lane.b32.xlu1 %v906_v44, %s1689_s29 }
 0x2b3   : > { %918 = vrot.lane.b32.xlu0 %v907_v45, %s1689_s29  ;;  %988 = vrot.lane.b32.xlu1 %v978_v46, %s1690_s30  ;;  %s251_s29 = scalar_lea.vmem %s2024_s6, %s1512_s23 }
 0x2b7   : > { %990 = vrot.lane.b32.xlu0 %v979_v47, %s1690_s30  ;;  %892 = vrot.lane.b32.xlu1 %v882_v48, %s1691_s7 }
 0x2bb   : > { %894 = vrot.lane.b32.xlu0 %v883_v49, %s1691_s7  ;;  %964 = vrot.lane.b32.xlu1 %v954_v50, %s1692_s8 }
 0x2bf   : > { %966 = vrot.lane.b32.xlu0 %v955_v51, %s1692_s8  ;;  %868 = vrot.lane.b32.xlu1 %v858_v52, %s1693_s9  ;;  %v1661_v51 = vld [vmem:[#allocation3 + $0x8] sm:$0xff]  }
 0x2c3   : > { %870 = vrot.lane.b32.xlu0 %v859_v53, %s1693_s9  ;;  %864 = vrot.lane.b32.xlu1 %v856_v54, %s1693_s9  ;;  %v1663_v54 = vld [vmem:[#allocation3] sm:$0xff]  }
 0x2c7   : > { %866 = vrot.lane.b32.xlu0 %v857_v55, %s1693_s9  ;;  %940 = vrot.lane.b32.xlu1 %v930_v56, %s1694_s10  ;;  %v1664_v55 = vld [vmem:[%s2021_s3] ss:$12 sps:$4 sm:$0xff]   ;;  %v1669_v56 = vld [vmem:[%s2021_s3 + $0x1c] ss:$12 sps:$4 sm:$0xff]  }
 0x2cb   : > { %942 = vrot.lane.b32.xlu0 %v931_v57, %s1694_s10  ;;  %936 = vrot.lane.b32.xlu1 %v928_v58, %s1694_s10 }
 0x2cf   : > { %938 = vrot.lane.b32.xlu0 %v929_v60, %s1694_s10  ;;  %1036 = vrot.lane.b32.xlu1 %v1026_v61, %s1695_s13  ;;  %v1673_v60 = vld [vmem:[%s2021_s3 + $0x20] ss:$12 sps:$4 sm:$0xff]  }
 0x2d3   : > { %1038 = vrot.lane.b32.xlu0 %v1027_v62, %s1695_s13  ;;  %1032 = vrot.lane.b32.xlu1 %v1024_v63, %s1695_s13 }
 0x2d7   : > { %1034 = vrot.lane.b32.xlu0 %v1025_v2, %s1695_s13  ;;  %1098 = vperm.xlu1 %1621, %v1092_v1  }
 0x2db   : > { %1103 = vperm.xlu0 %1620, %v1093_v5   ;;  %1108 = vperm.xlu1 %1621, %v1094_v6  }
 0x2df   : > { %1113 = vperm.xlu0 %1620, %v1095_v7  }
 0x309   : > { %v1009_v8 = vpop.permute.xlu1 %1008 }
 0x30a   : > { %1020 = vst.msk [vmem:[#allocation3 + $0x70] sm:$0xf] %vm298_vm3, %v1009_v8 }
 0x30d   : > { %v1011_v9 = vpop.permute.xlu0 %1010  ;;  %v913_v10 = vpop.permute.xlu1 %912 }
 0x30e   : > { %1021 = vst.msk [vmem:[#allocation3 + $0x74] sm:$0xf] %vm298_vm3, %v1011_v9  ;;  %924 = vst.msk [vmem:[#allocation3 + $0x30] sm:$0xf] %vm298_vm3, %v913_v10  ;;  %v1674_v10 = vld [vmem:[%s1757_s26] sm:$0xf] }
 0x311   : > { %v915_v11 = vpop.permute.xlu0 %914  ;;  %v985_v12 = vpop.permute.xlu1 %984 }
 0x312   : > { %925 = vst.msk [vmem:[#allocation3 + $0x34] sm:$0xf] %vm298_vm3, %v915_v11  ;;  %996 = vst.msk [vmem:[#allocation3 + $0x60] sm:$0xf] %vm298_vm3, %v985_v12  ;;  %v259_v11 = vunpack.c.l.bf16 %v1674_v10 }
 0x315   : > { %v987_v13 = vpop.permute.xlu0 %986  ;;  %v889_v14 = vpop.permute.xlu1 %888  ;;  %v1650_v28 = vld [vmem:[#allocation3 + $0x70] sm:$0xff]  }
 0x316   : > { %997 = vst.msk [vmem:[#allocation3 + $0x64] sm:$0xf] %vm298_vm3, %v987_v13  ;;  %900 = vst.msk [vmem:[#allocation3 + $0x20] sm:$0xf] %vm298_vm3, %v889_v14 }
 0x319   : > { %v891_v0 = vpop.permute.xlu0 %890  ;;  %v961_v15 = vpop.permute.xlu1 %960  ;;  %v1651_v29 = vld [vmem:[#allocation3 + $0x30] sm:$0xff]  }
 0x31a   : > { %901 = vst.msk [vmem:[#allocation3 + $0x24] sm:$0xf] %vm298_vm3, %v891_v0  ;;  %972 = vst.msk [vmem:[#allocation3 + $0x50] sm:$0xf] %vm298_vm3, %v961_v15 }
 0x31d   : > { %v963_v16 = vpop.permute.xlu0 %962  ;;  %v1013_v17 = vpop.permute.xlu1 %1012  ;;  %v1654_v36 = vld [vmem:[#allocation3 + $0x60] sm:$0xff]  }
 0x31e   : > { %973 = vst.msk [vmem:[#allocation3 + $0x54] sm:$0xf] %vm298_vm3, %v963_v16  ;;  %1022 = vst.msk [vmem:[#allocation3 + $0x78] sm:$0xf] %vm298_vm3, %v1013_v17 }
 0x321   : > { %v1015_v18 = vpop.permute.xlu0 %1014  ;;  %v917_v19 = vpop.permute.xlu1 %916  ;;  %v1655_v37 = vld [vmem:[#allocation3 + $0x20] sm:$0xff]  }
 0x322   : > { %1023 = vst.msk [vmem:[#allocation3 + $0x7c] sm:$0xf] %vm298_vm3, %v1015_v18  ;;  %926 = vst.msk [vmem:[#allocation3 + $0x38] sm:$0xf] %vm298_vm3, %v917_v19 }
 0x325   : > { %v919_v20 = vpop.permute.xlu0 %918  ;;  %v989_v21 = vpop.permute.xlu1 %988  ;;  %v1658_v44 = vld [vmem:[#allocation3 + $0x50] sm:$0xff]  }
 0x326   : > { %927 = vst.msk [vmem:[#allocation3 + $0x3c] sm:$0xf] %vm298_vm3, %v919_v20  ;;  %998 = vst.msk [vmem:[#allocation3 + $0x68] sm:$0xf] %vm298_vm3, %v989_v21  ;;  %v1675_v21 = vld [vmem:[%s1757_s26 + $0x8] sm:$0xf] }
 0x329   : > { %v991_v22 = vpop.permute.xlu0 %990  ;;  %v893_v23 = vpop.permute.xlu1 %892  ;;  %v1648_v24 = vld [vmem:[#allocation3 + $0x78] sm:$0xff]  }
 0x32a   : > { %999 = vst.msk [vmem:[#allocation3 + $0x6c] sm:$0xf] %vm298_vm3, %v991_v22  ;;  %902 = vst.msk [vmem:[#allocation3 + $0x28] sm:$0xf] %vm298_vm3, %v893_v23  ;;  %1554 = vmatprep.subr.bf16.mxu1 %v1648_v24  ;;  %v261_v22 = vunpack.c.l.bf16 %v1675_v21  ;;  %v1676_v23 = vld [vmem:[%s1757_s26 + $0x4] sm:$0xf] }
 0x32b   : > { %v260_v24 = vunpack.c.l.bf16 %v1676_v23 }
 0x32d   : > { %v895_v25 = vpop.permute.xlu0 %894  ;;  %v965_v26 = vpop.permute.xlu1 %964  ;;  %v1649_v27 = vld [vmem:[#allocation3 + $0x38] sm:$0xff]  }
 0x32e   : > { %903 = vst.msk [vmem:[#allocation3 + $0x2c] sm:$0xf] %vm298_vm3, %v895_v25  ;;  %974 = vst.msk [vmem:[#allocation3 + $0x58] sm:$0xf] %vm298_vm3, %v965_v26  ;;  %1555 = vmatpush3.bf16.msra.mxu1 %v1649_v27 }
 0x32f   : > { %1556 = vmatprep.subr.bf16.mxu1 %v1650_v28 }
 0x331   : > { %v967_v30 = vpop.permute.xlu0 %966  ;;  %v869_v31 = vpop.permute.xlu1 %868  ;;  %v1652_v32 = vld [vmem:[#allocation3 + $0x68] sm:$0xff]  }
 0x332   : > { %975 = vst.msk [vmem:[#allocation3 + $0x5c] sm:$0xf] %vm298_vm3, %v967_v30  ;;  %878 = vst.msk [vmem:[#allocation3 + $0x18] sm:$0xf] %vm298_vm3, %v869_v31  ;;  %1557 = vmatpush3.bf16.msra.mxu1 %v1651_v29 }
 0x333   : > { %1558 = vmatprep.subr.bf16.mxu1 %v1652_v32 }
 0x335   : > { %v871_v33 = vpop.permute.xlu0 %870  ;;  %v865_v34 = vpop.permute.xlu1 %864  ;;  %v1653_v35 = vld [vmem:[#allocation3 + $0x28] sm:$0xff]  }
 0x336   : > { %879 = vst.msk [vmem:[#allocation3 + $0x1c] sm:$0xf] %vm298_vm3, %v871_v33  ;;  %876 = vst.msk [vmem:[#allocation3 + $0x10] sm:$0xf] %vm298_vm3, %v865_v34  ;;  %1559 = vmatpush3.bf16.msra.mxu1 %v1653_v35 }
 0x337   : > { %1560 = vmatprep.subr.bf16.mxu1 %v1654_v36  ;;  %v1677_v36 = vld [vmem:[%s1757_s26 + $0xc] sm:$0xf] }
 0x339   : > { %v867_v38 = vpop.permute.xlu0 %866  ;;  %v941_v39 = vpop.permute.xlu1 %940  ;;  %v1656_v40 = vld [vmem:[#allocation3 + $0x58] sm:$0xff]  }
 0x33a   : > { %877 = vst.msk [vmem:[#allocation3 + $0x14] sm:$0xf] %vm298_vm3, %v867_v38  ;;  %950 = vst.msk [vmem:[#allocation3 + $0x48] sm:$0xf] %vm298_vm3, %v941_v39  ;;  %1561 = vmatpush3.bf16.msra.mxu1 %v1655_v37  ;;  %v262_v37 = vunpack.c.l.bf16 %v1677_v36 }
 0x33b   : > { %1562 = vmatprep.subr.bf16.mxu1 %v1656_v40 }
 0x33d   : > { %v943_v41 = vpop.permute.xlu0 %942  ;;  %v937_v42 = vpop.permute.xlu1 %936  ;;  %v1657_v43 = vld [vmem:[#allocation3 + $0x18] sm:$0xff]  }
 0x33e   : > { %951 = vst.msk [vmem:[#allocation3 + $0x4c] sm:$0xf] %vm298_vm3, %v943_v41  ;;  %948 = vst.msk [vmem:[#allocation3 + $0x40] sm:$0xf] %vm298_vm3, %v937_v42  ;;  %1563 = vmatpush3.bf16.msra.mxu1 %v1657_v43 }
 0x33f   : > { %1564 = vmatprep.subr.bf16.mxu1 %v1658_v44 }
 0x341   : > { %v939_v45 = vpop.permute.xlu0 %938  ;;  %v1037_v46 = vpop.permute.xlu1 %1036  ;;  %v1659_v47 = vld [vmem:[#allocation3 + $0x10] sm:$0xff]  }
 0x342   : > { %949 = vst.msk [vmem:[#allocation3 + $0x44] sm:$0xf] %vm298_vm3, %v939_v45  ;;  %1046 = vst.msk [vmem:[#allocation3 + $0x88] sm:$0xf] %vm298_vm3, %v1037_v46  ;;  %1565 = vmatpush3.bf16.msra.mxu1 %v1659_v47 }
 0x345   : > { %v1039_v48 = vpop.permute.xlu0 %1038  ;;  %v1033_v49 = vpop.permute.xlu1 %1032  ;;  %v1660_v50 = vld [vmem:[#allocation3 + $0x48] sm:$0xff]  }
 0x346   : > { %1047 = vst.msk [vmem:[#allocation3 + $0x8c] sm:$0xf] %vm298_vm3, %v1039_v48  ;;  %1044 = vst.msk [vmem:[#allocation3 + $0x80] sm:$0xf] %vm298_vm3, %v1033_v49  ;;  %1566 = vmatprep.subr.bf16.mxu1 %v1660_v50 }
 0x347   : > { %1567 = vmatpush3.bf16.msra.mxu1 %v1661_v51 }
 0x349   : > { %v1035_v52 = vpop.permute.xlu0 %1034  ;;  %v1662_v53 = vld [vmem:[#allocation3 + $0x40] sm:$0xff]  }
 0x34a   : > { %1045 = vst.msk [vmem:[#allocation3 + $0x84] sm:$0xf] %vm298_vm3, %v1035_v52  ;;  %1568 = vmatprep.subr.bf16.mxu1 %v1662_v53 }
 0x34b   : > { %1569 = vmatpush3.bf16.msra.mxu1 %v1663_v54 }
 0x34d   : > { %v1667_v57 = vld [vmem:[#allocation3 + $0x88] sm:$0xff]  }
 0x34e   : > { %1293 = vmatmul.mubr.bf16.vlgmr.msra.gmra.mxu1 %v1664_v55  ;;  %1594 = vmatprep.subr.bf16.mxu0 %v1667_v57 }
 0x34f   : > { %1595 = vmatpush3.bf16.msra.mxu0 %v1667_v57  ;;  %1300 = vmatprep.mubr.bf16.mxu1 %v1669_v56 }
 0x351   : > { %v1668_v58 = vld [vmem:[#allocation3 + $0x80] sm:$0xff]  }
 0x352   : > { %1596 = vmatprep.subr.bf16.mxu0 %v1668_v58  ;;  %v1099_v1 = vpop.permute.xlu1 %1098 }
 0x353   : > { %1597 = vmatpush3.bf16.msra.mxu0 %v1668_v58 }
 0x356   : > { %1301 = vmatmul.mubr.bf16.gmra.mxu1 %v1672_v59  ;;  %1599 = vmatmul.mubr.msk.bf16.vlgmr.msra.gmra.mxu0 %vm701_vm4, %v1673_v60  ;;  %v1104_v7 = vpop.permute.xlu0 %1103  ;;  %v1109_v14 = vpop.permute.xlu1 %1108 }
 0x35a   : > { %v1114_v31 = vpop.permute.xlu0 %1113 }
 0x40e   : > { %v1570_v61 = vpop.f32.mrf.mxu1 }
 0x410   : > { %v1571_v62 = vpop.f32.mrf.mxu1 }
 0x411   : > { %v1572_v2 = vadd.f32 %v1571_v62, %v1570_v61 }
 0x412   : > { %v1573_v63 = vpop.f32.mrf.mxu1 }
 0x413   : > { %v1295_v9 = vadd.f32 %v1572_v2, %v1099_v1 }
 0x414   : > { %v1574_v3 = vpop.f32.mrf.mxu1 }
 0x415   : > { %v1575_v8 = vadd.f32 %v1574_v3, %v1573_v63 }
 0x416   : > { %v1576_v5 = vpop.f32.mrf.mxu1  ;;  %v1600_v6 = vpop.f32.mrf.mxu0 }
 0x417   : > { %v1298_v20 = vadd.f32 %v1575_v8, %v1104_v7 }
 0x418   : > { %v1577_v12 = vpop.f32.mrf.mxu1  ;;  %v1343_v13 = vpop.f32.mrf.mxu0 }
 0x419   : > { %v1578_v0 = vadd.f32 %v1577_v12, %v1576_v5  ;;  %v1344_v15 = vadd.f32 %v1343_v13, %v1295_v9 }
 0x41a   : > { %v1579_v16 = vpop.f32.mrf.mxu1  ;;  %v1601_v17 = vpop.f32.mrf.mxu0 }
 0x41b   : > { %v1303_v18 = vadd.f32 %v1578_v0, %v1109_v14  ;;  %v1358_v19 = vsel %vm815_vm6, %v1344_v15, 0.0 }
 0x41c   : > { %v1362_v25 = vadd.f32 %v1358_v19, %v259_v11  ;;  %v1580_v26 = vpop.f32.mrf.mxu1  ;;  %v1346_v27 = vpop.f32.mrf.mxu0 }
 0x41d   : > { %v1352_v28 = vadd.f32 %v1600_v6, %v1303_v18  ;;  %v1581_v29 = vadd.f32 %v1580_v26, %v1579_v16  ;;  %v1347_v30 = vadd.f32 %v1346_v27, %v1298_v20 }
 0x41e   : > { %v1518_v32 = vpack.c.bf16 %v1362_v25, %v1362_v25 }
 0x41f   : > { %v1360_v33 = vsel %vm815_vm6, %v1352_v28, 0.0  ;;  %v1306_v34 = vadd.f32 %v1581_v29, %v1114_v31  ;;  %v1359_v35 = vsel %vm815_vm6, %v1347_v30, 0.0 }
 0x420   : > { %v1364_v38 = vadd.f32 %v1360_v33, %v261_v22  ;;  %1382 = vst.msk [vmem:[%s251_s29] sm:$0xf] %vm298_vm3, %v1518_v32  ;;  %v1363_v39 = vadd.f32 %v1359_v35, %v260_v24 }
 0x421   : > { %v1355_v40 = vadd.f32 %v1601_v17, %v1306_v34 }
 0x422   : > { %v1520_v41 = vpack.c.bf16 %v1364_v38, %v1364_v38  ;;  %v1519_v42 = vpack.c.bf16 %v1363_v39, %v1363_v39 }
 0x423   : > { %v1361_v43 = vsel %vm815_vm6, %v1355_v40, 0.0 }
 0x424   : > { %1384 = vst.msk [vmem:[%s251_s29 + $0x8] sm:$0xf] %vm298_vm3, %v1520_v41  ;;  %v1365_v44 = vadd.f32 %v1361_v43, %v262_v37  ;;  %1383 = vst.msk [vmem:[%s251_s29 + $0x4] sm:$0xf] %vm298_vm3, %v1519_v42 }
 0x426   : > { %v1521_v45 = vpack.c.bf16 %v1365_v44, %v1365_v44 }
 0x428   : > { %1385 = vst.msk [vmem:[%s251_s29 + $0xc] sm:$0xf] %vm298_vm3, %v1521_v45 }
 0x429 PF: > { %s16_s21 = sadd.s32 1, %s1684_s21  }
 0x42a   : > { %p13_p4 = scmp.ge.s32.totalorder %s16_s21, 4  }
 0x42c   :  { %15 = sbr.rel (!%p13_p4) target bundleno = 1 (0x1), region = 74 }

// kernel: _lambda_.27
= control target key start
LH: loop header
LB: loop body
LE: loop exit
PB: predicated region body
PF: predicated region fallthrough
CT: control target
= control target key end

     0   :  { %s414_s12 = smov 0   ;;  %s440_s0 = inlined_call_operand.vmem [shape: bf16[2,16,80], index: 0, kind: input, shape index: {}]   ;;  %s441_s1 = inlined_call_operand.vmem [shape: bf16[32,16], index: 1, kind: input, shape index: {}]   ;;  %s442_s2 = inlined_call_operand.vmem [shape: f32[1,80], index: 2, kind: input, shape index: {}]   ;;  %s443_s3 = inlined_call_operand.vmem [shape: bf16[2,32,80], index: 3, kind: output, shape index: {}]  }
   0x1 LB: > { %s338_s13 = sadd.s32 4294967295, %s391_s12   ;;  %p342_p0 = scmp.ge.s32.totalorder %s391_s12, 1  ;;  %s391_s12 = sphi %s414_s12, %s13_s12  }
   0x2   : > { %p137_p1 = scmp.lt.s32.totalorder %s391_s12, 3 }
   0x4   : > { %p138_p2 = pnand %p342_p0, %p137_p1 }
   0x5   : > { %p161_p3 = scmp.lt.s32.totalorder (!%p138_p2), %s338_s13, 1 }
   0x6   : > { %141 = sbr.rel (%p138_p2) target bundleno = 222 (0xde), region = 32 }
   0xb   : > { %v383_v0 = vld [vmem:[%s441_s1] sm:$0xff]   ;;  %vm194_vm0 = vcmask 130048   ;;  %s445_s13 = smov (!%p161_p3, %s338_s13), 1  ;;  %v384_v2 = vld [vmem:[%s441_s1 + $0x8] sm:$0xff]   ;;  %v253_v3 = vlaneseq  ;;  %v393_v7 = vmov 0   ;;  %vm278_vm3 = vcmask 650240  }
   0xc   : > { %369 = vmatprep.mubr.msk.bf16.mxu0 %vm194_vm0, %v383_v0  ;;  %s358_s16 = sshll.u32 %s445_s13, 3  ;;  %v250_v4 = vld [vmem:[%s442_s2] sm:$0x1]  ;;  %s359_s24 = sshll.u32 %s445_s13, 4 }
   0xd   : > { %s165_s19 = scalar_lea.vmem %s440_s0, %s358_s16  ;;  %v254_v5 = vshrl.u32 %v253_v3, 7  ;;  %vm251_vm1 = vcmp.ne.f32.partialorder %v250_v4, 0.0  ;;  %s170_s27 = scalar_lea.vmem %s443_s3, %s359_s24 }
   0xe   : > { %v382_v1 = vld [vmem:[%s165_s19] sm:$0xff]   ;;  %v252_v8 = vsel %vm251_vm1, 1, %v393_v7 }
   0xf   : > { %367 = vmatprep.subr.bf16.mxu0 %v382_v1  ;;  %v255_v6 = vsub.s32 0, %v254_v5 }
  0x10   : > { %368 = vmatpush3.bf16.msra.mxu0 %v382_v1 }
  0x11   : > { %v256_v9 = vrot.slane %v252_v8, %v255_v6 }
  0x13   : > { %370 = vmatmul.mubr.msk.bf16.vlgmr.msra.gmra.mxu0 %vm194_vm0, %v384_v2  ;;  %vm257_vm2 = vcmp.eq.s32.totalorder %v256_v9, 1 }
  0xd3   : > { %v371_v10 = vpop.f32.mrf.mxu0 }
  0xd4   : > { %v260_v11 = vsel %vm257_vm2, %v371_v10, 0.0 }
  0xd5   : > { %v362_v12 = vpack.c.bf16 %v260_v11, %v260_v11  ;;  %v235_v13 = vpop.f32.mrf.mxu0 }
  0xd6   : > { %v258_v14 = vsel %vm257_vm2, %v235_v13, 0.0 }
  0xd7   : > { %281 = vst.msk [vmem:[%s170_s27 + $0x8] sm:$0xf] %vm278_vm3, %v362_v12  ;;  %v360_v15 = vpack.c.bf16 %v258_v14, %v258_v14  ;;  %v372_v16 = vpop.f32.mrf.mxu0 }
  0xd8   : > { %v261_v17 = vsel %vm257_vm2, %v372_v16, 0.0 }
  0xd9   : > { %279 = vst.msk [vmem:[%s170_s27] sm:$0xf] %vm278_vm3, %v360_v15  ;;  %v363_v18 = vpack.c.bf16 %v261_v17, %v261_v17  ;;  %v238_v19 = vpop.f32.mrf.mxu0 }
  0xda   : > { %v259_v20 = vsel %vm257_vm2, %v238_v19, 0.0 }
  0xdb   : > { %282 = vst.msk [vmem:[%s170_s27 + $0xc] sm:$0xf] %vm278_vm3, %v363_v18  ;;  %v361_v21 = vpack.c.bf16 %v259_v20, %v259_v20 }
  0xdd   : > { %280 = vst.msk [vmem:[%s170_s27 + $0x4] sm:$0xf] %vm278_vm3, %v361_v21 }
  0xde PF: > { %s13_s12 = sadd.s32 1, %s391_s12  }
  0xdf   : > { %p10_p4 = scmp.ge.s32.totalorder %s13_s12, 4  }
  0xe1   :  { %12 = sbr.rel (!%p10_p4) target bundleno = 1 (0x1), region = 62 }

// kernel: _lambda_.26
= control target key start
LH: loop header
LB: loop body
LE: loop exit
PB: predicated region body
PF: predicated region fallthrough
CT: control target
= control target key end

     0   :  { %s1080_s24 = smov 0   ;;  %s1258_s0 = inlined_call_operand.vmem [shape: bf16[2,16,80], index: 0, kind: input, shape index: {}]   ;;  %s1259_s1 = inlined_call_operand.vmem [shape: bf16[2,16,80], index: 1, kind: input, shape index: {}]   ;;  %s1260_s2 = inlined_call_operand.vmem [shape: bf16[16,144], index: 2, kind: input, shape index: {}]   ;;  %s1261_s3 = inlined_call_operand.vmem [shape: f32[16,1], index: 3, kind: input, shape index: {}]   ;;  %s1262_s4 = inlined_call_operand.vmem [shape: bf16[16,144], index: 4, kind: input, shape index: {}]   ;;  %s1263_s5 = inlined_call_operand.vmem [shape: f32[16,1], index: 5, kind: input, shape index: {}]   ;;  %s1264_s6 = inlined_call_operand.vmem [shape: f32[1,80], index: 6, kind: input, shape index: {}]   ;;  %s1265_s7 = inlined_call_operand.vmem [shape: bf16[2,16,80], index: 7, kind: output, shape index: {}]  }
   0x1 LB: > { %s918_s25 = sadd.s32 4294967295, %s1028_s24   ;;  %p922_p0 = scmp.ge.s32.totalorder %s1028_s24, 1  ;;  %s1028_s24 = sphi %s1080_s24, %s17_s24  }
   0x2   : > { %p247_p1 = scmp.lt.s32.totalorder %s1028_s24, 3 }
   0x4   : > { %p248_p2 = pnand %p922_p0, %p247_p1 }
   0x5   : > { %p284_p3 = scmp.lt.s32.totalorder (!%p248_p2), %s918_s25, 1  ;;  %s1031_s10 = smov (!%p248_p2), 11  }
   0x6   : > { %251 = sbr.rel (%p248_p2) target bundleno = 998 (0x3e6), region = 48  ;;  %s1032_s11 = smov (!%p248_p2), 107  }
   0x7   : > { %s1033_s12 = smov (!%p248_p2), 108   ;;  %s1034_s13 = smov (!%p248_p2), 116  }
   0x8   : > { %s1035_s14 = smov (!%p248_p2), 117   ;;  %s1036_s15 = smov (!%p248_p2), 118  }
   0x9   : > { %s1037_s16 = smov (!%p248_p2), 126   ;;  %s1038_s17 = smov (!%p248_p2), 127  }
   0xa   : > { %s1039_s18 = smov (!%p248_p2), 106  }
   0xb   : > { %vm312_vm0 = vcmask 84992   ;;  %vm315_vm1 = vcmask 896728   ;;  %v1030_v0 = vmov 0   ;;  %s1267_s25 = smov (!%p284_p3, %s918_s25), 1  ;;  %vm330_vm2 = vcmask 740440   ;;  %v454_v32 = vld [vmem:[%s1261_s3] sm:$0xff] }
   0xc   : > { %313 = vst.msk [vmem:[#allocation2] sm:$0xf] %vm312_vm0, %v1030_v0  ;;  %314 = vst.msk [vmem:[#allocation2 + $0x4] sm:$0xf] %vm312_vm0, %v1030_v0  ;;  %533 = vmatprep.subr.bf16.mxu0 %v1030_v0  ;;  %996 = vset.pattern.permute.xlu0 %v1030_v0  ;;  %s1096_s26 = sshll.u32 %s1267_s25, 3  ;;  %vm335_vm3 = vcmask 650240   ;;  %v577_v60 = vlaneseq }
   0xd   : > { %316 = vst.msk [vmem:[#allocation2] sm:$0xf] %vm315_vm1, %v1030_v0  ;;  %317 = vst.msk [vmem:[#allocation2 + $0x4] sm:$0xf] %vm315_vm1, %v1030_v0  ;;  %997 = vset.pattern.permute.xlu1 %v1030_v0  ;;  %796 = vmatprep.subr.bf16.mxu1 %v1030_v0  ;;  %s288_s29 = scalar_lea.vmem %s1258_s0, %s1096_s26  ;;  %s293_s9 = scalar_lea.vmem %s1259_s1, %s1096_s26  ;;  %v1009_v31 = vld [vmem:[%s1260_s2 + $0x4] ss:$8 sps:$4 sm:$0xff]  }
   0xe   : > { %v971_v1 = vld [vmem:[%s288_s29] sm:$0xff]   ;;  %vm529_vm4 = vcmask 130048   ;;  %v455_v33 = vld [vmem:[%s1261_s3 + $0x8] sm:$0xff]  ;;  %v578_v62 = vshrl.u32 %v577_v60, 7 }
   0xf   : > { %v975_v2 = vld [vmem:[%s293_s9] sm:$0xff]   ;;  %v972_v3 = vunpack.c.l.bf16 %v971_v1  ;;  %v973_v4 = vunpack.c.h.bf16 %v971_v1  ;;  %942 = vmatprep.mubr.msk.bf16.mxu0 %vm529_vm4, %v1009_v31 }
  0x10   : > { %v976_v5 = vunpack.c.l.bf16 %v975_v2  ;;  %v977_v6 = vunpack.c.h.bf16 %v975_v2  ;;  %v1007_v59 = vld [vmem:[%s1260_s2] ss:$8 sps:$4 sm:$0xff]   ;;  %v579_v63 = vsub.s32 0, %v578_v62 }
  0x11   : > { %v300_v61 = vld [vmem:[%s1264_s6] sm:$0x1] }
  0x12   : > { %v1106_v7 = vadd.f32 %v976_v5, %v972_v3  ;;  %v1108_v8 = vadd.f32 %v977_v6, %v973_v4  ;;  %vm301_vm5 = vcmp.ne.f32.partialorder %v300_v61, 0.0 }
  0x13   : > { %v576_v1 = vsel %vm301_vm5, 1, %v1030_v0 }
  0x14   : > { %v964_v9 = vpack.c.bf16 %v1106_v7, %v1106_v7  ;;  %v965_v10 = vpack.c.bf16 %v1108_v8, %v1108_v8  ;;  %v1177_v2 = vrot.slane %v576_v1, %v579_v63 }
  0x16   : > { %324 = vrot.lane.b32.xlu0 %v964_v9, %s1031_s10  ;;  %vm581_vm6 = vcmp.eq.s32.totalorder %v1177_v2, 1 }
  0x1a   : > { %326 = vrot.lane.b32.xlu0 %v965_v10, %s1031_s10 }
  0x88   : > { %v325_v11 = vpop.permute.xlu0 %324 }
  0x89   : > { %331 = vst.msk [vmem:[#allocation2] sm:$0xf] %vm330_vm2, %v325_v11 }
  0x8c   : > { %v327_v12 = vpop.permute.xlu0 %326 }
  0x8d   : > { %332 = vst.msk [vmem:[#allocation2 + $0x4] sm:$0xf] %vm330_vm2, %v327_v12 }
  0x90   : > { %v333_v13 = vld [vmem:[#allocation2] sm:$0xf] }
  0x91   : > { %v410_v14 = vld [vmem:[#allocation2] sm:$0xf]  ;;  %336 = vst.msk [vmem:[#allocation3] sm:$0xf] %vm335_vm3, %v333_v13 }
  0x92   : > { %v398_v15 = vld [vmem:[#allocation2] sm:$0xf]  ;;  %414 = vrot.lane.b32.xlu1 %v410_v14, %s1032_s11 }
  0x93   : > { %402 = vrot.lane.b32.xlu0 %v398_v15, %s1033_s12  ;;  %v386_v17 = vld [vmem:[#allocation2] sm:$0xf] }
  0x94   : > { %v334_v16 = vld [vmem:[#allocation2 + $0x4] sm:$0xf]  ;;  %v374_v19 = vld [vmem:[#allocation2] sm:$0xf] }
  0x95   : > { %v411_v18 = vld [vmem:[#allocation2 + $0x4] sm:$0xf]  ;;  %337 = vst.msk [vmem:[#allocation3 + $0x4] sm:$0xf] %vm335_vm3, %v334_v16  ;;  %v362_v21 = vld [vmem:[#allocation2] sm:$0xf] }
  0x96   : > { %416 = vrot.lane.b32.xlu1 %v411_v18, %s1032_s11  ;;  %v399_v20 = vld [vmem:[#allocation2 + $0x4] sm:$0xf]  ;;  %v350_v23 = vld [vmem:[#allocation2] sm:$0xf] }
  0x97   : > { %390 = vrot.lane.b32.xlu0 %v386_v17, %s1034_s13  ;;  %v387_v22 = vld [vmem:[#allocation2 + $0x4] sm:$0xf]  ;;  %v338_v25 = vld [vmem:[#allocation2] sm:$0xf] }
  0x98   : > { %v375_v24 = vld [vmem:[#allocation2 + $0x4] sm:$0xf]  ;;  %v422_v27 = vld [vmem:[#allocation2] sm:$0xf] }
  0x99   : > { %v363_v26 = vld [vmem:[#allocation2 + $0x4] sm:$0xf] }
  0x9a   : > { %404 = vrot.lane.b32.xlu1 %v399_v20, %s1033_s12  ;;  %v351_v28 = vld [vmem:[#allocation2 + $0x4] sm:$0xf] }
  0x9b   : > { %378 = vrot.lane.b32.xlu0 %v374_v19, %s1035_s14  ;;  %v339_v29 = vld [vmem:[#allocation2 + $0x4] sm:$0xf] }
  0x9c   : > { %v423_v30 = vld [vmem:[#allocation2 + $0x4] sm:$0xf]  ;;  %v1005_v57 = vld [vmem:[#allocation3] sm:$0xff]  }
  0x9e   : > { %392 = vrot.lane.b32.xlu1 %v387_v22, %s1034_s13 }
  0x9f   : > { %366 = vrot.lane.b32.xlu0 %v362_v21, %s1036_s15 }
  0xa2   : > { %380 = vrot.lane.b32.xlu1 %v375_v24, %s1035_s14 }
  0xa3   : > { %354 = vrot.lane.b32.xlu0 %v350_v23, %s1037_s16 }
  0xa6   : > { %368 = vrot.lane.b32.xlu1 %v363_v26, %s1036_s15 }
  0xa7   : > { %342 = vrot.lane.b32.xlu0 %v338_v25, %s1038_s17 }
  0xaa   : > { %356 = vrot.lane.b32.xlu1 %v351_v28, %s1037_s16 }
  0xab   : > { %426 = vrot.lane.b32.xlu0 %v422_v27, %s1039_s18 }
  0xae   : > { %344 = vrot.lane.b32.xlu1 %v339_v29, %s1038_s17 }
  0xaf   : > { %458 = vperm.xlu0 %996, %v454_v32  }
  0xb2   : > { %428 = vrot.lane.b32.xlu1 %v423_v30, %s1039_s18 }
  0xb6   : > { %463 = vperm.xlu1 %997, %v455_v33  }
 0x104   : > { %v415_v34 = vpop.permute.xlu1 %414 }
 0x105   : > { %v403_v35 = vpop.permute.xlu0 %402  ;;  %420 = vst.msk [vmem:[#allocation3 + $0x38] sm:$0xf] %vm335_vm3, %v415_v34 }
 0x106   : > { %408 = vst.msk [vmem:[#allocation3 + $0x30] sm:$0xf] %vm335_vm3, %v403_v35 }
 0x108   : > { %v417_v36 = vpop.permute.xlu1 %416 }
 0x109   : > { %v391_v37 = vpop.permute.xlu0 %390  ;;  %421 = vst.msk [vmem:[#allocation3 + $0x3c] sm:$0xf] %vm335_vm3, %v417_v36 }
 0x10a   : > { %396 = vst.msk [vmem:[#allocation3 + $0x28] sm:$0xf] %vm335_vm3, %v391_v37 }
 0x10c   : > { %v405_v38 = vpop.permute.xlu1 %404 }
 0x10d   : > { %v379_v39 = vpop.permute.xlu0 %378  ;;  %409 = vst.msk [vmem:[#allocation3 + $0x34] sm:$0xf] %vm335_vm3, %v405_v38  ;;  %v718_v38 = vld [vmem:[%s1263_s5] sm:$0xff] }
 0x10e   : > { %384 = vst.msk [vmem:[#allocation3 + $0x20] sm:$0xf] %vm335_vm3, %v379_v39 }
 0x110   : > { %v393_v40 = vpop.permute.xlu1 %392  ;;  %v998_v42 = vld [vmem:[#allocation3 + $0x38] sm:$0xff]  }
 0x111   : > { %v367_v41 = vpop.permute.xlu0 %366  ;;  %397 = vst.msk [vmem:[#allocation3 + $0x2c] sm:$0xf] %vm335_vm3, %v393_v40  ;;  %534 = vmatpush1.bf16.msra.mxu0 %v998_v42  ;;  %v1021_v40 = vld [vmem:[%s1262_s4 + $0x4] ss:$8 sps:$4 sm:$0xff]  }
 0x112   : > { %372 = vst.msk [vmem:[#allocation3 + $0x18] sm:$0xf] %vm335_vm3, %v367_v41  ;;  %535 = vmatprep.subr.bf16.mxu0 %v1030_v0  ;;  %v719_v41 = vld [vmem:[%s1263_s5 + $0x8] sm:$0xff]  ;;  %956 = vmatprep.mubr.msk.bf16.mxu1 %vm529_vm4, %v1021_v40 }
 0x114   : > { %v381_v43 = vpop.permute.xlu1 %380  ;;  %v999_v45 = vld [vmem:[#allocation3 + $0x30] sm:$0xff]  }
 0x115   : > { %v355_v44 = vpop.permute.xlu0 %354  ;;  %385 = vst.msk [vmem:[#allocation3 + $0x24] sm:$0xf] %vm335_vm3, %v381_v43  ;;  %536 = vmatpush1.bf16.msra.mxu0 %v999_v45 }
 0x116   : > { %360 = vst.msk [vmem:[#allocation3 + $0x10] sm:$0xf] %vm335_vm3, %v355_v44  ;;  %537 = vmatprep.subr.bf16.mxu0 %v1030_v0 }
 0x118   : > { %v369_v46 = vpop.permute.xlu1 %368  ;;  %v1000_v48 = vld [vmem:[#allocation3 + $0x28] sm:$0xff]  }
 0x119   : > { %v343_v47 = vpop.permute.xlu0 %342  ;;  %373 = vst.msk [vmem:[#allocation3 + $0x1c] sm:$0xf] %vm335_vm3, %v369_v46  ;;  %538 = vmatpush1.bf16.msra.mxu0 %v1000_v48 }
 0x11a   : > { %348 = vst.msk [vmem:[#allocation3 + $0x8] sm:$0xf] %vm335_vm3, %v343_v47  ;;  %539 = vmatprep.subr.bf16.mxu0 %v1030_v0 }
 0x11c   : > { %v357_v49 = vpop.permute.xlu1 %356  ;;  %v1001_v51 = vld [vmem:[#allocation3 + $0x20] sm:$0xff]  }
 0x11d   : > { %v427_v50 = vpop.permute.xlu0 %426  ;;  %361 = vst.msk [vmem:[#allocation3 + $0x14] sm:$0xf] %vm335_vm3, %v357_v49  ;;  %540 = vmatpush1.bf16.msra.mxu0 %v1001_v51 }
 0x11e   : > { %432 = vst.msk [vmem:[#allocation3 + $0x40] sm:$0xf] %vm335_vm3, %v427_v50  ;;  %541 = vmatprep.subr.bf16.mxu0 %v1030_v0 }
 0x120   : > { %v345_v52 = vpop.permute.xlu1 %344  ;;  %v1002_v53 = vld [vmem:[#allocation3 + $0x18] sm:$0xff]  }
 0x121   : > { %349 = vst.msk [vmem:[#allocation3 + $0xc] sm:$0xf] %vm335_vm3, %v345_v52  ;;  %542 = vmatpush1.bf16.msra.mxu0 %v1002_v53 }
 0x122   : > { %543 = vmatprep.subr.bf16.mxu0 %v1030_v0 }
 0x124   : > { %v429_v54 = vpop.permute.xlu1 %428  ;;  %v1003_v55 = vld [vmem:[#allocation3 + $0x10] sm:$0xff]  }
 0x125   : > { %433 = vst.msk [vmem:[#allocation3 + $0x44] sm:$0xf] %vm335_vm3, %v429_v54  ;;  %544 = vmatpush1.bf16.msra.mxu0 %v1003_v55 }
 0x126   : > { %545 = vmatprep.subr.bf16.mxu0 %v1030_v0 }
 0x128   : > { %v1004_v56 = vld [vmem:[#allocation3 + $0x8] sm:$0xff]  }
 0x129   : > { %546 = vmatpush1.bf16.msra.mxu0 %v1004_v56 }
 0x12a   : > { %547 = vmatprep.subr.bf16.mxu0 %v1030_v0  ;;  %v459_v3 = vpop.permute.xlu0 %458 }
 0x12c   : > { %v1006_v58 = vld [vmem:[#allocation3 + $0x40] sm:$0xff]  }
 0x12d   : > { %548 = vmatpush1.bf16.msra.mxu0 %v1005_v57 }
 0x12e   : > { %563 = vmatprep.subr.bf16.mxu0 %v1030_v0 }
 0x131   : > { %564 = vmatpush2.bf16.msra.mxu0 %v1006_v58  ;;  %v464_v9 = vpop.permute.xlu1 %463 }
 0x134   : > { %566 = vmatmul.mubr.bf16.vlgmr.msra.gmra.mxu0 %v1007_v59 }
 0x1f4   : > { %v567_v4 = vpop.f32.mrf.mxu0 }
 0x1f5   : > { %v568_v5 = vadd.f32 %v567_v4, %v459_v3 }
 0x1f6   : > { %v569_v6 = vpop.f32.mrf.mxu0 }
 0x1f7   : > { %v574_v10 = vmax.f32 %v568_v5, 0.0  ;;  %v1019_v5 = vld [vmem:[%s1262_s4] ss:$8 sps:$4 sm:$0xff]  }
 0x1f8   : > { %v570_v11 = vpop.f32.mrf.mxu0 }
 0x1f9   : > { %v582_v12 = vsel %vm581_vm6, %v574_v10, 0.0  ;;  %v571_v13 = vadd.f32 %v570_v11, %v464_v9 }
 0x1fa   : > { %v966_v14 = vpack.c.bf16 %v582_v12, %v582_v12  ;;  %v572_v15 = vpop.f32.mrf.mxu0 }
 0x1fb   : > { %v575_v16 = vmax.f32 %v571_v13, 0.0 }
 0x1fc   : > { %590 = vrot.lane.b32.xlu1 %v966_v14, %s1031_s10 }
 0x1fd   : > { %v583_v17 = vsel %vm581_vm6, %v575_v16, 0.0 }
 0x1fe   : > { %v967_v18 = vpack.c.bf16 %v583_v17, %v583_v17 }
 0x200   : > { %592 = vrot.lane.b32.xlu0 %v967_v18, %s1031_s10 }
 0x26e   : > { %v591_v19 = vpop.permute.xlu1 %590 }
 0x26f   : > { %596 = vst.msk [vmem:[#allocation2] sm:$0xf] %vm330_vm2, %v591_v19 }
 0x272   : > { %v593_v20 = vpop.permute.xlu0 %592 }
 0x273   : > { %597 = vst.msk [vmem:[#allocation2 + $0x4] sm:$0xf] %vm330_vm2, %v593_v20 }
 0x276   : > { %v674_v21 = vld [vmem:[#allocation2] sm:$0xf] }
 0x277   : > { %678 = vrot.lane.b32.xlu1 %v674_v21, %s1032_s11  ;;  %v598_v22 = vld [vmem:[#allocation2] sm:$0xf] }
 0x278   : > { %600 = vst.msk [vmem:[#allocation3] sm:$0xf] %vm335_vm3, %v598_v22  ;;  %v662_v23 = vld [vmem:[#allocation2] sm:$0xf] }
 0x279   : > { %v650_v26 = vld [vmem:[#allocation2] sm:$0xf] }
 0x27a   : > { %v675_v24 = vld [vmem:[#allocation2 + $0x4] sm:$0xf]  ;;  %v638_v28 = vld [vmem:[#allocation2] sm:$0xf] }
 0x27b   : > { %666 = vrot.lane.b32.xlu1 %v662_v23, %s1033_s12  ;;  %680 = vrot.lane.b32.xlu0 %v675_v24, %s1032_s11  ;;  %v599_v25 = vld [vmem:[#allocation2 + $0x4] sm:$0xf]  ;;  %v626_v30 = vld [vmem:[#allocation2] sm:$0xf] }
 0x27c   : > { %601 = vst.msk [vmem:[#allocation3 + $0x4] sm:$0xf] %vm335_vm3, %v599_v25  ;;  %v663_v27 = vld [vmem:[#allocation2 + $0x4] sm:$0xf]  ;;  %v614_v32 = vld [vmem:[#allocation2] sm:$0xf] }
 0x27d   : > { %v651_v29 = vld [vmem:[#allocation2 + $0x4] sm:$0xf]  ;;  %v602_v34 = vld [vmem:[#allocation2] sm:$0xf] }
 0x27e   : > { %v639_v31 = vld [vmem:[#allocation2 + $0x4] sm:$0xf]  ;;  %v686_v36 = vld [vmem:[#allocation2] sm:$0xf] }
 0x27f   : > { %654 = vrot.lane.b32.xlu1 %v650_v26, %s1034_s13  ;;  %668 = vrot.lane.b32.xlu0 %v663_v27, %s1033_s12  ;;  %v627_v33 = vld [vmem:[#allocation2 + $0x4] sm:$0xf] }
 0x280   : > { %v615_v35 = vld [vmem:[#allocation2 + $0x4] sm:$0xf] }
 0x281   : > { %v603_v37 = vld [vmem:[#allocation2 + $0x4] sm:$0xf] }
 0x282   : > { %v687_v39 = vld [vmem:[#allocation2 + $0x4] sm:$0xf] }
 0x283   : > { %642 = vrot.lane.b32.xlu1 %v638_v28, %s1035_s14  ;;  %656 = vrot.lane.b32.xlu0 %v651_v29, %s1034_s13  ;;  %v1017_v3 = vld [vmem:[#allocation3] sm:$0xff]  }
 0x287   : > { %630 = vrot.lane.b32.xlu1 %v626_v30, %s1036_s15  ;;  %644 = vrot.lane.b32.xlu0 %v639_v31, %s1035_s14 }
 0x28b   : > { %618 = vrot.lane.b32.xlu1 %v614_v32, %s1037_s16  ;;  %632 = vrot.lane.b32.xlu0 %v627_v33, %s1036_s15 }
 0x28f   : > { %606 = vrot.lane.b32.xlu1 %v602_v34, %s1038_s17  ;;  %620 = vrot.lane.b32.xlu0 %v615_v35, %s1037_s16 }
 0x293   : > { %690 = vrot.lane.b32.xlu1 %v686_v36, %s1039_s18  ;;  %608 = vrot.lane.b32.xlu0 %v603_v37, %s1038_s17 }
 0x297   : > { %722 = vperm.xlu1 %997, %v718_v38   ;;  %692 = vrot.lane.b32.xlu0 %v687_v39, %s1039_s18  ;;  %s298_s18 = scalar_lea.vmem %s1265_s7, %s1096_s26 }
 0x29b   : > { %727 = vperm.xlu0 %996, %v719_v41  }
 0x2e9   : > { %v679_v42 = vpop.permute.xlu1 %678 }
 0x2ea   : > { %684 = vst.msk [vmem:[#allocation3 + $0x38] sm:$0xf] %vm335_vm3, %v679_v42 }
 0x2ed   : > { %v667_v43 = vpop.permute.xlu1 %666  ;;  %v681_v44 = vpop.permute.xlu0 %680 }
 0x2ee   : > { %672 = vst.msk [vmem:[#allocation3 + $0x30] sm:$0xf] %vm335_vm3, %v667_v43  ;;  %685 = vst.msk [vmem:[#allocation3 + $0x3c] sm:$0xf] %vm335_vm3, %v681_v44 }
 0x2f1   : > { %v655_v45 = vpop.permute.xlu1 %654  ;;  %v669_v46 = vpop.permute.xlu0 %668 }
 0x2f2   : > { %660 = vst.msk [vmem:[#allocation3 + $0x28] sm:$0xf] %vm335_vm3, %v655_v45  ;;  %673 = vst.msk [vmem:[#allocation3 + $0x34] sm:$0xf] %vm335_vm3, %v669_v46 }
 0x2f5   : > { %v643_v47 = vpop.permute.xlu1 %642  ;;  %v657_v48 = vpop.permute.xlu0 %656  ;;  %v1010_v49 = vld [vmem:[#allocation3 + $0x38] sm:$0xff]  }
 0x2f6   : > { %648 = vst.msk [vmem:[#allocation3 + $0x20] sm:$0xf] %vm335_vm3, %v643_v47  ;;  %661 = vst.msk [vmem:[#allocation3 + $0x2c] sm:$0xf] %vm335_vm3, %v657_v48  ;;  %797 = vmatpush1.bf16.msra.mxu1 %v1010_v49 }
 0x2f7   : > { %798 = vmatprep.subr.bf16.mxu1 %v1030_v0 }
 0x2f9   : > { %v631_v50 = vpop.permute.xlu1 %630  ;;  %v645_v51 = vpop.permute.xlu0 %644  ;;  %v1011_v52 = vld [vmem:[#allocation3 + $0x30] sm:$0xff]  }
 0x2fa   : > { %636 = vst.msk [vmem:[#allocation3 + $0x18] sm:$0xf] %vm335_vm3, %v631_v50  ;;  %649 = vst.msk [vmem:[#allocation3 + $0x24] sm:$0xf] %vm335_vm3, %v645_v51  ;;  %799 = vmatpush1.bf16.msra.mxu1 %v1011_v52 }
 0x2fb   : > { %800 = vmatprep.subr.bf16.mxu1 %v1030_v0 }
 0x2fd   : > { %v619_v53 = vpop.permute.xlu1 %618  ;;  %v633_v54 = vpop.permute.xlu0 %632  ;;  %v1012_v55 = vld [vmem:[#allocation3 + $0x28] sm:$0xff]  }
 0x2fe   : > { %624 = vst.msk [vmem:[#allocation3 + $0x10] sm:$0xf] %vm335_vm3, %v619_v53  ;;  %637 = vst.msk [vmem:[#allocation3 + $0x1c] sm:$0xf] %vm335_vm3, %v633_v54  ;;  %801 = vmatpush1.bf16.msra.mxu1 %v1012_v55 }
 0x2ff   : > { %802 = vmatprep.subr.bf16.mxu1 %v1030_v0 }
 0x301   : > { %v607_v56 = vpop.permute.xlu1 %606  ;;  %v621_v57 = vpop.permute.xlu0 %620  ;;  %v1013_v58 = vld [vmem:[#allocation3 + $0x20] sm:$0xff]  }
 0x302   : > { %612 = vst.msk [vmem:[#allocation3 + $0x8] sm:$0xf] %vm335_vm3, %v607_v56  ;;  %625 = vst.msk [vmem:[#allocation3 + $0x14] sm:$0xf] %vm335_vm3, %v621_v57  ;;  %803 = vmatpush1.bf16.msra.mxu1 %v1013_v58 }
 0x303   : > { %804 = vmatprep.subr.bf16.mxu1 %v1030_v0 }
 0x305   : > { %v691_v59 = vpop.permute.xlu1 %690  ;;  %v609_v60 = vpop.permute.xlu0 %608  ;;  %v1014_v61 = vld [vmem:[#allocation3 + $0x18] sm:$0xff]  }
 0x306   : > { %696 = vst.msk [vmem:[#allocation3 + $0x40] sm:$0xf] %vm335_vm3, %v691_v59  ;;  %613 = vst.msk [vmem:[#allocation3 + $0xc] sm:$0xf] %vm335_vm3, %v609_v60  ;;  %805 = vmatpush1.bf16.msra.mxu1 %v1014_v61 }
 0x307   : > { %806 = vmatprep.subr.bf16.mxu1 %v1030_v0 }
 0x309   : > { %v693_v62 = vpop.permute.xlu0 %692  ;;  %v1015_v63 = vld [vmem:[#allocation3 + $0x10] sm:$0xff]  }
 0x30a   : > { %697 = vst.msk [vmem:[#allocation3 + $0x44] sm:$0xf] %vm335_vm3, %v693_v62  ;;  %807 = vmatpush1.bf16.msra.mxu1 %v1015_v63 }
 0x30b   : > { %808 = vmatprep.subr.bf16.mxu1 %v1030_v0 }
 0x30d   : > { %v1016_v1 = vld [vmem:[#allocation3 + $0x8] sm:$0xff]  }
 0x30e   : > { %809 = vmatpush1.bf16.msra.mxu1 %v1016_v1 }
 0x30f   : > { %810 = vmatprep.subr.bf16.mxu1 %v1030_v0 }
 0x311   : > { %v1018_v4 = vld [vmem:[#allocation3 + $0x40] sm:$0xff]  }
 0x312   : > { %811 = vmatpush1.bf16.msra.mxu1 %v1017_v3  ;;  %v723_v6 = vpop.permute.xlu1 %722 }
 0x313   : > { %826 = vmatprep.subr.bf16.mxu1 %v1030_v0 }
 0x316   : > { %827 = vmatpush2.bf16.msra.mxu1 %v1018_v4  ;;  %v728_v13 = vpop.permute.xlu0 %727 }
 0x319   : > { %829 = vmatmul.mubr.bf16.vlgmr.msra.gmra.mxu1 %v1019_v5 }
 0x3d9   : > { %v830_v9 = vpop.f32.mrf.mxu1 }
 0x3da   : > { %v831_v10 = vadd.f32 %v830_v9, %v723_v6 }
 0x3db   : > { %v832_v11 = vpop.f32.mrf.mxu1 }
 0x3dc   : > { %v837_v12 = vsel %vm581_vm6, %v831_v10, 0.0 }
 0x3dd   : > { %v839_v14 = vadd.f32 %v837_v12, %v1106_v7  ;;  %v833_v15 = vpop.f32.mrf.mxu1 }
 0x3de   : > { %v834_v0 = vadd.f32 %v833_v15, %v728_v13 }
 0x3df   : > { %v968_v16 = vpack.c.bf16 %v839_v14, %v839_v14  ;;  %v835_v17 = vpop.f32.mrf.mxu1 }
 0x3e0   : > { %v838_v18 = vsel %vm581_vm6, %v834_v0, 0.0 }
 0x3e1   : > { %849 = vst.msk [vmem:[%s298_s18] sm:$0xf] %vm335_vm3, %v968_v16  ;;  %v840_v19 = vadd.f32 %v838_v18, %v1108_v8 }
 0x3e3   : > { %v969_v20 = vpack.c.bf16 %v840_v19, %v840_v19 }
 0x3e5   : > { %850 = vst.msk [vmem:[%s298_s18 + $0x4] sm:$0xf] %vm335_vm3, %v969_v20 }
 0x3e6 PF: > { %s17_s24 = sadd.s32 1, %s1028_s24  }
 0x3e7   : > { %p14_p4 = scmp.ge.s32.totalorder %s17_s24, 4  }
 0x3e9   :  { %16 = sbr.rel (!%p14_p4) target bundleno = 1 (0x1), region = 81 }

// kernel: _lambda_.28
= control target key start
LH: loop header
LB: loop body
LE: loop exit
PB: predicated region body
PF: predicated region fallthrough
CT: control target
= control target key end

     0   :  { %s1324_s24 = smov 0   ;;  %s1553_s0 = inlined_call_operand.vmem [shape: bf16[2,8,288], index: 0, kind: input, shape index: {}]   ;;  %s1554_s1 = inlined_call_operand.vmem [shape: bf16[2,8,288], index: 1, kind: input, shape index: {}]   ;;  %s1555_s2 = inlined_call_operand.vmem [shape: bf16[8,72], index: 2, kind: input, shape index: {}]   ;;  %s1556_s3 = inlined_call_operand.vmem [shape: f32[8,1], index: 3, kind: input, shape index: {}]   ;;  %s1557_s4 = inlined_call_operand.vmem [shape: bf16[8,72], index: 4, kind: input, shape index: {}]   ;;  %s1558_s5 = inlined_call_operand.vmem [shape: f32[8,1], index: 5, kind: input, shape index: {}]   ;;  %s1559_s6 = inlined_call_operand.vmem [shape: f32[1,288], index: 6, kind: input, shape index: {}]   ;;  %s1560_s7 = inlined_call_operand.vmem [shape: bf16[2,8,288], index: 7, kind: output, shape index: {}]  }
   0x1 LB: > { %s1134_s25 = sadd.s32 4294967295, %s1270_s24   ;;  %p1138_p0 = scmp.ge.s32.totalorder %s1270_s24, 1  ;;  %s1270_s24 = sphi %s1324_s24, %s17_s24  }
   0x2   : > { %p247_p1 = scmp.lt.s32.totalorder %s1270_s24, 3 }
   0x4   : > { %p248_p2 = pnand %p1138_p0, %p247_p1 }
   0x5   : > { %p284_p3 = scmp.lt.s32.totalorder (!%p248_p2), %s1134_s25, 1  ;;  %s1273_s10 = smov (!%p248_p2), 19  }
   0x6   : > { %251 = sbr.rel (%p248_p2) target bundleno = 992 (0x3e0), region = 48  ;;  %s1274_s11 = smov (!%p248_p2), 90  }
   0x7   : > { %s1275_s12 = smov (!%p248_p2), 92   ;;  %s1276_s13 = smov (!%p248_p2), 91  }
   0x8   : > { %s1278_s14 = smov (!%p248_p2), 109   ;;  %s1279_s15 = smov (!%p248_p2), 108  }
   0x9   : > { %s1280_s16 = smov (!%p248_p2), 126   ;;  %s1281_s17 = smov (!%p248_p2), 110  }
   0xa   : > { %s1282_s18 = smov (!%p248_p2), 127  }
   0xb   : > { %vm315_vm0 = vcmask 150528   ;;  %v1272_v0 = vmov 0   ;;  %s1567_s25 = smov (!%p284_p3, %s1134_s25), 1  ;;  %vm317_vm1 = vcmask 699800   ;;  %vm340_vm2 = vcmask 1043608   ;;  %v507_v33 = vld [vmem:[%s1556_s3] sm:$0xff] }
   0xc   : > { %316 = vst.msk [vmem:[#allocation2] sm:$0xf] %vm315_vm0, %v1272_v0  ;;  %631 = vmatprep.mubr.bf16.mxu0 %v1272_v0  ;;  %1253 = vset.pattern.permute.xlu0 %v1272_v0  ;;  %s1335_s26 = smul.u32 12, %s1567_s25  ;;  %vm341_vm3 = vcmask 1047556   ;;  %vm335_vm4 = vcmask 154624   ;;  %vm344_vm6 = vcmask 412672  }
   0xd   : > { %318 = vst.msk [vmem:[#allocation2 + $0x8] sm:$0xf] %vm317_vm1, %v1272_v0  ;;  %vm1358_vm5 = vmor %vm341_vm3, %vm340_vm2  ;;  %vm349_vm7 = vcmask 257024   ;;  %v1277_v25 = vmov 0.0   ;;  %vm1283_vm8 = vmmov 0   ;;  %vm361_vm9 = vcmask 1043456  }
   0xe   : > { %s288_s29 = scalar_lea.vmem %s1553_s0, %s1335_s26  ;;  %s293_s9 = scalar_lea.vmem %s1554_s1, %s1335_s26  ;;  %1204 = vmatprep.subr.bf16.mxu1 %v1277_v25  ;;  %1214 = vmatprep.mubr.msk.bf16.mxu1 %vm1283_vm8, %v1277_v25  ;;  %vm482_vm10 = vcmask 736256   ;;  %vm448_vm11 = vcmask 752640   ;;  %vm465_vm12 = vcmask 744448   ;;  %vm414_vm13 = vcmask 891904  }
   0xf   : > { %v302_v1 = vld [vmem:[%s288_s29] sm:$0xff]  ;;  %v303_v3 = vld [vmem:[%s288_s29 + $0x8] sm:$0xf]  ;;  %vm431_vm14 = vcmask 883712   ;;  %vm380_vm15 = vcmask 1031168   ;;  %vm397_vm0 = vcmask 900096  }
  0x10   : > { %v307_v2 = vld [vmem:[%s293_s9] sm:$0xff]  ;;  %v304_v4 = vunpack.c.l.bf16 %v302_v1  ;;  %v305_v5 = vunpack.c.h.bf16 %v302_v1  ;;  %v308_v8 = vld [vmem:[%s293_s9 + $0x8] sm:$0xf]  ;;  %v306_v9 = vunpack.c.l.bf16 %v303_v3  ;;  %vm363_vm1 = vcmask 1039360  }
  0x11   : > { %v309_v6 = vunpack.c.l.bf16 %v307_v2  ;;  %v310_v7 = vunpack.c.h.bf16 %v307_v2  ;;  %v311_v10 = vunpack.c.l.bf16 %v308_v8  ;;  %vm1561_vm2 = vcmask 588800  }
  0x13   : > { %v1346_v11 = vadd.f32 %v309_v6, %v304_v4  ;;  %v1348_v12 = vadd.f32 %v310_v7, %v305_v5  ;;  %v1350_v13 = vadd.f32 %v311_v10, %v306_v9 }
  0x15   : > { %v1186_v14 = vpack.c.bf16 %v1348_v12, %v1346_v11  ;;  %v1187_v15 = vpack.c.bf16 %v1350_v13, %v1350_v13 }
  0x17   : > { %330 = vrot.lane.b32.xlu0 %v1186_v14, %s1273_s10 }
  0x1b   : > { %332 = vrot.lane.b32.xlu0 %v1187_v15, %s1273_s10 }
  0x89   : > { %v331_v16 = vpop.permute.xlu0 %330 }
  0x8a   : > { %v334_v18 = vrot.slane %v331_v16, 4 }
  0x8c   : > { %v336_v19 = vsel %vm335_vm4, %v334_v18, %v331_v16 }
  0x8d   : > { %343 = vst.msk [vmem:[#allocation2] sm:$0xff] %vm1358_vm5, %v336_v19  ;;  %v333_v20 = vpop.permute.xlu0 %332 }
  0x8e   : > { %v337_v21 = vsel %vm335_vm4, %v334_v18, %v333_v20 }
  0x8f   : > { %345 = vst.msk [vmem:[#allocation2 + $0x8] sm:$0xf] %vm344_vm6, %v337_v21 }
  0x94   : > { %v1367_v22 = vld [vmem:[#allocation2] sm:$0xff] }
  0x95   : > { %475 = vrot.lane.b32.xlu1 %v1367_v22, %s1274_s11  ;;  %441 = vrot.lane.b32.xlu0 %v1367_v22, %s1275_s12 }
  0x96   : > { %v347_v23 = vld [vmem:[#allocation2 + $0x8] sm:$0xf] }
  0x97   : > { %350 = vst.msk [vmem:[#allocation3 + $0x8] sm:$0xf] %vm349_vm7, %v347_v23  ;;  %v472_v24 = vld [vmem:[#allocation2 + $0x8] sm:$0xf] }
  0x98   : > { %v438_v26 = vld [vmem:[#allocation2 + $0x8] sm:$0xf] }
  0x99   : > { %458 = vrot.lane.b32.xlu0 %v1367_v22, %s1276_s13  ;;  %477 = vrot.lane.b32.xlu1 %v472_v24, %s1274_s11  ;;  %v455_v27 = vld [vmem:[#allocation2 + $0x8] sm:$0xf] }
  0x9a   : > { %v404_v28 = vld [vmem:[#allocation2 + $0x8] sm:$0xf] }
  0x9b   : > { %v421_v29 = vld [vmem:[#allocation2 + $0x8] sm:$0xf] }
  0x9c   : > { %v370_v30 = vld [vmem:[#allocation2 + $0x8] sm:$0xf] }
  0x9d   : > { %407 = vrot.lane.b32.xlu0 %v1367_v22, %s1278_s14  ;;  %443 = vrot.lane.b32.xlu1 %v438_v26, %s1275_s12  ;;  %v387_v31 = vld [vmem:[#allocation2 + $0x8] sm:$0xf] }
  0x9e   : > { %v352_v32 = vld [vmem:[#allocation2 + $0x8] sm:$0xf] }
  0xa1   : > { %424 = vrot.lane.b32.xlu0 %v1367_v22, %s1279_s15  ;;  %460 = vrot.lane.b32.xlu1 %v455_v27, %s1276_s13 }
  0xa5   : > { %373 = vrot.lane.b32.xlu0 %v1367_v22, %s1280_s16  ;;  %409 = vrot.lane.b32.xlu1 %v404_v28, %s1278_s14 }
  0xa9   : > { %390 = vrot.lane.b32.xlu0 %v1367_v22, %s1281_s17  ;;  %426 = vrot.lane.b32.xlu1 %v421_v29, %s1279_s15 }
  0xad   : > { %355 = vrot.lane.b32.xlu0 %v1367_v22, %s1282_s18  ;;  %375 = vrot.lane.b32.xlu1 %v370_v30, %s1280_s16 }
  0xb1   : > { %392 = vrot.lane.b32.xlu1 %v387_v31, %s1281_s17  ;;  %510 = vperm.xlu0 %1253, %v507_v33  }
  0xb5   : > { %357 = vrot.lane.b32.xlu1 %v352_v32, %s1282_s18 }
 0x107   : > { %v476_v34 = vpop.permute.xlu1 %475  ;;  %v442_v35 = vpop.permute.xlu0 %441 }
 0x108   : > { %v479_v38 = vrot.slane %v476_v34, 4  ;;  %v445_v47 = vrot.slane %v442_v35, 4 }
 0x10b   : > { %v478_v36 = vpop.permute.xlu1 %477  ;;  %v459_v37 = vpop.permute.xlu0 %458 }
 0x10c   : > { %v480_v39 = vrot.slane %v478_v36, 4  ;;  %487 = vst.msk [vmem:[#allocation3 + $0x68] sm:$0xf] %vm349_vm7, %v478_v36  ;;  %v462_v52 = vrot.slane %v459_v37, 4 }
 0x10e   : > { %v481_v40 = vsel %vm361_vm9, %v479_v38, %v480_v39 }
 0x10f   : > { %v483_v41 = vsel %vm482_vm10, %v476_v34, %v481_v40  ;;  %v444_v42 = vpop.permute.xlu1 %443  ;;  %v408_v43 = vpop.permute.xlu0 %407 }
 0x110   : > { %v446_v44 = vrot.slane %v444_v42, 4  ;;  %453 = vst.msk [vmem:[#allocation3 + $0x50] sm:$0xf] %vm349_vm7, %v444_v42  ;;  %v1157_v45 = vcombine.high %v483_v41, %v483_v41  ;;  %v1156_v46 = vcombine.low %v483_v41, %v483_v41  ;;  %v411_v1 = vrot.slane %v408_v43, 4  ;;  %v488_v41 = vld [vmem:[%s1555_s2] sm:$0xf] }
 0x112   : > { %1159 = vmatprep.subr.msk.bf16.mxu0 %vm361_vm9, %v1157_v45  ;;  %v591_v48 = vsel %vm361_vm9, %v1156_v46, 0  ;;  %v447_v53 = vsel %vm361_vm9, %v445_v47, %v446_v44 }
 0x113   : > { %v461_v49 = vpop.permute.xlu1 %460  ;;  %v425_v50 = vpop.permute.xlu0 %424  ;;  %v1254_v51 = vld [vmem:[#allocation3 + $0x68] ss:$0 sps:$4 sm:$0xff]   ;;  %606 = vmatpush1.bf16.msra.mxu0 %v591_v48  ;;  %v449_v57 = vsel %vm448_vm11, %v442_v35, %v447_v53 }
 0x114   : > { %v463_v54 = vrot.slane %v461_v49, 4  ;;  %470 = vst.msk [vmem:[#allocation3 + $0x5c] sm:$0xf] %vm349_vm7, %v461_v49  ;;  %v597_v55 = vsel %vm361_vm9, %v1254_v51, 0  ;;  %v428_v4 = vrot.slane %v425_v50, 4 }
 0x115   : > { %1205 = vmatpush3.bf16.msra.mxu1 %v597_v55 }
 0x116   : > { %v464_v56 = vsel %vm361_vm9, %v462_v52, %v463_v54  ;;  %1206 = vmatprep.subr.bf16.mxu1 %v1277_v25 }
 0x117   : > { %v466_v58 = vsel %vm465_vm12, %v459_v37, %v464_v56  ;;  %v410_v59 = vpop.permute.xlu1 %409  ;;  %v374_v63 = vpop.permute.xlu0 %373 }
 0x118   : > { %v412_v60 = vrot.slane %v410_v59, 4  ;;  %419 = vst.msk [vmem:[#allocation3 + $0x38] sm:$0xf] %vm349_vm7, %v410_v59  ;;  %v1154_v61 = vcombine.high %v449_v57, %v466_v58  ;;  %v1153_v62 = vcombine.low %v449_v57, %v466_v58  ;;  %v377_v19 = vrot.slane %v374_v63, 4 }
 0x11a   : > { %607 = vmatprep.subr.bf16.mxu0 %v1154_v61  ;;  %v413_v5 = vsel %vm361_vm9, %v411_v1, %v412_v60 }
 0x11b   : > { %v427_v2 = vpop.permute.xlu1 %426  ;;  %v1255_v3 = vld [vmem:[#allocation3 + $0x50] ss:$12 sps:$4 sm:$0xff]   ;;  %608 = vmatpush1.bf16.msra.mxu0 %v1153_v62  ;;  %v415_v8 = vsel %vm414_vm13, %v408_v43, %v413_v5  ;;  %v391_v10 = vpop.permute.xlu0 %390  ;;  %v300_v43 = vld [vmem:[%s1559_s6] sm:$0x7] }
 0x11c   : > { %v429_v6 = vrot.slane %v427_v2, 4  ;;  %436 = vst.msk [vmem:[#allocation3 + $0x44] sm:$0xf] %vm349_vm7, %v427_v2  ;;  %1207 = vmatpush3.bf16.msra.mxu1 %v1255_v3  ;;  %v394_v23 = vrot.slane %v391_v10, 4  ;;  %vm301_vm3 = vcmp.ne.f32.partialorder %v300_v43, 0.0 }
 0x11d   : > { %1208 = vmatprep.subr.bf16.mxu1 %v1277_v25  ;;  %v683_v47 = vsel %vm301_vm3, 1, %v1272_v0 }
 0x11e   : > { %v430_v7 = vsel %vm361_vm9, %v428_v4, %v429_v6 }
 0x11f   : > { %v432_v9 = vsel %vm431_vm14, %v425_v50, %v430_v7  ;;  %v376_v14 = vpop.permute.xlu1 %375  ;;  %v356_v27 = vpop.permute.xlu0 %355 }
 0x120   : > { %v378_v15 = vrot.slane %v376_v14, 4  ;;  %385 = vst.msk [vmem:[#allocation3 + $0x20] sm:$0xf] %vm349_vm7, %v376_v14  ;;  %v1151_v16 = vcombine.high %v415_v8, %v432_v9  ;;  %v1150_v18 = vcombine.low %v415_v8, %v432_v9  ;;  %v359_v32 = vrot.slane %v356_v27, 4 }
 0x122   : > { %609 = vmatprep.subr.bf16.mxu0 %v1151_v16  ;;  %v379_v24 = vsel %vm361_vm9, %v377_v19, %v378_v15 }
 0x123   : > { %v393_v20 = vpop.permute.xlu1 %392  ;;  %v1256_v21 = vld [vmem:[#allocation3 + $0x38] ss:$12 sps:$4 sm:$0xff]   ;;  %610 = vmatpush1.bf16.msra.mxu0 %v1150_v18  ;;  %v381_v29 = vsel %vm380_vm15, %v374_v63, %v379_v24 }
 0x124   : > { %v395_v26 = vrot.slane %v393_v20, 4  ;;  %402 = vst.msk [vmem:[#allocation3 + $0x2c] sm:$0xf] %vm349_vm7, %v393_v20  ;;  %1209 = vmatpush3.bf16.msra.mxu1 %v1256_v21 }
 0x125   : > { %1210 = vmatprep.subr.bf16.mxu1 %v1277_v25 }
 0x126   : > { %v396_v28 = vsel %vm361_vm9, %v394_v23, %v395_v26 }
 0x127   : > { %v398_v30 = vsel %vm397_vm0, %v391_v10, %v396_v28  ;;  %v358_v31 = vpop.permute.xlu1 %357  ;;  %v875_v28 = vld [vmem:[%s1558_s5] sm:$0xff] }
 0x128   : > { %v360_v33 = vrot.slane %v358_v31, 4  ;;  %368 = vst.msk [vmem:[#allocation3 + $0x14] sm:$0xf] %vm349_vm7, %v358_v31  ;;  %v1148_v34 = vcombine.high %v381_v29, %v398_v30  ;;  %v1147_v35 = vcombine.low %v381_v29, %v398_v30 }
 0x12a   : > { %v362_v36 = vsel %vm361_vm9, %v359_v32, %v360_v33  ;;  %611 = vmatprep.subr.bf16.mxu0 %v1148_v34 }
 0x12b   : > { %v364_v37 = vsel %vm363_vm1, %v356_v27, %v362_v36  ;;  %v1257_v38 = vld [vmem:[#allocation3 + $0x20] ss:$12 sps:$4 sm:$0xff]   ;;  %612 = vmatpush1.bf16.msra.mxu0 %v1147_v35 }
 0x12c   : > { %v1145_v39 = vcombine.high %v1367_v22, %v364_v37  ;;  %v1144_v40 = vcombine.low %v1367_v22, %v364_v37  ;;  %1211 = vmatpush3.bf16.msra.mxu1 %v1257_v38  ;;  %v684_v22 = vlaneseq  ;;  %v511_v48 = vpop.permute.xlu0 %510 }
 0x12d   : > { %1212 = vmatprep.subr.bf16.mxu1 %v1277_v25 }
 0x12e   : > { %613 = vmatprep.subr.bf16.mxu0 %v1145_v39  ;;  %v685_v44 = vshrl.u32 %v684_v22, 7 }
 0x12f   : > { %v1258_v42 = vld [vmem:[#allocation3 + $0x8] ss:$12 sps:$4 sm:$0xff]   ;;  %614 = vmatpush1.bf16.msra.mxu0 %v1144_v40 }
 0x130   : > { %1213 = vmatpush3.bf16.msra.mxu1 %v1258_v42  ;;  %v690_v45 = vsub.s32 1, %v685_v44  ;;  %v686_v46 = vsub.s32 0, %v685_v44  ;;  %v694_v49 = vsub.s32 2, %v685_v44 }
 0x131   : > { %1218 = vmatprep.subr.bf16.mxu1 %v1277_v25 }
 0x132   : > { %1160 = vmatmul.mubr.msk.bf16.vlgmr.msra.gmra.mxu0 %vm1561_vm2, %v488_v41  ;;  %v1446_v51 = vrot.slane %v683_v47, %v690_v45  ;;  %v1448_v52 = vrot.slane %v683_v47, %v686_v46  ;;  %v1450_v56 = vrot.slane %v683_v47, %v694_v49 }
 0x133   : > { %997 = vmatprep.mubr.bf16.mxu0 %v1272_v0  ;;  %1215 = vmatmul.mubr.msk.bf16.vlgmr.msra.gmra.mxu1 %vm1561_vm2, %v488_v41 }
 0x134   : > { %1228 = vmatprep.mubr.msk.bf16.mxu1 %vm1283_vm8, %v1277_v25  ;;  %vm697_vm8 = vcmp.eq.s32.totalorder %v1446_v51, 1  ;;  %vm696_vm3 = vcmp.eq.s32.totalorder %v1448_v52, 1  ;;  %vm698_vm2 = vcmp.eq.s32.totalorder %v1450_v56, 1 }
 0x1f2   : > { %v633_v50 = vpop.f32.mrf.mxu0 }
 0x1f3   : > { %v634_v53 = vadd.f32 %v633_v50, %v511_v48  ;;  %v674_v54 = vpop.f32.mrf.mxu1 }
 0x1f4   : > { %v635_v55 = vpop.f32.mrf.mxu0  ;;  %v675_v57 = vadd.f32 %v674_v54, %v511_v48 }
 0x1f5   : > { %v680_v58 = vmax.f32 %v634_v53, 0.0  ;;  %v636_v59 = vadd.f32 %v635_v55, %v511_v48  ;;  %v1216_v60 = vpop.f32.mrf.mxu1 }
 0x1f6   : > { %v637_v61 = vpop.f32.mrf.mxu0  ;;  %v682_v0 = vmax.f32 %v675_v57, 0.0 }
 0x1f7   : > { %v681_v62 = vmax.f32 %v636_v59, 0.0  ;;  %v677_v63 = vpop.f32.mrf.mxu1  ;;  %v699_v3 = vsel %vm696_vm3, %v680_v58, 0.0 }
 0x1f8   : > { %v638_v1 = vpop.f32.mrf.mxu0  ;;  %v701_v6 = vsel %vm698_vm2, %v682_v0, 0.0 }
 0x1f9   : > { %v700_v2 = vsel %vm697_vm8, %v681_v62, 0.0  ;;  %v1217_v4 = vpop.f32.mrf.mxu1  ;;  %v1189_v7 = vpack.c.bf16 %v701_v6, %v701_v6 }
 0x1fa   : > { %v1188_v5 = vpack.c.bf16 %v700_v2, %v699_v3 }
 0x1fc   : > { %713 = vrot.lane.b32.xlu1 %v1188_v5, %s1273_s10 }
 0x200   : > { %715 = vrot.lane.b32.xlu1 %v1189_v7, %s1273_s10  ;;  %s298_s10 = scalar_lea.vmem %s1560_s7, %s1335_s26 }
 0x26e   : > { %v714_v8 = vpop.permute.xlu1 %713 }
 0x26f   : > { %v717_v9 = vrot.slane %v714_v8, 4 }
 0x271   : > { %v718_v10 = vsel %vm335_vm4, %v717_v9, %v714_v8 }
 0x272   : > { %722 = vst.msk [vmem:[#allocation2] sm:$0xff] %vm1358_vm5, %v718_v10  ;;  %v716_v14 = vpop.permute.xlu1 %715 }
 0x273   : > { %v719_v15 = vsel %vm335_vm4, %v717_v9, %v716_v14  ;;  %vm1564_vm4 = vcmask 588800  }
 0x274   : > { %723 = vst.msk [vmem:[#allocation2 + $0x8] sm:$0xf] %vm344_vm6, %v719_v15  ;;  %vm1565_vm5 = vmmov %vm1564_vm4 }
 0x279   : > { %v1468_v16 = vld [vmem:[#allocation2] sm:$0xff] }
 0x27a   : > { %844 = vrot.lane.b32.xlu0 %v1468_v16, %s1274_s11 }
 0x27b   : > { %v841_v18 = vld [vmem:[#allocation2 + $0x8] sm:$0xf] }
 0x27c   : > { %846 = vrot.lane.b32.xlu1 %v841_v18, %s1274_s11  ;;  %v725_v19 = vld [vmem:[#allocation2 + $0x8] sm:$0xf] }
 0x27d   : > { %727 = vst.msk [vmem:[#allocation3 + $0x8] sm:$0xf] %vm349_vm7, %v725_v19  ;;  %v809_v17 = vld [vmem:[#allocation2 + $0x8] sm:$0xf] }
 0x27e   : > { %812 = vrot.lane.b32.xlu0 %v1468_v16, %s1275_s12  ;;  %v825_v20 = vld [vmem:[#allocation2 + $0x8] sm:$0xf] }
 0x27f   : > { %v777_v21 = vld [vmem:[#allocation2 + $0x8] sm:$0xf] }
 0x280   : > { %814 = vrot.lane.b32.xlu1 %v809_v17, %s1275_s12  ;;  %v793_v23 = vld [vmem:[#allocation2 + $0x8] sm:$0xf] }
 0x281   : > { %v745_v24 = vld [vmem:[#allocation2 + $0x8] sm:$0xf] }
 0x282   : > { %828 = vrot.lane.b32.xlu0 %v1468_v16, %s1276_s13  ;;  %v761_v26 = vld [vmem:[#allocation2 + $0x8] sm:$0xf] }
 0x283   : > { %v729_v27 = vld [vmem:[#allocation2 + $0x8] sm:$0xf] }
 0x284   : > { %830 = vrot.lane.b32.xlu1 %v825_v20, %s1276_s13 }
 0x286   : > { %780 = vrot.lane.b32.xlu0 %v1468_v16, %s1278_s14 }
 0x288   : > { %782 = vrot.lane.b32.xlu1 %v777_v21, %s1278_s14 }
 0x28a   : > { %796 = vrot.lane.b32.xlu0 %v1468_v16, %s1279_s15 }
 0x28c   : > { %798 = vrot.lane.b32.xlu1 %v793_v23, %s1279_s15 }
 0x28e   : > { %748 = vrot.lane.b32.xlu0 %v1468_v16, %s1280_s16 }
 0x290   : > { %750 = vrot.lane.b32.xlu1 %v745_v24, %s1280_s16 }
 0x292   : > { %764 = vrot.lane.b32.xlu0 %v1468_v16, %s1281_s17 }
 0x294   : > { %766 = vrot.lane.b32.xlu1 %v761_v26, %s1281_s17 }
 0x296   : > { %732 = vrot.lane.b32.xlu0 %v1468_v16, %s1282_s18 }
 0x298   : > { %734 = vrot.lane.b32.xlu1 %v729_v27, %s1282_s18 }
 0x29a   : > { %878 = vperm.xlu0 %1253, %v875_v28  }
 0x2ec   : > { %v845_v29 = vpop.permute.xlu0 %844 }
 0x2ed   : > { %v848_v31 = vrot.slane %v845_v29, 4 }
 0x2ee   : > { %v847_v30 = vpop.permute.xlu1 %846 }
 0x2ef   : > { %v849_v32 = vrot.slane %v847_v30, 4  ;;  %855 = vst.msk [vmem:[#allocation3 + $0x68] sm:$0xf] %vm349_vm7, %v847_v30 }
 0x2f0   : > { %v813_v33 = vpop.permute.xlu0 %812 }
 0x2f1   : > { %v850_v34 = vsel %vm361_vm9, %v848_v31, %v849_v32  ;;  %v816_v37 = vrot.slane %v813_v33, 4 }
 0x2f2   : > { %v851_v35 = vsel %vm482_vm10, %v845_v29, %v850_v34  ;;  %v815_v36 = vpop.permute.xlu1 %814 }
 0x2f3   : > { %v817_v38 = vrot.slane %v815_v36, 4  ;;  %823 = vst.msk [vmem:[#allocation3 + $0x50] sm:$0xf] %vm349_vm7, %v815_v36  ;;  %v1177_v39 = vcombine.high %v851_v35, %v851_v35  ;;  %v1176_v40 = vcombine.low %v851_v35, %v851_v35 }
 0x2f4   : > { %v829_v41 = vpop.permute.xlu0 %828 }
 0x2f5   : > { %v818_v42 = vsel %vm361_vm9, %v816_v37, %v817_v38  ;;  %1179 = vmatprep.subr.msk.bf16.mxu0 %vm361_vm9, %v1177_v39  ;;  %v957_v22 = vsel %vm361_vm9, %v1176_v40, 0  ;;  %v832_v46 = vrot.slane %v829_v41, 4  ;;  %v856_v38 = vld [vmem:[%s1557_s4] sm:$0xf] }
 0x2f6   : > { %v819_v43 = vsel %vm448_vm11, %v813_v33, %v818_v42  ;;  %v831_v44 = vpop.permute.xlu1 %830  ;;  %v1259_v45 = vld [vmem:[#allocation3 + $0x68] ss:$0 sps:$4 sm:$0xff]   ;;  %972 = vmatpush1.bf16.msra.mxu0 %v957_v22 }
 0x2f7   : > { %v833_v47 = vrot.slane %v831_v44, 4  ;;  %839 = vst.msk [vmem:[#allocation3 + $0x5c] sm:$0xf] %vm349_vm7, %v831_v44  ;;  %v963_v49 = vsel %vm361_vm9, %v1259_v45, 0 }
 0x2f8   : > { %v781_v48 = vpop.permute.xlu0 %780  ;;  %1219 = vmatpush3.bf16.msra.mxu1 %v963_v49 }
 0x2f9   : > { %v834_v50 = vsel %vm361_vm9, %v832_v46, %v833_v47  ;;  %1220 = vmatprep.subr.bf16.mxu1 %v1277_v25  ;;  %v784_v55 = vrot.slane %v781_v48, 4 }
 0x2fa   : > { %v835_v53 = vsel %vm465_vm12, %v829_v41, %v834_v50  ;;  %v783_v54 = vpop.permute.xlu1 %782 }
 0x2fb   : > { %v785_v57 = vrot.slane %v783_v54, 4  ;;  %791 = vst.msk [vmem:[#allocation3 + $0x38] sm:$0xf] %vm349_vm7, %v783_v54  ;;  %v1173_v58 = vcombine.low %v819_v43, %v835_v53  ;;  %v1174_v59 = vcombine.high %v819_v43, %v835_v53 }
 0x2fc   : > { %v797_v60 = vpop.permute.xlu0 %796 }
 0x2fd   : > { %v786_v61 = vsel %vm361_vm9, %v784_v55, %v785_v57  ;;  %973 = vmatprep.subr.bf16.mxu0 %v1174_v59  ;;  %v800_v1 = vrot.slane %v797_v60, 4 }
 0x2fe   : > { %v787_v0 = vsel %vm414_vm13, %v781_v48, %v786_v61  ;;  %v799_v62 = vpop.permute.xlu1 %798  ;;  %v1260_v63 = vld [vmem:[#allocation3 + $0x50] ss:$12 sps:$4 sm:$0xff]   ;;  %974 = vmatpush1.bf16.msra.mxu0 %v1173_v58 }
 0x2ff   : > { %v801_v2 = vrot.slane %v799_v62, 4  ;;  %807 = vst.msk [vmem:[#allocation3 + $0x44] sm:$0xf] %vm349_vm7, %v799_v62  ;;  %1221 = vmatpush3.bf16.msra.mxu1 %v1260_v63 }
 0x300   : > { %v749_v3 = vpop.permute.xlu0 %748  ;;  %1222 = vmatprep.subr.bf16.mxu1 %v1277_v25 }
 0x301   : > { %v802_v4 = vsel %vm361_vm9, %v800_v1, %v801_v2  ;;  %v752_v7 = vrot.slane %v749_v3, 4 }
 0x302   : > { %v803_v5 = vsel %vm431_vm14, %v797_v60, %v802_v4  ;;  %v751_v6 = vpop.permute.xlu1 %750 }
 0x303   : > { %v753_v8 = vrot.slane %v751_v6, 4  ;;  %759 = vst.msk [vmem:[#allocation3 + $0x20] sm:$0xf] %vm349_vm7, %v751_v6  ;;  %v1170_v9 = vcombine.low %v787_v0, %v803_v5  ;;  %v1171_v10 = vcombine.high %v787_v0, %v803_v5 }
 0x304   : > { %v765_v14 = vpop.permute.xlu0 %764 }
 0x305   : > { %v754_v15 = vsel %vm361_vm9, %v752_v7, %v753_v8  ;;  %975 = vmatprep.subr.bf16.mxu0 %v1171_v10  ;;  %v768_v20 = vrot.slane %v765_v14, 4 }
 0x306   : > { %v755_v18 = vsel %vm380_vm15, %v749_v3, %v754_v15  ;;  %v767_v19 = vpop.permute.xlu1 %766  ;;  %v1261_v17 = vld [vmem:[#allocation3 + $0x38] ss:$12 sps:$4 sm:$0xff]   ;;  %976 = vmatpush1.bf16.msra.mxu0 %v1170_v9 }
 0x307   : > { %v769_v21 = vrot.slane %v767_v19, 4  ;;  %775 = vst.msk [vmem:[#allocation3 + $0x2c] sm:$0xf] %vm349_vm7, %v767_v19  ;;  %1223 = vmatpush3.bf16.msra.mxu1 %v1261_v17 }
 0x308   : > { %v733_v23 = vpop.permute.xlu0 %732  ;;  %1224 = vmatprep.subr.bf16.mxu1 %v1277_v25 }
 0x309   : > { %v770_v24 = vsel %vm361_vm9, %v768_v20, %v769_v21  ;;  %v736_v28 = vrot.slane %v733_v23, 4 }
 0x30a   : > { %v771_v26 = vsel %vm397_vm0, %v765_v14, %v770_v24  ;;  %v735_v27 = vpop.permute.xlu1 %734 }
 0x30b   : > { %v737_v29 = vrot.slane %v735_v27, 4  ;;  %743 = vst.msk [vmem:[#allocation3 + $0x14] sm:$0xf] %vm349_vm7, %v735_v27  ;;  %v1167_v30 = vcombine.low %v755_v18, %v771_v26  ;;  %v1168_v31 = vcombine.high %v755_v18, %v771_v26 }
 0x30d   : > { %v738_v32 = vsel %vm361_vm9, %v736_v28, %v737_v29  ;;  %977 = vmatprep.subr.bf16.mxu0 %v1168_v31 }
 0x30e   : > { %v739_v33 = vsel %vm363_vm1, %v733_v23, %v738_v32  ;;  %v1262_v34 = vld [vmem:[#allocation3 + $0x20] ss:$12 sps:$4 sm:$0xff]   ;;  %978 = vmatpush1.bf16.msra.mxu0 %v1167_v30 }
 0x30f   : > { %v1164_v35 = vcombine.low %v1468_v16, %v739_v33  ;;  %v1165_v36 = vcombine.high %v1468_v16, %v739_v33  ;;  %1225 = vmatpush3.bf16.msra.mxu1 %v1262_v34 }
 0x310   : > { %1226 = vmatprep.subr.bf16.mxu1 %v1277_v25 }
 0x311   : > { %979 = vmatprep.subr.bf16.mxu0 %v1165_v36 }
 0x312   : > { %v1263_v37 = vld [vmem:[#allocation3 + $0x8] ss:$12 sps:$4 sm:$0xff]   ;;  %980 = vmatpush1.bf16.msra.mxu0 %v1164_v35 }
 0x313   : > { %1227 = vmatpush3.bf16.msra.mxu1 %v1263_v37 }
 0x315   : > { %1180 = vmatmul.mubr.msk.bf16.vlgmr.msra.gmra.mxu0 %vm1564_vm4, %v856_v38  ;;  %v879_v39 = vpop.permute.xlu0 %878 }
 0x316   : > { %1229 = vmatmul.mubr.msk.bf16.vlgmr.msra.gmra.mxu1 %vm1565_vm5, %v856_v38 }
 0x3d5   : > { %v999_v40 = vpop.f32.mrf.mxu0 }
 0x3d6   : > { %v1000_v41 = vadd.f32 %v999_v40, %v879_v39  ;;  %v1040_v16 = vpop.f32.mrf.mxu1 }
 0x3d7   : > { %v1001_v42 = vpop.f32.mrf.mxu0  ;;  %v1041_v22 = vadd.f32 %v1040_v16, %v879_v39 }
 0x3d8   : > { %v1046_v25 = vsel %vm696_vm3, %v1000_v41, 0.0  ;;  %v1002_v43 = vadd.f32 %v1001_v42, %v879_v39  ;;  %v1230_v44 = vpop.f32.mrf.mxu1 }
 0x3d9   : > { %v1003_v45 = vpop.f32.mrf.mxu0  ;;  %v1048_v46 = vsel %vm698_vm2, %v1041_v22, 0.0  ;;  %v1049_v49 = vadd.f32 %v1046_v25, %v1346_v11 }
 0x3da   : > { %v1047_v47 = vsel %vm697_vm8, %v1002_v43, 0.0  ;;  %v1051_v48 = vadd.f32 %v1048_v46, %v1350_v13  ;;  %v1043_v50 = vpop.f32.mrf.mxu1 }
 0x3db   : > { %v1050_v53 = vadd.f32 %v1047_v47, %v1348_v12  ;;  %v1004_v54 = vpop.f32.mrf.mxu0 }
 0x3dc   : > { %v1191_v52 = vpack.c.bf16 %v1051_v48, %v1051_v48  ;;  %v1231_v57 = vpop.f32.mrf.mxu1 }
 0x3dd   : > { %v1190_v55 = vpack.c.bf16 %v1050_v53, %v1049_v49 }
 0x3de   : > { %1066 = vst.msk [vmem:[%s298_s10 + $0x8] sm:$0xf] %vm349_vm7, %v1191_v52 }
 0x3df   : > { %1065 = vst [vmem:[%s298_s10] sm:$0xff] %v1190_v55 }
 0x3e0 PF: > { %s17_s24 = sadd.s32 1, %s1270_s24  }
 0x3e1   : > { %p14_p4 = scmp.ge.s32.totalorder %s17_s24, 4  }
 0x3e3   :  { %16 = sbr.rel (!%p14_p4) target bundleno = 1 (0x1), region = 81 }

// kernel: _lambda_.29
= control target key start
LH: loop header
LB: loop body
LE: loop exit
PB: predicated region body
PF: predicated region fallthrough
CT: control target
= control target key end

     0   :  { %s1515_s30 = smov 0   ;;  %s1692_s0 = inlined_call_operand.vmem [shape: bf16[2,8,288], index: 0, kind: input, shape index: {}]   ;;  %s1693_s1 = inlined_call_operand.vmem [shape: bf16[2,8,288], index: 1, kind: input, shape index: {}]   ;;  %s1694_s2 = inlined_call_operand.vmem [shape: bf16[2,1,288], index: 2, kind: input, shape index: {}]   ;;  %s1695_s3 = inlined_call_operand.vmem [shape: bf16[3,72], index: 3, kind: input, shape index: {}]   ;;  %s1696_s4 = inlined_call_operand.vmem [shape: f32[3,1], index: 4, kind: input, shape index: {}]   ;;  %s1697_s5 = inlined_call_operand.vmem [shape: bf16[3,72], index: 5, kind: input, shape index: {}]   ;;  %s1698_s6 = inlined_call_operand.vmem [shape: f32[3,1], index: 6, kind: input, shape index: {}]   ;;  %s1699_s7 = inlined_call_operand.vmem [shape: f32[2,3,288], index: 7, kind: output, shape index: {0}]   ;;  %s1700_s8 = inlined_call_operand.vmem [shape: f32[2,3,288], index: 8, kind: output, shape index: {1}]   ;;  %s1701_s9 = inlined_call_operand.vmem [shape: f32[2,3,288], index: 9, kind: output, shape index: {2}]  }
   0x1 LB: > { %s1323_s10 = sadd.s32 4294967295, %s1451_s30   ;;  %p1327_p0 = scmp.ge.s32.totalorder %s1451_s30, 1  ;;  %s1451_s30 = sphi %s1515_s30, %s20_s30  }
   0x2   : > { %p311_p1 = scmp.lt.s32.totalorder %s1451_s30, 3 }
   0x4   : > { %p312_p2 = pnand %p1327_p0, %p311_p1 }
   0x5   : > { %p366_p3 = scmp.lt.s32.totalorder (!%p312_p2), %s1323_s10, 1  ;;  %s1454_s18 = smov (!%p312_p2), 19  }
   0x6   : > { %315 = sbr.rel (%p312_p2) target bundleno = 534 (0x216), region = 48  ;;  %s1455_s19 = smov (!%p312_p2), 90  }
   0x7   : > { %s1457_s20 = smov (!%p312_p2), 92   ;;  %s1458_s21 = smov (!%p312_p2), 91  }
   0x8   : > { %s1459_s22 = smov (!%p312_p2), 109   ;;  %s1460_s23 = smov (!%p312_p2), 108  }
   0x9   : > { %s1461_s24 = smov (!%p312_p2), 126   ;;  %s1462_s25 = smov (!%p312_p2), 110  }
   0xa   : > { %s1463_s26 = smov (!%p312_p2), 127  }
   0xb   : > { %vm396_vm0 = vcmask 150528   ;;  %v1453_v0 = vmov 0   ;;  %vm398_vm1 = vcmask 699800   ;;  %s1705_s10 = smov (!%p366_p3, %s1323_s10), 1  ;;  %vm414_vm2 = vcmask 1043608  }
   0xc   : > { %397 = vst.msk [vmem:[#allocation2] sm:$0xf] %vm396_vm0, %v1453_v0  ;;  %705 = vmatprep.mubr.bf16.mxu0 %v1453_v0  ;;  %1433 = vset.pattern.permute.xlu0 %v1453_v0  ;;  %s1531_s11 = smul.u32 12, %s1705_s10  ;;  %vm415_vm3 = vcmask 1047556   ;;  %vm409_vm4 = vcmask 154624   ;;  %vm418_vm6 = vcmask 412672  }
   0xd   : > { %399 = vst.msk [vmem:[#allocation2 + $0x8] sm:$0xf] %vm398_vm1, %v1453_v0  ;;  %1434 = vset.pattern.permute.xlu1 %v1453_v0  ;;  %vm1541_vm5 = vmor %vm415_vm3, %vm414_vm2  ;;  %vm423_vm7 = vcmask 257024   ;;  %v1456_v16 = vmov 0.0   ;;  %vm1464_vm8 = vmmov 0   ;;  %vm435_vm9 = vcmask 1043456  }
   0xe   : > { %s370_s14 = scalar_lea.vmem %s1692_s0, %s1531_s11  ;;  %s375_s17 = scalar_lea.vmem %s1693_s1, %s1531_s11  ;;  %1383 = vmatprep.subr.bf16.mxu1 %v1456_v16  ;;  %1393 = vmatprep.mubr.msk.bf16.mxu1 %vm1464_vm8, %v1456_v16  ;;  %v581_v36 = vld [vmem:[%s1696_s4] sm:$0x7]  ;;  %vm556_vm10 = vcmask 736256   ;;  %vm522_vm11 = vcmask 752640   ;;  %vm539_vm12 = vcmask 744448   ;;  %vm488_vm13 = vcmask 891904  }
   0xf   : > { %v400_v1 = vld [vmem:[%s370_s14] sm:$0xff]  ;;  %v401_v3 = vld [vmem:[%s370_s14 + $0x8] sm:$0xf]  ;;  %vm505_vm14 = vcmask 883712   ;;  %vm454_vm15 = vcmask 1031168   ;;  %vm471_vm0 = vcmask 900096   ;;  %s394_s28 = scalar_lea.vmem %s1701_s9, %s1531_s11 }
  0x10   : > { %v754_v2 = vld [vmem:[%s375_s17] sm:$0xff]  ;;  %404 = vrot.lane.b32.xlu0 %v400_v1, %s1454_s18  ;;  %v755_v4 = vld [vmem:[%s375_s17 + $0x8] sm:$0xf]  ;;  %vm437_vm1 = vcmask 1039360   ;;  %vm659_vm2 = vcmask 588800   ;;  %vm1164_vm3 = vcmask 256000  }
  0x11   : > { %758 = vrot.lane.b32.xlu1 %v754_v2, %s1454_s18  ;;  %v920_v37 = vld [vmem:[%s1698_s6] sm:$0x7] }
  0x14   : > { %406 = vrot.lane.b32.xlu0 %v401_v3, %s1454_s18 }
  0x15   : > { %760 = vrot.lane.b32.xlu1 %v755_v4, %s1454_s18 }
  0x82   : > { %v405_v5 = vpop.permute.xlu0 %404 }
  0x83   : > { %v408_v7 = vrot.slane %v405_v5, 4  ;;  %v759_v8 = vpop.permute.xlu1 %758 }
  0x84   : > { %v762_v12 = vrot.slane %v759_v8, 4 }
  0x85   : > { %v410_v9 = vsel %vm409_vm4, %v408_v7, %v405_v5 }
  0x86   : > { %417 = vst.msk [vmem:[#allocation2] sm:$0xff] %vm1541_vm5, %v410_v9  ;;  %v407_v10 = vpop.permute.xlu0 %406  ;;  %v763_v13 = vsel %vm409_vm4, %v762_v12, %v759_v8 }
  0x87   : > { %v411_v11 = vsel %vm409_vm4, %v408_v7, %v407_v10  ;;  %v761_v14 = vpop.permute.xlu1 %760 }
  0x88   : > { %419 = vst.msk [vmem:[#allocation2 + $0x8] sm:$0xf] %vm418_vm6, %v411_v11  ;;  %v764_v20 = vsel %vm409_vm4, %v762_v12, %v761_v14 }
  0x8d   : > { %v1551_v15 = vld [vmem:[#allocation2] sm:$0xff] }
  0x8e   : > { %549 = vrot.lane.b32.xlu0 %v1551_v15, %s1455_s19  ;;  %767 = vst.msk [vmem:[#allocation2] sm:$0xff] %vm1541_vm5, %v763_v13 }
  0x8f   : > { %v421_v17 = vld [vmem:[#allocation2 + $0x8] sm:$0xf] }
  0x90   : > { %v546_v18 = vld [vmem:[#allocation2 + $0x8] sm:$0xf]  ;;  %424 = vst.msk [vmem:[#allocation3 + $0x8] sm:$0xf] %vm423_vm7, %v421_v17 }
  0x91   : > { %v512_v19 = vld [vmem:[#allocation2 + $0x8] sm:$0xf]  ;;  %551 = vrot.lane.b32.xlu1 %v546_v18, %s1455_s19 }
  0x92   : > { %v529_v21 = vld [vmem:[#allocation2 + $0x8] sm:$0xf]  ;;  %515 = vrot.lane.b32.xlu0 %v1551_v15, %s1457_s20 }
  0x93   : > { %v478_v22 = vld [vmem:[#allocation2 + $0x8] sm:$0xf] }
  0x94   : > { %v495_v23 = vld [vmem:[#allocation2 + $0x8] sm:$0xf] }
  0x95   : > { %v444_v24 = vld [vmem:[#allocation2 + $0x8] sm:$0xf]  ;;  %517 = vrot.lane.b32.xlu1 %v512_v19, %s1457_s20  ;;  %v1563_v27 = vld [vmem:[#allocation2] sm:$0xff] }
  0x96   : > { %v461_v25 = vld [vmem:[#allocation2 + $0x8] sm:$0xf]  ;;  %532 = vrot.lane.b32.xlu0 %v1551_v15, %s1458_s21 }
  0x97   : > { %v426_v26 = vld [vmem:[#allocation2 + $0x8] sm:$0xf] }
  0x98   : > { %768 = vst.msk [vmem:[#allocation2 + $0x8] sm:$0xf] %vm418_vm6, %v764_v20 }
  0x99   : > { %534 = vrot.lane.b32.xlu1 %v529_v21, %s1458_s21 }
  0x9a   : > { %481 = vrot.lane.b32.xlu0 %v1551_v15, %s1459_s22 }
  0x9d   : > { %483 = vrot.lane.b32.xlu1 %v478_v22, %s1459_s22 }
  0x9e   : > { %498 = vrot.lane.b32.xlu0 %v1551_v15, %s1460_s23 }
  0x9f   : > { %v886_v28 = vld [vmem:[#allocation2 + $0x8] sm:$0xf] }
  0xa0   : > { %v854_v29 = vld [vmem:[#allocation2 + $0x8] sm:$0xf] }
  0xa1   : > { %500 = vrot.lane.b32.xlu1 %v495_v23, %s1460_s23  ;;  %v870_v30 = vld [vmem:[#allocation2 + $0x8] sm:$0xf] }
  0xa2   : > { %447 = vrot.lane.b32.xlu0 %v1551_v15, %s1461_s24  ;;  %v822_v31 = vld [vmem:[#allocation2 + $0x8] sm:$0xf] }
  0xa3   : > { %v838_v32 = vld [vmem:[#allocation2 + $0x8] sm:$0xf] }
  0xa4   : > { %v790_v33 = vld [vmem:[#allocation2 + $0x8] sm:$0xf] }
  0xa5   : > { %449 = vrot.lane.b32.xlu1 %v444_v24, %s1461_s24  ;;  %v806_v34 = vld [vmem:[#allocation2 + $0x8] sm:$0xf] }
  0xa6   : > { %464 = vrot.lane.b32.xlu0 %v1551_v15, %s1462_s25  ;;  %v774_v35 = vld [vmem:[#allocation2 + $0x8] sm:$0xf] }
  0xa9   : > { %466 = vrot.lane.b32.xlu1 %v461_v25, %s1462_s25 }
  0xaa   : > { %429 = vrot.lane.b32.xlu0 %v1551_v15, %s1463_s26 }
  0xad   : > { %431 = vrot.lane.b32.xlu1 %v426_v26, %s1463_s26 }
  0xae   : > { %889 = vrot.lane.b32.xlu0 %v1563_v27, %s1455_s19 }
  0xb1   : > { %891 = vrot.lane.b32.xlu1 %v886_v28, %s1455_s19  ;;  %s384_s19 = scalar_lea.vmem %s1699_s7, %s1531_s11 }
  0xb2   : > { %857 = vrot.lane.b32.xlu0 %v1563_v27, %s1457_s20 }
  0xb5   : > { %859 = vrot.lane.b32.xlu1 %v854_v29, %s1457_s20  ;;  %s1412_s20 = smul.u32 3, %s1705_s10 }
  0xb6   : > { %873 = vrot.lane.b32.xlu0 %v1563_v27, %s1458_s21 }
  0xb9   : > { %875 = vrot.lane.b32.xlu1 %v870_v30, %s1458_s21 }
  0xba   : > { %825 = vrot.lane.b32.xlu0 %v1563_v27, %s1459_s22 }
  0xbd   : > { %827 = vrot.lane.b32.xlu1 %v822_v31, %s1459_s22 }
  0xbe   : > { %841 = vrot.lane.b32.xlu0 %v1563_v27, %s1460_s23 }
  0xc1   : > { %843 = vrot.lane.b32.xlu1 %v838_v32, %s1460_s23  ;;  %s379_s23 = scalar_lea.vmem %s1694_s2, %s1412_s20 }
  0xc2   : > { %793 = vrot.lane.b32.xlu0 %v1563_v27, %s1461_s24 }
  0xc5   : > { %795 = vrot.lane.b32.xlu1 %v790_v33, %s1461_s24 }
  0xc6   : > { %809 = vrot.lane.b32.xlu0 %v1563_v27, %s1462_s25 }
  0xc9   : > { %811 = vrot.lane.b32.xlu1 %v806_v34, %s1462_s25  ;;  %s389_s25 = scalar_lea.vmem %s1700_s8, %s1531_s11 }
  0xca   : > { %777 = vrot.lane.b32.xlu0 %v1563_v27, %s1463_s26 }
  0xcd   : > { %779 = vrot.lane.b32.xlu1 %v774_v35, %s1463_s26 }
  0xce   : > { %584 = vperm.xlu0 %1433, %v581_v36  }
  0xd1   : > { %923 = vperm.xlu1 %1434, %v920_v37  }
 0x100   : > { %v550_v38 = vpop.permute.xlu0 %549 }
 0x101   : > { %v553_v40 = vrot.slane %v550_v38, 4 }
 0x103   : > { %v552_v39 = vpop.permute.xlu1 %551 }
 0x104   : > { %v554_v41 = vrot.slane %v552_v39, 4  ;;  %561 = vst.msk [vmem:[#allocation3 + $0x68] sm:$0xf] %vm423_vm7, %v552_v39  ;;  %v516_v42 = vpop.permute.xlu0 %515 }
 0x105   : > { %v519_v50 = vrot.slane %v516_v42, 4 }
 0x106   : > { %v555_v43 = vsel %vm435_vm9, %v553_v40, %v554_v41 }
 0x107   : > { %v557_v44 = vsel %vm556_vm10, %v550_v38, %v555_v43  ;;  %v518_v45 = vpop.permute.xlu1 %517 }
 0x108   : > { %v520_v46 = vrot.slane %v518_v45, 4  ;;  %527 = vst.msk [vmem:[#allocation3 + $0x50] sm:$0xf] %vm423_vm7, %v518_v45  ;;  %v1346_v47 = vcombine.high %v557_v44, %v557_v44  ;;  %v1345_v48 = vcombine.low %v557_v44, %v557_v44  ;;  %v533_v49 = vpop.permute.xlu0 %532 }
 0x109   : > { %v536_v55 = vrot.slane %v533_v49, 4 }
 0x10a   : > { %1348 = vmatprep.subr.msk.bf16.mxu0 %vm435_vm9, %v1346_v47  ;;  %v665_v51 = vsel %vm435_vm9, %v1345_v48, 0  ;;  %v521_v54 = vsel %vm435_vm9, %v519_v50, %v520_v46  ;;  %v770_v48 = vld [vmem:[#allocation2 + $0x8] sm:$0xf] }
 0x10b   : > { %v535_v52 = vpop.permute.xlu1 %534  ;;  %v1435_v53 = vld [vmem:[#allocation3 + $0x68] ss:$0 sps:$4 sm:$0xff]   ;;  %680 = vmatpush1.bf16.msra.mxu0 %v665_v51  ;;  %v523_v60 = vsel %vm522_vm11, %v516_v42, %v521_v54 }
 0x10c   : > { %v537_v56 = vrot.slane %v535_v52, 4  ;;  %544 = vst.msk [vmem:[#allocation3 + $0x5c] sm:$0xf] %vm423_vm7, %v535_v52  ;;  %v482_v57 = vpop.permute.xlu0 %481  ;;  %v671_v58 = vsel %vm435_vm9, %v1435_v53, 0 }
 0x10d   : > { %1384 = vmatpush3.bf16.msra.mxu1 %v671_v58  ;;  %v485_v4 = vrot.slane %v482_v57, 4 }
 0x10e   : > { %v538_v59 = vsel %vm435_vm9, %v536_v55, %v537_v56  ;;  %1385 = vmatprep.subr.bf16.mxu1 %v1456_v16 }
 0x10f   : > { %v540_v61 = vsel %vm539_vm12, %v533_v49, %v538_v59  ;;  %v484_v62 = vpop.permute.xlu1 %483 }
 0x110   : > { %v486_v63 = vrot.slane %v484_v62, 4  ;;  %493 = vst.msk [vmem:[#allocation3 + $0x38] sm:$0xf] %vm423_vm7, %v484_v62  ;;  %v1343_v1 = vcombine.high %v523_v60, %v540_v61  ;;  %v1342_v2 = vcombine.low %v523_v60, %v540_v61  ;;  %v499_v3 = vpop.permute.xlu0 %498 }
 0x111   : > { %v502_v8 = vrot.slane %v499_v3, 4 }
 0x112   : > { %681 = vmatprep.subr.bf16.mxu0 %v1343_v1  ;;  %v487_v7 = vsel %vm435_vm9, %v485_v4, %v486_v63 }
 0x113   : > { %v501_v5 = vpop.permute.xlu1 %500  ;;  %v1436_v6 = vld [vmem:[#allocation3 + $0x50] ss:$12 sps:$4 sm:$0xff]   ;;  %682 = vmatpush1.bf16.msra.mxu0 %v1342_v2  ;;  %v489_v12 = vsel %vm488_vm13, %v482_v57, %v487_v7 }
 0x114   : > { %v503_v9 = vrot.slane %v501_v5, 4  ;;  %510 = vst.msk [vmem:[#allocation3 + $0x44] sm:$0xf] %vm423_vm7, %v501_v5  ;;  %v448_v10 = vpop.permute.xlu0 %447  ;;  %1386 = vmatpush3.bf16.msra.mxu1 %v1436_v6 }
 0x115   : > { %1387 = vmatprep.subr.bf16.mxu1 %v1456_v16  ;;  %v451_v21 = vrot.slane %v448_v10, 4 }
 0x116   : > { %v504_v11 = vsel %vm435_vm9, %v502_v8, %v503_v9 }
 0x117   : > { %v506_v13 = vsel %vm505_vm14, %v499_v3, %v504_v11  ;;  %v450_v14 = vpop.permute.xlu1 %449 }
 0x118   : > { %v452_v17 = vrot.slane %v450_v14, 4  ;;  %459 = vst.msk [vmem:[#allocation3 + $0x20] sm:$0xf] %vm423_vm7, %v450_v14  ;;  %v1340_v18 = vcombine.high %v489_v12, %v506_v13  ;;  %v1339_v19 = vcombine.low %v489_v12, %v506_v13  ;;  %v465_v20 = vpop.permute.xlu0 %464 }
 0x119   : > { %v468_v25 = vrot.slane %v465_v20, 4 }
 0x11a   : > { %683 = vmatprep.subr.bf16.mxu0 %v1340_v18  ;;  %v453_v24 = vsel %vm435_vm9, %v451_v21, %v452_v17 }
 0x11b   : > { %v467_v22 = vpop.permute.xlu1 %466  ;;  %v1437_v23 = vld [vmem:[#allocation3 + $0x38] ss:$12 sps:$4 sm:$0xff]   ;;  %684 = vmatpush1.bf16.msra.mxu0 %v1339_v19  ;;  %v455_v30 = vsel %vm454_vm15, %v448_v10, %v453_v24 }
 0x11c   : > { %v469_v26 = vrot.slane %v467_v22, 4  ;;  %476 = vst.msk [vmem:[#allocation3 + $0x2c] sm:$0xf] %vm423_vm7, %v467_v22  ;;  %v430_v28 = vpop.permute.xlu0 %429  ;;  %1388 = vmatpush3.bf16.msra.mxu1 %v1437_v23 }
 0x11d   : > { %1389 = vmatprep.subr.bf16.mxu1 %v1456_v16  ;;  %v433_v33 = vrot.slane %v430_v28, 4 }
 0x11e   : > { %v470_v29 = vsel %vm435_vm9, %v468_v25, %v469_v26 }
 0x11f   : > { %v472_v31 = vsel %vm471_vm0, %v465_v20, %v470_v29  ;;  %v432_v32 = vpop.permute.xlu1 %431 }
 0x120   : > { %v434_v34 = vrot.slane %v432_v32, 4  ;;  %442 = vst.msk [vmem:[#allocation3 + $0x14] sm:$0xf] %vm423_vm7, %v432_v32  ;;  %v1337_v35 = vcombine.high %v455_v30, %v472_v31  ;;  %v1336_v36 = vcombine.low %v455_v30, %v472_v31  ;;  %v890_v37 = vpop.permute.xlu0 %889 }
 0x121   : > { %v893_v42 = vrot.slane %v890_v37, 4 }
 0x122   : > { %v436_v38 = vsel %vm435_vm9, %v433_v33, %v434_v34  ;;  %685 = vmatprep.subr.bf16.mxu0 %v1337_v35 }
 0x123   : > { %v438_v39 = vsel %vm437_vm1, %v430_v28, %v436_v38  ;;  %v892_v40 = vpop.permute.xlu1 %891  ;;  %v1438_v41 = vld [vmem:[#allocation3 + $0x20] ss:$12 sps:$4 sm:$0xff]   ;;  %686 = vmatpush1.bf16.msra.mxu0 %v1336_v36 }
 0x124   : > { %v894_v43 = vrot.slane %v892_v40, 4  ;;  %900 = vst.msk [vmem:[#allocation3 + $0x68] sm:$0xf] %vm423_vm7, %v892_v40  ;;  %v1334_v44 = vcombine.high %v1551_v15, %v438_v39  ;;  %v1333_v45 = vcombine.low %v1551_v15, %v438_v39  ;;  %v858_v46 = vpop.permute.xlu0 %857  ;;  %1390 = vmatpush3.bf16.msra.mxu1 %v1438_v41  ;;  %v562_v15 = vld [vmem:[%s1695_s3] sm:$0x3] }
 0x125   : > { %1391 = vmatprep.subr.bf16.mxu1 %v1456_v16  ;;  %v861_v52 = vrot.slane %v858_v46, 4 }
 0x126   : > { %v895_v47 = vsel %vm435_vm9, %v893_v42, %v894_v43  ;;  %687 = vmatprep.subr.bf16.mxu0 %v1334_v44 }
 0x127   : > { %v896_v49 = vsel %vm556_vm10, %v890_v37, %v895_v47  ;;  %v860_v50 = vpop.permute.xlu1 %859  ;;  %v1439_v51 = vld [vmem:[#allocation3 + $0x8] ss:$12 sps:$4 sm:$0xff]   ;;  %688 = vmatpush1.bf16.msra.mxu0 %v1333_v45 }
 0x128   : > { %v862_v53 = vrot.slane %v860_v50, 4  ;;  %868 = vst.msk [vmem:[#allocation3 + $0x50] sm:$0xf] %vm423_vm7, %v860_v50  ;;  %772 = vst.msk [vmem:[#allocation3 + $0x8] sm:$0xf] %vm423_vm7, %v770_v48  ;;  %v1364_v54 = vcombine.high %v896_v49, %v896_v49  ;;  %v1363_v55 = vcombine.low %v896_v49, %v896_v49  ;;  %v874_v56 = vpop.permute.xlu0 %873  ;;  %1392 = vmatpush3.bf16.msra.mxu1 %v1439_v51 }
 0x129   : > { %1397 = vmatprep.subr.bf16.mxu1 %v1456_v16  ;;  %v877_v62 = vrot.slane %v874_v56, 4  ;;  %v901_v48 = vld [vmem:[%s1697_s5] sm:$0x3] }
 0x12a   : > { %v863_v57 = vsel %vm435_vm9, %v861_v52, %v862_v53  ;;  %1366 = vmatprep.subr.msk.bf16.mxu0 %vm435_vm9, %v1364_v54  ;;  %v1002_v58 = vsel %vm435_vm9, %v1363_v55, 0  ;;  %1349 = vmatmul.mubr.msk.bf16.vlgmr.msra.gmra.mxu0 %vm659_vm2, %v562_v15 }
 0x12b   : > { %v864_v59 = vsel %vm522_vm11, %v858_v46, %v863_v57  ;;  %v876_v60 = vpop.permute.xlu1 %875  ;;  %v1440_v61 = vld [vmem:[#allocation3 + $0x68] ss:$0 sps:$4 sm:$0xff]   ;;  %1394 = vmatmul.mubr.msk.bf16.vlgmr.msra.gmra.mxu1 %vm659_vm2, %v562_v15  ;;  %1017 = vmatpush1.bf16.msra.mxu0 %v1002_v58 }
 0x12c   : > { %v878_v63 = vrot.slane %v876_v60, 4  ;;  %884 = vst.msk [vmem:[#allocation3 + $0x5c] sm:$0xf] %vm423_vm7, %v876_v60  ;;  %v826_v1 = vpop.permute.xlu0 %825  ;;  %v1008_v2 = vsel %vm435_vm9, %v1440_v61, 0  ;;  %1407 = vmatprep.mubr.msk.bf16.mxu1 %vm1464_vm8, %v1456_v16  ;;  %1042 = vmatprep.mubr.bf16.mxu0 %v1453_v0  ;;  %v1091_v60 = vld [vmem:[%s379_s23] sm:$0x7] }
 0x12d   : > { %1398 = vmatpush3.bf16.msra.mxu1 %v1008_v2  ;;  %v829_v6 = vrot.slane %v826_v1, 4 }
 0x12e   : > { %v879_v3 = vsel %vm435_vm9, %v877_v62, %v878_v63  ;;  %1399 = vmatprep.subr.bf16.mxu1 %v1456_v16  ;;  %v1092_v62 = vunpack.c.l.bf16 %v1091_v60 }
 0x12f   : > { %v880_v4 = vsel %vm539_vm12, %v874_v56, %v879_v3  ;;  %v828_v5 = vpop.permute.xlu1 %827 }
 0x130   : > { %v830_v7 = vrot.slane %v828_v5, 4  ;;  %836 = vst.msk [vmem:[#allocation3 + $0x38] sm:$0xf] %vm423_vm7, %v828_v5  ;;  %v1360_v8 = vcombine.low %v864_v59, %v880_v4  ;;  %v1361_v9 = vcombine.high %v864_v59, %v880_v4  ;;  %v842_v10 = vpop.permute.xlu0 %841  ;;  %v1094_v59 = vlaneseq }
 0x131   : > { %v845_v14 = vrot.slane %v842_v10, 4  ;;  %v1124_v63 = vsub.f32 1.0, %v1092_v62 }
 0x132   : > { %v831_v11 = vsel %vm435_vm9, %v829_v6, %v830_v7  ;;  %1018 = vmatprep.subr.bf16.mxu0 %v1361_v9  ;;  %v1095_v61 = vshrl.u32 %v1094_v59, 7 }
 0x133   : > { %v832_v0 = vsel %vm488_vm13, %v826_v1, %v831_v11  ;;  %v844_v12 = vpop.permute.xlu1 %843  ;;  %v1441_v13 = vld [vmem:[#allocation3 + $0x50] ss:$12 sps:$4 sm:$0xff]   ;;  %1019 = vmatpush1.bf16.msra.mxu0 %v1360_v8 }
 0x134   : > { %v846_v17 = vrot.slane %v844_v12, 4  ;;  %852 = vst.msk [vmem:[#allocation3 + $0x44] sm:$0xf] %vm423_vm7, %v844_v12  ;;  %v794_v18 = vpop.permute.xlu0 %793  ;;  %1400 = vmatpush3.bf16.msra.mxu1 %v1441_v13  ;;  %v1096_v1 = vsub.s32 0, %v1095_v61  ;;  %v1104_v2 = vsub.s32 4, %v1095_v61  ;;  %v1100_v3 = vsub.s32 2, %v1095_v61 }
 0x135   : > { %1401 = vmatprep.subr.bf16.mxu1 %v1456_v16  ;;  %v797_v22 = vrot.slane %v794_v18, 4 }
 0x136   : > { %v847_v19 = vsel %vm435_vm9, %v845_v14, %v846_v17  ;;  %v1129_v4 = vrot.slane %v1124_v63, %v1096_v1  ;;  %v1097_v5 = vrot.slane %v1092_v62, %v1096_v1  ;;  %v1105_v6 = vrot.slane %v1092_v62, %v1104_v2 }
 0x137   : > { %v848_v20 = vsel %vm505_vm14, %v842_v10, %v847_v19  ;;  %v796_v21 = vpop.permute.xlu1 %795  ;;  %v1101_v7 = vrot.slane %v1092_v62, %v1100_v3  ;;  %v1137_v8 = vrot.slane %v1124_v63, %v1104_v2  ;;  %v1133_v9 = vrot.slane %v1124_v63, %v1100_v3 }
 0x138   : > { %v798_v23 = vrot.slane %v796_v21, 4  ;;  %804 = vst.msk [vmem:[#allocation3 + $0x20] sm:$0xf] %vm423_vm7, %v796_v21  ;;  %v1357_v24 = vcombine.low %v832_v0, %v848_v20  ;;  %v1358_v25 = vcombine.high %v832_v0, %v848_v20  ;;  %v810_v26 = vpop.permute.xlu0 %809  ;;  %v1144_v11 = vrot.slane %v1129_v4, %v1096_v1 }
 0x139   : > { %v813_v32 = vrot.slane %v810_v26, 4  ;;  %v1112_v0 = vrot.slane %v1097_v5, %v1096_v1  ;;  %v1120_v12 = vrot.slane %v1105_v6, %v1096_v1  ;;  %v1116_v14 = vrot.slane %v1101_v7, %v1096_v1 }
 0x13a   : > { %v799_v28 = vsel %vm435_vm9, %v797_v22, %v798_v23  ;;  %1020 = vmatprep.subr.bf16.mxu0 %v1358_v25  ;;  %v1152_v17 = vrot.slane %v1137_v8, %v1096_v1  ;;  %v1148_v19 = vrot.slane %v1133_v9, %v1096_v1 }
 0x13b   : > { %v800_v29 = vsel %vm454_vm15, %v794_v18, %v799_v28  ;;  %v812_v30 = vpop.permute.xlu1 %811  ;;  %v1442_v31 = vld [vmem:[#allocation3 + $0x38] ss:$12 sps:$4 sm:$0xff]   ;;  %1021 = vmatpush1.bf16.msra.mxu0 %v1357_v24 }
 0x13c   : > { %v814_v33 = vrot.slane %v812_v30, 4  ;;  %820 = vst.msk [vmem:[#allocation3 + $0x2c] sm:$0xf] %vm423_vm7, %v812_v30  ;;  %v778_v34 = vpop.permute.xlu0 %777  ;;  %1402 = vmatpush3.bf16.msra.mxu1 %v1442_v31 }
 0x13d   : > { %1403 = vmatprep.subr.bf16.mxu1 %v1456_v16  ;;  %v781_v38 = vrot.slane %v778_v34, 4 }
 0x13e   : > { %v815_v35 = vsel %vm435_vm9, %v813_v32, %v814_v33 }
 0x13f   : > { %v816_v36 = vsel %vm471_vm0, %v810_v26, %v815_v35  ;;  %v780_v37 = vpop.permute.xlu1 %779 }
 0x140   : > { %v782_v39 = vrot.slane %v780_v37, 4  ;;  %788 = vst.msk [vmem:[#allocation3 + $0x14] sm:$0xf] %vm423_vm7, %v780_v37  ;;  %v1354_v40 = vcombine.low %v800_v29, %v816_v36  ;;  %v1355_v41 = vcombine.high %v800_v29, %v816_v36 }
 0x142   : > { %v783_v42 = vsel %vm435_vm9, %v781_v38, %v782_v39  ;;  %1022 = vmatprep.subr.bf16.mxu0 %v1355_v41 }
 0x143   : > { %v784_v43 = vsel %vm437_vm1, %v778_v34, %v783_v42  ;;  %v1443_v44 = vld [vmem:[#allocation3 + $0x20] ss:$12 sps:$4 sm:$0xff]   ;;  %1023 = vmatpush1.bf16.msra.mxu0 %v1354_v40 }
 0x144   : > { %v1351_v45 = vcombine.low %v1563_v27, %v784_v43  ;;  %v1352_v46 = vcombine.high %v1563_v27, %v784_v43  ;;  %1404 = vmatpush3.bf16.msra.mxu1 %v1443_v44 }
 0x145   : > { %1405 = vmatprep.subr.bf16.mxu1 %v1456_v16 }
 0x146   : > { %1024 = vmatprep.subr.bf16.mxu0 %v1352_v46 }
 0x147   : > { %v1444_v47 = vld [vmem:[#allocation3 + $0x8] ss:$12 sps:$4 sm:$0xff]   ;;  %1025 = vmatpush1.bf16.msra.mxu0 %v1351_v45 }
 0x148   : > { %1406 = vmatpush3.bf16.msra.mxu1 %v1444_v47 }
 0x149   : > { %v585_v49 = vpop.permute.xlu0 %584 }
 0x14a   : > { %1367 = vmatmul.mubr.msk.bf16.vlgmr.msra.gmra.mxu0 %vm659_vm2, %v901_v48 }
 0x14b   : > { %1408 = vmatmul.mubr.msk.bf16.vlgmr.msra.gmra.mxu1 %vm659_vm2, %v901_v48 }
 0x14c   : > { %v924_v10 = vpop.permute.xlu1 %923 }
 0x1ea   : > { %v707_v50 = vpop.f32.mrf.mxu0 }
 0x1eb   : > { %v748_v27 = vpop.f32.mrf.mxu1  ;;  %v708_v51 = vadd.f32 %v707_v50, %v585_v49 }
 0x1ec   : > { %v709_v16 = vpop.f32.mrf.mxu0  ;;  %v749_v52 = vadd.f32 %v748_v27, %v585_v49 }
 0x1ed   : > { %v1395_v53 = vpop.f32.mrf.mxu1  ;;  %v710_v15 = vadd.f32 %v709_v16, %v585_v49  ;;  %v1121_v25 = vmul.f32 %v1112_v0, %v708_v51 }
 0x1ee   : > { %v711_v54 = vpop.f32.mrf.mxu0  ;;  %1165 = vst.msk [vmem:[%s384_s19 + $0x8] sm:$0x7] %vm1164_vm3, %v749_v52  ;;  %v1123_v26 = vmul.f32 %v1120_v12, %v749_v52 }
 0x1ef   : > { %v1161_v55 = vcombine.low %v708_v51, %v710_v15  ;;  %v751_v56 = vpop.f32.mrf.mxu1  ;;  %v1122_v30 = vmul.f32 %v1116_v14, %v710_v15 }
 0x1f0   : > { %v712_v57 = vpop.f32.mrf.mxu0 }
 0x1f1   : > { %1163 = vst [vmem:[%s384_s19] sm:$0x77] %v1161_v55  ;;  %v1396_v58 = vpop.f32.mrf.mxu1 }
 0x20a   : > { %v1044_v13 = vpop.f32.mrf.mxu0 }
 0x20b   : > { %v1045_v18 = vadd.f32 %v1044_v13, %v924_v10  ;;  %v1085_v20 = vpop.f32.mrf.mxu1 }
 0x20c   : > { %v1046_v21 = vpop.f32.mrf.mxu0  ;;  %v1086_v22 = vadd.f32 %v1085_v20, %v924_v10 }
 0x20d   : > { %v1153_v23 = vmul.f32 %v1144_v11, %v1045_v18  ;;  %v1047_v24 = vadd.f32 %v1046_v21, %v924_v10  ;;  %v1409_v28 = vpop.f32.mrf.mxu1 }
 0x20e   : > { %v1048_v29 = vpop.f32.mrf.mxu0  ;;  %v1155_v31 = vmul.f32 %v1152_v17, %v1086_v22  ;;  %1171 = vst.msk [vmem:[%s389_s25 + $0x8] sm:$0x7] %vm1164_vm3, %v1086_v22 }
 0x20f   : > { %v1154_v32 = vmul.f32 %v1148_v19, %v1047_v24  ;;  %v1168_v33 = vcombine.low %v1045_v18, %v1047_v24  ;;  %v1088_v34 = vpop.f32.mrf.mxu1  ;;  %v1156_v37 = vadd.f32 %v1153_v23, %v1121_v25 }
 0x210   : > { %v1049_v35 = vpop.f32.mrf.mxu0  ;;  %v1158_v36 = vadd.f32 %v1155_v31, %v1123_v26 }
 0x211   : > { %v1157_v38 = vadd.f32 %v1154_v32, %v1122_v30  ;;  %1170 = vst [vmem:[%s389_s25] sm:$0x77] %v1168_v33  ;;  %v1410_v39 = vpop.f32.mrf.mxu1 }
 0x212   : > { %1177 = vst.msk [vmem:[%s394_s28 + $0x8] sm:$0x7] %vm1164_vm3, %v1158_v36 }
 0x213   : > { %v1174_v40 = vcombine.low %v1156_v37, %v1157_v38 }
 0x215   : > { %1176 = vst [vmem:[%s394_s28] sm:$0x77] %v1174_v40 }
 0x216 PF: > { %s20_s30 = sadd.s32 1, %s1451_s30  }
 0x217   : > { %p17_p4 = scmp.ge.s32.totalorder %s20_s30, 4  }
 0x219   :  { %19 = sbr.rel (!%p17_p4) target bundleno = 1 (0x1), region = 108 }

</bundles_post_ra>
